<compile_context>
chip_gen: v5e
topology: v5e:2x2
jax: 0.10.0
libtpu: 0.0.40
codegen_flags: <defaults>
</compile_context>

<pallas_src>
import functools

import jax
import jax.numpy as jnp
from jax.experimental import pallas as pl
from jax.experimental.pallas import tpu as pltpu


def _full_spec(shape):
    nd = len(shape)
    return pl.BlockSpec(shape, lambda i, nd=nd: (0,) * nd)


def _dot_nt(a, b):
    """(m, k) x (n, k) -> (m, n), contracting on the last dim of both (A @ B^T)."""
    return jax.lax.dot_general(a, b, (((1,), (1,)), ((), ())),
                               preferred_element_type=jnp.float32)


# ---------------------------------------------------------------------------
# Fused conv stack: [Conv5x5 + BN(folded) + ReLU] x 2 in a single kernel.
#   xp_ref : (B, H+4, W+4, Cin)  pre-padded NHWC input (padded once in wrapper)
#   w1_ref : (25, Cin, C1)       BN-folded conv1 taps (kh-major)
#   w2_ref : (25, C1,  C2)       BN-folded conv2 taps (kh-major)
#   o_ref  : (B*H*W, C2)         lane-dense output (C2 = 128)
#   y1p_ref: VMEM scratch holding the zero-padded conv1 activation.  Valid
#            data is stored at W offset 8 (sublane-aligned store); conv2 reads
#            windows at W offset kw+6 so the logical 2-pixel zero pad is kept.
# ---------------------------------------------------------------------------
def _conv_stack_kernel(xp_ref, w1_ref, b1_ref, w2_ref, b2_ref, o_ref, y1p_ref,
                       *, B, H, W):
    Cin = xp_ref.shape[-1]
    C1 = w1_ref.shape[-1]
    C2 = w2_ref.shape[-1]
    M = B * H * W

    # ---- conv1: accumulate the 25 taps fully in-kernel (no grid steps) ----
    acc1 = jnp.zeros((M, C1), jnp.float32)
    for kh in range(5):
        for kw in range(5):
            sl = xp_ref[:, kh:kh + H, kw:kw + W, :].reshape(M, Cin)
            acc1 = acc1 + jnp.dot(sl, w1_ref[kh * 5 + kw],
                                  preferred_element_type=jnp.float32)
    y1 = jnp.maximum(acc1 + b1_ref[...], 0.0)          # BN folded; LeakyReLU(0)

    # ---- zero-pad conv1 output into VMEM scratch (sublane-aligned store) ----
    y1p_ref[...] = jnp.zeros(y1p_ref.shape, y1p_ref.dtype)
    y1p_ref[:, 2:2 + H, 8:8 + W, :] = y1.reshape(B, H, W, C1)

    # ---- conv2: 25 taps over the VMEM-resident padded activation ----------
    acc2 = jnp.zeros((M, C2), jnp.float32)
    for kh in range(5):
        for kw in range(5):
            sl = y1p_ref[:, kh:kh + H, 6 + kw:6 + kw + W, :].reshape(M, C1)
            acc2 = acc2 + jnp.dot(sl, w2_ref[kh * 5 + kw],
                                  preferred_element_type=jnp.float32)
    o_ref[...] = jnp.maximum(acc2 + b2_ref[...], 0.0)


def conv_stack(x_pad, w1, b1, w2, b2):
    B, Hp, Wp, _ = x_pad.shape
    H, W = Hp - 4, Wp - 4
    C1, C2 = w1.shape[-1], w2.shape[-1]
    M = B * H * W
    # Scratch W extent: valid data lives at [8, 8+W); reads span [6, 10+W).
    Ws = ((W + 10 + 7) // 8) * 8
    kern = functools.partial(_conv_stack_kernel, B=B, H=H, W=W)
    return pl.pallas_call(
        kern,
        out_shape=jax.ShapeDtypeStruct((M, C2), jnp.float32),
        grid_spec=pltpu.PrefetchScalarGridSpec(
            num_scalar_prefetch=0,
            grid=(1,),
            in_specs=[_full_spec(x_pad.shape), _full_spec(w1.shape),
                      _full_spec(b1.shape), _full_spec(w2.shape),
                      _full_spec(b2.shape)],
            out_specs=_full_spec((M, C2)),
            scratch_shapes=[pltpu.VMEM((B, H + 4, Ws, C1), jnp.float32)],
        ),
        compiler_params=pltpu.CompilerParams(
            dimension_semantics=("arbitrary",)),
    )(x_pad, w1, b1, w2, b2)


# ---------------------------------------------------------------------------
# LSTM head: 2-layer LSTM (hidden=3) + Linear(6 -> 1).
#   x_ref    : (seq*B, F)  rows are time-major (t*B + b), F channel-major
#   wih0_ref : (4H, F)     lane-dense layer-0 input weight (PyTorch layout)
#   whh0/wih1/whh1 : (H, 4H)  pre-transposed tiny recurrent weights
#   b0/b1    : (1, 4H)     combined b_ih + b_hh per layer
#   wlin_ref : (6, 1), blin_ref : (1, 1)
# ---------------------------------------------------------------------------
def _lstm_head_kernel(x_ref, wih0_ref, whh0_ref, b0_ref,
                      wih1_ref, whh1_ref, b1_ref,
                      wlin_ref, blin_ref, o_ref, *, seq, batch):
    Hd = whh0_ref.shape[0]                      # hidden size (3)

    # Hoisted layer-0 input projection: all timesteps & all 4 gates in one
    # NT matmul (the only real FLOPs in the head).
    xp0 = _dot_nt(x_ref[...], wih0_ref[...]) + b0_ref[...]   # (seq*B, 4H)

    whh0 = whh0_ref[...]
    wih1 = wih1_ref[...]
    whh1 = whh1_ref[...]
    b1 = b1_ref[...]

    def gates(pre, c):                          # PyTorch gate order: i, f, g, o
        i = jax.nn.sigmoid(pre[:, 0:Hd])
        f = jax.nn.sigmoid(pre[:, Hd:2 * Hd])
        g = jnp.tanh(pre[:, 2 * Hd:3 * Hd])
        o = jax.nn.sigmoid(pre[:, 3 * Hd:4 * Hd])
        c_new = f * c + i * g
        return o * jnp.tanh(c_new), c_new

    z = jnp.zeros((batch, Hd), jnp.float32)
    h0, c0, h1, c1 = z, z, z, z
    outs = []
    for t in range(seq):                        # seq is tiny & static -> unrolled
        pre0 = xp0[t * batch:(t + 1) * batch, :] + jnp.dot(
            h0, whh0, preferred_element_type=jnp.float32)
        h0, c0 = gates(pre0, c0)
        pre1 = (jnp.dot(h0, wih1, preferred_element_type=jnp.float32)
                + jnp.dot(h1, whh1, preferred_element_type=jnp.float32) + b1)
        h1, c1 = gates(pre1, c1)
        outs.append(h1)

    feat = jnp.concatenate(outs, axis=1)        # (B, seq*Hd) = (B, 6), t-major
    y = jnp.dot(feat, wlin_ref[...],
                preferred_element_type=jnp.float32) + blin_ref[...]
    o_ref[...] = y.astype(o_ref.dtype)


def lstm_head(feat, wih0, whh0t, bg0, wih1t, whh1t, bg1, wlin_t, blin,
              *, seq, batch):
    args = (feat, wih0, whh0t, bg0, wih1t, whh1t, bg1, wlin_t, blin)
    kern = functools.partial(_lstm_head_kernel, seq=seq, batch=batch)
    return pl.pallas_call(
        kern,
        out_shape=jax.ShapeDtypeStruct((batch, 1), jnp.float32),
        grid_spec=pltpu.PrefetchScalarGridSpec(
            num_scalar_prefetch=0,
            grid=(1,),
            in_specs=[_full_spec(a.shape) for a in args],
            out_specs=_full_spec((batch, 1)),
        ),
        compiler_params=pltpu.CompilerParams(
            dimension_semantics=("arbitrary",)),
    )(*args)


# ---------------------------------------------------------------------------
# Parameter preparation: fold BN into convs, stack conv taps, combine LSTM
# biases, and lay weights out lane-dense for the kernels (done once, outside
# the forward pass).
# ---------------------------------------------------------------------------
def prepare_params(p, eps=1e-5):
    def fold(w, g, b, m, v):
        scale = g / jnp.sqrt(v + eps)                         # (Cout,)
        wf = w * scale[:, None, None, None]                   # (Cout,Cin,5,5)
        taps = jnp.transpose(wf, (2, 3, 1, 0)).reshape(25, w.shape[1], w.shape[0])
        bias = (b - m * scale).reshape(1, -1)
        return taps, bias

    w1t, b1 = fold(p['conv1_w'], p['bn1_g'], p['bn1_b'], p['bn1_m'], p['bn1_v'])
    w2t, b2 = fold(p['conv2_w'], p['bn2_g'], p['bn2_b'], p['bn2_m'], p['bn2_v'])
    return dict(
        w1=w1t, b1=b1, w2=w2t, b2=b2,
        wih0=p['w_ih_l0'],                                    # (4H, F) lane-dense
        whh0=p['w_hh_l0'].T,                                  # (H, 4H)
        bg0=(p['b_ih_l0'] + p['b_hh_l0']).reshape(1, -1),     # (1, 4H)
        wih1=p['w_ih_l1'].T,                                  # (H, 4H)
        whh1=p['w_hh_l1'].T,                                  # (H, 4H)
        bg1=(p['b_ih_l1'] + p['b_hh_l1']).reshape(1, -1),
        wlin=p['lin_w'].T,                                    # (6, 1)
        blin=p['lin_b'].reshape(1, 1),
    )


# ---------------------------------------------------------------------------
# Full model forward
# ---------------------------------------------------------------------------
def deepvo_small_forward(prep, x_nchw, *, seq_len=2):
    B, _, H, W = x_nchw.shape
    x_nhwc = jnp.transpose(x_nchw, (0, 2, 3, 1))              # layout glue
    x_pad = jnp.pad(x_nhwc, ((0, 0), (2, 2), (2, 2), (0, 0)))

    y2 = conv_stack(x_pad, prep['w1'], prep['b1'], prep['w2'], prep['b2'])
    C2 = prep['w2'].shape[-1]
    HW = H * W

    # PyTorch: extract_features(x).view(B, seq, -1) on contiguous NCHW, then
    # batch_first LSTM.  We feed the head time-major rows (t*B + b).
    feat = (y2.reshape(B, HW, C2).transpose(0, 2, 1)          # NCHW flat order
              .reshape(B, seq_len, -1)                        # .view(B, seq, -1)
              .transpose(1, 0, 2)
              .reshape(seq_len * B, -1))

    return lstm_head(feat, prep['wih0'], prep['whh0'], prep['bg0'],
                     prep['wih1'], prep['whh1'], prep['bg1'],
                     prep['wlin'], prep['blin'], seq=seq_len, batch=B)


# ---------------------------------------------------------------------------
# Deterministic synthetic parameters in PyTorch layouts (no checkpoint load)
# ---------------------------------------------------------------------------
def init_params(key, image_w, image_h, seq_len=2, hidden=3):
    F = 128 * image_w * image_h // seq_len
    ks = jax.random.split(key, 20)
    p = {}
    p['conv1_w'] = 0.05 * jax.random.normal(ks[0], (64, 6, 5, 5), jnp.float32)
    p['bn1_g'] = 1.0 + 0.1 * jax.random.normal(ks[1], (64,), jnp.float32)
    p['bn1_b'] = 0.1 * jax.random.normal(ks[2], (64,), jnp.float32)
    p['bn1_m'] = 0.1 * jax.random.normal(ks[3], (64,), jnp.float32)
    p['bn1_v'] = 1.0 + 0.5 * jax.random.uniform(ks[4], (64,), jnp.float32)
    p['conv2_w'] = 0.02 * jax.random.normal(ks[5], (128, 64, 5, 5), jnp.float32)
    p['bn2_g'] = 1.0 + 0.1 * jax.random.normal(ks[6], (128,), jnp.float32)
    p['bn2_b'] = 0.1 * jax.random.normal(ks[7], (128,), jnp.float32)
    p['bn2_m'] = 0.1 * jax.random.normal(ks[8], (128,), jnp.float32)
    p['bn2_v'] = 1.0 + 0.5 * jax.random.uniform(ks[9], (128,), jnp.float32)
    # LSTM (PyTorch layout, gate order i,f,g,o), 2 layers, hidden=3
    p['w_ih_l0'] = 0.02 * jax.random.normal(ks[10], (4 * hidden, F), jnp.float32)
    p['w_hh_l0'] = 0.02 * jax.random.normal(ks[11], (4 * hidden, hidden), jnp.float32)
    p['b_ih_l0'] = 0.02 * jax.random.normal(ks[12], (4 * hidden,), jnp.float32)
    p['b_hh_l0'] = 0.02 * jax.random.normal(ks[13], (4 * hidden,), jnp.float32)
    p['w_ih_l1'] = 0.02 * jax.random.normal(ks[14], (4 * hidden, hidden), jnp.float32)
    p['w_hh_l1'] = 0.02 * jax.random.normal(ks[15], (4 * hidden, hidden), jnp.float32)
    p['b_ih_l1'] = 0.02 * jax.random.normal(ks[16], (4 * hidden,), jnp.float32)
    p['b_hh_l1'] = 0.02 * jax.random.normal(ks[17], (4 * hidden,), jnp.float32)
    # Linear(in=6 (= seq_len*hidden), out=1)
    p['lin_w'] = 0.2 * jax.random.normal(ks[18], (1, seq_len * hidden), jnp.float32)
    p['lin_b'] = 0.1 * jax.random.normal(ks[19], (1,), jnp.float32)
    return p


if __name__ == "__main__":
    key = jax.random.PRNGKey(0)
    kp, kx = jax.random.split(key)

    image_w = image_h = 8
    batch, seq_len = 2, 2

    params = init_params(kp, image_w, image_h, seq_len)
    prep = prepare_params(params)                 # one-time weight layout prep
    x = jax.random.normal(kx, (batch, 6, image_w, image_h), jnp.float32)

    fwd = jax.jit(functools.partial(deepvo_small_forward, seq_len=seq_len))
    out = fwd(prep, x)
    out = jax.block_until_ready(out)
    assert out.shape == (batch, 1), out.shape
    assert bool(jnp.all(jnp.isfinite(out)))
    print("KERNEL_OK")
</pallas_src>

<mosaic_0001>
module attributes {stable_mosaic.version = 11 : i64} {
  func.func @_conv_stack_kernel(%arg0: i32, %arg1: memref<2x12x12x6xf32, #tpu.memory_space<vmem>>, %arg2: memref<25x6x64xf32, #tpu.memory_space<vmem>>, %arg3: memref<1x64xf32, #tpu.memory_space<vmem>>, %arg4: memref<25x64x128xf32, #tpu.memory_space<vmem>>, %arg5: memref<1x128xf32, #tpu.memory_space<vmem>>, %arg6: memref<128x128xf32, #tpu.memory_space<vmem>>, %arg7: memref<2x12x24x64xf32, #tpu.memory_space<vmem>>) attributes {dimension_semantics = [#tpu.dimension_semantics<arbitrary>], iteration_bounds = array<i64: 1>, scalar_prefetch = 0 : i64, scratch_operands = 1 : i64, tpu.core_type = #tpu.core_type<tc>, window_params = [{pipeline_mode = #tpu.pipeline_mode<synchronous>, transform_indices = @transform_0, window_bounds = array<i64: 2, 12, 12, 6>}, {pipeline_mode = #tpu.pipeline_mode<synchronous>, transform_indices = @transform_1, window_bounds = array<i64: 25, 6, 64>}, {pipeline_mode = #tpu.pipeline_mode<synchronous>, transform_indices = @transform_2, window_bounds = array<i64: 1, 64>}, {pipeline_mode = #tpu.pipeline_mode<synchronous>, transform_indices = @transform_3, window_bounds = array<i64: 25, 64, 128>}, {pipeline_mode = #tpu.pipeline_mode<synchronous>, transform_indices = @transform_4, window_bounds = array<i64: 1, 128>}, {pipeline_mode = #tpu.pipeline_mode<synchronous>, transform_indices = @transform_5, window_bounds = array<i64: 128, 128>}]} {
    %cst = arith.constant 0.000000e+00 : f32
    %0 = vector.broadcast %cst : f32 to vector<128x64xf32>
    %c0 = arith.constant 0 : index
    %c0_0 = arith.constant 0 : index
    %c0_1 = arith.constant 0 : index
    %c0_2 = arith.constant 0 : index
    %1 = vector.load %arg1[%c0, %c0_0, %c0_1, %c0_2] : memref<2x12x12x6xf32, #tpu.memory_space<vmem>>, vector<2x8x8x6xf32>
    %2 = vector.shape_cast %1 : vector<2x8x8x6xf32> to vector<128x6xf32>
    %c0_3 = arith.constant 0 : index
    %c0_4 = arith.constant 0 : index
    %c0_5 = arith.constant 0 : index
    %3 = vector.load %arg2[%c0_3, %c0_4, %c0_5] : memref<25x6x64xf32, #tpu.memory_space<vmem>>, vector<1x6x64xf32>
    %4 = vector.shape_cast %3 : vector<1x6x64xf32> to vector<6x64xf32>
    %cst_6 = arith.constant dense<0.000000e+00> : vector<128x64xf32>
    %5 = tpu.matmul %2, %4, %cst_6 {dimension_numbers = #tpu.dot_dimension_numbers<[1], [0], [0], [1], [0, 0, 1, 1], [], []>} : vector<128x6xf32>, vector<6x64xf32>, vector<128x64xf32> -> vector<128x64xf32>
    %6 = arith.addf %0, %5 : vector<128x64xf32>
    %c0_7 = arith.constant 0 : index
    %c0_8 = arith.constant 0 : index
    %c1 = arith.constant 1 : index
    %c0_9 = arith.constant 0 : index
    %7 = vector.load %arg1[%c0_7, %c0_8, %c1, %c0_9] : memref<2x12x12x6xf32, #tpu.memory_space<vmem>>, vector<2x8x8x6xf32>
    %8 = vector.shape_cast %7 : vector<2x8x8x6xf32> to vector<128x6xf32>
    %c1_10 = arith.constant 1 : index
    %c0_11 = arith.constant 0 : index
    %c0_12 = arith.constant 0 : index
    %9 = vector.load %arg2[%c1_10, %c0_11, %c0_12] : memref<25x6x64xf32, #tpu.memory_space<vmem>>, vector<1x6x64xf32>
    %10 = vector.shape_cast %9 : vector<1x6x64xf32> to vector<6x64xf32>
    %cst_13 = arith.constant dense<0.000000e+00> : vector<128x64xf32>
    %11 = tpu.matmul %8, %10, %cst_13 {dimension_numbers = #tpu.dot_dimension_numbers<[1], [0], [0], [1], [0, 0, 1, 1], [], []>} : vector<128x6xf32>, vector<6x64xf32>, vector<128x64xf32> -> vector<128x64xf32>
    %12 = arith.addf %6, %11 : vector<128x64xf32>
    %c0_14 = arith.constant 0 : index
    %c0_15 = arith.constant 0 : index
    %c2 = arith.constant 2 : index
    %c0_16 = arith.constant 0 : index
    %13 = vector.load %arg1[%c0_14, %c0_15, %c2, %c0_16] : memref<2x12x12x6xf32, #tpu.memory_space<vmem>>, vector<2x8x8x6xf32>
    %14 = vector.shape_cast %13 : vector<2x8x8x6xf32> to vector<128x6xf32>
    %c2_17 = arith.constant 2 : index
    %c0_18 = arith.constant 0 : index
    %c0_19 = arith.constant 0 : index
    %15 = vector.load %arg2[%c2_17, %c0_18, %c0_19] : memref<25x6x64xf32, #tpu.memory_space<vmem>>, vector<1x6x64xf32>
    %16 = vector.shape_cast %15 : vector<1x6x64xf32> to vector<6x64xf32>
    %cst_20 = arith.constant dense<0.000000e+00> : vector<128x64xf32>
    %17 = tpu.matmul %14, %16, %cst_20 {dimension_numbers = #tpu.dot_dimension_numbers<[1], [0], [0], [1], [0, 0, 1, 1], [], []>} : vector<128x6xf32>, vector<6x64xf32>, vector<128x64xf32> -> vector<128x64xf32>
    %18 = arith.addf %12, %17 : vector<128x64xf32>
    %c0_21 = arith.constant 0 : index
    %c0_22 = arith.constant 0 : index
    %c3 = arith.constant 3 : index
    %c0_23 = arith.constant 0 : index
    %19 = vector.load %arg1[%c0_21, %c0_22, %c3, %c0_23] : memref<2x12x12x6xf32, #tpu.memory_space<vmem>>, vector<2x8x8x6xf32>
    %20 = vector.shape_cast %19 : vector<2x8x8x6xf32> to vector<128x6xf32>
    %c3_24 = arith.constant 3 : index
    %c0_25 = arith.constant 0 : index
    %c0_26 = arith.constant 0 : index
    %21 = vector.load %arg2[%c3_24, %c0_25, %c0_26] : memref<25x6x64xf32, #tpu.memory_space<vmem>>, vector<1x6x64xf32>
    %22 = vector.shape_cast %21 : vector<1x6x64xf32> to vector<6x64xf32>
    %cst_27 = arith.constant dense<0.000000e+00> : vector<128x64xf32>
    %23 = tpu.matmul %20, %22, %cst_27 {dimension_numbers = #tpu.dot_dimension_numbers<[1], [0], [0], [1], [0, 0, 1, 1], [], []>} : vector<128x6xf32>, vector<6x64xf32>, vector<128x64xf32> -> vector<128x64xf32>
    %24 = arith.addf %18, %23 : vector<128x64xf32>
    %c0_28 = arith.constant 0 : index
    %c0_29 = arith.constant 0 : index
    %c4 = arith.constant 4 : index
    %c0_30 = arith.constant 0 : index
    %25 = vector.load %arg1[%c0_28, %c0_29, %c4, %c0_30] : memref<2x12x12x6xf32, #tpu.memory_space<vmem>>, vector<2x8x8x6xf32>
    %26 = vector.shape_cast %25 : vector<2x8x8x6xf32> to vector<128x6xf32>
    %c4_31 = arith.constant 4 : index
    %c0_32 = arith.constant 0 : index
    %c0_33 = arith.constant 0 : index
    %27 = vector.load %arg2[%c4_31, %c0_32, %c0_33] : memref<25x6x64xf32, #tpu.memory_space<vmem>>, vector<1x6x64xf32>
    %28 = vector.shape_cast %27 : vector<1x6x64xf32> to vector<6x64xf32>
    %cst_34 = arith.constant dense<0.000000e+00> : vector<128x64xf32>
    %29 = tpu.matmul %26, %28, %cst_34 {dimension_numbers = #tpu.dot_dimension_numbers<[1], [0], [0], [1], [0, 0, 1, 1], [], []>} : vector<128x6xf32>, vector<6x64xf32>, vector<128x64xf32> -> vector<128x64xf32>
    %30 = arith.addf %24, %29 : vector<128x64xf32>
    %c0_35 = arith.constant 0 : index
    %c1_36 = arith.constant 1 : index
    %c0_37 = arith.constant 0 : index
    %c0_38 = arith.constant 0 : index
    %31 = vector.load %arg1[%c0_35, %c1_36, %c0_37, %c0_38] : memref<2x12x12x6xf32, #tpu.memory_space<vmem>>, vector<2x8x8x6xf32>
    %32 = vector.shape_cast %31 : vector<2x8x8x6xf32> to vector<128x6xf32>
    %c5 = arith.constant 5 : index
    %c0_39 = arith.constant 0 : index
    %c0_40 = arith.constant 0 : index
    %33 = vector.load %arg2[%c5, %c0_39, %c0_40] : memref<25x6x64xf32, #tpu.memory_space<vmem>>, vector<1x6x64xf32>
    %34 = vector.shape_cast %33 : vector<1x6x64xf32> to vector<6x64xf32>
    %cst_41 = arith.constant dense<0.000000e+00> : vector<128x64xf32>
    %35 = tpu.matmul %32, %34, %cst_41 {dimension_numbers = #tpu.dot_dimension_numbers<[1], [0], [0], [1], [0, 0, 1, 1], [], []>} : vector<128x6xf32>, vector<6x64xf32>, vector<128x64xf32> -> vector<128x64xf32>
    %36 = arith.addf %30, %35 : vector<128x64xf32>
    %c0_42 = arith.constant 0 : index
    %c1_43 = arith.constant 1 : index
    %c1_44 = arith.constant 1 : index
    %c0_45 = arith.constant 0 : index
    %37 = vector.load %arg1[%c0_42, %c1_43, %c1_44, %c0_45] : memref<2x12x12x6xf32, #tpu.memory_space<vmem>>, vector<2x8x8x6xf32>
    %38 = vector.shape_cast %37 : vector<2x8x8x6xf32> to vector<128x6xf32>
    %c6 = arith.constant 6 : index
    %c0_46 = arith.constant 0 : index
    %c0_47 = arith.constant 0 : index
    %39 = vector.load %arg2[%c6, %c0_46, %c0_47] : memref<25x6x64xf32, #tpu.memory_space<vmem>>, vector<1x6x64xf32>
    %40 = vector.shape_cast %39 : vector<1x6x64xf32> to vector<6x64xf32>
    %cst_48 = arith.constant dense<0.000000e+00> : vector<128x64xf32>
    %41 = tpu.matmul %38, %40, %cst_48 {dimension_numbers = #tpu.dot_dimension_numbers<[1], [0], [0], [1], [0, 0, 1, 1], [], []>} : vector<128x6xf32>, vector<6x64xf32>, vector<128x64xf32> -> vector<128x64xf32>
    %42 = arith.addf %36, %41 : vector<128x64xf32>
    %c0_49 = arith.constant 0 : index
    %c1_50 = arith.constant 1 : index
    %c2_51 = arith.constant 2 : index
    %c0_52 = arith.constant 0 : index
    %43 = vector.load %arg1[%c0_49, %c1_50, %c2_51, %c0_52] : memref<2x12x12x6xf32, #tpu.memory_space<vmem>>, vector<2x8x8x6xf32>
    %44 = vector.shape_cast %43 : vector<2x8x8x6xf32> to vector<128x6xf32>
    %c7 = arith.constant 7 : index
    %c0_53 = arith.constant 0 : index
    %c0_54 = arith.constant 0 : index
    %45 = vector.load %arg2[%c7, %c0_53, %c0_54] : memref<25x6x64xf32, #tpu.memory_space<vmem>>, vector<1x6x64xf32>
    %46 = vector.shape_cast %45 : vector<1x6x64xf32> to vector<6x64xf32>
    %cst_55 = arith.constant dense<0.000000e+00> : vector<128x64xf32>
    %47 = tpu.matmul %44, %46, %cst_55 {dimension_numbers = #tpu.dot_dimension_numbers<[1], [0], [0], [1], [0, 0, 1, 1], [], []>} : vector<128x6xf32>, vector<6x64xf32>, vector<128x64xf32> -> vector<128x64xf32>
    %48 = arith.addf %42, %47 : vector<128x64xf32>
    %c0_56 = arith.constant 0 : index
    %c1_57 = arith.constant 1 : index
    %c3_58 = arith.constant 3 : index
    %c0_59 = arith.constant 0 : index
    %49 = vector.load %arg1[%c0_56, %c1_57, %c3_58, %c0_59] : memref<2x12x12x6xf32, #tpu.memory_space<vmem>>, vector<2x8x8x6xf32>
    %50 = vector.shape_cast %49 : vector<2x8x8x6xf32> to vector<128x6xf32>
    %c8 = arith.constant 8 : index
    %c0_60 = arith.constant 0 : index
    %c0_61 = arith.constant 0 : index
    %51 = vector.load %arg2[%c8, %c0_60, %c0_61] : memref<25x6x64xf32, #tpu.memory_space<vmem>>, vector<1x6x64xf32>
    %52 = vector.shape_cast %51 : vector<1x6x64xf32> to vector<6x64xf32>
    %cst_62 = arith.constant dense<0.000000e+00> : vector<128x64xf32>
    %53 = tpu.matmul %50, %52, %cst_62 {dimension_numbers = #tpu.dot_dimension_numbers<[1], [0], [0], [1], [0, 0, 1, 1], [], []>} : vector<128x6xf32>, vector<6x64xf32>, vector<128x64xf32> -> vector<128x64xf32>
    %54 = arith.addf %48, %53 : vector<128x64xf32>
    %c0_63 = arith.constant 0 : index
    %c1_64 = arith.constant 1 : index
    %c4_65 = arith.constant 4 : index
    %c0_66 = arith.constant 0 : index
    %55 = vector.load %arg1[%c0_63, %c1_64, %c4_65, %c0_66] : memref<2x12x12x6xf32, #tpu.memory_space<vmem>>, vector<2x8x8x6xf32>
    %56 = vector.shape_cast %55 : vector<2x8x8x6xf32> to vector<128x6xf32>
    %c9 = arith.constant 9 : index
    %c0_67 = arith.constant 0 : index
    %c0_68 = arith.constant 0 : index
    %57 = vector.load %arg2[%c9, %c0_67, %c0_68] : memref<25x6x64xf32, #tpu.memory_space<vmem>>, vector<1x6x64xf32>
    %58 = vector.shape_cast %57 : vector<1x6x64xf32> to vector<6x64xf32>
    %cst_69 = arith.constant dense<0.000000e+00> : vector<128x64xf32>
    %59 = tpu.matmul %56, %58, %cst_69 {dimension_numbers = #tpu.dot_dimension_numbers<[1], [0], [0], [1], [0, 0, 1, 1], [], []>} : vector<128x6xf32>, vector<6x64xf32>, vector<128x64xf32> -> vector<128x64xf32>
    %60 = arith.addf %54, %59 : vector<128x64xf32>
    %c0_70 = arith.constant 0 : index
    %c2_71 = arith.constant 2 : index
    %c0_72 = arith.constant 0 : index
    %c0_73 = arith.constant 0 : index
    %61 = vector.load %arg1[%c0_70, %c2_71, %c0_72, %c0_73] : memref<2x12x12x6xf32, #tpu.memory_space<vmem>>, vector<2x8x8x6xf32>
    %62 = vector.shape_cast %61 : vector<2x8x8x6xf32> to vector<128x6xf32>
    %c10 = arith.constant 10 : index
    %c0_74 = arith.constant 0 : index
    %c0_75 = arith.constant 0 : index
    %63 = vector.load %arg2[%c10, %c0_74, %c0_75] : memref<25x6x64xf32, #tpu.memory_space<vmem>>, vector<1x6x64xf32>
    %64 = vector.shape_cast %63 : vector<1x6x64xf32> to vector<6x64xf32>
    %cst_76 = arith.constant dense<0.000000e+00> : vector<128x64xf32>
    %65 = tpu.matmul %62, %64, %cst_76 {dimension_numbers = #tpu.dot_dimension_numbers<[1], [0], [0], [1], [0, 0, 1, 1], [], []>} : vector<128x6xf32>, vector<6x64xf32>, vector<128x64xf32> -> vector<128x64xf32>
    %66 = arith.addf %60, %65 : vector<128x64xf32>
    %c0_77 = arith.constant 0 : index
    %c2_78 = arith.constant 2 : index
    %c1_79 = arith.constant 1 : index
    %c0_80 = arith.constant 0 : index
    %67 = vector.load %arg1[%c0_77, %c2_78, %c1_79, %c0_80] : memref<2x12x12x6xf32, #tpu.memory_space<vmem>>, vector<2x8x8x6xf32>
    %68 = vector.shape_cast %67 : vector<2x8x8x6xf32> to vector<128x6xf32>
    %c11 = arith.constant 11 : index
    %c0_81 = arith.constant 0 : index
    %c0_82 = arith.constant 0 : index
    %69 = vector.load %arg2[%c11, %c0_81, %c0_82] : memref<25x6x64xf32, #tpu.memory_space<vmem>>, vector<1x6x64xf32>
    %70 = vector.shape_cast %69 : vector<1x6x64xf32> to vector<6x64xf32>
    %cst_83 = arith.constant dense<0.000000e+00> : vector<128x64xf32>
    %71 = tpu.matmul %68, %70, %cst_83 {dimension_numbers = #tpu.dot_dimension_numbers<[1], [0], [0], [1], [0, 0, 1, 1], [], []>} : vector<128x6xf32>, vector<6x64xf32>, vector<128x64xf32> -> vector<128x64xf32>
    %72 = arith.addf %66, %71 : vector<128x64xf32>
    %c0_84 = arith.constant 0 : index
    %c2_85 = arith.constant 2 : index
    %c2_86 = arith.constant 2 : index
    %c0_87 = arith.constant 0 : index
    %73 = vector.load %arg1[%c0_84, %c2_85, %c2_86, %c0_87] : memref<2x12x12x6xf32, #tpu.memory_space<vmem>>, vector<2x8x8x6xf32>
    %74 = vector.shape_cast %73 : vector<2x8x8x6xf32> to vector<128x6xf32>
    %c12 = arith.constant 12 : index
    %c0_88 = arith.constant 0 : index
    %c0_89 = arith.constant 0 : index
    %75 = vector.load %arg2[%c12, %c0_88, %c0_89] : memref<25x6x64xf32, #tpu.memory_space<vmem>>, vector<1x6x64xf32>
    %76 = vector.shape_cast %75 : vector<1x6x64xf32> to vector<6x64xf32>
    %cst_90 = arith.constant dense<0.000000e+00> : vector<128x64xf32>
    %77 = tpu.matmul %74, %76, %cst_90 {dimension_numbers = #tpu.dot_dimension_numbers<[1], [0], [0], [1], [0, 0, 1, 1], [], []>} : vector<128x6xf32>, vector<6x64xf32>, vector<128x64xf32> -> vector<128x64xf32>
    %78 = arith.addf %72, %77 : vector<128x64xf32>
    %c0_91 = arith.constant 0 : index
    %c2_92 = arith.constant 2 : index
    %c3_93 = arith.constant 3 : index
    %c0_94 = arith.constant 0 : index
    %79 = vector.load %arg1[%c0_91, %c2_92, %c3_93, %c0_94] : memref<2x12x12x6xf32, #tpu.memory_space<vmem>>, vector<2x8x8x6xf32>
    %80 = vector.shape_cast %79 : vector<2x8x8x6xf32> to vector<128x6xf32>
    %c13 = arith.constant 13 : index
    %c0_95 = arith.constant 0 : index
    %c0_96 = arith.constant 0 : index
    %81 = vector.load %arg2[%c13, %c0_95, %c0_96] : memref<25x6x64xf32, #tpu.memory_space<vmem>>, vector<1x6x64xf32>
    %82 = vector.shape_cast %81 : vector<1x6x64xf32> to vector<6x64xf32>
    %cst_97 = arith.constant dense<0.000000e+00> : vector<128x64xf32>
    %83 = tpu.matmul %80, %82, %cst_97 {dimension_numbers = #tpu.dot_dimension_numbers<[1], [0], [0], [1], [0, 0, 1, 1], [], []>} : vector<128x6xf32>, vector<6x64xf32>, vector<128x64xf32> -> vector<128x64xf32>
    %84 = arith.addf %78, %83 : vector<128x64xf32>
    %c0_98 = arith.constant 0 : index
    %c2_99 = arith.constant 2 : index
    %c4_100 = arith.constant 4 : index
    %c0_101 = arith.constant 0 : index
    %85 = vector.load %arg1[%c0_98, %c2_99, %c4_100, %c0_101] : memref<2x12x12x6xf32, #tpu.memory_space<vmem>>, vector<2x8x8x6xf32>
    %86 = vector.shape_cast %85 : vector<2x8x8x6xf32> to vector<128x6xf32>
    %c14 = arith.constant 14 : index
    %c0_102 = arith.constant 0 : index
    %c0_103 = arith.constant 0 : index
    %87 = vector.load %arg2[%c14, %c0_102, %c0_103] : memref<25x6x64xf32, #tpu.memory_space<vmem>>, vector<1x6x64xf32>
    %88 = vector.shape_cast %87 : vector<1x6x64xf32> to vector<6x64xf32>
    %cst_104 = arith.constant dense<0.000000e+00> : vector<128x64xf32>
    %89 = tpu.matmul %86, %88, %cst_104 {dimension_numbers = #tpu.dot_dimension_numbers<[1], [0], [0], [1], [0, 0, 1, 1], [], []>} : vector<128x6xf32>, vector<6x64xf32>, vector<128x64xf32> -> vector<128x64xf32>
    %90 = arith.addf %84, %89 : vector<128x64xf32>
    %c0_105 = arith.constant 0 : index
    %c3_106 = arith.constant 3 : index
    %c0_107 = arith.constant 0 : index
    %c0_108 = arith.constant 0 : index
    %91 = vector.load %arg1[%c0_105, %c3_106, %c0_107, %c0_108] : memref<2x12x12x6xf32, #tpu.memory_space<vmem>>, vector<2x8x8x6xf32>
    %92 = vector.shape_cast %91 : vector<2x8x8x6xf32> to vector<128x6xf32>
    %c15 = arith.constant 15 : index
    %c0_109 = arith.constant 0 : index
    %c0_110 = arith.constant 0 : index
    %93 = vector.load %arg2[%c15, %c0_109, %c0_110] : memref<25x6x64xf32, #tpu.memory_space<vmem>>, vector<1x6x64xf32>
    %94 = vector.shape_cast %93 : vector<1x6x64xf32> to vector<6x64xf32>
    %cst_111 = arith.constant dense<0.000000e+00> : vector<128x64xf32>
    %95 = tpu.matmul %92, %94, %cst_111 {dimension_numbers = #tpu.dot_dimension_numbers<[1], [0], [0], [1], [0, 0, 1, 1], [], []>} : vector<128x6xf32>, vector<6x64xf32>, vector<128x64xf32> -> vector<128x64xf32>
    %96 = arith.addf %90, %95 : vector<128x64xf32>
    %c0_112 = arith.constant 0 : index
    %c3_113 = arith.constant 3 : index
    %c1_114 = arith.constant 1 : index
    %c0_115 = arith.constant 0 : index
    %97 = vector.load %arg1[%c0_112, %c3_113, %c1_114, %c0_115] : memref<2x12x12x6xf32, #tpu.memory_space<vmem>>, vector<2x8x8x6xf32>
    %98 = vector.shape_cast %97 : vector<2x8x8x6xf32> to vector<128x6xf32>
    %c16 = arith.constant 16 : index
    %c0_116 = arith.constant 0 : index
    %c0_117 = arith.constant 0 : index
    %99 = vector.load %arg2[%c16, %c0_116, %c0_117] : memref<25x6x64xf32, #tpu.memory_space<vmem>>, vector<1x6x64xf32>
    %100 = vector.shape_cast %99 : vector<1x6x64xf32> to vector<6x64xf32>
    %cst_118 = arith.constant dense<0.000000e+00> : vector<128x64xf32>
    %101 = tpu.matmul %98, %100, %cst_118 {dimension_numbers = #tpu.dot_dimension_numbers<[1], [0], [0], [1], [0, 0, 1, 1], [], []>} : vector<128x6xf32>, vector<6x64xf32>, vector<128x64xf32> -> vector<128x64xf32>
    %102 = arith.addf %96, %101 : vector<128x64xf32>
    %c0_119 = arith.constant 0 : index
    %c3_120 = arith.constant 3 : index
    %c2_121 = arith.constant 2 : index
    %c0_122 = arith.constant 0 : index
    %103 = vector.load %arg1[%c0_119, %c3_120, %c2_121, %c0_122] : memref<2x12x12x6xf32, #tpu.memory_space<vmem>>, vector<2x8x8x6xf32>
    %104 = vector.shape_cast %103 : vector<2x8x8x6xf32> to vector<128x6xf32>
    %c17 = arith.constant 17 : index
    %c0_123 = arith.constant 0 : index
    %c0_124 = arith.constant 0 : index
    %105 = vector.load %arg2[%c17, %c0_123, %c0_124] : memref<25x6x64xf32, #tpu.memory_space<vmem>>, vector<1x6x64xf32>
    %106 = vector.shape_cast %105 : vector<1x6x64xf32> to vector<6x64xf32>
    %cst_125 = arith.constant dense<0.000000e+00> : vector<128x64xf32>
    %107 = tpu.matmul %104, %106, %cst_125 {dimension_numbers = #tpu.dot_dimension_numbers<[1], [0], [0], [1], [0, 0, 1, 1], [], []>} : vector<128x6xf32>, vector<6x64xf32>, vector<128x64xf32> -> vector<128x64xf32>
    %108 = arith.addf %102, %107 : vector<128x64xf32>
    %c0_126 = arith.constant 0 : index
    %c3_127 = arith.constant 3 : index
    %c3_128 = arith.constant 3 : index
    %c0_129 = arith.constant 0 : index
    %109 = vector.load %arg1[%c0_126, %c3_127, %c3_128, %c0_129] : memref<2x12x12x6xf32, #tpu.memory_space<vmem>>, vector<2x8x8x6xf32>
    %110 = vector.shape_cast %109 : vector<2x8x8x6xf32> to vector<128x6xf32>
    %c18 = arith.constant 18 : index
    %c0_130 = arith.constant 0 : index
    %c0_131 = arith.constant 0 : index
    %111 = vector.load %arg2[%c18, %c0_130, %c0_131] : memref<25x6x64xf32, #tpu.memory_space<vmem>>, vector<1x6x64xf32>
    %112 = vector.shape_cast %111 : vector<1x6x64xf32> to vector<6x64xf32>
    %cst_132 = arith.constant dense<0.000000e+00> : vector<128x64xf32>
    %113 = tpu.matmul %110, %112, %cst_132 {dimension_numbers = #tpu.dot_dimension_numbers<[1], [0], [0], [1], [0, 0, 1, 1], [], []>} : vector<128x6xf32>, vector<6x64xf32>, vector<128x64xf32> -> vector<128x64xf32>
    %114 = arith.addf %108, %113 : vector<128x64xf32>
    %c0_133 = arith.constant 0 : index
    %c3_134 = arith.constant 3 : index
    %c4_135 = arith.constant 4 : index
    %c0_136 = arith.constant 0 : index
    %115 = vector.load %arg1[%c0_133, %c3_134, %c4_135, %c0_136] : memref<2x12x12x6xf32, #tpu.memory_space<vmem>>, vector<2x8x8x6xf32>
    %116 = vector.shape_cast %115 : vector<2x8x8x6xf32> to vector<128x6xf32>
    %c19 = arith.constant 19 : index
    %c0_137 = arith.constant 0 : index
    %c0_138 = arith.constant 0 : index
    %117 = vector.load %arg2[%c19, %c0_137, %c0_138] : memref<25x6x64xf32, #tpu.memory_space<vmem>>, vector<1x6x64xf32>
    %118 = vector.shape_cast %117 : vector<1x6x64xf32> to vector<6x64xf32>
    %cst_139 = arith.constant dense<0.000000e+00> : vector<128x64xf32>
    %119 = tpu.matmul %116, %118, %cst_139 {dimension_numbers = #tpu.dot_dimension_numbers<[1], [0], [0], [1], [0, 0, 1, 1], [], []>} : vector<128x6xf32>, vector<6x64xf32>, vector<128x64xf32> -> vector<128x64xf32>
    %120 = arith.addf %114, %119 : vector<128x64xf32>
    %c0_140 = arith.constant 0 : index
    %c4_141 = arith.constant 4 : index
    %c0_142 = arith.constant 0 : index
    %c0_143 = arith.constant 0 : index
    %121 = vector.load %arg1[%c0_140, %c4_141, %c0_142, %c0_143] : memref<2x12x12x6xf32, #tpu.memory_space<vmem>>, vector<2x8x8x6xf32>
    %122 = vector.shape_cast %121 : vector<2x8x8x6xf32> to vector<128x6xf32>
    %c20 = arith.constant 20 : index
    %c0_144 = arith.constant 0 : index
    %c0_145 = arith.constant 0 : index
    %123 = vector.load %arg2[%c20, %c0_144, %c0_145] : memref<25x6x64xf32, #tpu.memory_space<vmem>>, vector<1x6x64xf32>
    %124 = vector.shape_cast %123 : vector<1x6x64xf32> to vector<6x64xf32>
    %cst_146 = arith.constant dense<0.000000e+00> : vector<128x64xf32>
    %125 = tpu.matmul %122, %124, %cst_146 {dimension_numbers = #tpu.dot_dimension_numbers<[1], [0], [0], [1], [0, 0, 1, 1], [], []>} : vector<128x6xf32>, vector<6x64xf32>, vector<128x64xf32> -> vector<128x64xf32>
    %126 = arith.addf %120, %125 : vector<128x64xf32>
    %c0_147 = arith.constant 0 : index
    %c4_148 = arith.constant 4 : index
    %c1_149 = arith.constant 1 : index
    %c0_150 = arith.constant 0 : index
    %127 = vector.load %arg1[%c0_147, %c4_148, %c1_149, %c0_150] : memref<2x12x12x6xf32, #tpu.memory_space<vmem>>, vector<2x8x8x6xf32>
    %128 = vector.shape_cast %127 : vector<2x8x8x6xf32> to vector<128x6xf32>
    %c21 = arith.constant 21 : index
    %c0_151 = arith.constant 0 : index
    %c0_152 = arith.constant 0 : index
    %129 = vector.load %arg2[%c21, %c0_151, %c0_152] : memref<25x6x64xf32, #tpu.memory_space<vmem>>, vector<1x6x64xf32>
    %130 = vector.shape_cast %129 : vector<1x6x64xf32> to vector<6x64xf32>
    %cst_153 = arith.constant dense<0.000000e+00> : vector<128x64xf32>
    %131 = tpu.matmul %128, %130, %cst_153 {dimension_numbers = #tpu.dot_dimension_numbers<[1], [0], [0], [1], [0, 0, 1, 1], [], []>} : vector<128x6xf32>, vector<6x64xf32>, vector<128x64xf32> -> vector<128x64xf32>
    %132 = arith.addf %126, %131 : vector<128x64xf32>
    %c0_154 = arith.constant 0 : index
    %c4_155 = arith.constant 4 : index
    %c2_156 = arith.constant 2 : index
    %c0_157 = arith.constant 0 : index
    %133 = vector.load %arg1[%c0_154, %c4_155, %c2_156, %c0_157] : memref<2x12x12x6xf32, #tpu.memory_space<vmem>>, vector<2x8x8x6xf32>
    %134 = vector.shape_cast %133 : vector<2x8x8x6xf32> to vector<128x6xf32>
    %c22 = arith.constant 22 : index
    %c0_158 = arith.constant 0 : index
    %c0_159 = arith.constant 0 : index
    %135 = vector.load %arg2[%c22, %c0_158, %c0_159] : memref<25x6x64xf32, #tpu.memory_space<vmem>>, vector<1x6x64xf32>
    %136 = vector.shape_cast %135 : vector<1x6x64xf32> to vector<6x64xf32>
    %cst_160 = arith.constant dense<0.000000e+00> : vector<128x64xf32>
    %137 = tpu.matmul %134, %136, %cst_160 {dimension_numbers = #tpu.dot_dimension_numbers<[1], [0], [0], [1], [0, 0, 1, 1], [], []>} : vector<128x6xf32>, vector<6x64xf32>, vector<128x64xf32> -> vector<128x64xf32>
    %138 = arith.addf %132, %137 : vector<128x64xf32>
    %c0_161 = arith.constant 0 : index
    %c4_162 = arith.constant 4 : index
    %c3_163 = arith.constant 3 : index
    %c0_164 = arith.constant 0 : index
    %139 = vector.load %arg1[%c0_161, %c4_162, %c3_163, %c0_164] : memref<2x12x12x6xf32, #tpu.memory_space<vmem>>, vector<2x8x8x6xf32>
    %140 = vector.shape_cast %139 : vector<2x8x8x6xf32> to vector<128x6xf32>
    %c23 = arith.constant 23 : index
    %c0_165 = arith.constant 0 : index
    %c0_166 = arith.constant 0 : index
    %141 = vector.load %arg2[%c23, %c0_165, %c0_166] : memref<25x6x64xf32, #tpu.memory_space<vmem>>, vector<1x6x64xf32>
    %142 = vector.shape_cast %141 : vector<1x6x64xf32> to vector<6x64xf32>
    %cst_167 = arith.constant dense<0.000000e+00> : vector<128x64xf32>
    %143 = tpu.matmul %140, %142, %cst_167 {dimension_numbers = #tpu.dot_dimension_numbers<[1], [0], [0], [1], [0, 0, 1, 1], [], []>} : vector<128x6xf32>, vector<6x64xf32>, vector<128x64xf32> -> vector<128x64xf32>
    %144 = arith.addf %138, %143 : vector<128x64xf32>
    %c0_168 = arith.constant 0 : index
    %c4_169 = arith.constant 4 : index
    %c4_170 = arith.constant 4 : index
    %c0_171 = arith.constant 0 : index
    %145 = vector.load %arg1[%c0_168, %c4_169, %c4_170, %c0_171] : memref<2x12x12x6xf32, #tpu.memory_space<vmem>>, vector<2x8x8x6xf32>
    %146 = vector.shape_cast %145 : vector<2x8x8x6xf32> to vector<128x6xf32>
    %c24 = arith.constant 24 : index
    %c0_172 = arith.constant 0 : index
    %c0_173 = arith.constant 0 : index
    %147 = vector.load %arg2[%c24, %c0_172, %c0_173] : memref<25x6x64xf32, #tpu.memory_space<vmem>>, vector<1x6x64xf32>
    %148 = vector.shape_cast %147 : vector<1x6x64xf32> to vector<6x64xf32>
    %cst_174 = arith.constant dense<0.000000e+00> : vector<128x64xf32>
    %149 = tpu.matmul %146, %148, %cst_174 {dimension_numbers = #tpu.dot_dimension_numbers<[1], [0], [0], [1], [0, 0, 1, 1], [], []>} : vector<128x6xf32>, vector<6x64xf32>, vector<128x64xf32> -> vector<128x64xf32>
    %150 = arith.addf %144, %149 : vector<128x64xf32>
    %c0_175 = arith.constant 0 : index
    %c0_176 = arith.constant 0 : index
    %151 = vector.load %arg3[%c0_175, %c0_176] : memref<1x64xf32, #tpu.memory_space<vmem>>, vector<1x64xf32>
    %152 = vector.broadcast %151 : vector<1x64xf32> to vector<128x64xf32>
    %153 = arith.addf %150, %152 : vector<128x64xf32>
    %cst_177 = arith.constant 0.000000e+00 : f32
    %154 = vector.broadcast %cst_177 : f32 to vector<128x64xf32>
    %155 = arith.maximumf %153, %154 : vector<128x64xf32>
    %cst_178 = arith.constant 0.000000e+00 : f32
    %156 = vector.broadcast %cst_178 : f32 to vector<2x12x24x64xf32>
    %c0_179 = arith.constant 0 : index
    %c0_180 = arith.constant 0 : index
    %c0_181 = arith.constant 0 : index
    %c0_182 = arith.constant 0 : index
    %157 = vector.load %arg7[%c0_179, %c0_180, %c0_181, %c0_182] : memref<2x12x24x64xf32, #tpu.memory_space<vmem>>, vector<2x12x24x64xf32>
    tpu.vector_store %arg7[%c0_179, %c0_180, %c0_181, %c0_182], %156 {strides = array<i32>} : memref<2x12x24x64xf32, #tpu.memory_space<vmem>>, vector<2x12x24x64xf32>,
    %158 = vector.shape_cast %155 : vector<128x64xf32> to vector<2x8x8x64xf32>
    %c0_183 = arith.constant 0 : index
    %c2_184 = arith.constant 2 : index
    %c8_185 = arith.constant 8 : index
    %c0_186 = arith.constant 0 : index
    %159 = vector.load %arg7[%c0_183, %c2_184, %c8_185, %c0_186] : memref<2x12x24x64xf32, #tpu.memory_space<vmem>>, vector<2x8x8x64xf32>
    tpu.vector_store %arg7[%c0_183, %c2_184, %c8_185, %c0_186], %158 {strides = array<i32>} : memref<2x12x24x64xf32, #tpu.memory_space<vmem>>, vector<2x8x8x64xf32>,
    %cst_187 = arith.constant 0.000000e+00 : f32
    %160 = vector.broadcast %cst_187 : f32 to vector<128x128xf32>
    %c0_188 = arith.constant 0 : index
    %c0_189 = arith.constant 0 : index
    %c6_190 = arith.constant 6 : index
    %c0_191 = arith.constant 0 : index
    %161 = vector.load %arg7[%c0_188, %c0_189, %c6_190, %c0_191] : memref<2x12x24x64xf32, #tpu.memory_space<vmem>>, vector<2x8x8x64xf32>
    %162 = vector.shape_cast %161 : vector<2x8x8x64xf32> to vector<128x64xf32>
    %c0_192 = arith.constant 0 : index
    %c0_193 = arith.constant 0 : index
    %c0_194 = arith.constant 0 : index
    %163 = vector.load %arg4[%c0_192, %c0_193, %c0_194] : memref<25x64x128xf32, #tpu.memory_space<vmem>>, vector<1x64x128xf32>
    %164 = vector.shape_cast %163 : vector<1x64x128xf32> to vector<64x128xf32>
    %cst_195 = arith.constant dense<0.000000e+00> : vector<128x128xf32>
    %165 = tpu.matmul %162, %164, %cst_195 {dimension_numbers = #tpu.dot_dimension_numbers<[1], [0], [0], [1], [0, 0, 1, 1], [], []>} : vector<128x64xf32>, vector<64x128xf32>, vector<128x128xf32> -> vector<128x128xf32>
    %166 = arith.addf %160, %165 : vector<128x128xf32>
    %c0_196 = arith.constant 0 : index
    %c0_197 = arith.constant 0 : index
    %c7_198 = arith.constant 7 : index
    %c0_199 = arith.constant 0 : index
    %167 = vector.load %arg7[%c0_196, %c0_197, %c7_198, %c0_199] : memref<2x12x24x64xf32, #tpu.memory_space<vmem>>, vector<2x8x8x64xf32>
    %168 = vector.shape_cast %167 : vector<2x8x8x64xf32> to vector<128x64xf32>
    %c1_200 = arith.constant 1 : index
    %c0_201 = arith.constant 0 : index
    %c0_202 = arith.constant 0 : index
    %169 = vector.load %arg4[%c1_200, %c0_201, %c0_202] : memref<25x64x128xf32, #tpu.memory_space<vmem>>, vector<1x64x128xf32>
    %170 = vector.shape_cast %169 : vector<1x64x128xf32> to vector<64x128xf32>
    %cst_203 = arith.constant dense<0.000000e+00> : vector<128x128xf32>
    %171 = tpu.matmul %168, %170, %cst_203 {dimension_numbers = #tpu.dot_dimension_numbers<[1], [0], [0], [1], [0, 0, 1, 1], [], []>} : vector<128x64xf32>, vector<64x128xf32>, vector<128x128xf32> -> vector<128x128xf32>
    %172 = arith.addf %166, %171 : vector<128x128xf32>
    %c0_204 = arith.constant 0 : index
    %c0_205 = arith.constant 0 : index
    %c8_206 = arith.constant 8 : index
    %c0_207 = arith.constant 0 : index
    %173 = vector.load %arg7[%c0_204, %c0_205, %c8_206, %c0_207] : memref<2x12x24x64xf32, #tpu.memory_space<vmem>>, vector<2x8x8x64xf32>
    %174 = vector.shape_cast %173 : vector<2x8x8x64xf32> to vector<128x64xf32>
    %c2_208 = arith.constant 2 : index
    %c0_209 = arith.constant 0 : index
    %c0_210 = arith.constant 0 : index
    %175 = vector.load %arg4[%c2_208, %c0_209, %c0_210] : memref<25x64x128xf32, #tpu.memory_space<vmem>>, vector<1x64x128xf32>
    %176 = vector.shape_cast %175 : vector<1x64x128xf32> to vector<64x128xf32>
    %cst_211 = arith.constant dense<0.000000e+00> : vector<128x128xf32>
    %177 = tpu.matmul %174, %176, %cst_211 {dimension_numbers = #tpu.dot_dimension_numbers<[1], [0], [0], [1], [0, 0, 1, 1], [], []>} : vector<128x64xf32>, vector<64x128xf32>, vector<128x128xf32> -> vector<128x128xf32>
    %178 = arith.addf %172, %177 : vector<128x128xf32>
    %c0_212 = arith.constant 0 : index
    %c0_213 = arith.constant 0 : index
    %c9_214 = arith.constant 9 : index
    %c0_215 = arith.constant 0 : index
    %179 = vector.load %arg7[%c0_212, %c0_213, %c9_214, %c0_215] : memref<2x12x24x64xf32, #tpu.memory_space<vmem>>, vector<2x8x8x64xf32>
    %180 = vector.shape_cast %179 : vector<2x8x8x64xf32> to vector<128x64xf32>
    %c3_216 = arith.constant 3 : index
    %c0_217 = arith.constant 0 : index
    %c0_218 = arith.constant 0 : index
    %181 = vector.load %arg4[%c3_216, %c0_217, %c0_218] : memref<25x64x128xf32, #tpu.memory_space<vmem>>, vector<1x64x128xf32>
    %182 = vector.shape_cast %181 : vector<1x64x128xf32> to vector<64x128xf32>
    %cst_219 = arith.constant dense<0.000000e+00> : vector<128x128xf32>
    %183 = tpu.matmul %180, %182, %cst_219 {dimension_numbers = #tpu.dot_dimension_numbers<[1], [0], [0], [1], [0, 0, 1, 1], [], []>} : vector<128x64xf32>, vector<64x128xf32>, vector<128x128xf32> -> vector<128x128xf32>
    %184 = arith.addf %178, %183 : vector<128x128xf32>
    %c0_220 = arith.constant 0 : index
    %c0_221 = arith.constant 0 : index
    %c10_222 = arith.constant 10 : index
    %c0_223 = arith.constant 0 : index
    %185 = vector.load %arg7[%c0_220, %c0_221, %c10_222, %c0_223] : memref<2x12x24x64xf32, #tpu.memory_space<vmem>>, vector<2x8x8x64xf32>
    %186 = vector.shape_cast %185 : vector<2x8x8x64xf32> to vector<128x64xf32>
    %c4_224 = arith.constant 4 : index
    %c0_225 = arith.constant 0 : index
    %c0_226 = arith.constant 0 : index
    %187 = vector.load %arg4[%c4_224, %c0_225, %c0_226] : memref<25x64x128xf32, #tpu.memory_space<vmem>>, vector<1x64x128xf32>
    %188 = vector.shape_cast %187 : vector<1x64x128xf32> to vector<64x128xf32>
    %cst_227 = arith.constant dense<0.000000e+00> : vector<128x128xf32>
    %189 = tpu.matmul %186, %188, %cst_227 {dimension_numbers = #tpu.dot_dimension_numbers<[1], [0], [0], [1], [0, 0, 1, 1], [], []>} : vector<128x64xf32>, vector<64x128xf32>, vector<128x128xf32> -> vector<128x128xf32>
    %190 = arith.addf %184, %189 : vector<128x128xf32>
    %c0_228 = arith.constant 0 : index
    %c1_229 = arith.constant 1 : index
    %c6_230 = arith.constant 6 : index
    %c0_231 = arith.constant 0 : index
    %191 = vector.load %arg7[%c0_228, %c1_229, %c6_230, %c0_231] : memref<2x12x24x64xf32, #tpu.memory_space<vmem>>, vector<2x8x8x64xf32>
    %192 = vector.shape_cast %191 : vector<2x8x8x64xf32> to vector<128x64xf32>
    %c5_232 = arith.constant 5 : index
    %c0_233 = arith.constant 0 : index
    %c0_234 = arith.constant 0 : index
    %193 = vector.load %arg4[%c5_232, %c0_233, %c0_234] : memref<25x64x128xf32, #tpu.memory_space<vmem>>, vector<1x64x128xf32>
    %194 = vector.shape_cast %193 : vector<1x64x128xf32> to vector<64x128xf32>
    %cst_235 = arith.constant dense<0.000000e+00> : vector<128x128xf32>
    %195 = tpu.matmul %192, %194, %cst_235 {dimension_numbers = #tpu.dot_dimension_numbers<[1], [0], [0], [1], [0, 0, 1, 1], [], []>} : vector<128x64xf32>, vector<64x128xf32>, vector<128x128xf32> -> vector<128x128xf32>
    %196 = arith.addf %190, %195 : vector<128x128xf32>
    %c0_236 = arith.constant 0 : index
    %c1_237 = arith.constant 1 : index
    %c7_238 = arith.constant 7 : index
    %c0_239 = arith.constant 0 : index
    %197 = vector.load %arg7[%c0_236, %c1_237, %c7_238, %c0_239] : memref<2x12x24x64xf32, #tpu.memory_space<vmem>>, vector<2x8x8x64xf32>
    %198 = vector.shape_cast %197 : vector<2x8x8x64xf32> to vector<128x64xf32>
    %c6_240 = arith.constant 6 : index
    %c0_241 = arith.constant 0 : index
    %c0_242 = arith.constant 0 : index
    %199 = vector.load %arg4[%c6_240, %c0_241, %c0_242] : memref<25x64x128xf32, #tpu.memory_space<vmem>>, vector<1x64x128xf32>
    %200 = vector.shape_cast %199 : vector<1x64x128xf32> to vector<64x128xf32>
    %cst_243 = arith.constant dense<0.000000e+00> : vector<128x128xf32>
    %201 = tpu.matmul %198, %200, %cst_243 {dimension_numbers = #tpu.dot_dimension_numbers<[1], [0], [0], [1], [0, 0, 1, 1], [], []>} : vector<128x64xf32>, vector<64x128xf32>, vector<128x128xf32> -> vector<128x128xf32>
    %202 = arith.addf %196, %201 : vector<128x128xf32>
    %c0_244 = arith.constant 0 : index
    %c1_245 = arith.constant 1 : index
    %c8_246 = arith.constant 8 : index
    %c0_247 = arith.constant 0 : index
    %203 = vector.load %arg7[%c0_244, %c1_245, %c8_246, %c0_247] : memref<2x12x24x64xf32, #tpu.memory_space<vmem>>, vector<2x8x8x64xf32>
    %204 = vector.shape_cast %203 : vector<2x8x8x64xf32> to vector<128x64xf32>
    %c7_248 = arith.constant 7 : index
    %c0_249 = arith.constant 0 : index
    %c0_250 = arith.constant 0 : index
    %205 = vector.load %arg4[%c7_248, %c0_249, %c0_250] : memref<25x64x128xf32, #tpu.memory_space<vmem>>, vector<1x64x128xf32>
    %206 = vector.shape_cast %205 : vector<1x64x128xf32> to vector<64x128xf32>
    %cst_251 = arith.constant dense<0.000000e+00> : vector<128x128xf32>
    %207 = tpu.matmul %204, %206, %cst_251 {dimension_numbers = #tpu.dot_dimension_numbers<[1], [0], [0], [1], [0, 0, 1, 1], [], []>} : vector<128x64xf32>, vector<64x128xf32>, vector<128x128xf32> -> vector<128x128xf32>
    %208 = arith.addf %202, %207 : vector<128x128xf32>
    %c0_252 = arith.constant 0 : index
    %c1_253 = arith.constant 1 : index
    %c9_254 = arith.constant 9 : index
    %c0_255 = arith.constant 0 : index
    %209 = vector.load %arg7[%c0_252, %c1_253, %c9_254, %c0_255] : memref<2x12x24x64xf32, #tpu.memory_space<vmem>>, vector<2x8x8x64xf32>
    %210 = vector.shape_cast %209 : vector<2x8x8x64xf32> to vector<128x64xf32>
    %c8_256 = arith.constant 8 : index
    %c0_257 = arith.constant 0 : index
    %c0_258 = arith.constant 0 : index
    %211 = vector.load %arg4[%c8_256, %c0_257, %c0_258] : memref<25x64x128xf32, #tpu.memory_space<vmem>>, vector<1x64x128xf32>
    %212 = vector.shape_cast %211 : vector<1x64x128xf32> to vector<64x128xf32>
    %cst_259 = arith.constant dense<0.000000e+00> : vector<128x128xf32>
    %213 = tpu.matmul %210, %212, %cst_259 {dimension_numbers = #tpu.dot_dimension_numbers<[1], [0], [0], [1], [0, 0, 1, 1], [], []>} : vector<128x64xf32>, vector<64x128xf32>, vector<128x128xf32> -> vector<128x128xf32>
    %214 = arith.addf %208, %213 : vector<128x128xf32>
    %c0_260 = arith.constant 0 : index
    %c1_261 = arith.constant 1 : index
    %c10_262 = arith.constant 10 : index
    %c0_263 = arith.constant 0 : index
    %215 = vector.load %arg7[%c0_260, %c1_261, %c10_262, %c0_263] : memref<2x12x24x64xf32, #tpu.memory_space<vmem>>, vector<2x8x8x64xf32>
    %216 = vector.shape_cast %215 : vector<2x8x8x64xf32> to vector<128x64xf32>
    %c9_264 = arith.constant 9 : index
    %c0_265 = arith.constant 0 : index
    %c0_266 = arith.constant 0 : index
    %217 = vector.load %arg4[%c9_264, %c0_265, %c0_266] : memref<25x64x128xf32, #tpu.memory_space<vmem>>, vector<1x64x128xf32>
    %218 = vector.shape_cast %217 : vector<1x64x128xf32> to vector<64x128xf32>
    %cst_267 = arith.constant dense<0.000000e+00> : vector<128x128xf32>
    %219 = tpu.matmul %216, %218, %cst_267 {dimension_numbers = #tpu.dot_dimension_numbers<[1], [0], [0], [1], [0, 0, 1, 1], [], []>} : vector<128x64xf32>, vector<64x128xf32>, vector<128x128xf32> -> vector<128x128xf32>
    %220 = arith.addf %214, %219 : vector<128x128xf32>
    %c0_268 = arith.constant 0 : index
    %c2_269 = arith.constant 2 : index
    %c6_270 = arith.constant 6 : index
    %c0_271 = arith.constant 0 : index
    %221 = vector.load %arg7[%c0_268, %c2_269, %c6_270, %c0_271] : memref<2x12x24x64xf32, #tpu.memory_space<vmem>>, vector<2x8x8x64xf32>
    %222 = vector.shape_cast %221 : vector<2x8x8x64xf32> to vector<128x64xf32>
    %c10_272 = arith.constant 10 : index
    %c0_273 = arith.constant 0 : index
    %c0_274 = arith.constant 0 : index
    %223 = vector.load %arg4[%c10_272, %c0_273, %c0_274] : memref<25x64x128xf32, #tpu.memory_space<vmem>>, vector<1x64x128xf32>
    %224 = vector.shape_cast %223 : vector<1x64x128xf32> to vector<64x128xf32>
    %cst_275 = arith.constant dense<0.000000e+00> : vector<128x128xf32>
    %225 = tpu.matmul %222, %224, %cst_275 {dimension_numbers = #tpu.dot_dimension_numbers<[1], [0], [0], [1], [0, 0, 1, 1], [], []>} : vector<128x64xf32>, vector<64x128xf32>, vector<128x128xf32> -> vector<128x128xf32>
    %226 = arith.addf %220, %225 : vector<128x128xf32>
    %c0_276 = arith.constant 0 : index
    %c2_277 = arith.constant 2 : index
    %c7_278 = arith.constant 7 : index
    %c0_279 = arith.constant 0 : index
    %227 = vector.load %arg7[%c0_276, %c2_277, %c7_278, %c0_279] : memref<2x12x24x64xf32, #tpu.memory_space<vmem>>, vector<2x8x8x64xf32>
    %228 = vector.shape_cast %227 : vector<2x8x8x64xf32> to vector<128x64xf32>
    %c11_280 = arith.constant 11 : index
    %c0_281 = arith.constant 0 : index
    %c0_282 = arith.constant 0 : index
    %229 = vector.load %arg4[%c11_280, %c0_281, %c0_282] : memref<25x64x128xf32, #tpu.memory_space<vmem>>, vector<1x64x128xf32>
    %230 = vector.shape_cast %229 : vector<1x64x128xf32> to vector<64x128xf32>
    %cst_283 = arith.constant dense<0.000000e+00> : vector<128x128xf32>
    %231 = tpu.matmul %228, %230, %cst_283 {dimension_numbers = #tpu.dot_dimension_numbers<[1], [0], [0], [1], [0, 0, 1, 1], [], []>} : vector<128x64xf32>, vector<64x128xf32>, vector<128x128xf32> -> vector<128x128xf32>
    %232 = arith.addf %226, %231 : vector<128x128xf32>
    %c0_284 = arith.constant 0 : index
    %c2_285 = arith.constant 2 : index
    %c8_286 = arith.constant 8 : index
    %c0_287 = arith.constant 0 : index
    %233 = vector.load %arg7[%c0_284, %c2_285, %c8_286, %c0_287] : memref<2x12x24x64xf32, #tpu.memory_space<vmem>>, vector<2x8x8x64xf32>
    %234 = vector.shape_cast %233 : vector<2x8x8x64xf32> to vector<128x64xf32>
    %c12_288 = arith.constant 12 : index
    %c0_289 = arith.constant 0 : index
    %c0_290 = arith.constant 0 : index
    %235 = vector.load %arg4[%c12_288, %c0_289, %c0_290] : memref<25x64x128xf32, #tpu.memory_space<vmem>>, vector<1x64x128xf32>
    %236 = vector.shape_cast %235 : vector<1x64x128xf32> to vector<64x128xf32>
    %cst_291 = arith.constant dense<0.000000e+00> : vector<128x128xf32>
    %237 = tpu.matmul %234, %236, %cst_291 {dimension_numbers = #tpu.dot_dimension_numbers<[1], [0], [0], [1], [0, 0, 1, 1], [], []>} : vector<128x64xf32>, vector<64x128xf32>, vector<128x128xf32> -> vector<128x128xf32>
    %238 = arith.addf %232, %237 : vector<128x128xf32>
    %c0_292 = arith.constant 0 : index
    %c2_293 = arith.constant 2 : index
    %c9_294 = arith.constant 9 : index
    %c0_295 = arith.constant 0 : index
    %239 = vector.load %arg7[%c0_292, %c2_293, %c9_294, %c0_295] : memref<2x12x24x64xf32, #tpu.memory_space<vmem>>, vector<2x8x8x64xf32>
    %240 = vector.shape_cast %239 : vector<2x8x8x64xf32> to vector<128x64xf32>
    %c13_296 = arith.constant 13 : index
    %c0_297 = arith.constant 0 : index
    %c0_298 = arith.constant 0 : index
    %241 = vector.load %arg4[%c13_296, %c0_297, %c0_298] : memref<25x64x128xf32, #tpu.memory_space<vmem>>, vector<1x64x128xf32>
    %242 = vector.shape_cast %241 : vector<1x64x128xf32> to vector<64x128xf32>
    %cst_299 = arith.constant dense<0.000000e+00> : vector<128x128xf32>
    %243 = tpu.matmul %240, %242, %cst_299 {dimension_numbers = #tpu.dot_dimension_numbers<[1], [0], [0], [1], [0, 0, 1, 1], [], []>} : vector<128x64xf32>, vector<64x128xf32>, vector<128x128xf32> -> vector<128x128xf32>
    %244 = arith.addf %238, %243 : vector<128x128xf32>
    %c0_300 = arith.constant 0 : index
    %c2_301 = arith.constant 2 : index
    %c10_302 = arith.constant 10 : index
    %c0_303 = arith.constant 0 : index
    %245 = vector.load %arg7[%c0_300, %c2_301, %c10_302, %c0_303] : memref<2x12x24x64xf32, #tpu.memory_space<vmem>>, vector<2x8x8x64xf32>
    %246 = vector.shape_cast %245 : vector<2x8x8x64xf32> to vector<128x64xf32>
    %c14_304 = arith.constant 14 : index
    %c0_305 = arith.constant 0 : index
    %c0_306 = arith.constant 0 : index
    %247 = vector.load %arg4[%c14_304, %c0_305, %c0_306] : memref<25x64x128xf32, #tpu.memory_space<vmem>>, vector<1x64x128xf32>
    %248 = vector.shape_cast %247 : vector<1x64x128xf32> to vector<64x128xf32>
    %cst_307 = arith.constant dense<0.000000e+00> : vector<128x128xf32>
    %249 = tpu.matmul %246, %248, %cst_307 {dimension_numbers = #tpu.dot_dimension_numbers<[1], [0], [0], [1], [0, 0, 1, 1], [], []>} : vector<128x64xf32>, vector<64x128xf32>, vector<128x128xf32> -> vector<128x128xf32>
    %250 = arith.addf %244, %249 : vector<128x128xf32>
    %c0_308 = arith.constant 0 : index
    %c3_309 = arith.constant 3 : index
    %c6_310 = arith.constant 6 : index
    %c0_311 = arith.constant 0 : index
    %251 = vector.load %arg7[%c0_308, %c3_309, %c6_310, %c0_311] : memref<2x12x24x64xf32, #tpu.memory_space<vmem>>, vector<2x8x8x64xf32>
    %252 = vector.shape_cast %251 : vector<2x8x8x64xf32> to vector<128x64xf32>
    %c15_312 = arith.constant 15 : index
    %c0_313 = arith.constant 0 : index
    %c0_314 = arith.constant 0 : index
    %253 = vector.load %arg4[%c15_312, %c0_313, %c0_314] : memref<25x64x128xf32, #tpu.memory_space<vmem>>, vector<1x64x128xf32>
    %254 = vector.shape_cast %253 : vector<1x64x128xf32> to vector<64x128xf32>
    %cst_315 = arith.constant dense<0.000000e+00> : vector<128x128xf32>
    %255 = tpu.matmul %252, %254, %cst_315 {dimension_numbers = #tpu.dot_dimension_numbers<[1], [0], [0], [1], [0, 0, 1, 1], [], []>} : vector<128x64xf32>, vector<64x128xf32>, vector<128x128xf32> -> vector<128x128xf32>
    %256 = arith.addf %250, %255 : vector<128x128xf32>
    %c0_316 = arith.constant 0 : index
    %c3_317 = arith.constant 3 : index
    %c7_318 = arith.constant 7 : index
    %c0_319 = arith.constant 0 : index
    %257 = vector.load %arg7[%c0_316, %c3_317, %c7_318, %c0_319] : memref<2x12x24x64xf32, #tpu.memory_space<vmem>>, vector<2x8x8x64xf32>
    %258 = vector.shape_cast %257 : vector<2x8x8x64xf32> to vector<128x64xf32>
    %c16_320 = arith.constant 16 : index
    %c0_321 = arith.constant 0 : index
    %c0_322 = arith.constant 0 : index
    %259 = vector.load %arg4[%c16_320, %c0_321, %c0_322] : memref<25x64x128xf32, #tpu.memory_space<vmem>>, vector<1x64x128xf32>
    %260 = vector.shape_cast %259 : vector<1x64x128xf32> to vector<64x128xf32>
    %cst_323 = arith.constant dense<0.000000e+00> : vector<128x128xf32>
    %261 = tpu.matmul %258, %260, %cst_323 {dimension_numbers = #tpu.dot_dimension_numbers<[1], [0], [0], [1], [0, 0, 1, 1], [], []>} : vector<128x64xf32>, vector<64x128xf32>, vector<128x128xf32> -> vector<128x128xf32>
    %262 = arith.addf %256, %261 : vector<128x128xf32>
    %c0_324 = arith.constant 0 : index
    %c3_325 = arith.constant 3 : index
    %c8_326 = arith.constant 8 : index
    %c0_327 = arith.constant 0 : index
    %263 = vector.load %arg7[%c0_324, %c3_325, %c8_326, %c0_327] : memref<2x12x24x64xf32, #tpu.memory_space<vmem>>, vector<2x8x8x64xf32>
    %264 = vector.shape_cast %263 : vector<2x8x8x64xf32> to vector<128x64xf32>
    %c17_328 = arith.constant 17 : index
    %c0_329 = arith.constant 0 : index
    %c0_330 = arith.constant 0 : index
    %265 = vector.load %arg4[%c17_328, %c0_329, %c0_330] : memref<25x64x128xf32, #tpu.memory_space<vmem>>, vector<1x64x128xf32>
    %266 = vector.shape_cast %265 : vector<1x64x128xf32> to vector<64x128xf32>
    %cst_331 = arith.constant dense<0.000000e+00> : vector<128x128xf32>
    %267 = tpu.matmul %264, %266, %cst_331 {dimension_numbers = #tpu.dot_dimension_numbers<[1], [0], [0], [1], [0, 0, 1, 1], [], []>} : vector<128x64xf32>, vector<64x128xf32>, vector<128x128xf32> -> vector<128x128xf32>
    %268 = arith.addf %262, %267 : vector<128x128xf32>
    %c0_332 = arith.constant 0 : index
    %c3_333 = arith.constant 3 : index
    %c9_334 = arith.constant 9 : index
    %c0_335 = arith.constant 0 : index
    %269 = vector.load %arg7[%c0_332, %c3_333, %c9_334, %c0_335] : memref<2x12x24x64xf32, #tpu.memory_space<vmem>>, vector<2x8x8x64xf32>
    %270 = vector.shape_cast %269 : vector<2x8x8x64xf32> to vector<128x64xf32>
    %c18_336 = arith.constant 18 : index
    %c0_337 = arith.constant 0 : index
    %c0_338 = arith.constant 0 : index
    %271 = vector.load %arg4[%c18_336, %c0_337, %c0_338] : memref<25x64x128xf32, #tpu.memory_space<vmem>>, vector<1x64x128xf32>
    %272 = vector.shape_cast %271 : vector<1x64x128xf32> to vector<64x128xf32>
    %cst_339 = arith.constant dense<0.000000e+00> : vector<128x128xf32>
    %273 = tpu.matmul %270, %272, %cst_339 {dimension_numbers = #tpu.dot_dimension_numbers<[1], [0], [0], [1], [0, 0, 1, 1], [], []>} : vector<128x64xf32>, vector<64x128xf32>, vector<128x128xf32> -> vector<128x128xf32>
    %274 = arith.addf %268, %273 : vector<128x128xf32>
    %c0_340 = arith.constant 0 : index
    %c3_341 = arith.constant 3 : index
    %c10_342 = arith.constant 10 : index
    %c0_343 = arith.constant 0 : index
    %275 = vector.load %arg7[%c0_340, %c3_341, %c10_342, %c0_343] : memref<2x12x24x64xf32, #tpu.memory_space<vmem>>, vector<2x8x8x64xf32>
    %276 = vector.shape_cast %275 : vector<2x8x8x64xf32> to vector<128x64xf32>
    %c19_344 = arith.constant 19 : index
    %c0_345 = arith.constant 0 : index
    %c0_346 = arith.constant 0 : index
    %277 = vector.load %arg4[%c19_344, %c0_345, %c0_346] : memref<25x64x128xf32, #tpu.memory_space<vmem>>, vector<1x64x128xf32>
    %278 = vector.shape_cast %277 : vector<1x64x128xf32> to vector<64x128xf32>
    %cst_347 = arith.constant dense<0.000000e+00> : vector<128x128xf32>
    %279 = tpu.matmul %276, %278, %cst_347 {dimension_numbers = #tpu.dot_dimension_numbers<[1], [0], [0], [1], [0, 0, 1, 1], [], []>} : vector<128x64xf32>, vector<64x128xf32>, vector<128x128xf32> -> vector<128x128xf32>
    %280 = arith.addf %274, %279 : vector<128x128xf32>
    %c0_348 = arith.constant 0 : index
    %c4_349 = arith.constant 4 : index
    %c6_350 = arith.constant 6 : index
    %c0_351 = arith.constant 0 : index
    %281 = vector.load %arg7[%c0_348, %c4_349, %c6_350, %c0_351] : memref<2x12x24x64xf32, #tpu.memory_space<vmem>>, vector<2x8x8x64xf32>
    %282 = vector.shape_cast %281 : vector<2x8x8x64xf32> to vector<128x64xf32>
    %c20_352 = arith.constant 20 : index
    %c0_353 = arith.constant 0 : index
    %c0_354 = arith.constant 0 : index
    %283 = vector.load %arg4[%c20_352, %c0_353, %c0_354] : memref<25x64x128xf32, #tpu.memory_space<vmem>>, vector<1x64x128xf32>
    %284 = vector.shape_cast %283 : vector<1x64x128xf32> to vector<64x128xf32>
    %cst_355 = arith.constant dense<0.000000e+00> : vector<128x128xf32>
    %285 = tpu.matmul %282, %284, %cst_355 {dimension_numbers = #tpu.dot_dimension_numbers<[1], [0], [0], [1], [0, 0, 1, 1], [], []>} : vector<128x64xf32>, vector<64x128xf32>, vector<128x128xf32> -> vector<128x128xf32>
    %286 = arith.addf %280, %285 : vector<128x128xf32>
    %c0_356 = arith.constant 0 : index
    %c4_357 = arith.constant 4 : index
    %c7_358 = arith.constant 7 : index
    %c0_359 = arith.constant 0 : index
    %287 = vector.load %arg7[%c0_356, %c4_357, %c7_358, %c0_359] : memref<2x12x24x64xf32, #tpu.memory_space<vmem>>, vector<2x8x8x64xf32>
    %288 = vector.shape_cast %287 : vector<2x8x8x64xf32> to vector<128x64xf32>
    %c21_360 = arith.constant 21 : index
    %c0_361 = arith.constant 0 : index
    %c0_362 = arith.constant 0 : index
    %289 = vector.load %arg4[%c21_360, %c0_361, %c0_362] : memref<25x64x128xf32, #tpu.memory_space<vmem>>, vector<1x64x128xf32>
    %290 = vector.shape_cast %289 : vector<1x64x128xf32> to vector<64x128xf32>
    %cst_363 = arith.constant dense<0.000000e+00> : vector<128x128xf32>
    %291 = tpu.matmul %288, %290, %cst_363 {dimension_numbers = #tpu.dot_dimension_numbers<[1], [0], [0], [1], [0, 0, 1, 1], [], []>} : vector<128x64xf32>, vector<64x128xf32>, vector<128x128xf32> -> vector<128x128xf32>
    %292 = arith.addf %286, %291 : vector<128x128xf32>
    %c0_364 = arith.constant 0 : index
    %c4_365 = arith.constant 4 : index
    %c8_366 = arith.constant 8 : index
    %c0_367 = arith.constant 0 : index
    %293 = vector.load %arg7[%c0_364, %c4_365, %c8_366, %c0_367] : memref<2x12x24x64xf32, #tpu.memory_space<vmem>>, vector<2x8x8x64xf32>
    %294 = vector.shape_cast %293 : vector<2x8x8x64xf32> to vector<128x64xf32>
    %c22_368 = arith.constant 22 : index
    %c0_369 = arith.constant 0 : index
    %c0_370 = arith.constant 0 : index
    %295 = vector.load %arg4[%c22_368, %c0_369, %c0_370] : memref<25x64x128xf32, #tpu.memory_space<vmem>>, vector<1x64x128xf32>
    %296 = vector.shape_cast %295 : vector<1x64x128xf32> to vector<64x128xf32>
    %cst_371 = arith.constant dense<0.000000e+00> : vector<128x128xf32>
    %297 = tpu.matmul %294, %296, %cst_371 {dimension_numbers = #tpu.dot_dimension_numbers<[1], [0], [0], [1], [0, 0, 1, 1], [], []>} : vector<128x64xf32>, vector<64x128xf32>, vector<128x128xf32> -> vector<128x128xf32>
    %298 = arith.addf %292, %297 : vector<128x128xf32>
    %c0_372 = arith.constant 0 : index
    %c4_373 = arith.constant 4 : index
    %c9_374 = arith.constant 9 : index
    %c0_375 = arith.constant 0 : index
    %299 = vector.load %arg7[%c0_372, %c4_373, %c9_374, %c0_375] : memref<2x12x24x64xf32, #tpu.memory_space<vmem>>, vector<2x8x8x64xf32>
    %300 = vector.shape_cast %299 : vector<2x8x8x64xf32> to vector<128x64xf32>
    %c23_376 = arith.constant 23 : index
    %c0_377 = arith.constant 0 : index
    %c0_378 = arith.constant 0 : index
    %301 = vector.load %arg4[%c23_376, %c0_377, %c0_378] : memref<25x64x128xf32, #tpu.memory_space<vmem>>, vector<1x64x128xf32>
    %302 = vector.shape_cast %301 : vector<1x64x128xf32> to vector<64x128xf32>
    %cst_379 = arith.constant dense<0.000000e+00> : vector<128x128xf32>
    %303 = tpu.matmul %300, %302, %cst_379 {dimension_numbers = #tpu.dot_dimension_numbers<[1], [0], [0], [1], [0, 0, 1, 1], [], []>} : vector<128x64xf32>, vector<64x128xf32>, vector<128x128xf32> -> vector<128x128xf32>
    %304 = arith.addf %298, %303 : vector<128x128xf32>
    %c0_380 = arith.constant 0 : index
    %c4_381 = arith.constant 4 : index
    %c10_382 = arith.constant 10 : index
    %c0_383 = arith.constant 0 : index
    %305 = vector.load %arg7[%c0_380, %c4_381, %c10_382, %c0_383] : memref<2x12x24x64xf32, #tpu.memory_space<vmem>>, vector<2x8x8x64xf32>
    %306 = vector.shape_cast %305 : vector<2x8x8x64xf32> to vector<128x64xf32>
    %c24_384 = arith.constant 24 : index
    %c0_385 = arith.constant 0 : index
    %c0_386 = arith.constant 0 : index
    %307 = vector.load %arg4[%c24_384, %c0_385, %c0_386] : memref<25x64x128xf32, #tpu.memory_space<vmem>>, vector<1x64x128xf32>
    %308 = vector.shape_cast %307 : vector<1x64x128xf32> to vector<64x128xf32>
    %cst_387 = arith.constant dense<0.000000e+00> : vector<128x128xf32>
    %309 = tpu.matmul %306, %308, %cst_387 {dimension_numbers = #tpu.dot_dimension_numbers<[1], [0], [0], [1], [0, 0, 1, 1], [], []>} : vector<128x64xf32>, vector<64x128xf32>, vector<128x128xf32> -> vector<128x128xf32>
    %310 = arith.addf %304, %309 : vector<128x128xf32>
    %c0_388 = arith.constant 0 : index
    %c0_389 = arith.constant 0 : index
    %311 = vector.load %arg5[%c0_388, %c0_389] : memref<1x128xf32, #tpu.memory_space<vmem>>, vector<1x128xf32>
    %312 = vector.broadcast %311 : vector<1x128xf32> to vector<128x128xf32>
    %313 = arith.addf %310, %312 : vector<128x128xf32>
    %cst_390 = arith.constant 0.000000e+00 : f32
    %314 = vector.broadcast %cst_390 : f32 to vector<128x128xf32>
    %315 = arith.maximumf %313, %314 : vector<128x128xf32>
    %c0_391 = arith.constant 0 : index
    %c0_392 = arith.constant 0 : index
    %316 = vector.load %arg6[%c0_391, %c0_392] : memref<128x128xf32, #tpu.memory_space<vmem>>, vector<128x128xf32>
    tpu.vector_store %arg6[%c0_391, %c0_392], %315 {strides = array<i32>} : memref<128x128xf32, #tpu.memory_space<vmem>>, vector<128x128xf32>,
    return
  }
  func.func @transform_0(%arg0: i32) -> (i32, i32, i32, i32) {
    %c0_i32 = arith.constant 0 : i32
    %c0_i32_0 = arith.constant 0 : i32
    %c0_i32_1 = arith.constant 0 : i32
    %c0_i32_2 = arith.constant 0 : i32
    %c0_i32_3 = arith.constant 0 : i32
    return %c0_i32, %c0_i32_0, %c0_i32_1, %c0_i32_2 : i32, i32, i32, i32
  }
  func.func @transform_1(%arg0: i32) -> (i32, i32, i32) {
    %c0_i32 = arith.constant 0 : i32
    %c0_i32_0 = arith.constant 0 : i32
    %c0_i32_1 = arith.constant 0 : i32
    %c0_i32_2 = arith.constant 0 : i32
    return %c0_i32, %c0_i32_0, %c0_i32_1 : i32, i32, i32
  }
  func.func @transform_2(%arg0: i32) -> (i32, i32) {
    %c0_i32 = arith.constant 0 : i32
    %c0_i32_0 = arith.constant 0 : i32
    %c0_i32_1 = arith.constant 0 : i32
    return %c0_i32, %c0_i32_0 : i32, i32
  }
  func.func @transform_3(%arg0: i32) -> (i32, i32, i32) {
    %c0_i32 = arith.constant 0 : i32
    %c0_i32_0 = arith.constant 0 : i32
    %c0_i32_1 = arith.constant 0 : i32
    %c0_i32_2 = arith.constant 0 : i32
    return %c0_i32, %c0_i32_0, %c0_i32_1 : i32, i32, i32
  }
  func.func @transform_4(%arg0: i32) -> (i32, i32) {
    %c0_i32 = arith.constant 0 : i32
    %c0_i32_0 = arith.constant 0 : i32
    %c0_i32_1 = arith.constant 0 : i32
    return %c0_i32, %c0_i32_0 : i32, i32
  }
  func.func @transform_5(%arg0: i32) -> (i32, i32) {
    %c0_i32 = arith.constant 0 : i32
    %c0_i32_0 = arith.constant 0 : i32
    %c0_i32_1 = arith.constant 0 : i32
    return %c0_i32, %c0_i32_0 : i32, i32
  }
}

module attributes {stable_mosaic.version = 11 : i64} {
  func.func @_lstm_head_kernel(%arg0: i32, %arg1: memref<4x4096xf32, #tpu.memory_space<vmem>>, %arg2: memref<12x4096xf32, #tpu.memory_space<vmem>>, %arg3: memref<3x12xf32, #tpu.memory_space<vmem>>, %arg4: memref<1x12xf32, #tpu.memory_space<vmem>>, %arg5: memref<3x12xf32, #tpu.memory_space<vmem>>, %arg6: memref<3x12xf32, #tpu.memory_space<vmem>>, %arg7: memref<1x12xf32, #tpu.memory_space<vmem>>, %arg8: memref<6x1xf32, #tpu.memory_space<vmem>>, %arg9: memref<1x1xf32, #tpu.memory_space<vmem>>, %arg10: memref<2x1xf32, #tpu.memory_space<vmem>>) attributes {dimension_semantics = [#tpu.dimension_semantics<arbitrary>], iteration_bounds = array<i64: 1>, scalar_prefetch = 0 : i64, scratch_operands = 0 : i64, tpu.core_type = #tpu.core_type<tc>, window_params = [{pipeline_mode = #tpu.pipeline_mode<synchronous>, transform_indices = @transform_0, window_bounds = array<i64: 4, 4096>}, {pipeline_mode = #tpu.pipeline_mode<synchronous>, transform_indices = @transform_1, window_bounds = array<i64: 12, 4096>}, {pipeline_mode = #tpu.pipeline_mode<synchronous>, transform_indices = @transform_2, window_bounds = array<i64: 3, 12>}, {pipeline_mode = #tpu.pipeline_mode<synchronous>, transform_indices = @transform_3, window_bounds = array<i64: 1, 12>}, {pipeline_mode = #tpu.pipeline_mode<synchronous>, transform_indices = @transform_4, window_bounds = array<i64: 3, 12>}, {pipeline_mode = #tpu.pipeline_mode<synchronous>, transform_indices = @transform_5, window_bounds = array<i64: 3, 12>}, {pipeline_mode = #tpu.pipeline_mode<synchronous>, transform_indices = @transform_6, window_bounds = array<i64: 1, 12>}, {pipeline_mode = #tpu.pipeline_mode<synchronous>, transform_indices = @transform_7, window_bounds = array<i64: 6, 1>}, {pipeline_mode = #tpu.pipeline_mode<synchronous>, transform_indices = @transform_8, window_bounds = array<i64: 1, 1>}, {pipeline_mode = #tpu.pipeline_mode<synchronous>, transform_indices = @transform_9, window_bounds = array<i64: 2, 1>}]} {
    %c0 = arith.constant 0 : index
    %c0_0 = arith.constant 0 : index
    %0 = vector.load %arg1[%c0, %c0_0] : memref<4x4096xf32, #tpu.memory_space<vmem>>, vector<4x4096xf32>
    %c0_1 = arith.constant 0 : index
    %c0_2 = arith.constant 0 : index
    %1 = vector.load %arg2[%c0_1, %c0_2] : memref<12x4096xf32, #tpu.memory_space<vmem>>, vector<12x4096xf32>
    %cst = arith.constant dense<0.000000e+00> : vector<4x12xf32>
    %2 = tpu.matmul %0, %1, %cst {dimension_numbers = #tpu.dot_dimension_numbers<[1], [1], [0], [0], [0, 0, 1, 0], [], []>} : vector<4x4096xf32>, vector<12x4096xf32>, vector<4x12xf32> -> vector<4x12xf32>
    %c0_3 = arith.constant 0 : index
    %c0_4 = arith.constant 0 : index
    %3 = vector.load %arg4[%c0_3, %c0_4] : memref<1x12xf32, #tpu.memory_space<vmem>>, vector<1x12xf32>
    %4 = vector.broadcast %3 : vector<1x12xf32> to vector<4x12xf32>
    %5 = arith.addf %2, %4 : vector<4x12xf32>
    %c0_5 = arith.constant 0 : index
    %c0_6 = arith.constant 0 : index
    %6 = vector.load %arg3[%c0_5, %c0_6] : memref<3x12xf32, #tpu.memory_space<vmem>>, vector<3x12xf32>
    %c0_7 = arith.constant 0 : index
    %c0_8 = arith.constant 0 : index
    %7 = vector.load %arg5[%c0_7, %c0_8] : memref<3x12xf32, #tpu.memory_space<vmem>>, vector<3x12xf32>
    %c0_9 = arith.constant 0 : index
    %c0_10 = arith.constant 0 : index
    %8 = vector.load %arg6[%c0_9, %c0_10] : memref<3x12xf32, #tpu.memory_space<vmem>>, vector<3x12xf32>
    %c0_11 = arith.constant 0 : index
    %c0_12 = arith.constant 0 : index
    %9 = vector.load %arg7[%c0_11, %c0_12] : memref<1x12xf32, #tpu.memory_space<vmem>>, vector<1x12xf32>
    %cst_13 = arith.constant 0.000000e+00 : f32
    %10 = vector.broadcast %cst_13 : f32 to vector<2x3xf32>
    %11 = vector.extract_strided_slice %5 {offsets = [0, 0], sizes = [2, 12], strides = [1, 1]} : vector<4x12xf32> to vector<2x12xf32>
    %cst_14 = arith.constant dense<0.000000e+00> : vector<2x12xf32>
    %12 = tpu.matmul %10, %6, %cst_14 {dimension_numbers = #tpu.dot_dimension_numbers<[1], [0], [0], [1], [0, 0, 1, 1], [], []>} : vector<2x3xf32>, vector<3x12xf32>, vector<2x12xf32> -> vector<2x12xf32>
    %13 = arith.addf %11, %12 : vector<2x12xf32>
    %14 = vector.extract_strided_slice %13 {offsets = [0, 0], sizes = [2, 3], strides = [1, 1]} : vector<2x12xf32> to vector<2x3xf32>
    %15 = arith.negf %14 : vector<2x3xf32>
    %16 = math.exp %15 : vector<2x3xf32>
    %cst_15 = arith.constant 1.000000e+00 : f32
    %17 = vector.broadcast %cst_15 : f32 to vector<2x3xf32>
    %18 = arith.addf %17, %16 : vector<2x3xf32>
    %19 = arith.divf %17, %18 : vector<2x3xf32>
    %20 = vector.extract_strided_slice %13 {offsets = [0, 3], sizes = [2, 3], strides = [1, 1]} : vector<2x12xf32> to vector<2x3xf32>
    %21 = arith.negf %20 : vector<2x3xf32>
    %22 = math.exp %21 : vector<2x3xf32>
    %cst_16 = arith.constant 1.000000e+00 : f32
    %23 = vector.broadcast %cst_16 : f32 to vector<2x3xf32>
    %24 = arith.addf %23, %22 : vector<2x3xf32>
    %25 = arith.divf %23, %24 : vector<2x3xf32>
    %26 = vector.extract_strided_slice %13 {offsets = [0, 6], sizes = [2, 3], strides = [1, 1]} : vector<2x12xf32> to vector<2x3xf32>
    %27 = math.tanh %26 : vector<2x3xf32>
    %28 = vector.extract_strided_slice %13 {offsets = [0, 9], sizes = [2, 3], strides = [1, 1]} : vector<2x12xf32> to vector<2x3xf32>
    %29 = arith.negf %28 : vector<2x3xf32>
    %30 = math.exp %29 : vector<2x3xf32>
    %cst_17 = arith.constant 1.000000e+00 : f32
    %31 = vector.broadcast %cst_17 : f32 to vector<2x3xf32>
    %32 = arith.addf %31, %30 : vector<2x3xf32>
    %33 = arith.divf %31, %32 : vector<2x3xf32>
    %34 = arith.mulf %25, %10 : vector<2x3xf32>
    %35 = arith.mulf %19, %27 : vector<2x3xf32>
    %36 = arith.addf %34, %35 : vector<2x3xf32>
    %37 = math.tanh %36 : vector<2x3xf32>
    %38 = arith.mulf %33, %37 : vector<2x3xf32>
    %cst_18 = arith.constant dense<0.000000e+00> : vector<2x12xf32>
    %39 = tpu.matmul %38, %7, %cst_18 {dimension_numbers = #tpu.dot_dimension_numbers<[1], [0], [0], [1], [0, 0, 1, 1], [], []>} : vector<2x3xf32>, vector<3x12xf32>, vector<2x12xf32> -> vector<2x12xf32>
    %cst_19 = arith.constant dense<0.000000e+00> : vector<2x12xf32>
    %40 = tpu.matmul %10, %8, %cst_19 {dimension_numbers = #tpu.dot_dimension_numbers<[1], [0], [0], [1], [0, 0, 1, 1], [], []>} : vector<2x3xf32>, vector<3x12xf32>, vector<2x12xf32> -> vector<2x12xf32>
    %41 = arith.addf %39, %40 : vector<2x12xf32>
    %42 = vector.broadcast %9 : vector<1x12xf32> to vector<2x12xf32>
    %43 = arith.addf %41, %42 : vector<2x12xf32>
    %44 = vector.extract_strided_slice %43 {offsets = [0, 0], sizes = [2, 3], strides = [1, 1]} : vector<2x12xf32> to vector<2x3xf32>
    %45 = arith.negf %44 : vector<2x3xf32>
    %46 = math.exp %45 : vector<2x3xf32>
    %cst_20 = arith.constant 1.000000e+00 : f32
    %47 = vector.broadcast %cst_20 : f32 to vector<2x3xf32>
    %48 = arith.addf %47, %46 : vector<2x3xf32>
    %49 = arith.divf %47, %48 : vector<2x3xf32>
    %50 = vector.extract_strided_slice %43 {offsets = [0, 3], sizes = [2, 3], strides = [1, 1]} : vector<2x12xf32> to vector<2x3xf32>
    %51 = arith.negf %50 : vector<2x3xf32>
    %52 = math.exp %51 : vector<2x3xf32>
    %cst_21 = arith.constant 1.000000e+00 : f32
    %53 = vector.broadcast %cst_21 : f32 to vector<2x3xf32>
    %54 = arith.addf %53, %52 : vector<2x3xf32>
    %55 = arith.divf %53, %54 : vector<2x3xf32>
    %56 = vector.extract_strided_slice %43 {offsets = [0, 6], sizes = [2, 3], strides = [1, 1]} : vector<2x12xf32> to vector<2x3xf32>
    %57 = math.tanh %56 : vector<2x3xf32>
    %58 = vector.extract_strided_slice %43 {offsets = [0, 9], sizes = [2, 3], strides = [1, 1]} : vector<2x12xf32> to vector<2x3xf32>
    %59 = arith.negf %58 : vector<2x3xf32>
    %60 = math.exp %59 : vector<2x3xf32>
    %cst_22 = arith.constant 1.000000e+00 : f32
    %61 = vector.broadcast %cst_22 : f32 to vector<2x3xf32>
    %62 = arith.addf %61, %60 : vector<2x3xf32>
    %63 = arith.divf %61, %62 : vector<2x3xf32>
    %64 = arith.mulf %55, %10 : vector<2x3xf32>
    %65 = arith.mulf %49, %57 : vector<2x3xf32>
    %66 = arith.addf %64, %65 : vector<2x3xf32>
    %67 = math.tanh %66 : vector<2x3xf32>
    %68 = arith.mulf %63, %67 : vector<2x3xf32>
    %69 = vector.extract_strided_slice %5 {offsets = [2, 0], sizes = [2, 12], strides = [1, 1]} : vector<4x12xf32> to vector<2x12xf32>
    %cst_23 = arith.constant dense<0.000000e+00> : vector<2x12xf32>
    %70 = tpu.matmul %38, %6, %cst_23 {dimension_numbers = #tpu.dot_dimension_numbers<[1], [0], [0], [1], [0, 0, 1, 1], [], []>} : vector<2x3xf32>, vector<3x12xf32>, vector<2x12xf32> -> vector<2x12xf32>
    %71 = arith.addf %69, %70 : vector<2x12xf32>
    %72 = vector.extract_strided_slice %71 {offsets = [0, 0], sizes = [2, 3], strides = [1, 1]} : vector<2x12xf32> to vector<2x3xf32>
    %73 = arith.negf %72 : vector<2x3xf32>
    %74 = math.exp %73 : vector<2x3xf32>
    %cst_24 = arith.constant 1.000000e+00 : f32
    %75 = vector.broadcast %cst_24 : f32 to vector<2x3xf32>
    %76 = arith.addf %75, %74 : vector<2x3xf32>
    %77 = arith.divf %75, %76 : vector<2x3xf32>
    %78 = vector.extract_strided_slice %71 {offsets = [0, 3], sizes = [2, 3], strides = [1, 1]} : vector<2x12xf32> to vector<2x3xf32>
    %79 = arith.negf %78 : vector<2x3xf32>
    %80 = math.exp %79 : vector<2x3xf32>
    %cst_25 = arith.constant 1.000000e+00 : f32
    %81 = vector.broadcast %cst_25 : f32 to vector<2x3xf32>
    %82 = arith.addf %81, %80 : vector<2x3xf32>
    %83 = arith.divf %81, %82 : vector<2x3xf32>
    %84 = vector.extract_strided_slice %71 {offsets = [0, 6], sizes = [2, 3], strides = [1, 1]} : vector<2x12xf32> to vector<2x3xf32>
    %85 = math.tanh %84 : vector<2x3xf32>
    %86 = vector.extract_strided_slice %71 {offsets = [0, 9], sizes = [2, 3], strides = [1, 1]} : vector<2x12xf32> to vector<2x3xf32>
    %87 = arith.negf %86 : vector<2x3xf32>
    %88 = math.exp %87 : vector<2x3xf32>
    %cst_26 = arith.constant 1.000000e+00 : f32
    %89 = vector.broadcast %cst_26 : f32 to vector<2x3xf32>
    %90 = arith.addf %89, %88 : vector<2x3xf32>
    %91 = arith.divf %89, %90 : vector<2x3xf32>
    %92 = arith.mulf %83, %36 : vector<2x3xf32>
    %93 = arith.mulf %77, %85 : vector<2x3xf32>
    %94 = arith.addf %92, %93 : vector<2x3xf32>
    %95 = math.tanh %94 : vector<2x3xf32>
    %96 = arith.mulf %91, %95 : vector<2x3xf32>
    %cst_27 = arith.constant dense<0.000000e+00> : vector<2x12xf32>
    %97 = tpu.matmul %96, %7, %cst_27 {dimension_numbers = #tpu.dot_dimension_numbers<[1], [0], [0], [1], [0, 0, 1, 1], [], []>} : vector<2x3xf32>, vector<3x12xf32>, vector<2x12xf32> -> vector<2x12xf32>
    %cst_28 = arith.constant dense<0.000000e+00> : vector<2x12xf32>
    %98 = tpu.matmul %68, %8, %cst_28 {dimension_numbers = #tpu.dot_dimension_numbers<[1], [0], [0], [1], [0, 0, 1, 1], [], []>} : vector<2x3xf32>, vector<3x12xf32>, vector<2x12xf32> -> vector<2x12xf32>
    %99 = arith.addf %97, %98 : vector<2x12xf32>
    %100 = vector.broadcast %9 : vector<1x12xf32> to vector<2x12xf32>
    %101 = arith.addf %99, %100 : vector<2x12xf32>
    %102 = vector.extract_strided_slice %101 {offsets = [0, 0], sizes = [2, 3], strides = [1, 1]} : vector<2x12xf32> to vector<2x3xf32>
    %103 = arith.negf %102 : vector<2x3xf32>
    %104 = math.exp %103 : vector<2x3xf32>
    %cst_29 = arith.constant 1.000000e+00 : f32
    %105 = vector.broadcast %cst_29 : f32 to vector<2x3xf32>
    %106 = arith.addf %105, %104 : vector<2x3xf32>
    %107 = arith.divf %105, %106 : vector<2x3xf32>
    %108 = vector.extract_strided_slice %101 {offsets = [0, 3], sizes = [2, 3], strides = [1, 1]} : vector<2x12xf32> to vector<2x3xf32>
    %109 = arith.negf %108 : vector<2x3xf32>
    %110 = math.exp %109 : vector<2x3xf32>
    %cst_30 = arith.constant 1.000000e+00 : f32
    %111 = vector.broadcast %cst_30 : f32 to vector<2x3xf32>
    %112 = arith.addf %111, %110 : vector<2x3xf32>
    %113 = arith.divf %111, %112 : vector<2x3xf32>
    %114 = vector.extract_strided_slice %101 {offsets = [0, 6], sizes = [2, 3], strides = [1, 1]} : vector<2x12xf32> to vector<2x3xf32>
    %115 = math.tanh %114 : vector<2x3xf32>
    %116 = vector.extract_strided_slice %101 {offsets = [0, 9], sizes = [2, 3], strides = [1, 1]} : vector<2x12xf32> to vector<2x3xf32>
    %117 = arith.negf %116 : vector<2x3xf32>
    %118 = math.exp %117 : vector<2x3xf32>
    %cst_31 = arith.constant 1.000000e+00 : f32
    %119 = vector.broadcast %cst_31 : f32 to vector<2x3xf32>
    %120 = arith.addf %119, %118 : vector<2x3xf32>
    %121 = arith.divf %119, %120 : vector<2x3xf32>
    %122 = arith.mulf %113, %66 : vector<2x3xf32>
    %123 = arith.mulf %107, %115 : vector<2x3xf32>
    %124 = arith.addf %122, %123 : vector<2x3xf32>
    %125 = math.tanh %124 : vector<2x3xf32>
    %126 = arith.mulf %121, %125 : vector<2x3xf32>
    %127 = tpu.concatenate %68, %126 in 1 : vector<2x3xf32>, vector<2x3xf32> -> vector<2x6xf32>
    %c0_32 = arith.constant 0 : index
    %c0_33 = arith.constant 0 : index
    %128 = vector.load %arg8[%c0_32, %c0_33] : memref<6x1xf32, #tpu.memory_space<vmem>>, vector<6x1xf32>
    %cst_34 = arith.constant dense<0.000000e+00> : vector<2x1xf32>
    %129 = tpu.matmul %127, %128, %cst_34 {dimension_numbers = #tpu.dot_dimension_numbers<[1], [0], [0], [1], [0, 0, 1, 1], [], []>} : vector<2x6xf32>, vector<6x1xf32>, vector<2x1xf32> -> vector<2x1xf32>
    %c0_35 = arith.constant 0 : index
    %c0_36 = arith.constant 0 : index
    %130 = vector.load %arg9[%c0_35, %c0_36] : memref<1x1xf32, #tpu.memory_space<vmem>>, vector<1x1xf32>
    %131 = vector.broadcast %130 : vector<1x1xf32> to vector<2x1xf32>
    %132 = arith.addf %129, %131 : vector<2x1xf32>
    %c0_37 = arith.constant 0 : index
    %c0_38 = arith.constant 0 : index
    %133 = vector.load %arg10[%c0_37, %c0_38] : memref<2x1xf32, #tpu.memory_space<vmem>>, vector<2x1xf32>
    tpu.vector_store %arg10[%c0_37, %c0_38], %132 {strides = array<i32>} : memref<2x1xf32, #tpu.memory_space<vmem>>, vector<2x1xf32>,
    return
  }
  func.func @transform_0(%arg0: i32) -> (i32, i32) {
    %c0_i32 = arith.constant 0 : i32
    %c0_i32_0 = arith.constant 0 : i32
    %c0_i32_1 = arith.constant 0 : i32
    return %c0_i32, %c0_i32_0 : i32, i32
  }
  func.func @transform_1(%arg0: i32) -> (i32, i32) {
    %c0_i32 = arith.constant 0 : i32
    %c0_i32_0 = arith.constant 0 : i32
    %c0_i32_1 = arith.constant 0 : i32
    return %c0_i32, %c0_i32_0 : i32, i32
  }
  func.func @transform_2(%arg0: i32) -> (i32, i32) {
    %c0_i32 = arith.constant 0 : i32
    %c0_i32_0 = arith.constant 0 : i32
    %c0_i32_1 = arith.constant 0 : i32
    return %c0_i32, %c0_i32_0 : i32, i32
  }
  func.func @transform_3(%arg0: i32) -> (i32, i32) {
    %c0_i32 = arith.constant 0 : i32
    %c0_i32_0 = arith.constant 0 : i32
    %c0_i32_1 = arith.constant 0 : i32
    return %c0_i32, %c0_i32_0 : i32, i32
  }
  func.func @transform_4(%arg0: i32) -> (i32, i32) {
    %c0_i32 = arith.constant 0 : i32
    %c0_i32_0 = arith.constant 0 : i32
    %c0_i32_1 = arith.constant 0 : i32
    return %c0_i32, %c0_i32_0 : i32, i32
  }
  func.func @transform_5(%arg0: i32) -> (i32, i32) {
    %c0_i32 = arith.constant 0 : i32
    %c0_i32_0 = arith.constant 0 : i32
    %c0_i32_1 = arith.constant 0 : i32
    return %c0_i32, %c0_i32_0 : i32, i32
  }
  func.func @transform_6(%arg0: i32) -> (i32, i32) {
    %c0_i32 = arith.constant 0 : i32
    %c0_i32_0 = arith.constant 0 : i32
    %c0_i32_1 = arith.constant 0 : i32
    return %c0_i32, %c0_i32_0 : i32, i32
  }
  func.func @transform_7(%arg0: i32) -> (i32, i32) {
    %c0_i32 = arith.constant 0 : i32
    %c0_i32_0 = arith.constant 0 : i32
    %c0_i32_1 = arith.constant 0 : i32
    return %c0_i32, %c0_i32_0 : i32, i32
  }
  func.func @transform_8(%arg0: i32) -> (i32, i32) {
    %c0_i32 = arith.constant 0 : i32
    %c0_i32_0 = arith.constant 0 : i32
    %c0_i32_1 = arith.constant 0 : i32
    return %c0_i32, %c0_i32_0 : i32, i32
  }
  func.func @transform_9(%arg0: i32) -> (i32, i32) {
    %c0_i32 = arith.constant 0 : i32
    %c0_i32_0 = arith.constant 0 : i32
    %c0_i32_1 = arith.constant 0 : i32
    return %c0_i32, %c0_i32_0 : i32, i32
  }
}

</mosaic_0001>

<bundles_post_ra>
// kernel: deepvo_small_forward.3
= control target key start
LH: loop header
LB: loop body
LE: loop exit
PB: predicated region body
PF: predicated region fallthrough
CT: control target
= control target key end

     0   :  { %vm865_vm0 = vcmask 1042432   ;;  %s1275_s22 = smov 3   ;;  %s1276_s23 = smov 6   ;;  %vm861_vm5 = vcmask 23552   ;;  %s1629_s1 = inlined_call_operand.vmem [shape: f32[12,4096], index: 1, kind: input, shape index: {}]   ;;  %s1630_s0 = inlined_call_operand.vmem [shape: f32[4,4096], index: 0, kind: input, shape index: {}]   ;;  %s1631_s3 = inlined_call_operand.vmem [shape: f32[1,12], index: 3, kind: input, shape index: {}]   ;;  %s1632_s2 = inlined_call_operand.vmem [shape: f32[3,12], index: 2, kind: input, shape index: {}]   ;;  %s1633_s4 = inlined_call_operand.vmem [shape: f32[3,12], index: 4, kind: input, shape index: {}]   ;;  %s1634_s5 = inlined_call_operand.vmem [shape: f32[3,12], index: 5, kind: input, shape index: {}]   ;;  %s1635_s6 = inlined_call_operand.vmem [shape: f32[1,12], index: 6, kind: input, shape index: {}]   ;;  %s1636_s7 = inlined_call_operand.vmem [shape: f32[6,1], index: 7, kind: input, shape index: {}]   ;;  %s1637_s8 = inlined_call_operand.<no memory space> [shape: f32[1,1], index: 8, kind: input, shape index: {}]   ;;  %s1638_s9 = inlined_call_operand.vmem [shape: f32[2,1], index: 9, kind: output, shape index: {}]  }
   0x1   :  { %v84_v0 = vld [vmem:[%s1629_s1 + $0x110] sm:$0xf]  ;;  %v82_v1 = vld [vmem:[%s1629_s1 + $0x100] sm:$0xf]  ;;  %v85_v2 = vld [vmem:[%s1629_s1 + $0x118] sm:$0xf] }
   0x2   :  { %271 = vmatpush.xpose.msra.mxu2 %v84_v0  ;;  %231 = vmatpush.xpose.msra.mxu0 %v82_v1  ;;  %v83_v3 = vld [vmem:[%s1629_s1 + $0x108] sm:$0xf]  ;;  %v52_v4 = vld [vmem:[%s1629_s1 + $0x10] sm:$0xff]  ;;  %v50_v5 = vld [vmem:[%s1629_s1] sm:$0xff]  ;;  %s1277_s25 = smov 119  }
   0x3   :  { %291 = vmatpush.xpose.msra.mxu3 %v85_v2  ;;  %251 = vmatpush.xpose.msra.mxu1 %v83_v3  ;;  %v35_v6 = vld [vmem:[%s1630_s0 + $0x8] sm:$0xff]  ;;  %v53_v7 = vld [vmem:[%s1629_s1 + $0x18] sm:$0xff]  ;;  %v88_v8 = vld [vmem:[%s1629_s1 + $0x130] sm:$0xf] }
   0x4   :  { %136 = vst [vmem:[#allocation1 + $0x10] ss:$2 sm:$0xff] %v35_v6  ;;  %v34_v9 = vld [vmem:[%s1630_s0] sm:$0xff]  ;;  %v51_v10 = vld [vmem:[%s1629_s1 + $0x8] sm:$0xff]  ;;  %v89_v12 = vld [vmem:[%s1629_s1 + $0x138] sm:$0xf] }
   0x5   :  { %134 = vst [vmem:[#allocation1] ss:$2 sm:$0xff] %v34_v9  ;;  %v86_v11 = vld [vmem:[%s1629_s1 + $0x120] sm:$0xf]  ;;  %v87_v13 = vld [vmem:[%s1629_s1 + $0x128] sm:$0xf] }
   0x6   :  { %272 = vmatpush.xpose.msra.mxu2 %v52_v4  ;;  %232 = vmatpush.xpose.msra.mxu0 %v50_v5  ;;  %v56_v14 = vld [vmem:[%s1629_s1 + $0x30] sm:$0xff]  ;;  %v37_v15 = vld [vmem:[%s1630_s0 + $0x18] sm:$0xff]  ;;  %v39_v17 = vld [vmem:[%s1630_s0 + $0x28] sm:$0xff] }
   0x7   :  { %292 = vmatpush.xpose.msra.mxu3 %v53_v7  ;;  %252 = vmatpush.xpose.msra.mxu1 %v51_v10  ;;  %v36_v16 = vld [vmem:[%s1630_s0 + $0x10] sm:$0xff]  ;;  %v38_v18 = vld [vmem:[%s1630_s0 + $0x20] sm:$0xff]  ;;  %140 = vst [vmem:[#allocation1 + $0x30] ss:$2 sm:$0xff] %v37_v15  ;;  %v57_v20 = vld [vmem:[%s1629_s1 + $0x38] sm:$0xff] }
   0x8   :  { %v54_v19 = vld [vmem:[%s1629_s1 + $0x20] sm:$0xff]  ;;  %v92_v21 = vld [vmem:[%s1629_s1 + $0x150] sm:$0xf]  ;;  %138 = vst [vmem:[#allocation1 + $0x20] ss:$2 sm:$0xff] %v36_v16  ;;  %v55_v26 = vld [vmem:[%s1629_s1 + $0x28] sm:$0xff] }
   0x9   :  { %v90_v24 = vld [vmem:[%s1629_s1 + $0x140] sm:$0xf]  ;;  %v93_v28 = vld [vmem:[%s1629_s1 + $0x158] sm:$0xf]  ;;  %v91_v30 = vld [vmem:[%s1629_s1 + $0x148] sm:$0xf] }
   0xa   :  { %351 = vmatpush.xpose.msrb.mxu2 %v88_v8  ;;  %311 = vmatpush.xpose.msrb.mxu0 %v86_v11  ;;  %v41_v29 = vld [vmem:[%s1630_s0 + $0x38] sm:$0xff]  ;;  %v40_v31 = vld [vmem:[%s1630_s0 + $0x30] sm:$0xff]  ;;  %v58_v35 = vld [vmem:[%s1629_s1 + $0x40] sm:$0xff] }
   0xb   :  { %371 = vmatpush.xpose.msrb.mxu3 %v89_v12  ;;  %331 = vmatpush.xpose.msrb.mxu1 %v87_v13  ;;  %v143_v22 = vld.sshfl [vmem:[#allocation1 + $0x10] sm:$0xff pattern:$0x75316420]  ;;  %v144_v23 = vld.sshfl [vmem:[#allocation1 + $0x18] sm:$0xff pattern:$0x75316420] }
   0xc   :  { %273 = vmatmul.f32.vlgmr.msra.gmra.mxu2 %v143_v22  ;;  %v141_v25 = vld.sshfl [vmem:[#allocation1] sm:$0xff pattern:$0x75316420]  ;;  %150 = vst [vmem:[#allocation1 + $0x10] ss:$2 sm:$0xff] %v39_v17  ;;  %293 = vmatmul.f32.vlgmr.msra.gmra.mxu3 %v144_v23  ;;  %v60_v32 = vld [vmem:[%s1629_s1 + $0x50] sm:$0xff] }
   0xd   :  { %233 = vmatmul.f32.vlgmr.msra.gmra.mxu0 %v141_v25  ;;  %v142_v27 = vld.sshfl [vmem:[#allocation1 + $0x8] sm:$0xff pattern:$0x75316420]  ;;  %v61_v36 = vld [vmem:[%s1629_s1 + $0x58] sm:$0xff]  ;;  %v96_v40 = vld [vmem:[%s1629_s1 + $0x170] sm:$0xf] }
   0xe   :  { %352 = vmatpush.xpose.msrb.mxu2 %v56_v14  ;;  %149 = vst [vmem:[#allocation1] ss:$2 sm:$0xff] %v38_v18  ;;  %253 = vmatmul.f32.vlgmr.msra.gmra.mxu1 %v142_v27  ;;  %v147_v33 = vld.sshfl [vmem:[#allocation1 + $0x30] sm:$0xff pattern:$0x75316420]  ;;  %v43_v37 = vld [vmem:[%s1630_s0 + $0x48] sm:$0xff] }
   0xf   :  { %372 = vmatpush.xpose.msrb.mxu3 %v57_v20  ;;  %312 = vmatpush.xpose.msrb.mxu0 %v54_v19  ;;  %v148_v34 = vld.sshfl [vmem:[#allocation1 + $0x38] sm:$0xff pattern:$0x75316420]  ;;  %v145_v38 = vld.sshfl [vmem:[#allocation1 + $0x20] sm:$0xff pattern:$0x75316420] }
  0x10   :  { %332 = vmatpush.xpose.msrb.mxu1 %v55_v26  ;;  %152 = vst [vmem:[#allocation1 + $0x30] ss:$2 sm:$0xff] %v41_v29  ;;  %v146_v39 = vld.sshfl [vmem:[#allocation1 + $0x28] sm:$0xff pattern:$0x75316420]  ;;  %v42_v44 = vld [vmem:[%s1630_s0 + $0x40] sm:$0xff] }
  0x11   :  { %151 = vst [vmem:[#allocation1 + $0x20] ss:$2 sm:$0xff] %v40_v31  ;;  %v59_v41 = vld [vmem:[%s1629_s1 + $0x48] sm:$0xff]  ;;  %v94_v42 = vld [vmem:[%s1629_s1 + $0x160] sm:$0xf]  ;;  %v45_v50 = vld [vmem:[%s1630_s0 + $0x58] sm:$0xff] }
  0x12   :  { %431 = vmatpush.xpose.msra.mxu2 %v92_v21  ;;  %v97_v43 = vld [vmem:[%s1629_s1 + $0x178] sm:$0xf]  ;;  %v95_v49 = vld [vmem:[%s1629_s1 + $0x168] sm:$0xf]  ;;  %v64_v51 = vld [vmem:[%s1629_s1 + $0x70] sm:$0xff] }
  0x13   :  { %391 = vmatpush.xpose.msra.mxu0 %v90_v24  ;;  %451 = vmatpush.xpose.msra.mxu3 %v93_v28  ;;  %v155_v45 = vld.sshfl [vmem:[#allocation1 + $0x10] sm:$0xff pattern:$0x75316420]  ;;  %v156_v46 = vld.sshfl [vmem:[#allocation1 + $0x18] sm:$0xff pattern:$0x75316420] }
  0x14   :  { %411 = vmatpush.xpose.msra.mxu1 %v91_v30  ;;  %353 = vmatmul.f32.vlgmr.msrb.gmra.mxu2 %v147_v33  ;;  %162 = vst [vmem:[#allocation1 + $0x10] ss:$2 sm:$0xff] %v43_v37  ;;  %v44_v52 = vld [vmem:[%s1630_s0 + $0x50] sm:$0xff]  ;;  %v62_v55 = vld [vmem:[%s1629_s1 + $0x60] sm:$0xff]  ;;  %v65_v56 = vld [vmem:[%s1629_s1 + $0x78] sm:$0xff] }
  0x15   :  { %373 = vmatmul.f32.vlgmr.msrb.gmra.mxu3 %v148_v34  ;;  %313 = vmatmul.f32.vlgmr.msrb.gmra.mxu0 %v145_v38  ;;  %v153_v47 = vld.sshfl [vmem:[#allocation1] sm:$0xff pattern:$0x75316420]  ;;  %v154_v48 = vld.sshfl [vmem:[#allocation1 + $0x8] sm:$0xff pattern:$0x75316420] }
  0x16   :  { %432 = vmatpush.xpose.msra.mxu2 %v60_v32  ;;  %333 = vmatmul.f32.vlgmr.msrb.gmra.mxu1 %v146_v39  ;;  %161 = vst [vmem:[#allocation1] ss:$2 sm:$0xff] %v42_v44  ;;  %v63_v59 = vld [vmem:[%s1629_s1 + $0x68] sm:$0xff]  ;;  %v100_v60 = vld [vmem:[%s1629_s1 + $0x190] sm:$0xf]  ;;  %v46_v3 = vld [vmem:[%s1630_s0 + $0x60] sm:$0xff] }
  0x17   :  { %452 = vmatpush.xpose.msra.mxu3 %v61_v36  ;;  %392 = vmatpush.xpose.msra.mxu0 %v58_v35  ;;  %v159_v53 = vld.sshfl [vmem:[#allocation1 + $0x30] sm:$0xff pattern:$0x75316420]  ;;  %v160_v54 = vld.sshfl [vmem:[#allocation1 + $0x38] sm:$0xff pattern:$0x75316420] }
  0x18   :  { %412 = vmatpush.xpose.msra.mxu1 %v59_v41  ;;  %164 = vst [vmem:[#allocation1 + $0x30] ss:$2 sm:$0xff] %v45_v50  ;;  %v157_v57 = vld.sshfl [vmem:[#allocation1 + $0x20] sm:$0xff pattern:$0x75316420]  ;;  %v47_v61 = vld [vmem:[%s1630_s0 + $0x68] sm:$0xff] }
  0x19   :  { %v158_v58 = vld.sshfl [vmem:[#allocation1 + $0x28] sm:$0xff pattern:$0x75316420]  ;;  %v98_v0 = vld [vmem:[%s1629_s1 + $0x180] sm:$0xf]  ;;  %v68_v6 = vld [vmem:[%s1629_s1 + $0x90] sm:$0xff] }
  0x1a   :  { %511 = vmatpush.xpose.msrb.mxu2 %v96_v40  ;;  %163 = vst [vmem:[#allocation1 + $0x20] ss:$2 sm:$0xff] %v44_v52  ;;  %v101_v1 = vld [vmem:[%s1629_s1 + $0x198] sm:$0xf]  ;;  %v99_v2 = vld [vmem:[%s1629_s1 + $0x188] sm:$0xf] }
  0x1b   :  { %471 = vmatpush.xpose.msrb.mxu0 %v94_v42  ;;  %531 = vmatpush.xpose.msrb.mxu3 %v97_v43  ;;  %v167_v62 = vld.sshfl [vmem:[#allocation1 + $0x10] sm:$0xff pattern:$0x75316420]  ;;  %v168_v63 = vld.sshfl [vmem:[#allocation1 + $0x18] sm:$0xff pattern:$0x75316420] }
  0x1c   :  { %491 = vmatpush.xpose.msrb.mxu1 %v95_v49  ;;  %433 = vmatmul.f32.vlgmr.msra.gmra.mxu2 %v155_v45  ;;  %174 = vst [vmem:[#allocation1 + $0x10] ss:$2 sm:$0xff] %v47_v61  ;;  %v66_v7 = vld [vmem:[%s1629_s1 + $0x80] sm:$0xff]  ;;  %v69_v8 = vld [vmem:[%s1629_s1 + $0x98] sm:$0xff]  ;;  %v67_v12 = vld [vmem:[%s1629_s1 + $0x88] sm:$0xff]  ;;  %v1273_v49 = vmov 0.0  }
  0x1d   :  { %453 = vmatmul.f32.vlgmr.msra.gmra.mxu3 %v156_v46  ;;  %393 = vmatmul.f32.vlgmr.msra.gmra.mxu0 %v153_v47  ;;  %v165_v4 = vld.sshfl [vmem:[#allocation1] sm:$0xff pattern:$0x75316420]  ;;  %v166_v5 = vld.sshfl [vmem:[#allocation1 + $0x8] sm:$0xff pattern:$0x75316420] }
  0x1e   :  { %512 = vmatpush.xpose.msrb.mxu2 %v64_v51  ;;  %413 = vmatmul.f32.vlgmr.msra.gmra.mxu1 %v154_v48  ;;  %173 = vst [vmem:[#allocation1] ss:$2 sm:$0xff] %v46_v3  ;;  %v49_v9 = vld [vmem:[%s1630_s0 + $0x78] sm:$0xff]  ;;  %v104_v13 = vld [vmem:[%s1629_s1 + $0x1b0] sm:$0xf]  ;;  %v70_v22 = vld [vmem:[%s1629_s1 + $0xa0] sm:$0xff] }
  0x1f   :  { %532 = vmatpush.xpose.msrb.mxu3 %v65_v56  ;;  %472 = vmatpush.xpose.msrb.mxu0 %v62_v55  ;;  %v171_v10 = vld.sshfl [vmem:[#allocation1 + $0x30] sm:$0xff pattern:$0x75316420]  ;;  %v172_v11 = vld.sshfl [vmem:[#allocation1 + $0x38] sm:$0xff pattern:$0x75316420] }
  0x20   :  { %492 = vmatpush.xpose.msrb.mxu1 %v63_v59  ;;  %176 = vst [vmem:[#allocation1 + $0x30] ss:$2 sm:$0xff] %v49_v9  ;;  %v48_v14 = vld [vmem:[%s1630_s0 + $0x70] sm:$0xff]  ;;  %v102_v17 = vld [vmem:[%s1629_s1 + $0x1a0] sm:$0xf]  ;;  %v73_v21 = vld [vmem:[%s1629_s1 + $0xb8] sm:$0xff] }
  0x21   :  { %v169_v15 = vld.sshfl [vmem:[#allocation1 + $0x20] sm:$0xff pattern:$0x75316420]  ;;  %v170_v16 = vld.sshfl [vmem:[#allocation1 + $0x28] sm:$0xff pattern:$0x75316420] }
  0x22   :  { %591 = vmatpush.xpose.msra.mxu2 %v100_v60  ;;  %v105_v18 = vld [vmem:[%s1629_s1 + $0x1b8] sm:$0xf]  ;;  %175 = vst [vmem:[#allocation1 + $0x20] ss:$2 sm:$0xff] %v48_v14  ;;  %v103_v19 = vld [vmem:[%s1629_s1 + $0x1a8] sm:$0xf] }
  0x23   :  { %551 = vmatpush.xpose.msra.mxu0 %v98_v0  ;;  %611 = vmatpush.xpose.msra.mxu3 %v101_v1  ;;  %v72_v20 = vld [vmem:[%s1629_s1 + $0xb0] sm:$0xff]  ;;  %v71_v23 = vld [vmem:[%s1629_s1 + $0xa8] sm:$0xff]  ;;  %v106_v25 = vld [vmem:[%s1629_s1 + $0x1c0] sm:$0xf] }
  0x24   :  { %571 = vmatpush.xpose.msra.mxu1 %v99_v2  ;;  %513 = vmatmul.f32.vlgmr.msrb.gmra.mxu2 %v159_v53  ;;  %v108_v24 = vld [vmem:[%s1629_s1 + $0x1d0] sm:$0xf]  ;;  %v109_v26 = vld [vmem:[%s1629_s1 + $0x1d8] sm:$0xf]  ;;  %v107_v27 = vld [vmem:[%s1629_s1 + $0x1c8] sm:$0xf] }
  0x25   :  { %533 = vmatmul.f32.vlgmr.msrb.gmra.mxu3 %v160_v54  ;;  %473 = vmatmul.f32.vlgmr.msrb.gmra.mxu0 %v157_v57  ;;  %v76_v28 = vld [vmem:[%s1629_s1 + $0xd0] sm:$0xff]  ;;  %v77_v29 = vld [vmem:[%s1629_s1 + $0xd8] sm:$0xff]  ;;  %v74_v30 = vld [vmem:[%s1629_s1 + $0xc0] sm:$0xff] }
  0x26   :  { %592 = vmatpush.xpose.msra.mxu2 %v68_v6  ;;  %493 = vmatmul.f32.vlgmr.msrb.gmra.mxu1 %v158_v58  ;;  %v75_v31 = vld [vmem:[%s1629_s1 + $0xc8] sm:$0xff]  ;;  %v112_v32 = vld [vmem:[%s1629_s1 + $0x1f0] sm:$0xf]  ;;  %v110_v33 = vld [vmem:[%s1629_s1 + $0x1e0] sm:$0xf] }
  0x27   :  { %612 = vmatpush.xpose.msra.mxu3 %v69_v8  ;;  %552 = vmatpush.xpose.msra.mxu0 %v66_v7  ;;  %v113_v34 = vld [vmem:[%s1629_s1 + $0x1f8] sm:$0xf]  ;;  %v111_v35 = vld [vmem:[%s1629_s1 + $0x1e8] sm:$0xf]  ;;  %v80_v36 = vld [vmem:[%s1629_s1 + $0xf0] sm:$0xff] }
  0x28   :  { %572 = vmatpush.xpose.msra.mxu1 %v67_v12  ;;  %v179_v37 = vld.sshfl [vmem:[#allocation1 + $0x10] sm:$0xff pattern:$0x75316420]  ;;  %v180_v38 = vld.sshfl [vmem:[#allocation1 + $0x18] sm:$0xff pattern:$0x75316420] }
  0x29   :  { %v177_v39 = vld.sshfl [vmem:[#allocation1] sm:$0xff pattern:$0x75316420]  ;;  %v81_v40 = vld [vmem:[%s1629_s1 + $0xf8] sm:$0xff]  ;;  %v79_v43 = vld [vmem:[%s1629_s1 + $0xe8] sm:$0xff] }
  0x2a   :  { %671 = vmatpush.xpose.msrb.mxu2 %v104_v13  ;;  %v178_v41 = vld.sshfl [vmem:[#allocation1 + $0x8] sm:$0xff pattern:$0x75316420]  ;;  %v78_v42 = vld [vmem:[%s1629_s1 + $0xe0] sm:$0xff] }
  0x2b   :  { %631 = vmatpush.xpose.msrb.mxu0 %v102_v17  ;;  %691 = vmatpush.xpose.msrb.mxu3 %v105_v18  ;;  %v857_v44 = vld [vmem:[%s1632_s2] sm:$0x7]  ;;  %v183_v45 = vld.sshfl [vmem:[#allocation1 + $0x30] sm:$0xff pattern:$0x75316420] }
  0x2c   :  { %651 = vmatpush.xpose.msrb.mxu1 %v103_v19  ;;  %593 = vmatmul.f32.vlgmr.msra.gmra.mxu2 %v167_v62  ;;  %v184_v46 = vld.sshfl [vmem:[#allocation1 + $0x38] sm:$0xff pattern:$0x75316420]  ;;  %v181_v47 = vld.sshfl [vmem:[#allocation1 + $0x20] sm:$0xff pattern:$0x75316420] }
  0x2d   :  { %613 = vmatmul.f32.vlgmr.msra.gmra.mxu3 %v168_v63  ;;  %553 = vmatmul.f32.vlgmr.msra.gmra.mxu0 %v165_v4  ;;  %v182_v48 = vld.sshfl [vmem:[#allocation1 + $0x28] sm:$0xff pattern:$0x75316420]  ;;  %v1238_v50 = vld [vmem:[%s1631_s3] ss:$0 sm:$0xff]  ;;  %s1274_s3 = smov 122  }
  0x2e   :  { %672 = vmatpush.xpose.msrb.mxu2 %v72_v20  ;;  %573 = vmatmul.f32.vlgmr.msra.gmra.mxu1 %v166_v5 }
  0x2f   :  { %692 = vmatpush.xpose.msrb.mxu3 %v73_v21  ;;  %632 = vmatpush.xpose.msrb.mxu0 %v70_v22 }
  0x30   :  { %652 = vmatpush.xpose.msrb.mxu1 %v71_v23 }
  0x32   :  { %751 = vmatpush.xpose.msra.mxu2 %v108_v24 }
  0x33   :  { %711 = vmatpush.xpose.msra.mxu0 %v106_v25  ;;  %771 = vmatpush.xpose.msra.mxu3 %v109_v26 }
  0x34   :  { %731 = vmatpush.xpose.msra.mxu1 %v107_v27  ;;  %673 = vmatmul.f32.vlgmr.msrb.gmra.mxu2 %v171_v10 }
  0x35   :  { %693 = vmatmul.f32.vlgmr.msrb.gmra.mxu3 %v172_v11  ;;  %633 = vmatmul.f32.vlgmr.msrb.gmra.mxu0 %v169_v15 }
  0x36   :  { %752 = vmatpush.xpose.msra.mxu2 %v76_v28  ;;  %653 = vmatmul.f32.vlgmr.msrb.gmra.mxu1 %v170_v16 }
  0x37   :  { %772 = vmatpush.xpose.msra.mxu3 %v77_v29  ;;  %712 = vmatpush.xpose.msra.mxu0 %v74_v30 }
  0x38   :  { %732 = vmatpush.xpose.msra.mxu1 %v75_v31 }
  0x3a   :  { %831 = vmatpush.xpose.msrb.mxu2 %v112_v32 }
  0x3b   :  { %791 = vmatpush.xpose.msrb.mxu0 %v110_v33  ;;  %851 = vmatpush.xpose.msrb.mxu3 %v113_v34 }
  0x3c   :  { %811 = vmatpush.xpose.msrb.mxu1 %v111_v35  ;;  %753 = vmatmul.f32.vlgmr.msra.gmra.mxu2 %v179_v37 }
  0x3d   :  { %773 = vmatmul.f32.vlgmr.msra.gmra.mxu3 %v180_v38  ;;  %713 = vmatmul.f32.vlgmr.msra.gmra.mxu0 %v177_v39 }
  0x3e   :  { %832 = vmatpush.xpose.msrb.mxu2 %v80_v36  ;;  %733 = vmatmul.f32.vlgmr.msra.gmra.mxu1 %v178_v41 }
  0x3f   :  { %852 = vmatpush.xpose.msrb.mxu3 %v81_v40  ;;  %792 = vmatpush.xpose.msrb.mxu0 %v78_v42 }
  0x40   :  { %812 = vmatpush.xpose.msrb.mxu1 %v79_v43 }
  0x43   :  { %1217 = vmatpush.msk.msra.mxu0 %vm865_vm0, %v857_v44  ;;  %1223 = vmatpush.msk.msra.mxu3 %vm865_vm0, %v857_v44 }
  0x44   :  { %833 = vmatmul.f32.vlgmr.msrb.gmra.mxu2 %v183_v45 }
  0x45   :  { %853 = vmatmul.f32.vlgmr.msrb.gmra.mxu3 %v184_v46  ;;  %793 = vmatmul.f32.vlgmr.msrb.gmra.mxu0 %v181_v47 }
  0x46   :  { %813 = vmatmul.f32.vlgmr.msrb.gmra.mxu1 %v182_v48 }
  0x4d   :  { %885 = vmatmul.f32.vlgmr.msra.gmra.mxu0 %v1273_v49 }
  0x8a   :  { %v234_v51 = vpop.f32.mrf.mxu0 }
  0x8b   :  { %v235_v52 = vadd.f32 %v1238_v50, %v234_v51  ;;  %v254_v53 = vpop.f32.mrf.mxu1 }
  0x8d   :  { %v255_v54 = vadd.f32 %v254_v53, %v235_v52 }
  0x8f   :  { %v274_v55 = vpop.f32.mrf.mxu2  ;;  %v294_v56 = vpop.f32.mrf.mxu3 }
  0x90   :  { %v275_v57 = vadd.f32 %v274_v55, %v255_v54 }
  0x92   :  { %v295_v58 = vadd.f32 %v294_v56, %v275_v57  ;;  %v314_v59 = vpop.f32.mrf.mxu0 }
  0x93   :  { %v334_v60 = vpop.f32.mrf.mxu1 }
  0x94   :  { %v315_v61 = vadd.f32 %v314_v59, %v295_v58 }
  0x96   :  { %v335_v62 = vadd.f32 %v334_v60, %v315_v61 }
  0x97   :  { %v354_v63 = vpop.f32.mrf.mxu2 }
  0x98   :  { %v374_v0 = vpop.f32.mrf.mxu3  ;;  %v355_v1 = vadd.f32 %v354_v63, %v335_v62 }
  0x9a   :  { %v375_v2 = vadd.f32 %v374_v0, %v355_v1  ;;  %v394_v3 = vpop.f32.mrf.mxu0 }
  0x9b   :  { %v414_v4 = vpop.f32.mrf.mxu1 }
  0x9c   :  { %v395_v5 = vadd.f32 %v394_v3, %v375_v2 }
  0x9e   :  { %v415_v6 = vadd.f32 %v414_v4, %v395_v5 }
  0x9f   :  { %v434_v7 = vpop.f32.mrf.mxu2 }
  0xa0   :  { %v454_v8 = vpop.f32.mrf.mxu3  ;;  %v435_v9 = vadd.f32 %v434_v7, %v415_v6 }
  0xa2   :  { %v455_v10 = vadd.f32 %v454_v8, %v435_v9  ;;  %v474_v11 = vpop.f32.mrf.mxu0 }
  0xa3   :  { %v494_v12 = vpop.f32.mrf.mxu1 }
  0xa4   :  { %v475_v13 = vadd.f32 %v474_v11, %v455_v10  ;;  %v858_v10 = vld [vmem:[%s1633_s4] sm:$0x7] }
  0xa5   :  { %1220 = vmatpush.msk.msra.mxu2 %vm865_vm0, %v858_v10 }
  0xa6   :  { %v495_v14 = vadd.f32 %v494_v12, %v475_v13  ;;  %v859_v13 = vld [vmem:[%s1634_s5] sm:$0x7] }
  0xa7   :  { %v514_v15 = vpop.f32.mrf.mxu2  ;;  %1219 = vmatpush.msk.msra.mxu1 %vm865_vm0, %v859_v13  ;;  %1226 = vmatpush.msk.msrb.mxu0 %vm865_vm0, %v859_v13 }
  0xa8   :  { %v534_v16 = vpop.f32.mrf.mxu3  ;;  %v515_v17 = vadd.f32 %v514_v15, %v495_v14  ;;  %946 = vmatmul.f32.vlgmr.msra.gmra.mxu1 %v1273_v49 }
  0xa9   :  { %1228 = vmatpush.msk.msrb.mxu1 %vm865_vm0, %v858_v10 }
  0xaa   :  { %v535_v18 = vadd.f32 %v534_v16, %v515_v17  ;;  %v554_v19 = vpop.f32.mrf.mxu0 }
  0xab   :  { %v574_v20 = vpop.f32.mrf.mxu1 }
  0xac   :  { %v555_v21 = vadd.f32 %v554_v19, %v535_v18 }
  0xae   :  { %v575_v22 = vadd.f32 %v574_v20, %v555_v21  ;;  %v1600_v21 = vld [vmem:[%s1635_s6] ss:$0 sm:$0xff] }
  0xaf   :  { %v594_v23 = vpop.f32.mrf.mxu2 }
  0xb0   :  { %v614_v24 = vpop.f32.mrf.mxu3  ;;  %v595_v25 = vadd.f32 %v594_v23, %v575_v22 }
  0xb2   :  { %v615_v26 = vadd.f32 %v614_v24, %v595_v25  ;;  %v634_v27 = vpop.f32.mrf.mxu0 }
  0xb3   :  { %v654_v28 = vpop.f32.mrf.mxu1 }
  0xb4   :  { %v635_v29 = vadd.f32 %v634_v27, %v615_v26 }
  0xb6   :  { %v655_v30 = vadd.f32 %v654_v28, %v635_v29 }
  0xb7   :  { %v674_v31 = vpop.f32.mrf.mxu2 }
  0xb8   :  { %v694_v32 = vpop.f32.mrf.mxu3  ;;  %v675_v33 = vadd.f32 %v674_v31, %v655_v30 }
  0xba   :  { %v695_v34 = vadd.f32 %v694_v32, %v675_v33  ;;  %v714_v35 = vpop.f32.mrf.mxu0 }
  0xbb   :  { %v734_v36 = vpop.f32.mrf.mxu1 }
  0xbc   :  { %v715_v37 = vadd.f32 %v714_v35, %v695_v34 }
  0xbe   :  { %v735_v38 = vadd.f32 %v734_v36, %v715_v37 }
  0xbf   :  { %v754_v39 = vpop.f32.mrf.mxu2 }
  0xc0   :  { %v774_v40 = vpop.f32.mrf.mxu3  ;;  %v755_v41 = vadd.f32 %v754_v39, %v735_v38 }
  0xc2   :  { %v775_v42 = vadd.f32 %v774_v40, %v755_v41  ;;  %v794_v43 = vpop.f32.mrf.mxu0 }
  0xc3   :  { %v814_v44 = vpop.f32.mrf.mxu1 }
  0xc4   :  { %v795_v45 = vadd.f32 %v794_v43, %v775_v42 }
  0xc6   :  { %v815_v46 = vadd.f32 %v814_v44, %v795_v45 }
  0xc7   :  { %v834_v47 = vpop.f32.mrf.mxu2 }
  0xc8   :  { %v854_v48 = vpop.f32.mrf.mxu3  ;;  %v835_v50 = vadd.f32 %v834_v47, %v815_v46 }
  0xca   :  { %v855_v51 = vadd.f32 %v854_v48, %v835_v50  ;;  %v886_v52 = vpop.f32.mrf.mxu0 }
  0xcc   :  { %v889_v53 = vadd.f32 %v886_v52, %v855_v51 }
  0xce   :  { %1241 = vtanh.f32 %v889_v53  ;;  %v1218_v55 = vmul.f32 -1.442695, %v889_v53 }
  0xd0   :  { %1243 = vpow2.f32 %v1218_v55 }
  0xd4   :  { %v1242_v54 = vpop.eup %1241 }
  0xd5   :  { %912 = vrot.lane.b32.xlu0 %v1242_v54, %s1274_s3 }
  0xd6   :  { %v1244_v56 = vpop.eup %1243 }
  0xd7   :  { %v893_v57 = vadd.f32 1.0, %v1244_v56 }
  0xd9   :  { %1245 = vrcp.f32 %v893_v57  ;;  %v905_v63 = vand.u32 2147483648, %v893_v57  ;;  %vm899_vm2 = vweird.f32 %v893_v57  ;;  %v903_v0 = vand.u32 2147483647, %v893_v57 }
  0xdb   :  { %v906_v2 = vor.u32 1.1754944e-38, %v905_v63  ;;  %vm904_vm4 = vcmp.eq.f32.partialorder %v903_v0, 8.507059e+37 }
  0xdf   :  { %v1246_v58 = vpop.eup %1245 }
  0xe0   :  { %v895_v59 = vmul.f32 %v1246_v58, %v893_v57  ;;  %vm900_vm1 = vweird.f32 %v1246_v58 }
  0xe1   :  { %vm901_vm3 = vmor %vm899_vm2, %vm900_vm1  ;;  %vm1187_vm2 = vcmask 1045504  }
  0xe2   :  { %v896_v60 = vsub.f32 1.0, %v895_v59 }
  0xe4   :  { %v897_v61 = vmul.f32 %v1246_v58, %v896_v60 }
  0xe6   :  { %v898_v62 = vadd.f32 %v1246_v58, %v897_v61 }
  0xe8   :  { %v902_v1 = vsel %vm901_vm3, %v1246_v58, %v898_v62  ;;  %vm1183_vm3 = vcmask 48128  }
  0xe9   :  { %v907_v4 = vsel %vm904_vm4, %v906_v2, %v902_v1  ;;  %vm1211_vm4 = vcmask 1024  }
  0xea   :  { %v910_v6 = vmul.f32 0.0, %v907_v4 }
 0x125   :  { %v947_v17 = vpop.f32.mrf.mxu1 }
 0x147   :  { %v913_v3 = vpop.permute.xlu0 %912 }
 0x148   :  { %v915_v5 = vmul.f32 %v913_v3, %v907_v4 }
 0x14a   :  { %917 = vrot.lane.b32.xlu0 %v915_v5, %s1275_s22 }
 0x1bc   :  { %v918_v7 = vpop.permute.xlu0 %917 }
 0x1bd   :  { %v1579_v8 = vadd.f32 %v918_v7, %v910_v6 }
 0x1bf   :  { %1247 = vtanh.f32 %v1579_v8  ;;  %v1064_v55 = vrot.slane %v1579_v8, 6 }
 0x1c5   :  { %v1248_v9 = vpop.eup %1247 }
 0x1c6   :  { %923 = vrot.lane.b32.xlu1 %v1248_v9, %s1276_s23 }
 0x238   :  { %v924_v11 = vpop.permute.xlu1 %923 }
 0x239   :  { %v926_v12 = vmul.f32 %v924_v11, %v907_v4 }
 0x23b   :  { %951 = vrot.lane.b32.xlu1 %v926_v12, %s1277_s25 }
 0x2ad   :  { %v952_v14 = vpop.permute.xlu1 %951 }
 0x2ae   :  { %1221 = vmatmul.msk.f32.vlgmr.msra.gmra.mxu2 %vm861_vm5, %v952_v14  ;;  %1224 = vmatmul.msk.f32.vlgmr.msra.gmra.mxu3 %vm861_vm5, %v952_v14 }
 0x331   :  { %v1036_v15 = vpop.f32.mrf.mxu3  ;;  %v975_v18 = vpop.f32.mrf.mxu2 }
 0x332   :  { %v1040_v16 = vrot.slane %v1036_v15, 6  ;;  %v976_v20 = vadd.f32 %v975_v18, %v947_v17 }
 0x334   :  { %v1042_v19 = vadd.f32 %v1040_v16, %v855_v51  ;;  %v981_v49 = vadd.f32 %v1600_v21, %v976_v20 }
 0x336   :  { %1249 = vtanh.f32 %v1042_v19  ;;  %v1225_v24 = vmul.f32 -1.442695, %v1042_v19  ;;  %v1222_v25 = vmul.f32 -1.442695, %v981_v49 }
 0x337   :  { %1251 = vtanh.f32 %v981_v49 }
 0x338   :  { %1253 = vpow2.f32 %v1225_v24 }
 0x339   :  { %1255 = vpow2.f32 %v1222_v25 }
 0x33c   :  { %v1250_v22 = vpop.eup %1249 }
 0x33d   :  { %1068 = vrot.lane.b32.xlu2 %v1250_v22, %s1274_s3  ;;  %v1252_v23 = vpop.eup %1251 }
 0x33e   :  { %v1254_v26 = vpop.eup %1253 }
 0x33f   :  { %v1046_v27 = vadd.f32 1.0, %v1254_v26  ;;  %v1256_v28 = vpop.eup %1255 }
 0x340   :  { %v985_v29 = vadd.f32 1.0, %v1256_v28 }
 0x341   :  { %1257 = vrcp.f32 %v1046_v27  ;;  %v1058_v38 = vand.u32 2147483648, %v1046_v27  ;;  %vm1052_vm7 = vweird.f32 %v1046_v27  ;;  %v1056_v39 = vand.u32 2147483647, %v1046_v27 }
 0x342   :  { %1259 = vrcp.f32 %v985_v29  ;;  %v997_v47 = vand.u32 2147483648, %v985_v29  ;;  %vm991_vm11 = vweird.f32 %v985_v29  ;;  %v995_v48 = vand.u32 2147483647, %v985_v29 }
 0x343   :  { %v1059_v42 = vor.u32 1.1754944e-38, %v1058_v38  ;;  %vm1057_vm9 = vcmp.eq.f32.partialorder %v1056_v39, 8.507059e+37 }
 0x344   :  { %v998_v51 = vor.u32 1.1754944e-38, %v997_v47  ;;  %vm996_vm13 = vcmp.eq.f32.partialorder %v995_v48, 8.507059e+37 }
 0x345   :  { %1004 = vrot.lane.b32.xlu2 %v1252_v23, %s1274_s3 }
 0x347   :  { %v1258_v30 = vpop.eup %1257 }
 0x348   :  { %v1048_v31 = vmul.f32 %v1258_v30, %v1046_v27  ;;  %v1260_v33 = vpop.eup %1259  ;;  %vm1053_vm6 = vweird.f32 %v1258_v30 }
 0x349   :  { %v987_v35 = vmul.f32 %v1260_v33, %v985_v29  ;;  %vm1054_vm8 = vmor %vm1052_vm7, %vm1053_vm6  ;;  %vm992_vm10 = vweird.f32 %v1260_v33 }
 0x34a   :  { %v1049_v32 = vsub.f32 1.0, %v1048_v31  ;;  %vm993_vm12 = vmor %vm991_vm11, %vm992_vm10 }
 0x34b   :  { %v988_v37 = vsub.f32 1.0, %v987_v35 }
 0x34c   :  { %v1050_v34 = vmul.f32 %v1258_v30, %v1049_v32 }
 0x34d   :  { %v989_v41 = vmul.f32 %v1260_v33, %v988_v37 }
 0x34e   :  { %v1051_v36 = vadd.f32 %v1258_v30, %v1050_v34 }
 0x34f   :  { %v990_v46 = vadd.f32 %v1260_v33, %v989_v41 }
 0x350   :  { %v1055_v40 = vsel %vm1054_vm8, %v1258_v30, %v1051_v36  ;;  %v1178_v30 = vld [vmem:[%s1636_s7] sm:$0x3f] }
 0x351   :  { %v1060_v44 = vsel %vm1057_vm9, %v1059_v42, %v1055_v40  ;;  %v994_v50 = vsel %vm993_vm12, %v1260_v33, %v990_v46  ;;  %1231 = vmatpush.msk.msrb.mxu2 %vm1187_vm2, %v1178_v30  ;;  %v14_v33 = vstv %s1637_s8 }
 0x352   :  { %v999_v53 = vsel %vm996_vm13, %v998_v51, %v994_v50  ;;  %v1066_v56 = vmul.f32 %v1064_v55, %v1060_v44  ;;  %15 = vst [vmem:[#allocation2] sm:$0x1] %v14_v33 }
 0x353   :  { %v1002_v59 = vmul.f32 0.0, %v999_v53 }
 0x359   :  { %v1240_v36 = vld [vmem:[#allocation2] ss:$0 sm:$0xff] }
 0x397   :  { %v1069_v43 = vpop.permute.xlu2 %1068 }
 0x398   :  { %v1071_v45 = vmul.f32 %v1069_v43, %v1060_v44 }
 0x39a   :  { %1073 = vrot.lane.b32.xlu0 %v1071_v45, %s1275_s22 }
 0x39f   :  { %v1005_v52 = vpop.permute.xlu2 %1004 }
 0x3a0   :  { %v1007_v54 = vmul.f32 %v1005_v52, %v999_v53 }
 0x3a2   :  { %1009 = vrot.lane.b32.xlu1 %v1007_v54, %s1275_s22 }
 0x40c   :  { %v1074_v57 = vpop.permute.xlu0 %1073 }
 0x40d   :  { %v1076_v58 = vadd.f32 %v1074_v57, %v1066_v56 }
 0x40f   :  { %1261 = vtanh.f32 %v1076_v58 }
 0x414   :  { %v1010_v60 = vpop.permute.xlu1 %1009 }
 0x415   :  { %v1262_v61 = vpop.eup %1261  ;;  %v1012_v62 = vadd.f32 %v1010_v60, %v1002_v59 }
 0x416   :  { %1079 = vrot.lane.b32.xlu2 %v1262_v61, %s1276_s23 }
 0x417   :  { %1263 = vtanh.f32 %v1012_v62 }
 0x41d   :  { %v1264_v63 = vpop.eup %1263 }
 0x41e   :  { %1015 = vrot.lane.b32.xlu0 %v1264_v63, %s1276_s23 }
 0x470   :  { %v1080_v0 = vpop.permute.xlu2 %1079 }
 0x471   :  { %v1082_v1 = vmul.f32 %v1080_v0, %v1060_v44 }
 0x473   :  { %v1109_v2 = vrot.slane %v1082_v1, 2 }
 0x475   :  { %1110 = vrot.lane.b32.xlu2 %v1109_v2, %s1277_s25 }
 0x490   :  { %v1016_v3 = vpop.permute.xlu0 %1015 }
 0x491   :  { %v1018_v4 = vmul.f32 %v1016_v3, %v999_v53 }
 0x493   :  { %1084 = vrot.lane.b32.xlu1 %v1018_v4, %s1277_s25 }
 0x4cf   :  { %v1111_v5 = vpop.permute.xlu2 %1110 }
 0x4d0   :  { %1229 = vmatmul.msk.f32.vlgmr.msrb.gmra.mxu1 %vm861_vm5, %v1111_v5 }
 0x505   :  { %v1085_v6 = vpop.permute.xlu1 %1084 }
 0x506   :  { %1227 = vmatmul.msk.f32.vlgmr.msrb.gmra.mxu0 %vm861_vm5, %v1085_v6 }
 0x54d   :  { %v1131_v7 = vpop.f32.mrf.mxu1 }
 0x583   :  { %v1105_v8 = vpop.f32.mrf.mxu0 }
 0x584   :  { %v1132_v9 = vadd.f32 %v1131_v7, %v1105_v8 }
 0x586   :  { %v1134_v10 = vadd.f32 %v1600_v21, %v1132_v9 }
 0x588   :  { %1265 = vtanh.f32 %v1134_v10  ;;  %v1230_v12 = vmul.f32 -1.442695, %v1134_v10 }
 0x58a   :  { %1267 = vpow2.f32 %v1230_v12 }
 0x58e   :  { %v1266_v11 = vpop.eup %1265 }
 0x58f   :  { %1157 = vrot.lane.b32.xlu0 %v1266_v11, %s1274_s3 }
 0x590   :  { %v1268_v13 = vpop.eup %1267 }
 0x591   :  { %v1138_v14 = vadd.f32 1.0, %v1268_v13 }
 0x593   :  { %1269 = vrcp.f32 %v1138_v14  ;;  %v1150_v20 = vand.u32 2147483648, %v1138_v14  ;;  %vm1144_vm15 = vweird.f32 %v1138_v14  ;;  %v1148_v49 = vand.u32 2147483647, %v1138_v14 }
 0x595   :  { %v1151_v22 = vor.u32 1.1754944e-38, %v1150_v20  ;;  %vm1149_vm1 = vcmp.eq.f32.partialorder %v1148_v49, 8.507059e+37 }
 0x599   :  { %v1270_v15 = vpop.eup %1269 }
 0x59a   :  { %v1140_v16 = vmul.f32 %v1270_v15, %v1138_v14  ;;  %vm1145_vm14 = vweird.f32 %v1270_v15 }
 0x59b   :  { %vm1146_vm0 = vmor %vm1144_vm15, %vm1145_vm14 }
 0x59c   :  { %v1141_v17 = vsub.f32 1.0, %v1140_v16 }
 0x59e   :  { %v1142_v18 = vmul.f32 %v1270_v15, %v1141_v17 }
 0x5a0   :  { %v1143_v19 = vadd.f32 %v1270_v15, %v1142_v18 }
 0x5a2   :  { %v1147_v21 = vsel %vm1146_vm0, %v1270_v15, %v1143_v19 }
 0x5a3   :  { %v1152_v24 = vsel %vm1149_vm1, %v1151_v22, %v1147_v21 }
 0x5a4   :  { %v1155_v26 = vmul.f32 %v1152_v24, %v1012_v62 }
 0x601   :  { %v1158_v23 = vpop.permute.xlu0 %1157 }
 0x602   :  { %v1160_v25 = vmul.f32 %v1158_v23, %v1152_v24 }
 0x604   :  { %1162 = vrot.lane.b32.xlu1 %v1160_v25, %s1275_s22 }
 0x676   :  { %v1163_v27 = vpop.permute.xlu1 %1162 }
 0x677   :  { %v1165_v28 = vadd.f32 %v1163_v27, %v1155_v26 }
 0x679   :  { %1271 = vtanh.f32 %v1165_v28 }
 0x67f   :  { %v1272_v29 = vpop.eup %1271 }
 0x680   :  { %1168 = vrot.lane.b32.xlu2 %v1272_v29, %s1276_s23 }
 0x6da   :  { %v1169_v31 = vpop.permute.xlu2 %1168 }
 0x6db   :  { %v1171_v32 = vmul.f32 %v1169_v31, %v1152_v24 }
 0x6dd   :  { %1174 = vrot.lane.b32.xlu0 %v1171_v32, %s1274_s3 }
 0x74f   :  { %v1175_v34 = vpop.permute.xlu0 %1174 }
 0x750   :  { %v1177_v35 = vsel %vm861_vm5, %v1085_v6, %v1175_v34 }
 0x751   :  { %1232 = vmatmul.msk.f32.vlgmr.msrb.gmra.mxu2 %vm1183_vm3, %v1177_v35 }
 0x7d4   :  { %v1208_v37 = vpop.f32.mrf.mxu2 }
 0x7d5   :  { %v1209_v38 = vadd.f32 %v1240_v36, %v1208_v37 }
 0x7d7   :  { %1212 = vst.msk [vmem:[%s1638_s9] sm:$0x3] %vm1211_vm4, %v1209_v38 }

// kernel: deepvo_small_forward.2
= control target key start
LH: loop header
LB: loop body
LE: loop exit
PB: predicated region body
PF: predicated region fallthrough
CT: control target
= control target key end

     0   :  { %10 = vsyncpa [#allocation4], 0  ;;  %s8965_s21 = smov [#allocation3]   ;;  %s8966_s23 = smov 128   ;;  %s12672_s0 = inlined_call_operand.vmem [shape: f32[2,12,12,6], index: 0, kind: input, shape index: {}]   ;;  %s12673_s1 = inlined_call_operand.vmem [shape: f32[25,6,64], index: 1, kind: input, shape index: {}]   ;;  %s12674_s2 = inlined_call_operand.vmem [shape: f32[1,64], index: 2, kind: input, shape index: {}]   ;;  %s12675_s3 = inlined_call_operand.hbm [shape: f32[25,64,128], index: 3, kind: input, shape index: {}]   ;;  %s12676_s4 = inlined_call_operand.vmem [shape: f32[1,128], index: 4, kind: input, shape index: {}]   ;;  %s12677_s5 = inlined_call_operand.vmem [shape: f32[128,128], index: 5, kind: output, shape index: {}]  }
   0x1   :  { %s21_s20 = sshll.u32 %s12675_s3, 4  ;;  %s23_s22 = sshll.u32 %s8965_s21, 4  ;;  %s22_s20 = int_to_ptr.hbm [resolvable:$true] %s21_s20  ;;  %s24_s22 = int_to_ptr.vmem [resolvable:$true] %s23_s22 }
   0x2   :  { %s8967_s24 = smov 8  }
   0x3   :  { %29 = dma.hbm_to_vmem [thread:$0]  %s22_s20, 25600, %s24_s22, [#allocation4], %s8966_s23, %s8966_s23, %s8967_s24  }
   0x4   :  { %8963 = dma.done.wait [#allocation4], 25600  }
   0x5   :  { %8964 = vsyncadd [#allocation4], 4294941696  ;;  %vm120_vm0 = vcmask 1045504   ;;  %vm71_vm1 = vcmask 48128   ;;  %v7762_v0 = vld [vmem:[%s12673_s1 + $0x8] sm:$0x3f] }
   0x6   :  { %v52_v1 = vld [vmem:[%s12673_s1] sm:$0x3f]  ;;  %8931 = vmatpush.msk.msra.mxu2 %vm120_vm0, %v7762_v0  ;;  %v7797_v4 = vld [vmem:[%s12673_s1 + $0x10] sm:$0x3f]  ;;  %v7815_v5 = vld [vmem:[%s12673_s1 + $0x18] sm:$0x3f]  ;;  %7763 = vmatpush.msk.msra.mxu0 %vm120_vm0, %v7762_v0 }
   0x7   :  { %v61_v2 = vld [vmem:[%s12672_s0 + $0xc1] sm:$0xff]  ;;  %8932 = vmatpush.msk.msra.mxu3 %vm120_vm0, %v52_v1  ;;  %7780 = vmatpush.msk.msra.mxu1 %vm120_vm0, %v52_v1  ;;  %v9043_v9 = vld [vmem:[%s12672_s0 + $0xd1] sm:$0xff]  ;;  %vm3795_vm2 = vcmask 523264  }
   0x8   :  { %v44_v3 = vld [vmem:[%s12672_s0 + $0xc0] sm:$0xff]  ;;  %7772 = vmatmul.msk.f32.vlgmr.msra.gmra.mxu2 %vm71_vm1, %v61_v2  ;;  %v9048_v10 = vld [vmem:[%s12672_s0 + $0xd0] sm:$0xff]  ;;  %v7935_v26 = vld [vmem:[%s12673_s1 + $0x38] sm:$0x3f] }
   0x9   :  { %7789 = vmatmul.msk.f32.vlgmr.msra.gmra.mxu3 %vm71_vm1, %v44_v3  ;;  %v53_v6 = vld [vmem:[%s12672_s0 + $0x1] sm:$0xff]  ;;  %7798 = vmatpush.msk.msrb.mxu2 %vm120_vm0, %v7797_v4  ;;  %v9057_v11 = vld [vmem:[%s12672_s0 + $0x11] sm:$0xff] }
   0xa   :  { %7816 = vmatpush.msk.msrb.mxu3 %vm120_vm0, %v7815_v5  ;;  %v36_v7 = vld [vmem:[%s12672_s0] sm:$0xff]  ;;  %7764 = vmatmul.msk.f32.vlgmr.msra.gmra.mxu0 %vm71_vm1, %v53_v6  ;;  %v9062_v12 = vld [vmem:[%s12672_s0 + $0x10] sm:$0xff]  ;;  %v7867_v32 = vld [vmem:[%s12673_s1 + $0x28] sm:$0x3f] }
   0xb   :  { %v7833_v8 = vld [vmem:[%s12673_s1 + $0x20] sm:$0x3f]  ;;  %7781 = vmatmul.msk.f32.vlgmr.msra.gmra.mxu1 %vm71_vm1, %v36_v7  ;;  %v9099_v17 = vld [vmem:[%s12672_s0 + $0xf1] sm:$0xff] }
   0xc   :  { %7834 = vmatpush.msk.msrb.mxu0 %vm120_vm0, %v7833_v8  ;;  %v9071_v13 = vld [vmem:[%s12672_s0 + $0xe1] sm:$0xff]  ;;  %12720 = vst [vmem:[#allocation7_spill] sm:$0xff] %v9099_v17  ;;  %v9104_v18 = vld [vmem:[%s12672_s0 + $0xf0] sm:$0xff]  ;;  %7936 = vmatpush.msk.msra.mxu3 %vm120_vm0, %v7935_v26 }
   0xd   :  { %v9076_v14 = vld [vmem:[%s12672_s0 + $0xe0] sm:$0xff]  ;;  %v9113_v19 = vld [vmem:[%s12672_s0 + $0x31] sm:$0xff]  ;;  %7868 = vmatpush.msk.msrb.mxu1 %vm120_vm0, %v7867_v32 }
   0xe   :  { %v9085_v15 = vld [vmem:[%s12672_s0 + $0x21] sm:$0xff]  ;;  %v9118_v20 = vld [vmem:[%s12672_s0 + $0x30] sm:$0xff] }
   0xf   :  { %v9090_v16 = vld [vmem:[%s12672_s0 + $0x20] sm:$0xff]  ;;  %12721 = vst [vmem:[#allocation8_spill] sm:$0xff] %v9118_v20  ;;  %v7901_v25 = vld [vmem:[%s12673_s1 + $0x30] sm:$0x3f] }
  0x10   :  { %7773 = vmatmul.msk.f32.gmra.mxu2 %vm71_vm1, %v9043_v9  ;;  %12719 = vst [vmem:[#allocation6_spill] sm:$0xff] %v9090_v16  ;;  %v9127_v21 = vld [vmem:[%s12672_s0 + $0x101] sm:$0xff]  ;;  %v9163_v27 = vld [vmem:[%s12672_s0 + $0x111] sm:$0xff] }
  0x11   :  { %7790 = vmatmul.msk.f32.gmra.mxu3 %vm71_vm1, %v9048_v10  ;;  %12722 = vst [vmem:[#allocation9_spill] sm:$0xff] %v9127_v21  ;;  %v9132_v22 = vld [vmem:[%s12672_s0 + $0x100] sm:$0xff]  ;;  %7902 = vmatpush.msk.msra.mxu2 %vm120_vm0, %v7901_v25  ;;  %v9168_v28 = vld [vmem:[%s12672_s0 + $0x110] sm:$0xff] }
  0x12   :  { %7765 = vmatmul.msk.f32.gmra.mxu0 %vm71_vm1, %v9057_v11  ;;  %v9141_v23 = vld [vmem:[%s12672_s0 + $0x41] sm:$0xff]  ;;  %12724 = vst [vmem:[#allocation11_spill] sm:$0xff] %v9163_v27  ;;  %v9173_v29 = vld [vmem:[%s12672_s0 + $0x51] sm:$0xff] }
  0x13   :  { %7782 = vmatmul.msk.f32.gmra.mxu1 %vm71_vm1, %v9062_v12  ;;  %v9146_v24 = vld [vmem:[%s12672_s0 + $0x40] sm:$0xff]  ;;  %v41_v30 = vld [vmem:[%s12672_s0 + $0x50] sm:$0xff] }
  0x14   :  { %12723 = vst [vmem:[#allocation10_spill] sm:$0xff] %v9146_v24  ;;  %v7969_v31 = vld [vmem:[%s12673_s1 + $0x40] sm:$0x3f]  ;;  %v9221_v37 = vld [vmem:[%s12672_s0 + $0x131] sm:$0xff] }
  0x15   :  { %7970 = vmatpush.msk.msra.mxu0 %vm120_vm0, %v7969_v31  ;;  %v9196_v33 = vld [vmem:[%s12672_s0 + $0x121] sm:$0xff]  ;;  %12726 = vst [vmem:[#allocation13_spill] sm:$0xff] %v9221_v37  ;;  %v9226_v38 = vld [vmem:[%s12672_s0 + $0x130] sm:$0xff] }
  0x16   :  { %12725 = vst [vmem:[#allocation12_spill] sm:$0xff] %v9196_v33  ;;  %v9201_v34 = vld [vmem:[%s12672_s0 + $0x120] sm:$0xff]  ;;  %v9235_v39 = vld [vmem:[%s12672_s0 + $0x71] sm:$0xff] }
  0x17   :  { %v9210_v35 = vld [vmem:[%s12672_s0 + $0x61] sm:$0xff]  ;;  %v43_v40 = vld [vmem:[%s12672_s0 + $0x70] sm:$0xff] }
  0x18   :  { %7774 = vmatmul.msk.f32.gmra.mxu2 %vm71_vm1, %v9071_v13  ;;  %v42_v36 = vld [vmem:[%s12672_s0 + $0x60] sm:$0xff]  ;;  %v9260_v44 = vld [vmem:[%s12672_s0 + $0x12] sm:$0xff] }
  0x19   :  { %7791 = vmatmul.msk.f32.gmra.mxu3 %vm71_vm1, %v9076_v14  ;;  %v305_v41 = vld [vmem:[%s12672_s0 + $0x2] sm:$0xff]  ;;  %v9265_v45 = vld [vmem:[%s12672_s0 + $0x13] sm:$0xff] }
  0x1a   :  { %7766 = vmatmul.msk.f32.gmra.mxu0 %vm71_vm1, %v9085_v15  ;;  %v455_v42 = vld [vmem:[%s12672_s0 + $0x3] sm:$0xff]  ;;  %v9274_v46 = vld [vmem:[%s12672_s0 + $0x14] sm:$0xff] }
  0x1b   :  { %7783 = vmatmul.msk.f32.gmra.mxu1 %vm71_vm1, %v9090_v16  ;;  %v605_v43 = vld [vmem:[%s12672_s0 + $0x4] sm:$0xff]  ;;  %v9306_v50 = vld [vmem:[%s12672_s0 + $0x32] sm:$0xff] }
  0x1c   :  { %v9283_v47 = vld [vmem:[%s12672_s0 + $0x22] sm:$0xff]  ;;  %v9311_v51 = vld [vmem:[%s12672_s0 + $0x33] sm:$0xff] }
  0x1d   :  { %v9288_v48 = vld [vmem:[%s12672_s0 + $0x23] sm:$0xff]  ;;  %v9320_v52 = vld [vmem:[%s12672_s0 + $0x34] sm:$0xff] }
  0x1e   :  { %v9297_v49 = vld [vmem:[%s12672_s0 + $0x24] sm:$0xff]  ;;  %v9351_v56 = vld [vmem:[%s12672_s0 + $0x52] sm:$0xff] }
  0x1f   :  { %v9329_v53 = vld [vmem:[%s12672_s0 + $0x42] sm:$0xff]  ;;  %v9356_v57 = vld [vmem:[%s12672_s0 + $0x53] sm:$0xff] }
  0x20   :  { %7775 = vmatmul.msk.f32.gmra.mxu2 %vm71_vm1, %v9099_v17  ;;  %v9334_v54 = vld [vmem:[%s12672_s0 + $0x43] sm:$0xff]  ;;  %v9365_v58 = vld [vmem:[%s12672_s0 + $0x54] sm:$0xff] }
  0x21   :  { %7792 = vmatmul.msk.f32.gmra.mxu3 %vm71_vm1, %v9104_v18  ;;  %v9343_v55 = vld [vmem:[%s12672_s0 + $0x44] sm:$0xff]  ;;  %v9395_v62 = vld [vmem:[%s12672_s0 + $0x72] sm:$0xff] }
  0x22   :  { %7767 = vmatmul.msk.f32.gmra.mxu0 %vm71_vm1, %v9113_v19  ;;  %v9373_v59 = vld [vmem:[%s12672_s0 + $0x62] sm:$0xff]  ;;  %v9400_v63 = vld [vmem:[%s12672_s0 + $0x73] sm:$0xff] }
  0x23   :  { %7784 = vmatmul.msk.f32.gmra.mxu1 %vm71_vm1, %v9118_v20  ;;  %v9378_v60 = vld [vmem:[%s12672_s0 + $0x63] sm:$0xff]  ;;  %v9409_v0 = vld [vmem:[%s12672_s0 + $0x74] sm:$0xff] }
  0x24   :  { %v9387_v61 = vld [vmem:[%s12672_s0 + $0x64] sm:$0xff]  ;;  %v9443_v25 = vld [vmem:[%s12672_s0 + $0xd2] sm:$0xff] }
  0x25   :  { %v9414_v1 = vld [vmem:[%s12672_s0 + $0x80] sm:$0xff]  ;;  %v9448_v26 = vld [vmem:[%s12672_s0 + $0xd3] sm:$0xff] }
  0x26   :  { %12727 = vst [vmem:[#allocation14_spill] sm:$0xff] %v9414_v1  ;;  %v313_v2 = vld [vmem:[%s12672_s0 + $0xc2] sm:$0xff] }
  0x27   :  { %v463_v3 = vld [vmem:[%s12672_s0 + $0xc3] sm:$0xff] }
  0x28   :  { %7776 = vmatmul.msk.f32.gmra.mxu2 %vm71_vm1, %v9127_v21  ;;  %v613_v5 = vld [vmem:[%s12672_s0 + $0xc4] sm:$0xff] }
  0x29   :  { %7793 = vmatmul.msk.f32.gmra.mxu3 %vm71_vm1, %v9132_v22  ;;  %v9609_v21 = vld [vmem:[%s12672_s0 + $0x123] sm:$0xff] }
  0x2a   :  { %7768 = vmatmul.msk.f32.gmra.mxu0 %vm71_vm1, %v9141_v23  ;;  %12742 = vst [vmem:[#allocation29_spill] sm:$0xff] %v9609_v21 }
  0x2b   :  { %7785 = vmatmul.msk.f32.gmra.mxu1 %vm71_vm1, %v9146_v24 }
  0x30   :  { %7777 = vmatmul.msk.f32.gmra.mxu2 %vm71_vm1, %v9163_v27 }
  0x31   :  { %7794 = vmatmul.msk.f32.gmra.mxu3 %vm71_vm1, %v9168_v28 }
  0x32   :  { %7769 = vmatmul.msk.f32.gmra.mxu0 %vm71_vm1, %v9173_v29 }
  0x33   :  { %7786 = vmatmul.msk.f32.gmra.mxu1 %vm71_vm1, %v41_v30 }
  0x38   :  { %7778 = vmatmul.msk.f32.gmra.mxu2 %vm71_vm1, %v9196_v33  ;;  %v8071_v33 = vld [vmem:[%s12673_s1 + $0x58] sm:$0x3f] }
  0x39   :  { %7795 = vmatmul.msk.f32.gmra.mxu3 %vm71_vm1, %v9201_v34 }
  0x3a   :  { %7770 = vmatmul.msk.f32.gmra.mxu0 %vm71_vm1, %v9210_v35 }
  0x3b   :  { %7787 = vmatmul.msk.f32.gmra.mxu1 %vm71_vm1, %v42_v36 }
  0x40   :  { %7779 = vmatmul.msk.f32.gmra.mxu2 %vm71_vm1, %v9221_v37 }
  0x41   :  { %7796 = vmatmul.msk.f32.gmra.mxu3 %vm71_vm1, %v9226_v38 }
  0x42   :  { %7771 = vmatmul.msk.f32.gmra.mxu0 %vm71_vm1, %v9235_v39 }
  0x43   :  { %7788 = vmatmul.msk.f32.gmra.mxu1 %vm71_vm1, %v43_v40 }
  0x48   :  { %7799 = vmatmul.msk.f32.vlgmr.msrb.gmra.mxu2 %vm71_vm1, %v305_v41  ;;  %v9472_v41 = vld [vmem:[%s12672_s0 + $0xe2] sm:$0xff] }
  0x49   :  { %7817 = vmatmul.msk.f32.vlgmr.msrb.gmra.mxu3 %vm71_vm1, %v455_v42  ;;  %v9477_v42 = vld [vmem:[%s12672_s0 + $0xe3] sm:$0xff] }
  0x4a   :  { %7835 = vmatmul.msk.f32.vlgmr.msrb.gmra.mxu0 %vm71_vm1, %v605_v43  ;;  %8072 = vmatpush.msk.msrb.mxu3 %vm120_vm0, %v8071_v33  ;;  %v9575_v33 = vld [vmem:[%s12672_s0 + $0x113] sm:$0xff] }
  0x4b   :  { %7869 = vmatmul.msk.f32.vlgmr.msrb.gmra.mxu1 %vm71_vm1, %v9062_v12  ;;  %12738 = vst [vmem:[#allocation25_spill] sm:$0xff] %v9575_v33 }
  0x50   :  { %7800 = vmatmul.msk.f32.gmra.mxu2 %vm71_vm1, %v9260_v44 }
  0x51   :  { %7818 = vmatmul.msk.f32.gmra.mxu3 %vm71_vm1, %v9265_v45 }
  0x52   :  { %7836 = vmatmul.msk.f32.gmra.mxu0 %vm71_vm1, %v9274_v46 }
  0x53   :  { %7870 = vmatmul.msk.f32.gmra.mxu1 %vm71_vm1, %v9090_v16  ;;  %v9535_v16 = vld [vmem:[%s12672_s0 + $0x103] sm:$0xff] }
  0x54   :  { %12734 = vst [vmem:[#allocation21_spill] sm:$0xff] %v9535_v16 }
  0x58   :  { %7801 = vmatmul.msk.f32.gmra.mxu2 %vm71_vm1, %v9283_v47 }
  0x59   :  { %7819 = vmatmul.msk.f32.gmra.mxu3 %vm71_vm1, %v9288_v48 }
  0x5a   :  { %7837 = vmatmul.msk.f32.gmra.mxu0 %vm71_vm1, %v9297_v49 }
  0x5b   :  { %7871 = vmatmul.msk.f32.gmra.mxu1 %vm71_vm1, %v9118_v20  ;;  %v9530_v20 = vld [vmem:[%s12672_s0 + $0x102] sm:$0xff] }
  0x5c   :  { %12733 = vst [vmem:[#allocation20_spill] sm:$0xff] %v9530_v20 }
  0x60   :  { %7802 = vmatmul.msk.f32.gmra.mxu2 %vm71_vm1, %v9306_v50 }
  0x61   :  { %7820 = vmatmul.msk.f32.gmra.mxu3 %vm71_vm1, %v9311_v51 }
  0x62   :  { %7838 = vmatmul.msk.f32.gmra.mxu0 %vm71_vm1, %v9320_v52 }
  0x63   :  { %7872 = vmatmul.msk.f32.gmra.mxu1 %vm71_vm1, %v9146_v24 }
  0x68   :  { %7803 = vmatmul.msk.f32.gmra.mxu2 %vm71_vm1, %v9329_v53 }
  0x69   :  { %7821 = vmatmul.msk.f32.gmra.mxu3 %vm71_vm1, %v9334_v54 }
  0x6a   :  { %7839 = vmatmul.msk.f32.gmra.mxu0 %vm71_vm1, %v9343_v55 }
  0x6b   :  { %7873 = vmatmul.msk.f32.gmra.mxu1 %vm71_vm1, %v41_v30 }
  0x70   :  { %7804 = vmatmul.msk.f32.gmra.mxu2 %vm71_vm1, %v9351_v56 }
  0x71   :  { %7822 = vmatmul.msk.f32.gmra.mxu3 %vm71_vm1, %v9356_v57 }
  0x72   :  { %7840 = vmatmul.msk.f32.gmra.mxu0 %vm71_vm1, %v9365_v58 }
  0x73   :  { %7874 = vmatmul.msk.f32.gmra.mxu1 %vm71_vm1, %v42_v36 }
  0x78   :  { %7805 = vmatmul.msk.f32.gmra.mxu2 %vm71_vm1, %v9373_v59 }
  0x79   :  { %7823 = vmatmul.msk.f32.gmra.mxu3 %vm71_vm1, %v9378_v60 }
  0x7a   :  { %7841 = vmatmul.msk.f32.gmra.mxu0 %vm71_vm1, %v9387_v61 }
  0x7b   :  { %7875 = vmatmul.msk.f32.gmra.mxu1 %vm71_vm1, %v43_v40 }
  0x80   :  { %7806 = vmatmul.msk.f32.gmra.mxu2 %vm71_vm1, %v9395_v62 }
  0x81   :  { %7824 = vmatmul.msk.f32.gmra.mxu3 %vm71_vm1, %v9400_v63 }
  0x82   :  { %7842 = vmatmul.msk.f32.gmra.mxu0 %vm71_vm1, %v9409_v0 }
  0x83   :  { %7876 = vmatmul.msk.f32.gmra.mxu1 %vm71_vm1, %v9414_v1 }
  0x87   :  { %v9428_v4 = vpop.f32.mrf.mxu0 }
  0x88   :  { %7807 = vmatmul.msk.f32.gmra.mxu2 %vm71_vm1, %v313_v2  ;;  %v9433_v6 = vpop.f32.mrf.mxu1 }
  0x89   :  { %7825 = vmatmul.msk.f32.gmra.mxu3 %vm71_vm1, %v463_v3 }
  0x8a   :  { %7843 = vmatmul.msk.f32.gmra.mxu0 %vm71_vm1, %v613_v5 }
  0x8b   :  { %v165_v7 = vpop.f32.mrf.mxu2  ;;  %7877 = vmatmul.msk.f32.gmra.mxu1 %vm71_vm1, %v9048_v10  ;;  %v9459_v10 = vld [vmem:[%s12672_s0 + $0xd4] sm:$0xff] }
  0x8c   :  { %v281_v8 = vpop.f32.mrf.mxu3 }
  0x8d   :  { %v9438_v12 = vadd.f32 %v281_v8, %v165_v7  ;;  %v9501_v8 = vld [vmem:[%s12672_s0 + $0xf2] sm:$0xff] }
  0x8e   :  { %12729 = vst [vmem:[#allocation16_spill] sm:$0xff] %v9501_v8 }
  0x8f   :  { %v9454_v30 = vpop.f32.mrf.mxu0 }
  0x90   :  { %7808 = vmatmul.msk.f32.gmra.mxu2 %vm71_vm1, %v9443_v25  ;;  %v9461_v31 = vpop.f32.mrf.mxu1 }
  0x91   :  { %7826 = vmatmul.msk.f32.gmra.mxu3 %vm71_vm1, %v9448_v26 }
  0x92   :  { %7844 = vmatmul.msk.f32.gmra.mxu0 %vm71_vm1, %v9459_v10 }
  0x93   :  { %v168_v32 = vpop.f32.mrf.mxu2  ;;  %7878 = vmatmul.msk.f32.gmra.mxu1 %vm71_vm1, %v9076_v14  ;;  %v9488_v14 = vld [vmem:[%s12672_s0 + $0xe4] sm:$0xff] }
  0x94   :  { %v284_v36 = vpop.f32.mrf.mxu3 }
  0x95   :  { %v9467_v40 = vadd.f32 %v284_v36, %v168_v32  ;;  %v9506_v32 = vld [vmem:[%s12672_s0 + $0xf3] sm:$0xff] }
  0x96   :  { %12730 = vst [vmem:[#allocation17_spill] sm:$0xff] %v9506_v32 }
  0x97   :  { %v9483_v43 = vpop.f32.mrf.mxu0 }
  0x98   :  { %7809 = vmatmul.msk.f32.gmra.mxu2 %vm71_vm1, %v9472_v41  ;;  %v9490_v2 = vpop.f32.mrf.mxu1 }
  0x99   :  { %7827 = vmatmul.msk.f32.gmra.mxu3 %vm71_vm1, %v9477_v42 }
  0x9a   :  { %7845 = vmatmul.msk.f32.gmra.mxu0 %vm71_vm1, %v9488_v14 }
  0x9b   :  { %v171_v3 = vpop.f32.mrf.mxu2  ;;  %7879 = vmatmul.msk.f32.gmra.mxu1 %vm71_vm1, %v9104_v18  ;;  %v9517_v18 = vld [vmem:[%s12672_s0 + $0xf4] sm:$0xff] }
  0x9c   :  { %v287_v5 = vpop.f32.mrf.mxu3  ;;  %12731 = vst [vmem:[#allocation18_spill] sm:$0xff] %v9517_v18 }
  0x9d   :  { %v9496_v7 = vadd.f32 %v287_v5, %v171_v3 }
  0x9f   :  { %12728 = vst [vmem:[#allocation15_spill] sm:$0xff] %v9496_v7  ;;  %v9512_v36 = vpop.f32.mrf.mxu0 }
  0xa0   :  { %7810 = vmatmul.msk.f32.gmra.mxu2 %vm71_vm1, %v9501_v8  ;;  %v9519_v3 = vpop.f32.mrf.mxu1 }
  0xa1   :  { %7828 = vmatmul.msk.f32.gmra.mxu3 %vm71_vm1, %v9506_v32  ;;  %v258_v32 = vadd.f32 %v9433_v6, %v9428_v4  ;;  %v261_v4 = vadd.f32 %v9461_v31, %v9454_v30 }
  0xa2   :  { %7846 = vmatmul.msk.f32.gmra.mxu0 %vm71_vm1, %v9517_v18 }
  0xa3   :  { %v174_v5 = vpop.f32.mrf.mxu2  ;;  %7880 = vmatmul.msk.f32.gmra.mxu1 %vm71_vm1, %v9132_v22  ;;  %v9546_v22 = vld [vmem:[%s12672_s0 + $0x104] sm:$0xff] }
  0xa4   :  { %v290_v1 = vpop.f32.mrf.mxu3  ;;  %12735 = vst [vmem:[#allocation22_spill] sm:$0xff] %v9546_v22 }
  0xa5   :  { %v9525_v24 = vadd.f32 %v290_v1, %v174_v5  ;;  %v8037_v5 = vld [vmem:[%s12673_s1 + $0x50] sm:$0x3f] }
  0xa6   :  { %8038 = vmatpush.msk.msrb.mxu2 %vm120_vm0, %v8037_v5  ;;  %v9570_v5 = vld [vmem:[%s12672_s0 + $0x112] sm:$0xff] }
  0xa7   :  { %12732 = vst [vmem:[#allocation19_spill] sm:$0xff] %v9525_v24  ;;  %v9541_v37 = vpop.f32.mrf.mxu0 }
  0xa8   :  { %7811 = vmatmul.msk.f32.gmra.mxu2 %vm71_vm1, %v9530_v20  ;;  %v9548_v1 = vpop.f32.mrf.mxu1  ;;  %v8003_v20 = vld [vmem:[%s12673_s1 + $0x48] sm:$0x3f]  ;;  %12737 = vst [vmem:[#allocation24_spill] sm:$0xff] %v9570_v5 }
  0xa9   :  { %7829 = vmatmul.msk.f32.gmra.mxu3 %vm71_vm1, %v9535_v16  ;;  %8004 = vmatpush.msk.msra.mxu1 %vm120_vm0, %v8003_v20 }
  0xaa   :  { %7847 = vmatmul.msk.f32.gmra.mxu0 %vm71_vm1, %v9546_v22 }
  0xab   :  { %v177_v27 = vpop.f32.mrf.mxu2  ;;  %7881 = vmatmul.msk.f32.gmra.mxu1 %vm71_vm1, %v9168_v28 }
  0xac   :  { %v293_v24 = vpop.f32.mrf.mxu3 }
  0xad   :  { %v9562_v16 = vadd.f32 %v293_v24, %v177_v27  ;;  %v9587_v27 = vld [vmem:[%s12672_s0 + $0x114] sm:$0xff] }
  0xae   :  { %12739 = vst [vmem:[#allocation26_spill] sm:$0xff] %v9587_v27 }
  0xaf   :  { %12736 = vst [vmem:[#allocation23_spill] sm:$0xff] %v9562_v16  ;;  %v9582_v24 = vpop.f32.mrf.mxu0  ;;  %v8105_v16 = vld [vmem:[%s12673_s1 + $0x60] sm:$0x3f] }
  0xb0   :  { %7812 = vmatmul.msk.f32.gmra.mxu2 %vm71_vm1, %v9570_v5  ;;  %v9589_v28 = vpop.f32.mrf.mxu1  ;;  %8106 = vmatpush.msk.msrb.mxu0 %vm120_vm0, %v8105_v16  ;;  %v9604_v5 = vld [vmem:[%s12672_s0 + $0x122] sm:$0xff] }
  0xb1   :  { %7830 = vmatmul.msk.f32.gmra.mxu3 %vm71_vm1, %v9575_v33  ;;  %12741 = vst [vmem:[#allocation28_spill] sm:$0xff] %v9604_v5  ;;  %v9620_v16 = vld [vmem:[%s12672_s0 + $0x124] sm:$0xff] }
  0xb2   :  { %7848 = vmatmul.msk.f32.gmra.mxu0 %vm71_vm1, %v9587_v27  ;;  %12743 = vst [vmem:[#allocation30_spill] sm:$0xff] %v9620_v16  ;;  %v9638_v27 = vld [vmem:[%s12672_s0 + $0x133] sm:$0xff] }
  0xb3   :  { %v180_v20 = vpop.f32.mrf.mxu2  ;;  %7882 = vmatmul.msk.f32.gmra.mxu1 %vm71_vm1, %v9201_v34  ;;  %12746 = vst [vmem:[#allocation33_spill] sm:$0xff] %v9638_v27 }
  0xb4   :  { %v296_v22 = vpop.f32.mrf.mxu3 }
  0xb5   :  { %v9598_v33 = vadd.f32 %v296_v22, %v180_v20 }
  0xb7   :  { %12740 = vst [vmem:[#allocation27_spill] sm:$0xff] %v9598_v33  ;;  %v9615_v34 = vpop.f32.mrf.mxu0 }
  0xb8   :  { %7813 = vmatmul.msk.f32.gmra.mxu2 %vm71_vm1, %v9604_v5  ;;  %v9622_v22 = vpop.f32.mrf.mxu1 }
  0xb9   :  { %7831 = vmatmul.msk.f32.gmra.mxu3 %vm71_vm1, %v9609_v21  ;;  %v9633_v21 = vld [vmem:[%s12672_s0 + $0x132] sm:$0xff] }
  0xba   :  { %7849 = vmatmul.msk.f32.gmra.mxu0 %vm71_vm1, %v9620_v16  ;;  %12745 = vst [vmem:[#allocation32_spill] sm:$0xff] %v9633_v21 }
  0xbb   :  { %v183_v20 = vpop.f32.mrf.mxu2  ;;  %7883 = vmatmul.msk.f32.gmra.mxu1 %vm71_vm1, %v9226_v38  ;;  %v9649_v38 = vld [vmem:[%s12672_s0 + $0x134] sm:$0xff] }
  0xbc   :  { %v299_v33 = vpop.f32.mrf.mxu3 }
  0xbd   :  { %v9628_v5 = vadd.f32 %v299_v33, %v183_v20  ;;  %v9656_v20 = vld [vmem:[%s12672_s0 + $0x140] sm:$0xff] }
  0xbe   :  { %12747 = vst [vmem:[#allocation34_spill] sm:$0xff] %v9656_v20 }
  0xbf   :  { %12744 = vst [vmem:[#allocation31_spill] sm:$0xff] %v9628_v5  ;;  %v9644_v16 = vpop.f32.mrf.mxu0 }
  0xc0   :  { %7814 = vmatmul.msk.f32.gmra.mxu2 %vm71_vm1, %v9633_v21  ;;  %v9651_v33 = vpop.f32.mrf.mxu1 }
  0xc1   :  { %7832 = vmatmul.msk.f32.gmra.mxu3 %vm71_vm1, %v9638_v27 }
  0xc2   :  { %7850 = vmatmul.msk.f32.gmra.mxu0 %vm71_vm1, %v9649_v38 }
  0xc3   :  { %v186_v5 = vpop.f32.mrf.mxu2  ;;  %7884 = vmatmul.msk.f32.gmra.mxu1 %vm71_vm1, %v9656_v20 }
  0xc4   :  { %v302_v7 = vpop.f32.mrf.mxu3 }
  0xc5   :  { %v9662_v27 = vadd.f32 %v302_v7, %v186_v5 }
  0xc7   :  { %12748 = vst [vmem:[#allocation35_spill] sm:$0xff] %v9662_v27  ;;  %v691_v21 = vpop.f32.mrf.mxu0 }
  0xc8   :  { %7903 = vmatmul.msk.f32.vlgmr.msra.gmra.mxu2 %vm71_vm1, %v9057_v11  ;;  %v842_v18 = vpop.f32.mrf.mxu1 }
  0xc9   :  { %7937 = vmatmul.msk.f32.vlgmr.msra.gmra.mxu3 %vm71_vm1, %v9260_v44 }
  0xca   :  { %7971 = vmatmul.msk.f32.vlgmr.msra.gmra.mxu0 %vm71_vm1, %v9265_v45 }
  0xcb   :  { %v391_v8 = vpop.f32.mrf.mxu2  ;;  %8005 = vmatmul.msk.f32.vlgmr.msra.gmra.mxu1 %vm71_vm1, %v9274_v46 }
  0xcc   :  { %v541_v17 = vpop.f32.mrf.mxu3  ;;  %v439_v7 = vadd.f32 %v391_v8, %v258_v32  ;;  %v264_v8 = vadd.f32 %v9490_v2, %v9483_v43 }
  0xce   :  { %v589_v5 = vadd.f32 %v541_v17, %v439_v7 }
  0xcf   :  { %v694_v44 = vpop.f32.mrf.mxu0 }
  0xd0   :  { %7904 = vmatmul.msk.f32.gmra.mxu2 %vm71_vm1, %v9085_v15  ;;  %v739_v11 = vadd.f32 %v691_v21, %v589_v5  ;;  %v845_v20 = vpop.f32.mrf.mxu1 }
  0xd1   :  { %7938 = vmatmul.msk.f32.gmra.mxu3 %vm71_vm1, %v9283_v47 }
  0xd2   :  { %v9680_v6 = vadd.f32 %v842_v18, %v739_v11  ;;  %7972 = vmatmul.msk.f32.gmra.mxu0 %vm71_vm1, %v9288_v48 }
  0xd3   :  { %v394_v45 = vpop.f32.mrf.mxu2  ;;  %8006 = vmatmul.msk.f32.gmra.mxu1 %vm71_vm1, %v9297_v49 }
  0xd4   :  { %v544_v27 = vpop.f32.mrf.mxu3  ;;  %v440_v17 = vadd.f32 %v394_v45, %v261_v4 }
  0xd6   :  { %v590_v21 = vadd.f32 %v544_v27, %v440_v17  ;;  %v270_v17 = vadd.f32 %v9548_v1, %v9541_v37 }
  0xd7   :  { %v697_v30 = vpop.f32.mrf.mxu0 }
  0xd8   :  { %7905 = vmatmul.msk.f32.gmra.mxu2 %vm71_vm1, %v9113_v19  ;;  %v740_v46 = vadd.f32 %v694_v44, %v590_v21  ;;  %v848_v31 = vpop.f32.mrf.mxu1 }
  0xd9   :  { %7939 = vmatmul.msk.f32.gmra.mxu3 %vm71_vm1, %v9306_v50 }
  0xda   :  { %v9692_v32 = vadd.f32 %v845_v20, %v740_v46  ;;  %7973 = vmatmul.msk.f32.gmra.mxu0 %vm71_vm1, %v9311_v51  ;;  %v267_v20 = vadd.f32 %v9519_v3, %v9512_v36 }
  0xdb   :  { %v397_v18 = vpop.f32.mrf.mxu2  ;;  %8007 = vmatmul.msk.f32.gmra.mxu1 %vm71_vm1, %v9320_v52 }
  0xdc   :  { %v547_v7 = vpop.f32.mrf.mxu3  ;;  %v441_v49 = vadd.f32 %v397_v18, %v264_v8  ;;  %v273_v8 = vadd.f32 %v9589_v28, %v9582_v24 }
  0xde   :  { %v591_v27 = vadd.f32 %v547_v7, %v441_v49 }
  0xdf   :  { %v700_v43 = vpop.f32.mrf.mxu0 }
  0xe0   :  { %7906 = vmatmul.msk.f32.gmra.mxu2 %vm71_vm1, %v9141_v23  ;;  %v741_v5 = vadd.f32 %v697_v30, %v591_v27  ;;  %v851_v2 = vpop.f32.mrf.mxu1 }
  0xe1   :  { %7940 = vmatmul.msk.f32.gmra.mxu3 %vm71_vm1, %v9329_v53 }
  0xe2   :  { %v9704_v11 = vadd.f32 %v848_v31, %v741_v5  ;;  %7974 = vmatmul.msk.f32.gmra.mxu0 %vm71_vm1, %v9334_v54  ;;  %v276_v5 = vadd.f32 %v9622_v22, %v9615_v34  ;;  %v9754_v34 = vld [vmem:[%s12672_s0 + $0x82] sm:$0xff] }
  0xe3   :  { %v400_v44 = vpop.f32.mrf.mxu2  ;;  %8008 = vmatmul.msk.f32.gmra.mxu1 %vm71_vm1, %v9343_v55 }
  0xe4   :  { %v550_v4 = vpop.f32.mrf.mxu3  ;;  %v442_v23 = vadd.f32 %v400_v44, %v267_v20 }
  0xe6   :  { %v592_v52 = vadd.f32 %v550_v4, %v442_v23  ;;  %v9763_v4 = vld [vmem:[%s12672_s0 + $0x83] sm:$0xff] }
  0xe7   :  { %v703_v36 = vpop.f32.mrf.mxu0 }
  0xe8   :  { %7907 = vmatmul.msk.f32.gmra.mxu2 %vm71_vm1, %v9173_v29  ;;  %v742_v45 = vadd.f32 %v700_v43, %v592_v52  ;;  %v854_v3 = vpop.f32.mrf.mxu1  ;;  %v9768_v52 = vld [vmem:[%s12672_s0 + $0x84] sm:$0xff] }
  0xe9   :  { %7941 = vmatmul.msk.f32.gmra.mxu3 %vm71_vm1, %v9351_v56 }
  0xea   :  { %v9716_v21 = vadd.f32 %v851_v2, %v742_v45  ;;  %7975 = vmatmul.msk.f32.gmra.mxu0 %vm71_vm1, %v9356_v57  ;;  %v279_v45 = vadd.f32 %v9651_v33, %v9644_v16 }
  0xeb   :  { %v403_v46 = vpop.f32.mrf.mxu2  ;;  %8009 = vmatmul.msk.f32.gmra.mxu1 %vm71_vm1, %v9365_v58 }
  0xec   :  { %v553_v30 = vpop.f32.mrf.mxu3  ;;  %v443_v29 = vadd.f32 %v403_v46, %v270_v17 }
  0xee   :  { %v593_v55 = vadd.f32 %v553_v30, %v443_v29 }
  0xef   :  { %v706_v37 = vpop.f32.mrf.mxu0 }
  0xf0   :  { %7908 = vmatmul.msk.f32.gmra.mxu2 %vm71_vm1, %v9210_v35  ;;  %v743_v31 = vadd.f32 %v703_v36, %v593_v55  ;;  %v857_v1 = vpop.f32.mrf.mxu1 }
  0xf1   :  { %7942 = vmatmul.msk.f32.gmra.mxu3 %vm71_vm1, %v9373_v59 }
  0xf2   :  { %v9728_v18 = vadd.f32 %v854_v3, %v743_v31  ;;  %7976 = vmatmul.msk.f32.gmra.mxu0 %vm71_vm1, %v9378_v60 }
  0xf3   :  { %v406_v7 = vpop.f32.mrf.mxu2  ;;  %8010 = vmatmul.msk.f32.gmra.mxu1 %vm71_vm1, %v9387_v61  ;;  %v9749_v61 = vld [vmem:[%s12672_s0 + $0x81] sm:$0xff] }
  0xf4   :  { %v556_v49 = vpop.f32.mrf.mxu3  ;;  %v444_v35 = vadd.f32 %v406_v7, %v273_v8 }
  0xf6   :  { %v594_v58 = vadd.f32 %v556_v49, %v444_v35 }
  0xf7   :  { %v709_v24 = vpop.f32.mrf.mxu0 }
  0xf8   :  { %7909 = vmatmul.msk.f32.gmra.mxu2 %vm71_vm1, %v9235_v39  ;;  %v744_v27 = vadd.f32 %v706_v37, %v594_v58  ;;  %v860_v28 = vpop.f32.mrf.mxu1 }
  0xf9   :  { %7943 = vmatmul.msk.f32.gmra.mxu3 %vm71_vm1, %v9395_v62 }
  0xfa   :  { %v9740_v43 = vadd.f32 %v857_v1, %v744_v27  ;;  %7977 = vmatmul.msk.f32.gmra.mxu0 %vm71_vm1, %v9400_v63  ;;  %v12750_v27 = vld [vmem:[#allocation16_spill] sm:$0xff] }
  0xfb   :  { %v409_v2 = vpop.f32.mrf.mxu2  ;;  %8011 = vmatmul.msk.f32.gmra.mxu1 %vm71_vm1, %v9409_v0 }
  0xfc   :  { %v559_v20 = vpop.f32.mrf.mxu3  ;;  %v445_v39 = vadd.f32 %v409_v2, %v276_v5 }
  0xfe   :  { %v595_v22 = vadd.f32 %v559_v20, %v445_v39  ;;  %v12751_v39 = vld [vmem:[#allocation17_spill] sm:$0xff] }
  0xff   :  { %v712_v0 = vpop.f32.mrf.mxu0 }
 0x100   :  { %7910 = vmatmul.msk.f32.gmra.mxu2 %vm71_vm1, %v9749_v61  ;;  %v745_v44 = vadd.f32 %v709_v24, %v595_v22  ;;  %v863_v23 = vpop.f32.mrf.mxu1 }
 0x101   :  { %7944 = vmatmul.msk.f32.gmra.mxu3 %vm71_vm1, %v9754_v34 }
 0x102   :  { %v9772_v36 = vadd.f32 %v860_v28, %v745_v44  ;;  %7978 = vmatmul.msk.f32.gmra.mxu0 %vm71_vm1, %v9763_v4 }
 0x103   :  { %v412_v3 = vpop.f32.mrf.mxu2  ;;  %8012 = vmatmul.msk.f32.gmra.mxu1 %vm71_vm1, %v9768_v52 }
 0x104   :  { %v562_v17 = vpop.f32.mrf.mxu3  ;;  %v446_v46 = vadd.f32 %v412_v3, %v279_v45  ;;  %v12755_v45 = vld [vmem:[#allocation20_spill] sm:$0xff] }
 0x106   :  { %v596_v30 = vadd.f32 %v562_v17, %v446_v46 }
 0x107   :  { %v715_v16 = vpop.f32.mrf.mxu0 }
 0x108   :  { %7911 = vmatmul.msk.f32.gmra.mxu2 %vm71_vm1, %v9043_v9  ;;  %v746_v29 = vadd.f32 %v712_v0, %v596_v30  ;;  %v866_v33 = vpop.f32.mrf.mxu1  ;;  %v12754_v0 = vld [vmem:[#allocation9_spill] sm:$0xff] }
 0x109   :  { %7945 = vmatmul.msk.f32.gmra.mxu3 %vm71_vm1, %v9443_v25 }
 0x10a   :  { %v9782_v55 = vadd.f32 %v863_v23, %v746_v29  ;;  %7979 = vmatmul.msk.f32.gmra.mxu0 %vm71_vm1, %v9448_v26 }
 0x10b   :  { %v415_v31 = vpop.f32.mrf.mxu2  ;;  %8013 = vmatmul.msk.f32.gmra.mxu1 %vm71_vm1, %v9459_v10 }
 0x10c   :  { %v565_v37 = vpop.f32.mrf.mxu3  ;;  %v447_v1 = vadd.f32 %v415_v31, %v9438_v12  ;;  %v12758_v31 = vld [vmem:[#allocation19_spill] sm:$0xff] }
 0x10e   :  { %v597_v8 = vadd.f32 %v565_v37, %v447_v1 }
 0x10f   :  { %v718_v25 = vpop.f32.mrf.mxu0 }
 0x110   :  { %7912 = vmatmul.msk.f32.gmra.mxu2 %vm71_vm1, %v9071_v13  ;;  %v747_v9 = vadd.f32 %v715_v16, %v597_v8  ;;  %v869_v7 = vpop.f32.mrf.mxu1  ;;  %v12749_v13 = vld [vmem:[#allocation7_spill] sm:$0xff]  ;;  %v12756_v16 = vld [vmem:[#allocation21_spill] sm:$0xff] }
 0x111   :  { %7946 = vmatmul.msk.f32.gmra.mxu3 %vm71_vm1, %v9472_v41  ;;  %v12759_v8 = vld [vmem:[#allocation11_spill] sm:$0xff] }
 0x112   :  { %v9793_v49 = vadd.f32 %v866_v33, %v747_v9  ;;  %7980 = vmatmul.msk.f32.gmra.mxu0 %vm71_vm1, %v9477_v42  ;;  %v12757_v33 = vld [vmem:[#allocation22_spill] sm:$0xff] }
 0x113   :  { %v418_v35 = vpop.f32.mrf.mxu2  ;;  %8014 = vmatmul.msk.f32.gmra.mxu1 %vm71_vm1, %v9488_v14  ;;  %v12752_v14 = vld [vmem:[#allocation18_spill] sm:$0xff] }
 0x114   :  { %v568_v58 = vpop.f32.mrf.mxu3  ;;  %v448_v12 = vadd.f32 %v418_v35, %v9467_v40  ;;  %v12753_v40 = vld [vmem:[#allocation15_spill] sm:$0xff] }
 0x116   :  { %v598_v26 = vadd.f32 %v568_v58, %v448_v12  ;;  %v8173_v58 = vld [vmem:[%s12673_s1 + $0x70] sm:$0x3f] }
 0x117   :  { %v721_v24 = vpop.f32.mrf.mxu0  ;;  %8174 = vmatpush.msk.msra.mxu2 %vm120_vm0, %v8173_v58  ;;  %v12770_v58 = vld [vmem:[#allocation32_spill] sm:$0xff] }
 0x118   :  { %7913 = vmatmul.msk.f32.gmra.mxu2 %vm71_vm1, %v12749_v13  ;;  %v748_v10 = vadd.f32 %v718_v25, %v598_v26  ;;  %v872_v28 = vpop.f32.mrf.mxu1  ;;  %v12760_v25 = vld [vmem:[#allocation24_spill] sm:$0xff]  ;;  %v8207_v26 = vld [vmem:[%s12673_s1 + $0x78] sm:$0x3f] }
 0x119   :  { %7947 = vmatmul.msk.f32.gmra.mxu3 %vm71_vm1, %v12750_v27 }
 0x11a   :  { %v9804_v5 = vadd.f32 %v869_v7, %v748_v10  ;;  %7981 = vmatmul.msk.f32.gmra.mxu0 %vm71_vm1, %v12751_v39  ;;  %8208 = vmatpush.msk.msra.mxu3 %vm120_vm0, %v8207_v26 }
 0x11b   :  { %v421_v2 = vpop.f32.mrf.mxu2  ;;  %8015 = vmatmul.msk.f32.gmra.mxu1 %vm71_vm1, %v12752_v14  ;;  %v8139_v14 = vld [vmem:[%s12673_s1 + $0x68] sm:$0x3f] }
 0x11c   :  { %v571_v20 = vpop.f32.mrf.mxu3  ;;  %v449_v22 = vadd.f32 %v421_v2, %v12753_v40  ;;  %v12763_v2 = vld [vmem:[#allocation23_spill] sm:$0xff]  ;;  %8140 = vmatpush.msk.msrb.mxu1 %vm120_vm0, %v8139_v14 }
 0x11d   :  { %v12772_v14 = vld [vmem:[#allocation31_spill] sm:$0xff] }
 0x11e   :  { %v599_v44 = vadd.f32 %v571_v20, %v449_v22  ;;  %v12764_v22 = vld [vmem:[#allocation12_spill] sm:$0xff] }
 0x11f   :  { %v724_v3 = vpop.f32.mrf.mxu0 }
 0x120   :  { %7914 = vmatmul.msk.f32.gmra.mxu2 %vm71_vm1, %v12754_v0  ;;  %v749_v23 = vadd.f32 %v721_v24, %v599_v44  ;;  %v875_v17 = vpop.f32.mrf.mxu1  ;;  %v12761_v24 = vld [vmem:[#allocation25_spill] sm:$0xff]  ;;  %v12765_v0 = vld [vmem:[#allocation28_spill] sm:$0xff] }
 0x121   :  { %7948 = vmatmul.msk.f32.gmra.mxu3 %vm71_vm1, %v12755_v45 }
 0x122   :  { %v9815_v46 = vadd.f32 %v872_v28, %v749_v23  ;;  %7982 = vmatmul.msk.f32.gmra.mxu0 %vm71_vm1, %v12756_v16  ;;  %v12762_v28 = vld [vmem:[#allocation26_spill] sm:$0xff] }
 0x123   :  { %v424_v30 = vpop.f32.mrf.mxu2  ;;  %8016 = vmatmul.msk.f32.gmra.mxu1 %vm71_vm1, %v12757_v33 }
 0x124   :  { %v574_v29 = vpop.f32.mrf.mxu3  ;;  %v450_v37 = vadd.f32 %v424_v30, %v12758_v31  ;;  %v8241_v30 = vld [vmem:[%s12673_s1 + $0x80] sm:$0x3f]  ;;  %v12766_v31 = vld [vmem:[#allocation29_spill] sm:$0xff] }
 0x125   :  { %8242 = vmatpush.msk.msra.mxu0 %vm120_vm0, %v8241_v30  ;;  %v9888_v30 = vld [vmem:[%s12672_s0 + $0x143] sm:$0xff] }
 0x126   :  { %v600_v1 = vadd.f32 %v574_v29, %v450_v37  ;;  %v12767_v37 = vld [vmem:[#allocation30_spill] sm:$0xff] }
 0x127   :  { %v727_v7 = vpop.f32.mrf.mxu0 }
 0x128   :  { %7915 = vmatmul.msk.f32.gmra.mxu2 %vm71_vm1, %v12759_v8  ;;  %v750_v9 = vadd.f32 %v724_v3, %v600_v1  ;;  %v878_v35 = vpop.f32.mrf.mxu1  ;;  %v12768_v1 = vld [vmem:[#allocation27_spill] sm:$0xff] }
 0x129   :  { %7949 = vmatmul.msk.f32.gmra.mxu3 %vm71_vm1, %v12760_v25 }
 0x12a   :  { %v9830_v12 = vadd.f32 %v875_v17, %v750_v9  ;;  %7983 = vmatmul.msk.f32.gmra.mxu0 %vm71_vm1, %v12761_v24 }
 0x12b   :  { %v427_v13 = vpop.f32.mrf.mxu2  ;;  %8017 = vmatmul.msk.f32.gmra.mxu1 %vm71_vm1, %v12762_v28 }
 0x12c   :  { %v577_v10 = vpop.f32.mrf.mxu3  ;;  %v451_v20 = vadd.f32 %v427_v13, %v12763_v2 }
 0x12e   :  { %v601_v40 = vadd.f32 %v577_v10, %v451_v20  ;;  %v12771_v20 = vld [vmem:[#allocation33_spill] sm:$0xff] }
 0x12f   :  { %v730_v23 = vpop.f32.mrf.mxu0 }
 0x130   :  { %7916 = vmatmul.msk.f32.gmra.mxu2 %vm71_vm1, %v12764_v22  ;;  %v751_v44 = vadd.f32 %v727_v7, %v601_v40  ;;  %v881_v3 = vpop.f32.mrf.mxu1  ;;  %v12769_v7 = vld [vmem:[#allocation13_spill] sm:$0xff]  ;;  %v9874_v22 = vld [vmem:[%s12672_s0 + $0x141] sm:$0xff] }
 0x131   :  { %7950 = vmatmul.msk.f32.gmra.mxu3 %vm71_vm1, %v12765_v0 }
 0x132   :  { %v9849_v17 = vadd.f32 %v878_v35, %v751_v44  ;;  %7984 = vmatmul.msk.f32.gmra.mxu0 %vm71_vm1, %v12766_v31  ;;  %v9879_v44 = vld [vmem:[%s12672_s0 + $0x142] sm:$0xff] }
 0x133   :  { %v430_v29 = vpop.f32.mrf.mxu2  ;;  %8018 = vmatmul.msk.f32.gmra.mxu1 %vm71_vm1, %v12767_v37 }
 0x134   :  { %v580_v33 = vpop.f32.mrf.mxu3  ;;  %v452_v8 = vadd.f32 %v430_v29, %v12768_v1 }
 0x136   :  { %v602_v9 = vadd.f32 %v580_v33, %v452_v8  ;;  %v9893_v33 = vld [vmem:[%s12672_s0 + $0x144] sm:$0xff] }
 0x137   :  { %v733_v26 = vpop.f32.mrf.mxu0  ;;  %v12773_v8 = vld [vmem:[#allocation35_spill] sm:$0xff] }
 0x138   :  { %7917 = vmatmul.msk.f32.gmra.mxu2 %vm71_vm1, %v12769_v7  ;;  %v752_v35 = vadd.f32 %v730_v23, %v602_v9  ;;  %v884_v13 = vpop.f32.mrf.mxu1 }
 0x139   :  { %7951 = vmatmul.msk.f32.gmra.mxu3 %vm71_vm1, %v12770_v58 }
 0x13a   :  { %v9864_v10 = vadd.f32 %v881_v3, %v752_v35  ;;  %7985 = vmatmul.msk.f32.gmra.mxu0 %vm71_vm1, %v12771_v20  ;;  %v12774_v35 = vld [vmem:[#allocation6_spill] sm:$0xff] }
 0x13b   :  { %v433_v28 = vpop.f32.mrf.mxu2  ;;  %8019 = vmatmul.msk.f32.gmra.mxu1 %vm71_vm1, %v9649_v38 }
 0x13c   :  { %v583_v2 = vpop.f32.mrf.mxu3  ;;  %v453_v40 = vadd.f32 %v433_v28, %v12772_v14 }
 0x13e   :  { %v603_v23 = vadd.f32 %v583_v2, %v453_v40 }
 0x13f   :  { %v736_v38 = vpop.f32.mrf.mxu0 }
 0x140   :  { %7918 = vmatmul.msk.f32.gmra.mxu2 %vm71_vm1, %v9874_v22  ;;  %v753_v3 = vadd.f32 %v733_v26, %v603_v23  ;;  %v887_v29 = vpop.f32.mrf.mxu1 }
 0x141   :  { %7952 = vmatmul.msk.f32.gmra.mxu3 %vm71_vm1, %v9879_v44 }
 0x142   :  { %v9895_v31 = vadd.f32 %v884_v13, %v753_v3  ;;  %7986 = vmatmul.msk.f32.gmra.mxu0 %vm71_vm1, %v9888_v30  ;;  %v12775_v3 = vld [vmem:[#allocation8_spill] sm:$0xff] }
 0x143   :  { %v436_v37 = vpop.f32.mrf.mxu2  ;;  %8020 = vmatmul.msk.f32.gmra.mxu1 %vm71_vm1, %v9893_v33 }
 0x144   :  { %v586_v1 = vpop.f32.mrf.mxu3  ;;  %v454_v9 = vadd.f32 %v436_v37, %v12773_v8 }
 0x146   :  { %v604_v7 = vadd.f32 %v586_v1, %v454_v9 }
 0x147   :  { %v1292_v13 = vpop.f32.mrf.mxu0 }
 0x148   :  { %8039 = vmatmul.msk.f32.vlgmr.msrb.gmra.mxu2 %vm71_vm1, %v12774_v35  ;;  %v754_v26 = vadd.f32 %v736_v38, %v604_v7  ;;  %v1442_v28 = vpop.f32.mrf.mxu1 }
 0x149   :  { %8073 = vmatmul.msk.f32.vlgmr.msrb.gmra.mxu3 %vm71_vm1, %v9085_v15 }
 0x14a   :  { %v9906_v2 = vadd.f32 %v887_v29, %v754_v26  ;;  %8107 = vmatmul.msk.f32.vlgmr.msrb.gmra.mxu0 %vm71_vm1, %v9283_v47 }
 0x14b   :  { %v992_v20 = vpop.f32.mrf.mxu2  ;;  %8141 = vmatmul.msk.f32.vlgmr.msrb.gmra.mxu1 %vm71_vm1, %v9288_v48  ;;  %v9927_v48 = vld [vmem:[%s12672_s0 + $0x41] sm:$0xff] }
 0x14c   :  { %v1142_v14 = vpop.f32.mrf.mxu3  ;;  %v1040_v40 = vadd.f32 %v992_v20, %v9680_v6  ;;  %v12776_v6 = vld [vmem:[#allocation10_spill] sm:$0xff] }
 0x14e   :  { %v1190_v23 = vadd.f32 %v1142_v14, %v1040_v40 }
 0x14f   :  { %v1295_v15 = vpop.f32.mrf.mxu0 }
 0x150   :  { %8040 = vmatmul.msk.f32.gmra.mxu2 %vm71_vm1, %v12775_v3  ;;  %v1340_v38 = vadd.f32 %v1292_v13, %v1190_v23  ;;  %v1445_v29 = vpop.f32.mrf.mxu1  ;;  %v9943_v13 = vld [vmem:[%s12672_s0 + $0x50] sm:$0xff] }
 0x151   :  { %8074 = vmatmul.msk.f32.gmra.mxu3 %vm71_vm1, %v9113_v19 }
 0x152   :  { %v9917_v37 = vadd.f32 %v1442_v28, %v1340_v38  ;;  %8108 = vmatmul.msk.f32.gmra.mxu0 %vm71_vm1, %v9306_v50  ;;  %v9948_v28 = vld [vmem:[%s12672_s0 + $0x51] sm:$0xff]  ;;  %v9964_v38 = vld [vmem:[%s12672_s0 + $0x60] sm:$0xff] }
 0x153   :  { %v995_v1 = vpop.f32.mrf.mxu2  ;;  %8142 = vmatmul.msk.f32.gmra.mxu1 %vm71_vm1, %v9311_v51 }
 0x154   :  { %v1145_v8 = vpop.f32.mrf.mxu3  ;;  %v1041_v47 = vadd.f32 %v995_v1, %v9692_v32 }
 0x156   :  { %v1191_v19 = vadd.f32 %v1145_v8, %v1041_v47 }
 0x157   :  { %v1298_v7 = vpop.f32.mrf.mxu0 }
 0x158   :  { %8041 = vmatmul.msk.f32.gmra.mxu2 %vm71_vm1, %v12776_v6  ;;  %v1341_v9 = vadd.f32 %v1295_v15, %v1191_v19  ;;  %v1448_v50 = vpop.f32.mrf.mxu1  ;;  %v9969_v15 = vld [vmem:[%s12672_s0 + $0x61] sm:$0xff]  ;;  %v9985_v6 = vld [vmem:[%s12672_s0 + $0x70] sm:$0xff] }
 0x159   :  { %8075 = vmatmul.msk.f32.gmra.mxu3 %vm71_vm1, %v9927_v48 }
 0x15a   :  { %v9933_v35 = vadd.f32 %v1445_v29, %v1341_v9  ;;  %8109 = vmatmul.msk.f32.gmra.mxu0 %vm71_vm1, %v9329_v53  ;;  %v9990_v9 = vld [vmem:[%s12672_s0 + $0x71] sm:$0xff] }
 0x15b   :  { %v998_v51 = vpop.f32.mrf.mxu2  ;;  %8143 = vmatmul.msk.f32.gmra.mxu1 %vm71_vm1, %v9334_v54 }
 0x15c   :  { %v1148_v26 = vpop.f32.mrf.mxu3  ;;  %v1042_v32 = vadd.f32 %v998_v51, %v9704_v11 }
 0x15e   :  { %v1192_v20 = vadd.f32 %v1148_v26, %v1042_v32 }
 0x15f   :  { %v1301_v54 = vpop.f32.mrf.mxu0 }
 0x160   :  { %8042 = vmatmul.msk.f32.gmra.mxu2 %vm71_vm1, %v9943_v13  ;;  %v1342_v53 = vadd.f32 %v1298_v7, %v1192_v20  ;;  %v1451_v11 = vpop.f32.mrf.mxu1 }
 0x161   :  { %8076 = vmatmul.msk.f32.gmra.mxu3 %vm71_vm1, %v9948_v28 }
 0x162   :  { %v9954_v14 = vadd.f32 %v1448_v50, %v1342_v53  ;;  %8110 = vmatmul.msk.f32.gmra.mxu0 %vm71_vm1, %v9351_v56  ;;  %v12777_v53 = vld [vmem:[#allocation14_spill] sm:$0xff] }
 0x163   :  { %v1001_v40 = vpop.f32.mrf.mxu2  ;;  %8144 = vmatmul.msk.f32.gmra.mxu1 %vm71_vm1, %v9356_v57 }
 0x164   :  { %v1151_v23 = vpop.f32.mrf.mxu3  ;;  %v1043_v3 = vadd.f32 %v1001_v40, %v9716_v21 }
 0x166   :  { %v1193_v29 = vadd.f32 %v1151_v23, %v1043_v3 }
 0x167   :  { %v1304_v57 = vpop.f32.mrf.mxu0 }
 0x168   :  { %8043 = vmatmul.msk.f32.gmra.mxu2 %vm71_vm1, %v9964_v38  ;;  %v1343_v56 = vadd.f32 %v1301_v54, %v1193_v29  ;;  %v1454_v21 = vpop.f32.mrf.mxu1 }
 0x169   :  { %8077 = vmatmul.msk.f32.gmra.mxu3 %vm71_vm1, %v9969_v15 }
 0x16a   :  { %v9975_v1 = vadd.f32 %v1451_v11, %v1343_v56  ;;  %8111 = vmatmul.msk.f32.gmra.mxu0 %vm71_vm1, %v9373_v59 }
 0x16b   :  { %v1004_v8 = vpop.f32.mrf.mxu2  ;;  %8145 = vmatmul.msk.f32.gmra.mxu1 %vm71_vm1, %v9378_v60 }
 0x16c   :  { %v1154_v47 = vpop.f32.mrf.mxu3  ;;  %v1044_v19 = vadd.f32 %v1004_v8, %v9728_v18 }
 0x16e   :  { %v1194_v7 = vadd.f32 %v1154_v47, %v1044_v19 }
 0x16f   :  { %v1307_v60 = vpop.f32.mrf.mxu0 }
 0x170   :  { %8044 = vmatmul.msk.f32.gmra.mxu2 %vm71_vm1, %v9985_v6  ;;  %v1344_v59 = vadd.f32 %v1304_v57, %v1194_v7  ;;  %v1457_v18 = vpop.f32.mrf.mxu1 }
 0x171   :  { %8078 = vmatmul.msk.f32.gmra.mxu3 %vm71_vm1, %v9990_v9 }
 0x172   :  { %v9996_v50 = vadd.f32 %v1454_v21, %v1344_v59  ;;  %8112 = vmatmul.msk.f32.gmra.mxu0 %vm71_vm1, %v9395_v62  ;;  %v10036_v21 = vld [vmem:[%s12672_s0 + $0x93] sm:$0xff]  ;;  %v8029_v59 = vld [vmem:[%s12672_s0 + $0xe0] sm:$0xff] }
 0x173   :  { %v1007_v51 = vpop.f32.mrf.mxu2  ;;  %8146 = vmatmul.msk.f32.gmra.mxu1 %vm71_vm1, %v9400_v63  ;;  %v10017_v63 = vld [vmem:[%s12672_s0 + $0x90] sm:$0xff] }
 0x174   :  { %v1157_v26 = vpop.f32.mrf.mxu3  ;;  %v1045_v32 = vadd.f32 %v1007_v51, %v9740_v43  ;;  %v10022_v43 = vld [vmem:[%s12672_s0 + $0x91] sm:$0xff] }
 0x176   :  { %v1195_v20 = vadd.f32 %v1157_v26, %v1045_v32 }
 0x177   :  { %v1310_v11 = vpop.f32.mrf.mxu0 }
 0x178   :  { %8045 = vmatmul.msk.f32.gmra.mxu2 %vm71_vm1, %v12777_v53  ;;  %v1345_v54 = vadd.f32 %v1307_v60, %v1195_v20  ;;  %v1460_v40 = vpop.f32.mrf.mxu1  ;;  %v8063_v60 = vld [vmem:[%s12672_s0 + $0xe1] sm:$0xff] }
 0x179   :  { %8079 = vmatmul.msk.f32.gmra.mxu3 %vm71_vm1, %v9749_v61 }
 0x17a   :  { %v10007_v23 = vadd.f32 %v1457_v18, %v1345_v54  ;;  %8113 = vmatmul.msk.f32.gmra.mxu0 %vm71_vm1, %v9754_v34 }
 0x17b   :  { %v1010_v3 = vpop.f32.mrf.mxu2  ;;  %8147 = vmatmul.msk.f32.gmra.mxu1 %vm71_vm1, %v9763_v4 }
 0x17c   :  { %v1160_v29 = vpop.f32.mrf.mxu3  ;;  %v1046_v62 = vadd.f32 %v1010_v3, %v9772_v36  ;;  %v10031_v36 = vld [vmem:[%s12672_s0 + $0x92] sm:$0xff] }
 0x17e   :  { %v1196_v56 = vadd.f32 %v1160_v29, %v1046_v62 }
 0x17f   :  { %v1313_v4 = vpop.f32.mrf.mxu0 }
 0x180   :  { %8046 = vmatmul.msk.f32.gmra.mxu2 %vm71_vm1, %v10017_v63  ;;  %v1346_v34 = vadd.f32 %v1310_v11, %v1196_v56  ;;  %v1463_v57 = vpop.f32.mrf.mxu1  ;;  %v10063_v11 = vld [vmem:[%s12672_s0 + $0xf0] sm:$0xff] }
 0x181   :  { %8080 = vmatmul.msk.f32.gmra.mxu3 %vm71_vm1, %v10022_v43 }
 0x182   :  { %v10038_v8 = vadd.f32 %v1460_v40, %v1346_v34  ;;  %8114 = vmatmul.msk.f32.gmra.mxu0 %vm71_vm1, %v10031_v36  ;;  %v10068_v40 = vld [vmem:[%s12672_s0 + $0xf1] sm:$0xff] }
 0x183   :  { %v1013_v47 = vpop.f32.mrf.mxu2  ;;  %8148 = vmatmul.msk.f32.gmra.mxu1 %vm71_vm1, %v10036_v21 }
 0x184   :  { %v1163_v19 = vpop.f32.mrf.mxu3  ;;  %v1047_v7 = vadd.f32 %v1013_v47, %v9782_v55 }
 0x186   :  { %v1197_v18 = vadd.f32 %v1163_v19, %v1047_v7 }
 0x187   :  { %v1316_v26 = vpop.f32.mrf.mxu0 }
 0x188   :  { %8047 = vmatmul.msk.f32.gmra.mxu2 %vm71_vm1, %v8029_v59  ;;  %v1347_v51 = vadd.f32 %v1313_v4, %v1197_v18  ;;  %v1466_v32 = vpop.f32.mrf.mxu1  ;;  %v10084_v4 = vld [vmem:[%s12672_s0 + $0x100] sm:$0xff]  ;;  %v10105_v18 = vld [vmem:[%s12672_s0 + $0x110] sm:$0xff] }
 0x189   :  { %8081 = vmatmul.msk.f32.gmra.mxu3 %vm71_vm1, %v8063_v60 }
 0x18a   :  { %v10053_v20 = vadd.f32 %v1463_v57, %v1347_v51  ;;  %8115 = vmatmul.msk.f32.gmra.mxu0 %vm71_vm1, %v9472_v41  ;;  %v10089_v57 = vld [vmem:[%s12672_s0 + $0x101] sm:$0xff]  ;;  %v10110_v51 = vld [vmem:[%s12672_s0 + $0x111] sm:$0xff] }
 0x18b   :  { %v1016_v53 = vpop.f32.mrf.mxu2  ;;  %8149 = vmatmul.msk.f32.gmra.mxu1 %vm71_vm1, %v9477_v42 }
 0x18c   :  { %v1166_v55 = vpop.f32.mrf.mxu3  ;;  %v1048_v54 = vadd.f32 %v1016_v53, %v9793_v49 }
 0x18e   :  { %v1198_v3 = vadd.f32 %v1166_v55, %v1048_v54 }
 0x18f   :  { %v1319_v42 = vpop.f32.mrf.mxu0 }
 0x190   :  { %8048 = vmatmul.msk.f32.gmra.mxu2 %vm71_vm1, %v10063_v11  ;;  %v1348_v41 = vadd.f32 %v1316_v26, %v1198_v3  ;;  %v1469_v49 = vpop.f32.mrf.mxu1  ;;  %v10126_v3 = vld [vmem:[%s12672_s0 + $0x120] sm:$0xff] }
 0x191   :  { %8082 = vmatmul.msk.f32.gmra.mxu3 %vm71_vm1, %v10068_v40 }
 0x192   :  { %v10074_v29 = vadd.f32 %v1466_v32, %v1348_v41  ;;  %8116 = vmatmul.msk.f32.gmra.mxu0 %vm71_vm1, %v12750_v27  ;;  %v10131_v41 = vld [vmem:[%s12672_s0 + $0x121] sm:$0xff] }
 0x193   :  { %v1019_v62 = vpop.f32.mrf.mxu2  ;;  %8150 = vmatmul.msk.f32.gmra.mxu1 %vm71_vm1, %v12751_v39 }
 0x194   :  { %v1169_v56 = vpop.f32.mrf.mxu3  ;;  %v1049_v34 = vadd.f32 %v1019_v62, %v9804_v5  ;;  %v8309_v62 = vld [vmem:[%s12673_s1 + $0x90] sm:$0x3f] }
 0x195   :  { %8310 = vmatpush.msk.msrb.mxu2 %vm120_vm0, %v8309_v62 }
 0x196   :  { %v1199_v47 = vadd.f32 %v1169_v56, %v1049_v34  ;;  %v8343_v34 = vld [vmem:[%s12673_s1 + $0x98] sm:$0x3f] }
 0x197   :  { %v1322_v39 = vpop.f32.mrf.mxu0  ;;  %8344 = vmatpush.msk.msrb.mxu3 %vm120_vm0, %v8343_v34 }
 0x198   :  { %8049 = vmatmul.msk.f32.gmra.mxu2 %vm71_vm1, %v10084_v4  ;;  %v1349_v27 = vadd.f32 %v1319_v42, %v1199_v47  ;;  %v1472_v5 = vpop.f32.mrf.mxu1 }
 0x199   :  { %8083 = vmatmul.msk.f32.gmra.mxu3 %vm71_vm1, %v10089_v57 }
 0x19a   :  { %v10095_v19 = vadd.f32 %v1469_v49, %v1349_v27  ;;  %8117 = vmatmul.msk.f32.gmra.mxu0 %vm71_vm1, %v12755_v45  ;;  %v10140_v49 = vld [vmem:[%s12672_s0 + $0x123] sm:$0xff] }
 0x19b   :  { %v1022_v7 = vpop.f32.mrf.mxu2  ;;  %8151 = vmatmul.msk.f32.gmra.mxu1 %vm71_vm1, %v12756_v16 }
 0x19c   :  { %v1172_v59 = vpop.f32.mrf.mxu3  ;;  %v1050_v60 = vadd.f32 %v1022_v7, %v9815_v46  ;;  %v10163_v7 = vld [vmem:[%s12672_s0 + $0x130] sm:$0xff] }
 0x19e   :  { %v1200_v26 = vadd.f32 %v1172_v59, %v1050_v60 }
 0x19f   :  { %v1325_v16 = vpop.f32.mrf.mxu0 }
 0x1a0   :  { %8050 = vmatmul.msk.f32.gmra.mxu2 %vm71_vm1, %v10105_v18  ;;  %v1350_v45 = vadd.f32 %v1322_v39, %v1200_v26  ;;  %v1475_v46 = vpop.f32.mrf.mxu1 }
 0x1a1   :  { %8084 = vmatmul.msk.f32.gmra.mxu3 %vm71_vm1, %v10110_v51 }
 0x1a2   :  { %v10116_v32 = vadd.f32 %v1472_v5, %v1350_v45  ;;  %8118 = vmatmul.msk.f32.gmra.mxu0 %vm71_vm1, %v12760_v25  ;;  %v8275_v5 = vld [vmem:[%s12673_s1 + $0x88] sm:$0x3f]  ;;  %v10178_v45 = vld [vmem:[%s12672_s0 + $0x133] sm:$0xff] }
 0x1a3   :  { %v1025_v53 = vpop.f32.mrf.mxu2  ;;  %8152 = vmatmul.msk.f32.gmra.mxu1 %vm71_vm1, %v12761_v24 }
 0x1a4   :  { %v1175_v55 = vpop.f32.mrf.mxu3  ;;  %v1051_v54 = vadd.f32 %v1025_v53, %v9830_v12  ;;  %8276 = vmatpush.msk.msra.mxu1 %vm120_vm0, %v8275_v5 }
 0x1a6   :  { %v1201_v42 = vadd.f32 %v1175_v55, %v1051_v54 }
 0x1a7   :  { %v1328_v24 = vpop.f32.mrf.mxu0 }
 0x1a8   :  { %8051 = vmatmul.msk.f32.gmra.mxu2 %vm71_vm1, %v10126_v3  ;;  %v1351_v25 = vadd.f32 %v1325_v16, %v1201_v42  ;;  %v1478_v12 = vpop.f32.mrf.mxu1 }
 0x1a9   :  { %8085 = vmatmul.msk.f32.gmra.mxu3 %vm71_vm1, %v10131_v41 }
 0x1aa   :  { %v10146_v56 = vadd.f32 %v1475_v46, %v1351_v25  ;;  %8119 = vmatmul.msk.f32.gmra.mxu0 %vm71_vm1, %v12765_v0  ;;  %v10168_v0 = vld [vmem:[%s12672_s0 + $0x131] sm:$0xff]  ;;  %v8377_v46 = vld [vmem:[%s12673_s1 + $0xa0] sm:$0x3f] }
 0x1ab   :  { %v1028_v47 = vpop.f32.mrf.mxu2  ;;  %8153 = vmatmul.msk.f32.gmra.mxu1 %vm71_vm1, %v10140_v49  ;;  %8378 = vmatpush.msk.msrb.mxu0 %vm120_vm0, %v8377_v46  ;;  %v12778_v25 = vld [vmem:[#allocation34_spill] sm:$0xff] }
 0x1ac   :  { %v1178_v27 = vpop.f32.mrf.mxu3  ;;  %v1052_v39 = vadd.f32 %v1028_v47, %v9849_v17 }
 0x1ae   :  { %v1202_v59 = vadd.f32 %v1178_v27, %v1052_v39  ;;  %v10205_v27 = vld [vmem:[%s12672_s0 + $0x150] sm:$0xff] }
 0x1af   :  { %v1331_v60 = vpop.f32.mrf.mxu0  ;;  %v10210_v39 = vld [vmem:[%s12672_s0 + $0x151] sm:$0xff] }
 0x1b0   :  { %8052 = vmatmul.msk.f32.gmra.mxu2 %vm71_vm1, %v10163_v7  ;;  %v1352_v17 = vadd.f32 %v1328_v24, %v1202_v59  ;;  %v1481_v26 = vpop.f32.mrf.mxu1 }
 0x1b1   :  { %8086 = vmatmul.msk.f32.gmra.mxu3 %vm71_vm1, %v10168_v0 }
 0x1b2   :  { %v10180_v16 = vadd.f32 %v1478_v12, %v1352_v17  ;;  %8120 = vmatmul.msk.f32.gmra.mxu0 %vm71_vm1, %v12770_v58  ;;  %v10224_v17 = vld [vmem:[%s12672_s0 + $0x153] sm:$0xff] }
 0x1b3   :  { %v1031_v53 = vpop.f32.mrf.mxu2  ;;  %8154 = vmatmul.msk.f32.gmra.mxu1 %vm71_vm1, %v10178_v45 }
 0x1b4   :  { %v1181_v55 = vpop.f32.mrf.mxu3  ;;  %v1053_v54 = vadd.f32 %v1031_v53, %v9864_v10 }
 0x1b6   :  { %v1203_v42 = vadd.f32 %v1181_v55, %v1053_v54  ;;  %v8157_v55 = vld [vmem:[%s12672_s0 + $0x24] sm:$0xff]  ;;  %v8191_v54 = vld [vmem:[%s12672_s0 + $0x30] sm:$0xff] }
 0x1b7   :  { %v1334_v12 = vpop.f32.mrf.mxu0 }
 0x1b8   :  { %8053 = vmatmul.msk.f32.gmra.mxu2 %vm71_vm1, %v12778_v25  ;;  %v1353_v24 = vadd.f32 %v1331_v60, %v1203_v42  ;;  %v1484_v62 = vpop.f32.mrf.mxu1 }
 0x1b9   :  { %8087 = vmatmul.msk.f32.gmra.mxu3 %vm71_vm1, %v9874_v22 }
 0x1ba   :  { %v10195_v34 = vadd.f32 %v1481_v26, %v1353_v24  ;;  %8121 = vmatmul.msk.f32.gmra.mxu0 %vm71_vm1, %v9879_v44 }
 0x1bb   :  { %v1034_v58 = vpop.f32.mrf.mxu2  ;;  %8155 = vmatmul.msk.f32.gmra.mxu1 %vm71_vm1, %v9888_v30 }
 0x1bc   :  { %v1184_v47 = vpop.f32.mrf.mxu3  ;;  %v1054_v10 = vadd.f32 %v1034_v58, %v9895_v31  ;;  %v10219_v31 = vld [vmem:[%s12672_s0 + $0x152] sm:$0xff] }
 0x1be   :  { %v1204_v5 = vadd.f32 %v1184_v47, %v1054_v10 }
 0x1bf   :  { %v1337_v30 = vpop.f32.mrf.mxu0 }
 0x1c0   :  { %8054 = vmatmul.msk.f32.gmra.mxu2 %vm71_vm1, %v10205_v27  ;;  %v1354_v44 = vadd.f32 %v1334_v12, %v1204_v5  ;;  %v1487_v59 = vpop.f32.mrf.mxu1  ;;  %v8225_v12 = vld [vmem:[%s12672_s0 + $0x31] sm:$0xff] }
 0x1c1   :  { %8088 = vmatmul.msk.f32.gmra.mxu3 %vm71_vm1, %v10210_v39 }
 0x1c2   :  { %v10226_v60 = vadd.f32 %v1484_v62, %v1354_v44  ;;  %8122 = vmatmul.msk.f32.gmra.mxu0 %vm71_vm1, %v10219_v31  ;;  %v8259_v62 = vld [vmem:[%s12672_s0 + $0x32] sm:$0xff] }
 0x1c3   :  { %v1037_v26 = vpop.f32.mrf.mxu2  ;;  %8156 = vmatmul.msk.f32.gmra.mxu1 %vm71_vm1, %v10224_v17  ;;  %v10255_v44 = vld [vmem:[%s12672_s0 + $0x34] sm:$0xff] }
 0x1c4   :  { %v1187_v46 = vpop.f32.mrf.mxu3  ;;  %v1055_v53 = vadd.f32 %v1037_v26, %v9906_v2 }
 0x1c6   :  { %v1205_v42 = vadd.f32 %v1187_v46, %v1055_v53  ;;  %v10269_v53 = vld [vmem:[%s12672_s0 + $0x42] sm:$0xff] }
 0x1c7   :  { %v1893_v24 = vpop.f32.mrf.mxu0 }
 0x1c8   :  { %8175 = vmatmul.msk.f32.vlgmr.msra.gmra.mxu2 %vm71_vm1, %v8157_v55  ;;  %v1355_v25 = vadd.f32 %v1337_v30, %v1205_v42  ;;  %v2043_v2 = vpop.f32.mrf.mxu1  ;;  %v10260_v30 = vld [vmem:[%s12672_s0 + $0x40] sm:$0xff] }
 0x1c9   :  { %8209 = vmatmul.msk.f32.vlgmr.msra.gmra.mxu3 %vm71_vm1, %v8191_v54 }
 0x1ca   :  { %v10247_v58 = vadd.f32 %v1487_v59, %v1355_v25  ;;  %8243 = vmatmul.msk.f32.vlgmr.msra.gmra.mxu0 %vm71_vm1, %v8225_v12 }
 0x1cb   :  { %v1593_v47 = vpop.f32.mrf.mxu2  ;;  %8277 = vmatmul.msk.f32.vlgmr.msra.gmra.mxu1 %vm71_vm1, %v8259_v62 }
 0x1cc   :  { %v1743_v10 = vpop.f32.mrf.mxu3  ;;  %v1641_v5 = vadd.f32 %v1593_v47, %v9917_v37  ;;  %v10290_v47 = vld [vmem:[%s12672_s0 + $0x52] sm:$0xff] }
 0x1cd   :  { %12779 = vst [vmem:[#allocation7_spill] sm:$0xff] %v10290_v47 }
 0x1ce   :  { %v1791_v59 = vadd.f32 %v1743_v10, %v1641_v5 }
 0x1cf   :  { %v1896_v46 = vpop.f32.mrf.mxu0 }
 0x1d0   :  { %8176 = vmatmul.msk.f32.gmra.mxu2 %vm71_vm1, %v10255_v44  ;;  %v1941_v26 = vadd.f32 %v1893_v24, %v1791_v59  ;;  %v2046_v37 = vpop.f32.mrf.mxu1  ;;  %v10281_v24 = vld [vmem:[%s12672_s0 + $0x44] sm:$0xff] }
 0x1d1   :  { %8210 = vmatmul.msk.f32.gmra.mxu3 %vm71_vm1, %v10260_v30 }
 0x1d2   :  { %v10271_v55 = vadd.f32 %v2043_v2, %v1941_v26  ;;  %8244 = vmatmul.msk.f32.gmra.mxu0 %vm71_vm1, %v9927_v48  ;;  %v10302_v26 = vld [vmem:[%s12672_s0 + $0x54] sm:$0xff] }
 0x1d3   :  { %v1596_v54 = vpop.f32.mrf.mxu2  ;;  %8278 = vmatmul.msk.f32.gmra.mxu1 %vm71_vm1, %v10269_v53 }
 0x1d4   :  { %v1746_v42 = vpop.f32.mrf.mxu3  ;;  %v1642_v25 = vadd.f32 %v1596_v54, %v9933_v35 }
 0x1d6   :  { %v1792_v12 = vadd.f32 %v1746_v42, %v1642_v25  ;;  %v10311_v42 = vld [vmem:[%s12672_s0 + $0x62] sm:$0xff] }
 0x1d7   :  { %v1899_v62 = vpop.f32.mrf.mxu0  ;;  %12780 = vst [vmem:[#allocation16_spill] sm:$0xff] %v10311_v42 }
 0x1d8   :  { %8177 = vmatmul.msk.f32.gmra.mxu2 %vm71_vm1, %v10281_v24  ;;  %v1942_v2 = vadd.f32 %v1896_v46, %v1792_v12  ;;  %v2049_v48 = vpop.f32.mrf.mxu1 }
 0x1d9   :  { %8211 = vmatmul.msk.f32.gmra.mxu3 %vm71_vm1, %v9943_v13 }
 0x1da   :  { %v10292_v35 = vadd.f32 %v2046_v37, %v1942_v2  ;;  %8245 = vmatmul.msk.f32.gmra.mxu0 %vm71_vm1, %v9948_v28 }
 0x1db   :  { %v1599_v10 = vpop.f32.mrf.mxu2  ;;  %8279 = vmatmul.msk.f32.gmra.mxu1 %vm71_vm1, %v10290_v47 }
 0x1dc   :  { %v1749_v5 = vpop.f32.mrf.mxu3  ;;  %v1643_v59 = vadd.f32 %v1599_v10, %v9954_v14 }
 0x1de   :  { %v1793_v46 = vadd.f32 %v1749_v5, %v1643_v59  ;;  %v10332_v59 = vld [vmem:[%s12672_s0 + $0x72] sm:$0xff] }
 0x1df   :  { %v1902_v54 = vpop.f32.mrf.mxu0  ;;  %12781 = vst [vmem:[#allocation17_spill] sm:$0xff] %v10332_v59 }
 0x1e0   :  { %8178 = vmatmul.msk.f32.gmra.mxu2 %vm71_vm1, %v10302_v26  ;;  %v1943_v37 = vadd.f32 %v1899_v62, %v1793_v46  ;;  %v2052_v28 = vpop.f32.mrf.mxu1  ;;  %v10323_v62 = vld [vmem:[%s12672_s0 + $0x64] sm:$0xff] }
 0x1e1   :  { %8212 = vmatmul.msk.f32.gmra.mxu3 %vm71_vm1, %v9964_v38 }
 0x1e2   :  { %v10313_v14 = vadd.f32 %v2049_v48, %v1943_v37  ;;  %8246 = vmatmul.msk.f32.gmra.mxu0 %vm71_vm1, %v9969_v15 }
 0x1e3   :  { %v1602_v25 = vpop.f32.mrf.mxu2  ;;  %8280 = vmatmul.msk.f32.gmra.mxu1 %vm71_vm1, %v10311_v42 }
 0x1e4   :  { %v1752_v12 = vpop.f32.mrf.mxu3  ;;  %v1644_v2 = vadd.f32 %v1602_v25, %v9975_v1  ;;  %v10344_v25 = vld [vmem:[%s12672_s0 + $0x74] sm:$0xff] }
 0x1e6   :  { %v1794_v10 = vadd.f32 %v1752_v12, %v1644_v2 }
 0x1e7   :  { %v1905_v5 = vpop.f32.mrf.mxu0 }
 0x1e8   :  { %8179 = vmatmul.msk.f32.gmra.mxu2 %vm71_vm1, %v10323_v62  ;;  %v1944_v48 = vadd.f32 %v1902_v54, %v1794_v10  ;;  %v2055_v15 = vpop.f32.mrf.mxu1  ;;  %v10358_v10 = vld [vmem:[%s12672_s0 + $0x82] sm:$0xff] }
 0x1e9   :  { %8213 = vmatmul.msk.f32.gmra.mxu3 %vm71_vm1, %v9985_v6 }
 0x1ea   :  { %v10334_v1 = vadd.f32 %v2052_v28, %v1944_v48  ;;  %8247 = vmatmul.msk.f32.gmra.mxu0 %vm71_vm1, %v9990_v9  ;;  %v10349_v28 = vld [vmem:[%s12672_s0 + $0x80] sm:$0xff] }
 0x1eb   :  { %v1605_v46 = vpop.f32.mrf.mxu2  ;;  %8281 = vmatmul.msk.f32.gmra.mxu1 %vm71_vm1, %v10332_v59 }
 0x1ec   :  { %v1755_v37 = vpop.f32.mrf.mxu3  ;;  %v1645_v54 = vadd.f32 %v1605_v46, %v9996_v50 }
 0x1ee   :  { %v1795_v12 = vadd.f32 %v1755_v37, %v1645_v54 }
 0x1ef   :  { %v1908_v2 = vpop.f32.mrf.mxu0 }
 0x1f0   :  { %8180 = vmatmul.msk.f32.gmra.mxu2 %vm71_vm1, %v10344_v25  ;;  %v1945_v9 = vadd.f32 %v1905_v5, %v1795_v12  ;;  %v2058_v50 = vpop.f32.mrf.mxu1 }
 0x1f1   :  { %8214 = vmatmul.msk.f32.gmra.mxu3 %vm71_vm1, %v10349_v28 }
 0x1f2   :  { %v10360_v48 = vadd.f32 %v2055_v15, %v1945_v9  ;;  %8248 = vmatmul.msk.f32.gmra.mxu0 %vm71_vm1, %v9749_v61 }
 0x1f3   :  { %v1608_v46 = vpop.f32.mrf.mxu2  ;;  %8282 = vmatmul.msk.f32.gmra.mxu1 %vm71_vm1, %v10358_v10 }
 0x1f4   :  { %v1758_v59 = vpop.f32.mrf.mxu3  ;;  %v1646_v5 = vadd.f32 %v1608_v46, %v10007_v23  ;;  %v10386_v23 = vld [vmem:[%s12672_s0 + $0xa0] sm:$0xff] }
 0x1f6   :  { %v1796_v37 = vadd.f32 %v1758_v59, %v1646_v5 }
 0x1f7   :  { %v1911_v15 = vpop.f32.mrf.mxu0 }
 0x1f8   :  { %8181 = vmatmul.msk.f32.gmra.mxu2 %vm71_vm1, %v9768_v52  ;;  %v1946_v54 = vadd.f32 %v1908_v2, %v1796_v37  ;;  %v2061_v12 = vpop.f32.mrf.mxu1  ;;  %v10381_v52 = vld [vmem:[%s12672_s0 + $0x94] sm:$0xff]  ;;  %v10400_v2 = vld [vmem:[%s12672_s0 + $0xa2] sm:$0xff] }
 0x1f9   :  { %8215 = vmatmul.msk.f32.gmra.mxu3 %vm71_vm1, %v10017_v63  ;;  %12782 = vst [vmem:[#allocation18_spill] sm:$0xff] %v10400_v2  ;;  %v8165_v37 = vld [vmem:[%s12672_s0 + $0xe4] sm:$0xff] }
 0x1fa   :  { %v10371_v9 = vadd.f32 %v2058_v50, %v1946_v54  ;;  %8249 = vmatmul.msk.f32.gmra.mxu0 %vm71_vm1, %v10022_v43 }
 0x1fb   :  { %v1611_v42 = vpop.f32.mrf.mxu2  ;;  %8283 = vmatmul.msk.f32.gmra.mxu1 %vm71_vm1, %v10031_v36 }
 0x1fc   :  { %v1761_v47 = vpop.f32.mrf.mxu3  ;;  %v1647_v61 = vadd.f32 %v1611_v42, %v10038_v8  ;;  %v10395_v8 = vld [vmem:[%s12672_s0 + $0xa1] sm:$0xff] }
 0x1fe   :  { %v1797_v59 = vadd.f32 %v1761_v47, %v1647_v61 }
 0x1ff   :  { %v1914_v36 = vpop.f32.mrf.mxu0 }
 0x200   :  { %8182 = vmatmul.msk.f32.gmra.mxu2 %vm71_vm1, %v10381_v52  ;;  %v1947_v43 = vadd.f32 %v1911_v15, %v1797_v59  ;;  %v2064_v42 = vpop.f32.mrf.mxu1  ;;  %v8267_v59 = vld [vmem:[%s12672_s0 + $0xf2] sm:$0xff] }
 0x201   :  { %8216 = vmatmul.msk.f32.gmra.mxu3 %vm71_vm1, %v10386_v23 }
 0x202   :  { %v10402_v47 = vadd.f32 %v2061_v12, %v1947_v43  ;;  %8250 = vmatmul.msk.f32.gmra.mxu0 %vm71_vm1, %v10395_v8 }
 0x203   :  { %v1614_v50 = vpop.f32.mrf.mxu2  ;;  %8284 = vmatmul.msk.f32.gmra.mxu1 %vm71_vm1, %v10400_v2 }
 0x204   :  { %v1764_v46 = vpop.f32.mrf.mxu3  ;;  %v1648_v5 = vadd.f32 %v1614_v50, %v10053_v20 }
 0x206   :  { %v1798_v54 = vadd.f32 %v1764_v46, %v1648_v5 }
 0x207   :  { %v1917_v12 = vpop.f32.mrf.mxu0 }
 0x208   :  { %8183 = vmatmul.msk.f32.gmra.mxu2 %vm71_vm1, %v8165_v37  ;;  %v1948_v15 = vadd.f32 %v1914_v36, %v1798_v54  ;;  %v2067_v61 = vpop.f32.mrf.mxu1 }
 0x209   :  { %8217 = vmatmul.msk.f32.gmra.mxu3 %vm71_vm1, %v10063_v11  ;;  %v10427_v11 = vld [vmem:[%s12672_s0 + $0xf4] sm:$0xff] }
 0x20a   :  { %v10418_v43 = vadd.f32 %v2064_v42, %v1948_v15  ;;  %8251 = vmatmul.msk.f32.gmra.mxu0 %vm71_vm1, %v10068_v40  ;;  %v10436_v40 = vld [vmem:[%s12672_s0 + $0x102] sm:$0xff] }
 0x20b   :  { %v1617_v20 = vpop.f32.mrf.mxu2  ;;  %8285 = vmatmul.msk.f32.gmra.mxu1 %vm71_vm1, %v8267_v59  ;;  %12783 = vst [vmem:[#allocation15_spill] sm:$0xff] %v10436_v40  ;;  %v10448_v59 = vld [vmem:[%s12672_s0 + $0x104] sm:$0xff] }
 0x20c   :  { %v1767_v50 = vpop.f32.mrf.mxu3  ;;  %v1649_v36 = vadd.f32 %v1617_v20, %v10074_v29 }
 0x20e   :  { %v1799_v46 = vadd.f32 %v1767_v50, %v1649_v36  ;;  %v10457_v36 = vld [vmem:[%s12672_s0 + $0x112] sm:$0xff] }
 0x20f   :  { %v1920_v5 = vpop.f32.mrf.mxu0  ;;  %12784 = vst [vmem:[#allocation9_spill] sm:$0xff] %v10457_v36 }
 0x210   :  { %8184 = vmatmul.msk.f32.gmra.mxu2 %vm71_vm1, %v10427_v11  ;;  %v1949_v42 = vadd.f32 %v1917_v12, %v1799_v46  ;;  %v2070_v37 = vpop.f32.mrf.mxu1 }
 0x211   :  { %8218 = vmatmul.msk.f32.gmra.mxu3 %vm71_vm1, %v10084_v4 }
 0x212   :  { %v10438_v29 = vadd.f32 %v2067_v61, %v1949_v42  ;;  %8252 = vmatmul.msk.f32.gmra.mxu0 %vm71_vm1, %v10089_v57 }
 0x213   :  { %v1620_v54 = vpop.f32.mrf.mxu2  ;;  %8286 = vmatmul.msk.f32.gmra.mxu1 %vm71_vm1, %v10436_v40 }
 0x214   :  { %v1770_v15 = vpop.f32.mrf.mxu3  ;;  %v1650_v12 = vadd.f32 %v1620_v54, %v10095_v19  ;;  %v10469_v54 = vld [vmem:[%s12672_s0 + $0x114] sm:$0xff] }
 0x216   :  { %v1800_v20 = vadd.f32 %v1770_v15, %v1650_v12 }
 0x217   :  { %v1923_v50 = vpop.f32.mrf.mxu0 }
 0x218   :  { %8185 = vmatmul.msk.f32.gmra.mxu2 %vm71_vm1, %v10448_v59  ;;  %v1950_v61 = vadd.f32 %v1920_v5, %v1800_v20  ;;  %v2073_v57 = vpop.f32.mrf.mxu1  ;;  %v10478_v20 = vld [vmem:[%s12672_s0 + $0x122] sm:$0xff] }
 0x219   :  { %8219 = vmatmul.msk.f32.gmra.mxu3 %vm71_vm1, %v10105_v18  ;;  %12785 = vst [vmem:[#allocation20_spill] sm:$0xff] %v10478_v20 }
 0x21a   :  { %v10459_v19 = vadd.f32 %v2070_v37, %v1950_v61  ;;  %8253 = vmatmul.msk.f32.gmra.mxu0 %vm71_vm1, %v10110_v51 }
 0x21b   :  { %v1623_v46 = vpop.f32.mrf.mxu2  ;;  %8287 = vmatmul.msk.f32.gmra.mxu1 %vm71_vm1, %v10457_v36 }
 0x21c   :  { %v1773_v42 = vpop.f32.mrf.mxu3  ;;  %v1651_v5 = vadd.f32 %v1623_v46, %v10116_v32 }
 0x21e   :  { %v1801_v15 = vadd.f32 %v1773_v42, %v1651_v5  ;;  %v10490_v42 = vld [vmem:[%s12672_s0 + $0x124] sm:$0xff] }
 0x21f   :  { %v1926_v12 = vpop.f32.mrf.mxu0 }
 0x220   :  { %8186 = vmatmul.msk.f32.gmra.mxu2 %vm71_vm1, %v10469_v54  ;;  %v1951_v37 = vadd.f32 %v1923_v50, %v1801_v15  ;;  %v2076_v51 = vpop.f32.mrf.mxu1 }
 0x221   :  { %8220 = vmatmul.msk.f32.gmra.mxu3 %vm71_vm1, %v10126_v3 }
 0x222   :  { %v10480_v32 = vadd.f32 %v2073_v57, %v1951_v37  ;;  %8254 = vmatmul.msk.f32.gmra.mxu0 %vm71_vm1, %v10131_v41  ;;  %v10499_v37 = vld [vmem:[%s12672_s0 + $0x132] sm:$0xff] }
 0x223   :  { %v1626_v61 = vpop.f32.mrf.mxu2  ;;  %8288 = vmatmul.msk.f32.gmra.mxu1 %vm71_vm1, %v10478_v20  ;;  %12786 = vst [vmem:[#allocation21_spill] sm:$0xff] %v10499_v37 }
 0x224   :  { %v1776_v46 = vpop.f32.mrf.mxu3  ;;  %v1652_v50 = vadd.f32 %v1626_v61, %v10146_v56  ;;  %v8445_v56 = vld [vmem:[%s12673_s1 + $0xb0] sm:$0x3f] }
 0x225   :  { %8446 = vmatpush.msk.msra.mxu2 %vm120_vm0, %v8445_v56 }
 0x226   :  { %v1802_v5 = vadd.f32 %v1776_v46, %v1652_v50 }
 0x227   :  { %v1929_v15 = vpop.f32.mrf.mxu0 }
 0x228   :  { %8187 = vmatmul.msk.f32.gmra.mxu2 %vm71_vm1, %v10490_v42  ;;  %v1952_v57 = vadd.f32 %v1926_v12, %v1802_v5  ;;  %v2079_v41 = vpop.f32.mrf.mxu1  ;;  %v8479_v12 = vld [vmem:[%s12673_s1 + $0xb8] sm:$0x3f] }
 0x229   :  { %8221 = vmatmul.msk.f32.gmra.mxu3 %vm71_vm1, %v10163_v7 }
 0x22a   :  { %v10505_v61 = vadd.f32 %v2076_v51, %v1952_v57  ;;  %8255 = vmatmul.msk.f32.gmra.mxu0 %vm71_vm1, %v10168_v0  ;;  %8480 = vmatpush.msk.msra.mxu3 %vm120_vm0, %v8479_v12  ;;  %v8411_v51 = vld [vmem:[%s12673_s1 + $0xa8] sm:$0x3f]  ;;  %v10522_v57 = vld [vmem:[%s12672_s0 + $0x134] sm:$0xff]  ;;  %v10527_v0 = vld [vmem:[%s12672_s0 + $0x140] sm:$0xff] }
 0x22b   :  { %v1629_v46 = vpop.f32.mrf.mxu2  ;;  %8289 = vmatmul.msk.f32.gmra.mxu1 %vm71_vm1, %v10499_v37  ;;  %v10537_v37 = vld [vmem:[%s12672_s0 + $0x142] sm:$0xff] }
 0x22c   :  { %v1779_v50 = vpop.f32.mrf.mxu3  ;;  %v1653_v5 = vadd.f32 %v1629_v46, %v10180_v16  ;;  %8412 = vmatpush.msk.msrb.mxu1 %vm120_vm0, %v8411_v51 }
 0x22e   :  { %v1803_v56 = vadd.f32 %v1779_v50, %v1653_v5  ;;  %v8513_v50 = vld [vmem:[%s12673_s1 + $0xc0] sm:$0x3f] }
 0x22f   :  { %v1932_v12 = vpop.f32.mrf.mxu0  ;;  %8514 = vmatpush.msk.msra.mxu0 %vm120_vm0, %v8513_v50 }
 0x230   :  { %8188 = vmatmul.msk.f32.gmra.mxu2 %vm71_vm1, %v10522_v57  ;;  %v1953_v16 = vadd.f32 %v1929_v15, %v1803_v56  ;;  %v2082_v46 = vpop.f32.mrf.mxu1 }
 0x231   :  { %8222 = vmatmul.msk.f32.gmra.mxu3 %vm71_vm1, %v10527_v0 }
 0x232   :  { %v10539_v20 = vadd.f32 %v2079_v41, %v1953_v16  ;;  %8256 = vmatmul.msk.f32.gmra.mxu0 %vm71_vm1, %v9874_v22 }
 0x233   :  { %v1632_v5 = vpop.f32.mrf.mxu2  ;;  %8290 = vmatmul.msk.f32.gmra.mxu1 %vm71_vm1, %v10537_v37 }
 0x234   :  { %v1782_v51 = vpop.f32.mrf.mxu3  ;;  %v1654_v15 = vadd.f32 %v1632_v5, %v10195_v34  ;;  %v10583_v5 = vld [vmem:[%s12672_s0 + $0x162] sm:$0xff] }
 0x236   :  { %v1804_v56 = vadd.f32 %v1782_v51, %v1654_v15 }
 0x237   :  { %v1935_v16 = vpop.f32.mrf.mxu0 }
 0x238   :  { %8189 = vmatmul.msk.f32.gmra.mxu2 %vm71_vm1, %v9893_v33  ;;  %v1954_v41 = vadd.f32 %v1932_v12, %v1804_v56  ;;  %v2085_v36 = vpop.f32.mrf.mxu1  ;;  %v10564_v33 = vld [vmem:[%s12672_s0 + $0x154] sm:$0xff]  ;;  %v10569_v12 = vld [vmem:[%s12672_s0 + $0x160] sm:$0xff] }
 0x239   :  { %8223 = vmatmul.msk.f32.gmra.mxu3 %vm71_vm1, %v10205_v27 }
 0x23a   :  { %v10554_v40 = vadd.f32 %v2082_v46, %v1954_v41  ;;  %8257 = vmatmul.msk.f32.gmra.mxu0 %vm71_vm1, %v10210_v39  ;;  %v8293_v41 = vld [vmem:[%s12672_s0 + $0x33] sm:$0xff] }
 0x23b   :  { %v1635_v22 = vpop.f32.mrf.mxu2  ;;  %8291 = vmatmul.msk.f32.gmra.mxu1 %vm71_vm1, %v10219_v31 }
 0x23c   :  { %v1785_v2 = vpop.f32.mrf.mxu3  ;;  %v1655_v34 = vadd.f32 %v1635_v22, %v10226_v60  ;;  %v10578_v60 = vld [vmem:[%s12672_s0 + $0x161] sm:$0xff] }
 0x23e   :  { %v1805_v46 = vadd.f32 %v1785_v2, %v1655_v34 }
 0x23f   :  { %v1938_v31 = vpop.f32.mrf.mxu0 }
 0x240   :  { %8190 = vmatmul.msk.f32.gmra.mxu2 %vm71_vm1, %v10564_v33  ;;  %v1955_v39 = vadd.f32 %v1935_v16, %v1805_v46  ;;  %v2088_v50 = vpop.f32.mrf.mxu1  ;;  %v8395_v46 = vld [vmem:[%s12672_s0 + $0x41] sm:$0xff] }
 0x241   :  { %8224 = vmatmul.msk.f32.gmra.mxu3 %vm71_vm1, %v10569_v12 }
 0x242   :  { %v10585_v2 = vadd.f32 %v2085_v36, %v1955_v39  ;;  %8258 = vmatmul.msk.f32.gmra.mxu0 %vm71_vm1, %v10578_v60 }
 0x243   :  { %v1638_v51 = vpop.f32.mrf.mxu2  ;;  %8292 = vmatmul.msk.f32.gmra.mxu1 %vm71_vm1, %v10583_v5 }
 0x244   :  { %v1788_v15 = vpop.f32.mrf.mxu3  ;;  %v1656_v56 = vadd.f32 %v1638_v51, %v10247_v58 }
 0x246   :  { %v1806_v16 = vadd.f32 %v1788_v15, %v1656_v56 }
 0x247   :  { %v2494_v36 = vpop.f32.mrf.mxu0 }
 0x248   :  { %8311 = vmatmul.msk.f32.vlgmr.msrb.gmra.mxu2 %vm71_vm1, %v8293_v41  ;;  %v1956_v22 = vadd.f32 %v1938_v31, %v1806_v16  ;;  %v2644_v34 = vpop.f32.mrf.mxu1 }
 0x249   :  { %8345 = vmatmul.msk.f32.vlgmr.msrb.gmra.mxu3 %vm71_vm1, %v10255_v44  ;;  %v10610_v44 = vld [vmem:[%s12672_s0 + $0x43] sm:$0xff] }
 0x24a   :  { %v10601_v39 = vadd.f32 %v2088_v50, %v1956_v22  ;;  %8379 = vmatmul.msk.f32.vlgmr.msrb.gmra.mxu0 %vm71_vm1, %v10260_v30  ;;  %v8396_v30 = vld [vmem:[%s12672_s0 + $0x51] sm:$0xff] }
 0x24b   :  { %v2193_v58 = vpop.f32.mrf.mxu2  ;;  %8413 = vmatmul.msk.f32.vlgmr.msrb.gmra.mxu1 %vm71_vm1, %v8395_v46  ;;  %v10628_v46 = vld [vmem:[%s12672_s0 + $0x53] sm:$0xff] }
 0x24c   :  { %v2344_v51 = vpop.f32.mrf.mxu3  ;;  %v2241_v31 = vadd.f32 %v2193_v58, %v10271_v55 }
 0x24e   :  { %v2392_v15 = vadd.f32 %v2344_v51, %v2241_v31 }
 0x24f   :  { %v2497_v56 = vpop.f32.mrf.mxu0 }
 0x250   :  { %8312 = vmatmul.msk.f32.gmra.mxu2 %vm71_vm1, %v10610_v44  ;;  %v2542_v50 = vadd.f32 %v2494_v36, %v2392_v15  ;;  %v2647_v41 = vpop.f32.mrf.mxu1 }
 0x251   :  { %8346 = vmatmul.msk.f32.gmra.mxu3 %vm71_vm1, %v10281_v24 }
 0x252   :  { %v10619_v55 = vadd.f32 %v2644_v34, %v2542_v50  ;;  %8380 = vmatmul.msk.f32.gmra.mxu0 %vm71_vm1, %v9943_v13  ;;  %v8397_v13 = vld [vmem:[%s12672_s0 + $0x61] sm:$0xff] }
 0x253   :  { %v2196_v16 = vpop.f32.mrf.mxu2  ;;  %8414 = vmatmul.msk.f32.gmra.mxu1 %vm71_vm1, %v8396_v30  ;;  %v10646_v30 = vld [vmem:[%s12672_s0 + $0x63] sm:$0xff] }
 0x254   :  { %v2347_v22 = vpop.f32.mrf.mxu3  ;;  %v2242_v36 = vadd.f32 %v2196_v16, %v10292_v35 }
 0x256   :  { %v2393_v58 = vadd.f32 %v2347_v22, %v2242_v36 }
 0x257   :  { %v2500_v51 = vpop.f32.mrf.mxu0 }
 0x258   :  { %8313 = vmatmul.msk.f32.gmra.mxu2 %vm71_vm1, %v10628_v46  ;;  %v2543_v34 = vadd.f32 %v2497_v56, %v2393_v58  ;;  %v2650_v31 = vpop.f32.mrf.mxu1 }
 0x259   :  { %8347 = vmatmul.msk.f32.gmra.mxu3 %vm71_vm1, %v10302_v26 }
 0x25a   :  { %v10637_v35 = vadd.f32 %v2647_v41, %v2543_v34  ;;  %8381 = vmatmul.msk.f32.gmra.mxu0 %vm71_vm1, %v9964_v38  ;;  %v8398_v38 = vld [vmem:[%s12672_s0 + $0x71] sm:$0xff] }
 0x25b   :  { %v2199_v15 = vpop.f32.mrf.mxu2  ;;  %8415 = vmatmul.msk.f32.gmra.mxu1 %vm71_vm1, %v8397_v13  ;;  %v10664_v13 = vld [vmem:[%s12672_s0 + $0x73] sm:$0xff] }
 0x25c   :  { %v2350_v50 = vpop.f32.mrf.mxu3  ;;  %v2243_v56 = vadd.f32 %v2199_v15, %v10313_v14 }
 0x25e   :  { %v2394_v16 = vadd.f32 %v2350_v50, %v2243_v56 }
 0x25f   :  { %v2503_v22 = vpop.f32.mrf.mxu0 }
 0x260   :  { %8314 = vmatmul.msk.f32.gmra.mxu2 %vm71_vm1, %v10646_v30  ;;  %v2544_v41 = vadd.f32 %v2500_v51, %v2394_v16  ;;  %v2653_v36 = vpop.f32.mrf.mxu1 }
 0x261   :  { %8348 = vmatmul.msk.f32.gmra.mxu3 %vm71_vm1, %v10323_v62 }
 0x262   :  { %v10655_v14 = vadd.f32 %v2650_v31, %v2544_v41  ;;  %8382 = vmatmul.msk.f32.gmra.mxu0 %vm71_vm1, %v9985_v6  ;;  %v8399_v6 = vld [vmem:[%s12672_s0 + $0x81] sm:$0xff] }
 0x263   :  { %v2202_v58 = vpop.f32.mrf.mxu2  ;;  %8416 = vmatmul.msk.f32.gmra.mxu1 %vm71_vm1, %v8398_v38  ;;  %v10682_v38 = vld [vmem:[%s12672_s0 + $0x83] sm:$0xff] }
 0x264   :  { %v2353_v34 = vpop.f32.mrf.mxu3  ;;  %v2244_v51 = vadd.f32 %v2202_v58, %v10334_v1  ;;  %v10687_v58 = vld [vmem:[%s12672_s0 + $0x84] sm:$0xff] }
 0x266   :  { %v2395_v15 = vadd.f32 %v2353_v34, %v2244_v51 }
 0x267   :  { %v2506_v50 = vpop.f32.mrf.mxu0 }
 0x268   :  { %8315 = vmatmul.msk.f32.gmra.mxu2 %vm71_vm1, %v10664_v13  ;;  %v2545_v31 = vadd.f32 %v2503_v22, %v2395_v15  ;;  %v2656_v56 = vpop.f32.mrf.mxu1 }
 0x269   :  { %8349 = vmatmul.msk.f32.gmra.mxu3 %vm71_vm1, %v10344_v25 }
 0x26a   :  { %v10673_v1 = vadd.f32 %v2653_v36, %v2545_v31  ;;  %8383 = vmatmul.msk.f32.gmra.mxu0 %vm71_vm1, %v10349_v28 }
 0x26b   :  { %v2205_v16 = vpop.f32.mrf.mxu2  ;;  %8417 = vmatmul.msk.f32.gmra.mxu1 %vm71_vm1, %v8399_v6 }
 0x26c   :  { %v2356_v41 = vpop.f32.mrf.mxu3  ;;  %v2245_v22 = vadd.f32 %v2205_v16, %v10360_v48  ;;  %v8400_v48 = vld [vmem:[%s12672_s0 + $0x91] sm:$0xff] }
 0x26e   :  { %v2396_v36 = vadd.f32 %v2356_v41, %v2245_v22 }
 0x26f   :  { %v2509_v28 = vpop.f32.mrf.mxu0 }
 0x270   :  { %8316 = vmatmul.msk.f32.gmra.mxu2 %vm71_vm1, %v10682_v38  ;;  %v2546_v34 = vadd.f32 %v2506_v50, %v2396_v36  ;;  %v2659_v15 = vpop.f32.mrf.mxu1 }
 0x271   :  { %8350 = vmatmul.msk.f32.gmra.mxu3 %vm71_vm1, %v10687_v58 }
 0x272   :  { %v10696_v51 = vadd.f32 %v2656_v56, %v2546_v34  ;;  %8384 = vmatmul.msk.f32.gmra.mxu0 %vm71_vm1, %v10017_v63 }
 0x273   :  { %v2208_v31 = vpop.f32.mrf.mxu2  ;;  %8418 = vmatmul.msk.f32.gmra.mxu1 %vm71_vm1, %v8400_v48 }
 0x274   :  { %v2359_v6 = vpop.f32.mrf.mxu3  ;;  %v2246_v50 = vadd.f32 %v2208_v31, %v10371_v9 }
 0x276   :  { %v2397_v16 = vadd.f32 %v2359_v6, %v2246_v50 }
 0x277   :  { %v2512_v56 = vpop.f32.mrf.mxu0 }
 0x278   :  { %8317 = vmatmul.msk.f32.gmra.mxu2 %vm71_vm1, %v10036_v21  ;;  %v2547_v41 = vadd.f32 %v2509_v28, %v2397_v16  ;;  %v10716_v21 = vld [vmem:[%s12672_s0 + $0xa3] sm:$0xff]  ;;  %v2662_v9 = vpop.f32.mrf.mxu1 }
 0x279   :  { %8351 = vmatmul.msk.f32.gmra.mxu3 %vm71_vm1, %v10381_v52  ;;  %v10721_v28 = vld [vmem:[%s12672_s0 + $0xa4] sm:$0xff] }
 0x27a   :  { %v10706_v22 = vadd.f32 %v2659_v15, %v2547_v41  ;;  %8385 = vmatmul.msk.f32.gmra.mxu0 %vm71_vm1, %v10386_v23  ;;  %v8402_v15 = vld [vmem:[%s12672_s0 + $0xb1] sm:$0xff] }
 0x27b   :  { %v2211_v36 = vpop.f32.mrf.mxu2  ;;  %8419 = vmatmul.msk.f32.gmra.mxu1 %vm71_vm1, %v10395_v8  ;;  %v8301_v41 = vld [vmem:[%s12672_s0 + $0xf3] sm:$0xff] }
 0x27c   :  { %v2362_v34 = vpop.f32.mrf.mxu3  ;;  %v2247_v63 = vadd.f32 %v2211_v36, %v10402_v47  ;;  %v8368_v47 = vld [vmem:[%s12672_s0 + $0xb0] sm:$0xff] }
 0x27e   :  { %v2398_v48 = vadd.f32 %v2362_v34, %v2247_v63 }
 0x27f   :  { %v2515_v8 = vpop.f32.mrf.mxu0 }
 0x280   :  { %8318 = vmatmul.msk.f32.gmra.mxu2 %vm71_vm1, %v10716_v21  ;;  %v2548_v23 = vadd.f32 %v2512_v56, %v2398_v48  ;;  %v2665_v36 = vpop.f32.mrf.mxu1 }
 0x281   :  { %8352 = vmatmul.msk.f32.gmra.mxu3 %vm71_vm1, %v10721_v28 }
 0x282   :  { %v10733_v31 = vadd.f32 %v2662_v9, %v2548_v23  ;;  %8386 = vmatmul.msk.f32.gmra.mxu0 %vm71_vm1, %v8368_v47  ;;  %v8403_v9 = vld [vmem:[%s12672_s0 + $0x101] sm:$0xff] }
 0x283   :  { %v2214_v6 = vpop.f32.mrf.mxu2  ;;  %8420 = vmatmul.msk.f32.gmra.mxu1 %vm71_vm1, %v8402_v15 }
 0x284   :  { %v2365_v50 = vpop.f32.mrf.mxu3  ;;  %v2248_v16 = vadd.f32 %v2214_v6, %v10418_v43 }
 0x286   :  { %v2399_v56 = vadd.f32 %v2365_v50, %v2248_v16 }
 0x287   :  { %v2518_v63 = vpop.f32.mrf.mxu0 }
 0x288   :  { %8319 = vmatmul.msk.f32.gmra.mxu2 %vm71_vm1, %v8301_v41  ;;  %v2549_v34 = vadd.f32 %v2515_v8, %v2399_v56  ;;  %v10774_v41 = vld [vmem:[%s12672_s0 + $0x113] sm:$0xff] }
 0x289   :  { %8353 = vmatmul.msk.f32.gmra.mxu3 %vm71_vm1, %v10427_v11  ;;  %v10756_v11 = vld [vmem:[%s12672_s0 + $0x103] sm:$0xff] }
 0x28a   :  { %v10747_v48 = vadd.f32 %v2665_v36, %v2549_v34  ;;  %8387 = vmatmul.msk.f32.gmra.mxu0 %vm71_vm1, %v10084_v4  ;;  %v8404_v4 = vld [vmem:[%s12672_s0 + $0x111] sm:$0xff] }
 0x28b   :  { %v2217_v43 = vpop.f32.mrf.mxu2  ;;  %8421 = vmatmul.msk.f32.gmra.mxu1 %vm71_vm1, %v8403_v9 }
 0x28c   :  { %v2368_v23 = vpop.f32.mrf.mxu3  ;;  %v2249_v47 = vadd.f32 %v2217_v43, %v10438_v29 }
 0x28e   :  { %v2400_v8 = vadd.f32 %v2368_v23, %v2249_v47 }
 0x28f   :  { %v2521_v6 = vpop.f32.mrf.mxu0 }
 0x290   :  { %8320 = vmatmul.msk.f32.gmra.mxu2 %vm71_vm1, %v10756_v11  ;;  %v10760_v15 = vadd.f32 %v2518_v63, %v2400_v8  ;;  %v8406_v8 = vld [vmem:[%s12672_s0 + $0x131] sm:$0xff] }
 0x291   :  { %8354 = vmatmul.msk.f32.gmra.mxu3 %vm71_vm1, %v10448_v59 }
 0x292   :  { %8388 = vmatmul.msk.f32.gmra.mxu0 %vm71_vm1, %v10105_v18  ;;  %v8405_v18 = vld [vmem:[%s12672_s0 + $0x121] sm:$0xff] }
 0x293   :  { %v2220_v29 = vpop.f32.mrf.mxu2  ;;  %8422 = vmatmul.msk.f32.gmra.mxu1 %vm71_vm1, %v8404_v4 }
 0x294   :  { %v2371_v50 = vpop.f32.mrf.mxu3  ;;  %v2250_v16 = vadd.f32 %v2220_v29, %v10459_v19 }
 0x296   :  { %v2401_v56 = vadd.f32 %v2371_v50, %v2250_v16  ;;  %v8407_v50 = vld [vmem:[%s12672_s0 + $0x141] sm:$0xff] }
 0x297   :  { %v2524_v34 = vpop.f32.mrf.mxu0 }
 0x298   :  { %8321 = vmatmul.msk.f32.gmra.mxu2 %vm71_vm1, %v10774_v41  ;;  %v10778_v36 = vadd.f32 %v2521_v6, %v2401_v56  ;;  %v10823_v56 = vld [vmem:[%s12672_s0 + $0x144] sm:$0xff] }
 0x299   :  { %8355 = vmatmul.msk.f32.gmra.mxu3 %vm71_vm1, %v10469_v54 }
 0x29a   :  { %8389 = vmatmul.msk.f32.gmra.mxu0 %vm71_vm1, %v10126_v3 }
 0x29b   :  { %v2223_v19 = vpop.f32.mrf.mxu2  ;;  %8423 = vmatmul.msk.f32.gmra.mxu1 %vm71_vm1, %v8405_v18  ;;  %v3933_v18 = vld [vmem:[#allocation3 + $0x78] sm:$0xff] }
 0x29c   :  { %v2374_v63 = vpop.f32.mrf.mxu3  ;;  %v2251_v9 = vadd.f32 %v2223_v19, %v10480_v32  ;;  %3990 = vmatpush.msra.mxu1 %v3933_v18  ;;  %v8408_v19 = vld [vmem:[%s12672_s0 + $0x151] sm:$0xff] }
 0x29e   :  { %v2402_v43 = vadd.f32 %v2374_v63, %v2251_v9 }
 0x29f   :  { %v2527_v47 = vpop.f32.mrf.mxu0 }
 0x2a0   :  { %8322 = vmatmul.msk.f32.gmra.mxu2 %vm71_vm1, %v10140_v49  ;;  %v10791_v23 = vadd.f32 %v2524_v34, %v2402_v43 }
 0x2a1   :  { %8356 = vmatmul.msk.f32.gmra.mxu3 %vm71_vm1, %v10490_v42 }
 0x2a2   :  { %8390 = vmatmul.msk.f32.gmra.mxu0 %vm71_vm1, %v10163_v7 }
 0x2a3   :  { %v2226_v6 = vpop.f32.mrf.mxu2  ;;  %8424 = vmatmul.msk.f32.gmra.mxu1 %vm71_vm1, %v8406_v8 }
 0x2a4   :  { %v2377_v3 = vpop.f32.mrf.mxu3  ;;  %v2252_v32 = vadd.f32 %v2226_v6, %v10505_v61 }
 0x2a6   :  { %v2403_v49 = vadd.f32 %v2377_v3, %v2252_v32 }
 0x2a7   :  { %v2530_v29 = vpop.f32.mrf.mxu0 }
 0x2a8   :  { %8323 = vmatmul.msk.f32.gmra.mxu2 %vm71_vm1, %v10178_v45  ;;  %v10804_v4 = vadd.f32 %v2527_v47, %v2403_v49  ;;  %v10818_v45 = vld [vmem:[%s12672_s0 + $0x143] sm:$0xff] }
 0x2a9   :  { %8357 = vmatmul.msk.f32.gmra.mxu3 %vm71_vm1, %v10522_v57 }
 0x2aa   :  { %8391 = vmatmul.msk.f32.gmra.mxu0 %vm71_vm1, %v10527_v0 }
 0x2ab   :  { %v2229_v16 = vpop.f32.mrf.mxu2  ;;  %8425 = vmatmul.msk.f32.gmra.mxu1 %vm71_vm1, %v8407_v50  ;;  %v8410_v50 = vld [vmem:[%s12672_s0 + $0x171] sm:$0xff] }
 0x2ac   :  { %v2380_v7 = vpop.f32.mrf.mxu3  ;;  %v2253_v61 = vadd.f32 %v2229_v16, %v10539_v20 }
 0x2ae   :  { %v2404_v34 = vadd.f32 %v2380_v7, %v2253_v61 }
 0x2af   :  { %v2533_v20 = vpop.f32.mrf.mxu0 }
 0x2b0   :  { %8324 = vmatmul.msk.f32.gmra.mxu2 %vm71_vm1, %v10818_v45  ;;  %v10827_v0 = vadd.f32 %v2530_v29, %v2404_v34  ;;  %v3932_v29 = vld [vmem:[#allocation3 + $0x70] sm:$0xff] }
 0x2b1   :  { %8358 = vmatmul.msk.f32.gmra.mxu3 %vm71_vm1, %v10823_v56  ;;  %3991 = vmatpush.msra.mxu1 %v3932_v29 }
 0x2b2   :  { %8392 = vmatmul.msk.f32.gmra.mxu0 %vm71_vm1, %v10205_v27 }
 0x2b3   :  { %v2232_v63 = vpop.f32.mrf.mxu2  ;;  %8426 = vmatmul.msk.f32.gmra.mxu1 %vm71_vm1, %v8408_v19 }
 0x2b4   :  { %v2383_v9 = vpop.f32.mrf.mxu3  ;;  %v2254_v43 = vadd.f32 %v2232_v63, %v10554_v40  ;;  %v10857_v40 = vld [vmem:[%s12672_s0 + $0x164] sm:$0xff] }
 0x2b6   :  { %v2405_v47 = vadd.f32 %v2383_v9, %v2254_v43 }
 0x2b7   :  { %v2536_v6 = vpop.f32.mrf.mxu0 }
 0x2b8   :  { %8325 = vmatmul.msk.f32.gmra.mxu2 %vm71_vm1, %v10224_v17  ;;  %v10840_v8 = vadd.f32 %v2533_v20, %v2405_v47  ;;  %v10852_v17 = vld [vmem:[%s12672_s0 + $0x163] sm:$0xff] }
 0x2b9   :  { %8359 = vmatmul.msk.f32.gmra.mxu3 %vm71_vm1, %v10564_v33  ;;  %v3931_v47 = vld [vmem:[#allocation3 + $0x68] sm:$0xff] }
 0x2ba   :  { %8393 = vmatmul.msk.f32.gmra.mxu0 %vm71_vm1, %v10569_v12  ;;  %3992 = vmatpush.msra.mxu1 %v3931_v47 }
 0x2bb   :  { %v2235_v3 = vpop.f32.mrf.mxu2  ;;  %8427 = vmatmul.msk.f32.gmra.mxu1 %vm71_vm1, %v10578_v60 }
 0x2bc   :  { %v2386_v32 = vpop.f32.mrf.mxu3  ;;  %v2255_v27 = vadd.f32 %v2235_v3, %v10585_v2  ;;  %v8376_v2 = vld [vmem:[%s12672_s0 + $0x170] sm:$0xff] }
 0x2be   :  { %v2406_v49 = vadd.f32 %v2386_v32, %v2255_v27  ;;  %v10892_v32 = vpop.f32.mrf.mxu1  ;;  %v12788_v27 = vld [vmem:[#allocation16_spill] sm:$0xff] }
 0x2bf   :  { %v2539_v60 = vpop.f32.mrf.mxu0 }
 0x2c0   :  { %8326 = vmatmul.msk.f32.gmra.mxu2 %vm71_vm1, %v10852_v17  ;;  %v10861_v12 = vadd.f32 %v2536_v6, %v2406_v49 }
 0x2c1   :  { %8360 = vmatmul.msk.f32.gmra.mxu3 %vm71_vm1, %v10857_v40 }
 0x2c2   :  { %8394 = vmatmul.msk.f32.gmra.mxu0 %vm71_vm1, %v8376_v2  ;;  %v3930_v2 = vld [vmem:[#allocation3 + $0x60] sm:$0xff] }
 0x2c3   :  { %v2238_v16 = vpop.f32.mrf.mxu2  ;;  %8428 = vmatmul.msk.f32.gmra.mxu1 %vm71_vm1, %v8410_v50  ;;  %v12789_v50 = vld [vmem:[#allocation17_spill] sm:$0xff] }
 0x2c4   :  { %v2389_v7 = vpop.f32.mrf.mxu3  ;;  %v2256_v61 = vadd.f32 %v2238_v16, %v10601_v39  ;;  %v12787_v39 = vld [vmem:[#allocation7_spill] sm:$0xff]  ;;  %3993 = vmatpush.msra.mxu1 %v3930_v2 }
 0x2c6   :  { %v2407_v34 = vadd.f32 %v2389_v7, %v2256_v61  ;;  %v10909_v7 = vpop.f32.mrf.mxu1 }
 0x2c7   :  { %v3095_v20 = vpop.f32.mrf.mxu0 }
 0x2c8   :  { %8447 = vmatmul.msk.f32.vlgmr.msra.gmra.mxu2 %vm71_vm1, %v10269_v53  ;;  %v10876_v18 = vadd.f32 %v2539_v60, %v2407_v34 }
 0x2c9   :  { %8481 = vmatmul.msk.f32.vlgmr.msra.gmra.mxu3 %vm71_vm1, %v10610_v44 }
 0x2ca   :  { %8515 = vmatmul.msk.f32.vlgmr.msra.gmra.mxu0 %vm71_vm1, %v10281_v24 }
 0x2cb   :  { %v2794_v19 = vpop.f32.mrf.mxu2 }
 0x2cc   :  { %v2944_v63 = vpop.f32.mrf.mxu3  ;;  %v2842_v9 = vadd.f32 %v2794_v19, %v10619_v55 }
 0x2ce   :  { %v2992_v43 = vadd.f32 %v2944_v63, %v2842_v9  ;;  %v10922_v9 = vpop.f32.mrf.mxu1 }
 0x2cf   :  { %v3098_v44 = vpop.f32.mrf.mxu0 }
 0x2d0   :  { %8448 = vmatmul.msk.f32.gmra.mxu2 %vm71_vm1, %v12787_v39  ;;  %v10885_v53 = vadd.f32 %v3095_v20, %v2992_v43 }
 0x2d1   :  { %8482 = vmatmul.msk.f32.gmra.mxu3 %vm71_vm1, %v10628_v46 }
 0x2d2   :  { %8516 = vmatmul.msk.f32.gmra.mxu0 %vm71_vm1, %v10302_v26 }
 0x2d3   :  { %v2797_v6 = vpop.f32.mrf.mxu2 }
 0x2d4   :  { %v2947_v3 = vpop.f32.mrf.mxu3  ;;  %v2843_v24 = vadd.f32 %v2797_v6, %v10637_v35 }
 0x2d6   :  { %v2993_v55 = vadd.f32 %v2947_v3, %v2843_v24  ;;  %v10938_v6 = vpop.f32.mrf.mxu1  ;;  %v12790_v24 = vld [vmem:[#allocation18_spill] sm:$0xff] }
 0x2d7   :  { %v3101_v46 = vpop.f32.mrf.mxu0 }
 0x2d8   :  { %8449 = vmatmul.msk.f32.gmra.mxu2 %vm71_vm1, %v12788_v27  ;;  %v10896_v49 = vadd.f32 %v3098_v44, %v2993_v55 }
 0x2d9   :  { %8483 = vmatmul.msk.f32.gmra.mxu3 %vm71_vm1, %v10646_v30 }
 0x2da   :  { %8517 = vmatmul.msk.f32.gmra.mxu0 %vm71_vm1, %v10323_v62 }
 0x2db   :  { %v2800_v29 = vpop.f32.mrf.mxu2 }
 0x2dc   :  { %v2950_v60 = vpop.f32.mrf.mxu3  ;;  %v2844_v26 = vadd.f32 %v2800_v29, %v10655_v14 }
 0x2de   :  { %v2994_v35 = vadd.f32 %v2950_v60, %v2844_v26  ;;  %v8470_v60 = vld [vmem:[%s12672_s0 + $0xb3] sm:$0xff] }
 0x2df   :  { %v3104_v30 = vpop.f32.mrf.mxu0 }
 0x2e0   :  { %8450 = vmatmul.msk.f32.gmra.mxu2 %vm71_vm1, %v12789_v50  ;;  %v10905_v16 = vadd.f32 %v3101_v46, %v2994_v35  ;;  %v3928_v35 = vld [vmem:[#allocation3 + $0x50] sm:$0xff] }
 0x2e1   :  { %8484 = vmatmul.msk.f32.gmra.mxu3 %vm71_vm1, %v10664_v13 }
 0x2e2   :  { %8518 = vmatmul.msk.f32.gmra.mxu0 %vm71_vm1, %v10344_v25 }
 0x2e3   :  { %v2803_v61 = vpop.f32.mrf.mxu2 }
 0x2e4   :  { %v2953_v34 = vpop.f32.mrf.mxu3  ;;  %v2845_v62 = vadd.f32 %v2803_v61, %v10673_v1  ;;  %v8434_v1 = vld [vmem:[%s12672_s0 + $0x92] sm:$0xff] }
 0x2e6   :  { %v2995_v14 = vadd.f32 %v2953_v34, %v2845_v62  ;;  %v12791_v62 = vld [vmem:[#allocation15_spill] sm:$0xff] }
 0x2e7   :  { %v3107_v13 = vpop.f32.mrf.mxu0 }
 0x2e8   :  { %8451 = vmatmul.msk.f32.gmra.mxu2 %vm71_vm1, %v10358_v10  ;;  %v10916_v20 = vadd.f32 %v3104_v30, %v2995_v14  ;;  %v8468_v10 = vld [vmem:[%s12672_s0 + $0x93] sm:$0xff] }
 0x2e9   :  { %8485 = vmatmul.msk.f32.gmra.mxu3 %vm71_vm1, %v10682_v38  ;;  %v3929_v38 = vld [vmem:[#allocation3 + $0x58] sm:$0xff] }
 0x2ea   :  { %8519 = vmatmul.msk.f32.gmra.mxu0 %vm71_vm1, %v10687_v58  ;;  %3994 = vmatpush.msra.mxu1 %v3929_v38  ;;  %v12792_v38 = vld [vmem:[#allocation9_spill] sm:$0xff] }
 0x2eb   :  { %v2806_v19 = vpop.f32.mrf.mxu2 }
 0x2ec   :  { %v2956_v63 = vpop.f32.mrf.mxu3  ;;  %v2846_v25 = vadd.f32 %v2806_v19, %v10696_v51  ;;  %3995 = vmatpush.msra.mxu1 %v3928_v35  ;;  %v2700_v19 = vadd.f32 %v10892_v32, %v10760_v15  ;;  %v2701_v15 = vadd.f32 %v10909_v7, %v10778_v36  ;;  %v3908_v7 = vld [vmem:[#allocation3 + $0x38] sm:$0xff]  ;;  %v3926_v35 = vld [vmem:[#allocation3 + $0x40] sm:$0xff] }
 0x2ed   :  { %4103 = vmatpush.msrb.mxu2 %v3908_v7  ;;  %v8476_v7 = vld [vmem:[%s12672_s0 + $0x153] sm:$0xff] }
 0x2ee   :  { %v2996_v43 = vadd.f32 %v2956_v63, %v2846_v25 }
 0x2ef   :  { %v3110_v58 = vpop.f32.mrf.mxu0 }
 0x2f0   :  { %8452 = vmatmul.msk.f32.gmra.mxu2 %vm71_vm1, %v8434_v1  ;;  %v10932_v47 = vadd.f32 %v3107_v13, %v2996_v43  ;;  %v3927_v43 = vld [vmem:[#allocation3 + $0x48] sm:$0xff] }
 0x2f1   :  { %8486 = vmatmul.msk.f32.gmra.mxu3 %vm71_vm1, %v8468_v10  ;;  %3996 = vmatpush.msra.mxu1 %v3927_v43  ;;  %v3902_v43 = vld [vmem:[#allocation3 + $0x8] sm:$0xff] }
 0x2f2   :  { %8520 = vmatmul.msk.f32.gmra.mxu0 %vm71_vm1, %v10381_v52 }
 0x2f3   :  { %v2809_v39 = vpop.f32.mrf.mxu2  ;;  %3997 = vmatpush.msra.mxu1 %v3926_v35 }
 0x2f4   :  { %v2959_v51 = vpop.f32.mrf.mxu3  ;;  %v2847_v44 = vadd.f32 %v2809_v39, %v10706_v22  ;;  %v8436_v22 = vld [vmem:[%s12672_s0 + $0xb2] sm:$0xff] }
 0x2f6   :  { %v2997_v3 = vadd.f32 %v2959_v51, %v2847_v44  ;;  %v8473_v44 = vld [vmem:[%s12672_s0 + $0x123] sm:$0xff] }
 0x2f7   :  { %v3113_v27 = vpop.f32.mrf.mxu0 }
 0x2f8   :  { %8453 = vmatmul.msk.f32.gmra.mxu2 %vm71_vm1, %v12790_v24  ;;  %v10942_v55 = vadd.f32 %v3110_v58, %v2997_v3  ;;  %v12793_v24 = vld [vmem:[#allocation20_spill] sm:$0xff] }
 0x2f9   :  { %8487 = vmatmul.msk.f32.gmra.mxu3 %vm71_vm1, %v10716_v21  ;;  %v10955_v21 = vpop.f32.mrf.mxu1 }
 0x2fa   :  { %8521 = vmatmul.msk.f32.gmra.mxu0 %vm71_vm1, %v10721_v28 }
 0x2fb   :  { %v2812_v46 = vpop.f32.mrf.mxu2 }
 0x2fc   :  { %v2962_v29 = vpop.f32.mrf.mxu3  ;;  %v2848_v52 = vadd.f32 %v2812_v46, %v10733_v31  ;;  %v8504_v31 = vld [vmem:[%s12672_s0 + $0xb4] sm:$0xff] }
 0x2fe   :  { %v2998_v26 = vadd.f32 %v2962_v29, %v2848_v52  ;;  %v3906_v52 = vld [vmem:[#allocation3 + $0x28] sm:$0xff] }
 0x2ff   :  { %v3116_v28 = vpop.f32.mrf.mxu0 }
 0x300   :  { %8454 = vmatmul.msk.f32.gmra.mxu2 %vm71_vm1, %v8436_v22  ;;  %v10958_v2 = vadd.f32 %v3113_v27, %v2998_v26  ;;  %v4184_v27 = vld [vmem:[#allocation3 + $0xb8] sm:$0xff]  ;;  %v4183_v22 = vld [vmem:[#allocation3 + $0xb0] sm:$0xff] }
 0x301   :  { %8488 = vmatmul.msk.f32.gmra.mxu3 %vm71_vm1, %v8470_v60  ;;  %v10974_v63 = vpop.f32.mrf.mxu1  ;;  %v8474_v60 = vld [vmem:[%s12672_s0 + $0x133] sm:$0xff] }
 0x302   :  { %8522 = vmatmul.msk.f32.gmra.mxu0 %vm71_vm1, %v8504_v31  ;;  %4241 = vmatpush.msrb.mxu3 %v4184_v27  ;;  %v4182_v31 = vld [vmem:[#allocation3 + $0xa8] sm:$0xff] }
 0x303   :  { %v2815_v50 = vpop.f32.mrf.mxu2 }
 0x304   :  { %v2965_v30 = vpop.f32.mrf.mxu3  ;;  %v2849_v61 = vadd.f32 %v2815_v50, %v10747_v48  ;;  %4242 = vmatpush.msrb.mxu3 %v4183_v22  ;;  %v4338_v50 = vld [vmem:[#allocation3 + $0xf8] sm:$0xff] }
 0x305   :  { %4395 = vmatpush.msrb.mxu0 %v4338_v50 }
 0x306   :  { %v2999_v34 = vadd.f32 %v2965_v30, %v2849_v61  ;;  %v3904_v61 = vld [vmem:[#allocation3 + $0x18] sm:$0xff]  ;;  %4243 = vmatpush.msrb.mxu3 %v4182_v31 }
 0x307   :  { %v3119_v13 = vpop.f32.mrf.mxu0 }
 0x308   :  { %8455 = vmatmul.msk.f32.gmra.mxu2 %vm71_vm1, %v12791_v62  ;;  %v10968_v14 = vadd.f32 %v3116_v28, %v2999_v34  ;;  %v3905_v28 = vld [vmem:[#allocation3 + $0x20] sm:$0xff]  ;;  %v8968_v62 = vmov 0.0  }
 0x309   :  { %8489 = vmatmul.msk.f32.gmra.mxu3 %vm71_vm1, %v10756_v11  ;;  %v4181_v34 = vld [vmem:[#allocation3 + $0xa0] sm:$0xff]  ;;  %3796 = vst.msk [vmem:[#allocation2] sm:$0xff] %vm3795_vm2, %v8968_v62 }
 0x30a   :  { %8523 = vmatmul.msk.f32.gmra.mxu0 %vm71_vm1, %v10448_v59  ;;  %v10988_v59 = vpop.f32.mrf.mxu1  ;;  %3797 = vst.msk [vmem:[#allocation2 + $0x8] sm:$0xff] %vm3795_vm2, %v8968_v62  ;;  %4244 = vmatpush.msrb.mxu3 %v4181_v34 }
 0x30b   :  { %v2818_v25 = vpop.f32.mrf.mxu2  ;;  %3798 = vst.msk [vmem:[#allocation2 + $0x10] sm:$0xff] %vm3795_vm2, %v8968_v62 }
 0x30c   :  { %v2968_v1 = vpop.f32.mrf.mxu3  ;;  %v2850_v48 = vadd.f32 %v2818_v25, %v2700_v19  ;;  %v3903_v19 = vld [vmem:[#allocation3 + $0x10] sm:$0xff]  ;;  %v4180_v25 = vld [vmem:[#allocation3 + $0x98] sm:$0xff]  ;;  %3799 = vst.msk [vmem:[#allocation2 + $0x18] sm:$0xff] %vm3795_vm2, %v8968_v62 }
 0x30d   :  { %3800 = vst.msk [vmem:[#allocation2 + $0x20] sm:$0xff] %vm3795_vm2, %v8968_v62  ;;  %4245 = vmatpush.msrb.mxu3 %v4180_v25 }
 0x30e   :  { %v3000_v10 = vadd.f32 %v2968_v1, %v2850_v48  ;;  %3801 = vst.msk [vmem:[#allocation2 + $0x28] sm:$0xff] %vm3795_vm2, %v8968_v62 }
 0x30f   :  { %v3122_v11 = vpop.f32.mrf.mxu0  ;;  %3802 = vst.msk [vmem:[#allocation2 + $0x30] sm:$0xff] %vm3795_vm2, %v8968_v62 }
 0x310   :  { %8456 = vmatmul.msk.f32.gmra.mxu2 %vm71_vm1, %v12792_v38  ;;  %v10980_v58 = vadd.f32 %v3119_v13, %v3000_v10  ;;  %v4337_v13 = vld [vmem:[#allocation3 + $0xf0] sm:$0xff]  ;;  %v4336_v10 = vld [vmem:[#allocation3 + $0xe8] sm:$0xff]  ;;  %3803 = vst.msk [vmem:[#allocation2 + $0x38] sm:$0xff] %vm3795_vm2, %v8968_v62 }
 0x311   :  { %8490 = vmatmul.msk.f32.gmra.mxu3 %vm71_vm1, %v10774_v41  ;;  %4396 = vmatpush.msrb.mxu0 %v4337_v13  ;;  %v4179_v38 = vld [vmem:[#allocation3 + $0x90] sm:$0xff]  ;;  %3804 = vst.msk [vmem:[#allocation2 + $0x40] sm:$0xff] %vm3795_vm2, %v8968_v62  ;;  %v3909_v31 = vld [vmem:[#allocation2 + $0x7] sm:$0xff] }
 0x312   :  { %8524 = vmatmul.msk.f32.gmra.mxu0 %vm71_vm1, %v10469_v54  ;;  %v3907_v54 = vld [vmem:[#allocation3 + $0x30] sm:$0xff]  ;;  %v11009_v26 = vpop.f32.mrf.mxu1  ;;  %4246 = vmatpush.msrb.mxu3 %v4179_v38  ;;  %3805 = vst.msk [vmem:[#allocation2 + $0x48] sm:$0xff] %vm3795_vm2, %v8968_v62  ;;  %v3885_v13 = vld [vmem:[#allocation2 + $0x6] sm:$0xff] }
 0x313   :  { %v2821_v32 = vpop.f32.mrf.mxu2  ;;  %4104 = vmatpush.msrb.mxu2 %v3907_v54  ;;  %4397 = vmatpush.msrb.mxu0 %v4336_v10  ;;  %3806 = vst.msk [vmem:[#allocation2 + $0x50] sm:$0xff] %vm3795_vm2, %v8968_v62  ;;  %v4314_v38 = vld [vmem:[#allocation2 + $0x9] sm:$0xff] }
 0x314   :  { %v2971_v39 = vpop.f32.mrf.mxu3  ;;  %v2851_v51 = vadd.f32 %v2821_v32, %v2701_v15  ;;  %v4178_v15 = vld [vmem:[#allocation3 + $0x88] sm:$0xff]  ;;  %3807 = vst.msk [vmem:[#allocation2 + $0x58] sm:$0xff] %vm3795_vm2, %v8968_v62  ;;  %8531 = vmatmul.msk.f32.vlgmr.msra.gmra.mxu1 %vm3795_vm2, %v3909_v31  ;;  %v11169_v10 = vld [vmem:[#allocation2 + $0x1f] sm:$0xff] }
 0x315   :  { %4105 = vmatpush.msrb.mxu2 %v3906_v52  ;;  %4247 = vmatpush.msrb.mxu3 %v4178_v15  ;;  %3808 = vst.msk [vmem:[#allocation2 + $0x60] sm:$0xff] %vm3795_vm2, %v8968_v62 }
 0x316   :  { %v3001_v3 = vadd.f32 %v2971_v39, %v2851_v51  ;;  %v4334_v51 = vld [vmem:[#allocation3 + $0xd8] sm:$0xff]  ;;  %3809 = vst.msk [vmem:[#allocation2 + $0x68] sm:$0xff] %vm3795_vm2, %v8968_v62 }
 0x317   :  { %v10998_v36 = vpop.f32.mrf.mxu0  ;;  %4106 = vmatpush.msrb.mxu2 %v3905_v28  ;;  %3810 = vst.msk [vmem:[#allocation2 + $0x70] sm:$0xff] %vm3795_vm2, %v8968_v62  ;;  %v8478_v28 = vld [vmem:[%s12672_s0 + $0x173] sm:$0xff] }
 0x318   :  { %8457 = vmatmul.msk.f32.gmra.mxu2 %vm71_vm1, %v12793_v24  ;;  %v10995_v41 = vadd.f32 %v3122_v11, %v3001_v3  ;;  %v4335_v11 = vld [vmem:[#allocation3 + $0xe0] sm:$0xff]  ;;  %v8442_v24 = vld [vmem:[%s12672_s0 + $0x152] sm:$0xff]  ;;  %3811 = vst.msk [vmem:[#allocation2 + $0x78] sm:$0xff] %vm3795_vm2, %v8968_v62 }
 0x319   :  { %8491 = vmatmul.msk.f32.gmra.mxu3 %vm71_vm1, %v8473_v44  ;;  %4107 = vmatpush.msrb.mxu2 %v3904_v61  ;;  %v4177_v44 = vld [vmem:[#allocation3 + $0x80] sm:$0xff]  ;;  %3812 = vst.msk [vmem:[#allocation2 + $0x80] sm:$0xff] %vm3795_vm2, %v8968_v62 }
 0x31a   :  { %8525 = vmatmul.msk.f32.gmra.mxu0 %vm71_vm1, %v10490_v42  ;;  %v12794_v42 = vld [vmem:[#allocation21_spill] sm:$0xff]  ;;  %v11038_v32 = vpop.f32.mrf.mxu1  ;;  %4248 = vmatpush.msrb.mxu3 %v4177_v44  ;;  %3813 = vst.msk [vmem:[#allocation2 + $0x88] sm:$0xff] %vm3795_vm2, %v8968_v62  ;;  %v11190_v44 = vld [vmem:[#allocation2 + $0x20] sm:$0xff] }
 0x31b   :  { %v11000_v46 = vpop.f32.mrf.mxu2  ;;  %4108 = vmatpush.msrb.mxu2 %v3903_v19  ;;  %4398 = vmatpush.msrb.mxu0 %v4335_v11  ;;  %3814 = vst.msk [vmem:[#allocation2 + $0x90] sm:$0xff] %vm3795_vm2, %v8968_v62  ;;  %v4160_v19 = vld [vmem:[#allocation2 + $0x8] sm:$0xff]  ;;  %v4492_v11 = vld [vmem:[#allocation3 + $0x138] sm:$0xff] }
 0x31c   :  { %v11002_v29 = vpop.f32.mrf.mxu3  ;;  %3815 = vst.msk [vmem:[#allocation2 + $0x98] sm:$0xff] %vm3795_vm2, %v8968_v62  ;;  %4549 = vmatpush.msrb.mxu1 %v4492_v11 }
 0x31d   :  { %4109 = vmatpush.msrb.mxu2 %v3902_v43  ;;  %4399 = vmatpush.msrb.mxu0 %v4334_v51  ;;  %3816 = vst.msk [vmem:[#allocation2 + $0xa0] sm:$0xff] %vm3795_vm2, %v8968_v62  ;;  %v11188_v51 = vld [vmem:[#allocation2 + $0x1e] sm:$0xff] }
 0x31e   :  { %3817 = vst.msk [vmem:[#allocation2 + $0xa8] sm:$0xff] %vm3795_vm2, %v8968_v62  ;;  %8532 = vmatmul.msk.f32.gmra.mxu1 %vm3795_vm2, %v11169_v10 }
 0x31f   :  { %v11014_v30 = vpop.f32.mrf.mxu0  ;;  %3818 = vst.msk [vmem:[#allocation2 + $0xb0] sm:$0xff] %vm3795_vm2, %v8968_v62 }
 0x320   :  { %8458 = vmatmul.msk.f32.gmra.mxu2 %vm71_vm1, %v12794_v42  ;;  %3819 = vst.msk [vmem:[#allocation2 + $0xb8] sm:$0xff] %vm3795_vm2, %v8968_v62  ;;  %v8512_v42 = vld [vmem:[%s12672_s0 + $0x174] sm:$0xff] }
 0x321   :  { %8492 = vmatmul.msk.f32.gmra.mxu3 %vm71_vm1, %v8474_v60  ;;  %3820 = vst.msk [vmem:[#allocation2 + $0xc0] sm:$0xff] %vm3795_vm2, %v8968_v62 }
 0x322   :  { %8526 = vmatmul.msk.f32.gmra.mxu0 %vm71_vm1, %v10522_v57  ;;  %v3901_v57 = vld [vmem:[#allocation3] sm:$0xff]  ;;  %v11082_v27 = vpop.f32.mrf.mxu1  ;;  %3821 = vst.msk [vmem:[#allocation2 + $0xc8] sm:$0xff] %vm3795_vm2, %v8968_v62 }
 0x323   :  { %v11022_v1 = vpop.f32.mrf.mxu2  ;;  %4110 = vmatpush.msrb.mxu2 %v3901_v57  ;;  %3822 = vst.msk [vmem:[#allocation2 + $0xd0] sm:$0xff] %vm3795_vm2, %v8968_v62 }
 0x324   :  { %v11024_v48 = vpop.f32.mrf.mxu3  ;;  %3823 = vst.msk [vmem:[#allocation2 + $0xd8] sm:$0xff] %vm3795_vm2, %v8968_v62 }
 0x325   :  { %3824 = vst.msk [vmem:[#allocation2 + $0xe0] sm:$0xff] %vm3795_vm2, %v8968_v62 }
 0x326   :  { %3825 = vst.msk [vmem:[#allocation2 + $0xe8] sm:$0xff] %vm3795_vm2, %v8968_v62 }
 0x327   :  { %v11044_v39 = vpop.f32.mrf.mxu0  ;;  %3826 = vst.msk [vmem:[#allocation2 + $0xf0] sm:$0xff] %vm3795_vm2, %v8968_v62 }
 0x328   :  { %8459 = vmatmul.msk.f32.gmra.mxu2 %vm71_vm1, %v10537_v37  ;;  %3827 = vst.msk [vmem:[#allocation2 + $0xf8] sm:$0xff] %vm3795_vm2, %v8968_v62 }
 0x329   :  { %8493 = vmatmul.msk.f32.gmra.mxu3 %vm71_vm1, %v10818_v45  ;;  %v4333_v45 = vld [vmem:[#allocation3 + $0xd0] sm:$0xff]  ;;  %3828 = vst.msk [vmem:[#allocation2 + $0x100] sm:$0xff] %vm3795_vm2, %v8968_v62 }
 0x32a   :  { %8527 = vmatmul.msk.f32.gmra.mxu0 %vm71_vm1, %v10823_v56  ;;  %v4332_v56 = vld [vmem:[#allocation3 + $0xc8] sm:$0xff]  ;;  %3829 = vst.msk [vmem:[#allocation2 + $0x108] sm:$0xff] %vm3795_vm2, %v8968_v62 }
 0x32b   :  { %v11052_v37 = vpop.f32.mrf.mxu2  ;;  %4400 = vmatpush.msrb.mxu0 %v4333_v45  ;;  %3830 = vst.msk [vmem:[#allocation2 + $0x110] sm:$0xff] %vm3795_vm2, %v8968_v62 }
 0x32c   :  { %v11054_v3 = vpop.f32.mrf.mxu3  ;;  %3831 = vst.msk [vmem:[#allocation2 + $0x118] sm:$0xff] %vm3795_vm2, %v8968_v62 }
 0x32d   :  { %4401 = vmatpush.msrb.mxu0 %v4332_v56  ;;  %3832 = vst.msk [vmem:[#allocation2 + $0x120] sm:$0xff] %vm3795_vm2, %v8968_v62  ;;  %v4491_v56 = vld [vmem:[#allocation3 + $0x130] sm:$0xff] }
 0x32e   :  { %3833 = vst.msk [vmem:[#allocation2 + $0x128] sm:$0xff] %vm3795_vm2, %v8968_v62  ;;  %4550 = vmatpush.msrb.mxu1 %v4491_v56 }
 0x32f   :  { %v11076_v54 = vpop.f32.mrf.mxu0  ;;  %3834 = vst.msk [vmem:[#allocation2 + $0x130] sm:$0xff] %vm3795_vm2, %v8968_v62 }
 0x330   :  { %8460 = vmatmul.msk.f32.gmra.mxu2 %vm71_vm1, %v8442_v24  ;;  %3835 = vst.msk [vmem:[#allocation2 + $0x138] sm:$0xff] %vm3795_vm2, %v8968_v62 }
 0x331   :  { %8494 = vmatmul.msk.f32.gmra.mxu3 %vm71_vm1, %v8476_v7  ;;  %3836 = vst.msk [vmem:[#allocation2 + $0x140] sm:$0xff] %vm3795_vm2, %v8968_v62  ;;  %v4315_v7 = vld [vmem:[#allocation2 + $0x21] sm:$0xff] }
 0x332   :  { %8528 = vmatmul.msk.f32.gmra.mxu0 %vm71_vm1, %v10564_v33  ;;  %3837 = vst.msk [vmem:[#allocation2 + $0x148] sm:$0xff] %vm3795_vm2, %v8968_v62 }
 0x333   :  { %v11086_v52 = vpop.f32.mrf.mxu2  ;;  %3838 = vst.msk [vmem:[#allocation2 + $0x150] sm:$0xff] %vm3795_vm2, %v8968_v62 }
 0x334   :  { %v11088_v22 = vpop.f32.mrf.mxu3  ;;  %3839 = vst.msk [vmem:[#allocation2 + $0x158] sm:$0xff] %vm3795_vm2, %v8968_v62 }
 0x335   :  { %3840 = vst.msk [vmem:[#allocation2 + $0x160] sm:$0xff] %vm3795_vm2, %v8968_v62 }
 0x336   :  { %3841 = vst.msk [vmem:[#allocation2 + $0x168] sm:$0xff] %vm3795_vm2, %v8968_v62 }
 0x337   :  { %v11106_v33 = vpop.f32.mrf.mxu0  ;;  %3842 = vst.msk [vmem:[#allocation2 + $0x170] sm:$0xff] %vm3795_vm2, %v8968_v62 }
 0x338   :  { %8461 = vmatmul.msk.f32.gmra.mxu2 %vm71_vm1, %v10583_v5  ;;  %v11122_v5 = vpop.f32.mrf.mxu1  ;;  %3843 = vst.msk [vmem:[#allocation2 + $0x178] sm:$0xff] %vm3795_vm2, %v8968_v62 }
 0x339   :  { %8495 = vmatmul.msk.f32.gmra.mxu3 %vm71_vm1, %v10852_v17  ;;  %v8444_v17 = vld [vmem:[%s12672_s0 + $0x172] sm:$0xff]  ;;  %3844 = vst.msk [vmem:[#allocation2 + $0x180] sm:$0xff] %vm3795_vm2, %v8968_v62 }
 0x33a   :  { %8529 = vmatmul.msk.f32.gmra.mxu0 %vm71_vm1, %v10857_v40  ;;  %v4331_v40 = vld [vmem:[#allocation3 + $0xc0] sm:$0xff]  ;;  %3845 = vst.msk [vmem:[#allocation2 + $0x188] sm:$0xff] %vm3795_vm2, %v8968_v62 }
 0x33b   :  { %v11114_v60 = vpop.f32.mrf.mxu2  ;;  %4402 = vmatpush.msrb.mxu0 %v4331_v40  ;;  %3846 = vst.msk [vmem:[#allocation2 + $0x190] sm:$0xff] %vm3795_vm2, %v8968_v62 }
 0x33c   :  { %v11116_v35 = vpop.f32.mrf.mxu3  ;;  %3847 = vst.msk [vmem:[#allocation2 + $0x198] sm:$0xff] %vm3795_vm2, %v8968_v62 }
 0x33d   :  { %3848 = vst.msk [vmem:[#allocation2 + $0x1a0] sm:$0xff] %vm3795_vm2, %v8968_v62 }
 0x33e   :  { %3849 = vst.msk [vmem:[#allocation2 + $0x1a8] sm:$0xff] %vm3795_vm2, %v8968_v62 }
 0x33f   :  { %v11140_v50 = vpop.f32.mrf.mxu0  ;;  %3850 = vst.msk [vmem:[#allocation2 + $0x1b0] sm:$0xff] %vm3795_vm2, %v8968_v62 }
 0x340   :  { %8462 = vmatmul.msk.f32.gmra.mxu2 %vm71_vm1, %v8444_v17  ;;  %v11163_v25 = vpop.f32.mrf.mxu1  ;;  %v3293_v17 = vadd.f32 %v11038_v32, %v10885_v53  ;;  %3851 = vst.msk [vmem:[#allocation2 + $0x1b8] sm:$0xff] %vm3795_vm2, %v8968_v62 }
 0x341   :  { %8496 = vmatmul.msk.f32.gmra.mxu3 %vm71_vm1, %v8478_v28  ;;  %v3294_v28 = vadd.f32 %v11082_v27, %v10896_v49  ;;  %3852 = vst.msk [vmem:[#allocation2 + $0x1c0] sm:$0xff] %vm3795_vm2, %v8968_v62 }
 0x342   :  { %8530 = vmatmul.msk.f32.gmra.mxu0 %vm71_vm1, %v8512_v42  ;;  %3853 = vst.msk [vmem:[#allocation2 + $0x1c8] sm:$0xff] %vm3795_vm2, %v8968_v62 }
 0x343   :  { %v11152_v61 = vpop.f32.mrf.mxu2  ;;  %3854 = vst.msk [vmem:[#allocation2 + $0x1d0] sm:$0xff] %vm3795_vm2, %v8968_v62 }
 0x344   :  { %v11154_v34 = vpop.f32.mrf.mxu3  ;;  %3855 = vst.msk [vmem:[#allocation2 + $0x1d8] sm:$0xff] %vm3795_vm2, %v8968_v62 }
 0x345   :  { %3856 = vst.msk [vmem:[#allocation2 + $0x1e0] sm:$0xff] %vm3795_vm2, %v8968_v62 }
 0x346   :  { %3857 = vst.msk [vmem:[#allocation2 + $0x1e8] sm:$0xff] %vm3795_vm2, %v8968_v62 }
 0x347   :  { %v3695_v43 = vpop.f32.mrf.mxu0  ;;  %3858 = vst.msk [vmem:[#allocation2 + $0x1f0] sm:$0xff] %vm3795_vm2, %v8968_v62 }
 0x348   :  { %8547 = vmatmul.msk.f32.vlgmr.msrb.gmra.mxu2 %vm3795_vm2, %v3885_v13  ;;  %v11196_v45 = vpop.f32.mrf.mxu1  ;;  %v3295_v13 = vadd.f32 %v11122_v5, %v10905_v16  ;;  %3859 = vst.msk [vmem:[#allocation2 + $0x1f8] sm:$0xff] %vm3795_vm2, %v8968_v62 }
 0x349   :  { %8563 = vmatmul.msk.f32.vlgmr.msrb.gmra.mxu3 %vm3795_vm2, %v4160_v19  ;;  %3860 = vst.msk [vmem:[#allocation2 + $0x200] sm:$0xff] %vm3795_vm2, %v8968_v62 }
 0x34a   :  { %8579 = vmatmul.msk.f32.vlgmr.msrb.gmra.mxu0 %vm3795_vm2, %v4314_v38  ;;  %3861 = vst.msk [vmem:[#allocation2 + $0x208] sm:$0xff] %vm3795_vm2, %v8968_v62 }
 0x34b   :  { %v3395_v57 = vpop.f32.mrf.mxu2  ;;  %3862 = vst.msk [vmem:[#allocation2 + $0x210] sm:$0xff] %vm3795_vm2, %v8968_v62 }
 0x34c   :  { %v3545_v15 = vpop.f32.mrf.mxu3  ;;  %v3443_v42 = vadd.f32 %v3395_v57, %v3293_v17  ;;  %3863 = vst.msk [vmem:[#allocation2 + $0x218] sm:$0xff] %vm3795_vm2, %v8968_v62 }
 0x34d   :  { %3864 = vst.msk [vmem:[#allocation2 + $0x220] sm:$0xff] %vm3795_vm2, %v8968_v62 }
 0x34e   :  { %v3593_v49 = vadd.f32 %v3545_v15, %v3443_v42  ;;  %v11238_v15 = vld [vmem:[%s12674_s2] ss:$0 sm:$0xff]  ;;  %3865 = vst.msk [vmem:[#allocation2 + $0x228] sm:$0xff] %vm3795_vm2, %v8968_v62 }
 0x34f   :  { %v3698_v24 = vpop.f32.mrf.mxu0  ;;  %3866 = vst.msk [vmem:[#allocation2 + $0x230] sm:$0xff] %vm3795_vm2, %v8968_v62 }
 0x350   :  { %8548 = vmatmul.msk.f32.gmra.mxu2 %vm3795_vm2, %v11188_v51  ;;  %v3260_v19 = vpop.f32.mrf.mxu1  ;;  %v3743_v57 = vadd.f32 %v3695_v43, %v3593_v49  ;;  %3867 = vst.msk [vmem:[#allocation2 + $0x238] sm:$0xff] %vm3795_vm2, %v8968_v62 }
 0x351   :  { %8564 = vmatmul.msk.f32.gmra.mxu3 %vm3795_vm2, %v11190_v44 }
 0x352   :  { %8580 = vmatmul.msk.f32.gmra.mxu0 %vm3795_vm2, %v4315_v7  ;;  %v3763_v43 = vadd.f32 %v11238_v15, %v3743_v57  ;;  %v3297_v57 = vadd.f32 %v11196_v45, %v10932_v47 }
 0x353   :  { %v3398_v40 = vpop.f32.mrf.mxu2 }
 0x354   :  { %v3548_v31 = vpop.f32.mrf.mxu3  ;;  %v3444_v53 = vadd.f32 %v3398_v40, %v3294_v28  ;;  %v3296_v40 = vadd.f32 %v11163_v25, %v10916_v20 }
 0x356   :  { %v3594_v27 = vadd.f32 %v3548_v31, %v3444_v53 }
 0x357   :  { %v3701_v32 = vpop.f32.mrf.mxu0 }
 0x358   :  { %v3744_v16 = vadd.f32 %v3698_v24, %v3594_v27  ;;  %v4490_v24 = vld [vmem:[#allocation3 + $0x128] sm:$0xff]  ;;  %v3263_v49 = vpop.f32.mrf.mxu1 }
 0x359   :  { %4551 = vmatpush.msrb.mxu1 %v4490_v24 }
 0x35a   :  { %v3764_v28 = vadd.f32 %v11238_v15, %v3744_v16 }
 0x35b   :  { %v3401_v38 = vpop.f32.mrf.mxu2 }
 0x35c   :  { %v3551_v11 = vpop.f32.mrf.mxu3  ;;  %v3445_v7 = vadd.f32 %v3401_v38, %v3295_v13  ;;  %v3780_v20 = vmax.f32 %v3764_v28, 0.0 }
 0x35e   :  { %v3595_v5 = vadd.f32 %v3551_v11, %v3445_v7  ;;  %3870 = vst.msk [vmem:[#allocation2 + $0x50] sm:$0xff] %vm3795_vm2, %v3780_v20  ;;  %v4489_v20 = vld [vmem:[#allocation3 + $0x120] sm:$0xff] }
 0x35f   :  { %v3704_v17 = vpop.f32.mrf.mxu0  ;;  %4552 = vmatpush.msrb.mxu1 %v4489_v20 }
 0x360   :  { %v3745_v56 = vadd.f32 %v3701_v32, %v3595_v5  ;;  %v3779_v32 = vmax.f32 %v3763_v43, 0.0  ;;  %v3266_v28 = vpop.f32.mrf.mxu1 }
 0x362   :  { %v3765_v31 = vadd.f32 %v11238_v15, %v3745_v56  ;;  %3869 = vst.msk [vmem:[#allocation2 + $0x38] sm:$0xff] %vm3795_vm2, %v3779_v32 }
 0x363   :  { %v3404_v42 = vpop.f32.mrf.mxu2 }
 0x364   :  { %v3554_v53 = vpop.f32.mrf.mxu3  ;;  %v3446_v27 = vadd.f32 %v3404_v42, %v3296_v40  ;;  %v3781_v25 = vmax.f32 %v3765_v31, 0.0  ;;  %v3298_v42 = vadd.f32 %v3260_v19, %v10942_v55 }
 0x366   :  { %v3596_v13 = vadd.f32 %v3554_v53, %v3446_v27  ;;  %3871 = vst.msk [vmem:[#allocation2 + $0x68] sm:$0xff] %vm3795_vm2, %v3781_v25 }
 0x367   :  { %v3707_v11 = vpop.f32.mrf.mxu0 }
 0x368   :  { %v3746_v38 = vadd.f32 %v3704_v17, %v3596_v13 }
 0x369   :  { %v11274_v24 = vld [vmem:[#allocation2 + $0x37] sm:$0xff] }
 0x36a   :  { %v3766_v7 = vadd.f32 %v11238_v15, %v3746_v38  ;;  %v11276_v17 = vld [vmem:[#allocation2 + $0x36] sm:$0xff]  ;;  %8533 = vmatmul.msk.f32.gmra.mxu1 %vm3795_vm2, %v11274_v24 }
 0x36b   :  { %v3407_v16 = vpop.f32.mrf.mxu2  ;;  %v11278_v40 = vld [vmem:[#allocation2 + $0x38] sm:$0xff]  ;;  %8549 = vmatmul.msk.f32.gmra.mxu2 %vm3795_vm2, %v11276_v17  ;;  %v11289_v38 = vld [vmem:[#allocation2 + $0x4f] sm:$0xff] }
 0x36c   :  { %v3557_v5 = vpop.f32.mrf.mxu3  ;;  %v3782_v43 = vmax.f32 %v3766_v7, 0.0  ;;  %v3447_v56 = vadd.f32 %v3407_v16, %v3297_v57  ;;  %v4316_v47 = vld [vmem:[#allocation2 + $0x39] sm:$0xff]  ;;  %8565 = vmatmul.msk.f32.gmra.mxu3 %vm3795_vm2, %v11278_v40  ;;  %v11291_v57 = vld [vmem:[#allocation2 + $0x4e] sm:$0xff] }
 0x36d   :  { %8581 = vmatmul.msk.f32.gmra.mxu0 %vm3795_vm2, %v4316_v47  ;;  %v4317_v7 = vld [vmem:[#allocation2 + $0x51] sm:$0xff] }
 0x36e   :  { %3872 = vst.msk [vmem:[#allocation2 + $0x80] sm:$0xff] %vm3795_vm2, %v3782_v43  ;;  %v3597_v62 = vadd.f32 %v3557_v5, %v3447_v56  ;;  %v3269_v5 = vpop.f32.mrf.mxu1  ;;  %v3299_v43 = vadd.f32 %v3263_v49, %v10958_v2 }
 0x36f   :  { %v3710_v31 = vpop.f32.mrf.mxu0 }
 0x370   :  { %v3747_v45 = vadd.f32 %v3707_v11, %v3597_v62  ;;  %v11293_v11 = vld [vmem:[#allocation2 + $0x50] sm:$0xff] }
 0x372   :  { %v3767_v53 = vadd.f32 %v11238_v15, %v3747_v45  ;;  %8534 = vmatmul.msk.f32.gmra.mxu1 %vm3795_vm2, %v11289_v38 }
 0x373   :  { %v3410_v32 = vpop.f32.mrf.mxu2  ;;  %8550 = vmatmul.msk.f32.gmra.mxu2 %vm3795_vm2, %v11291_v57 }
 0x374   :  { %v3560_v27 = vpop.f32.mrf.mxu3  ;;  %v3783_v25 = vmax.f32 %v3767_v53, 0.0  ;;  %v3448_v13 = vadd.f32 %v3410_v32, %v3298_v42  ;;  %8566 = vmatmul.msk.f32.gmra.mxu3 %vm3795_vm2, %v11293_v11  ;;  %v11305_v53 = vld [vmem:[#allocation2 + $0x67] sm:$0xff] }
 0x375   :  { %8582 = vmatmul.msk.f32.gmra.mxu0 %vm3795_vm2, %v4317_v7  ;;  %v11307_v32 = vld [vmem:[#allocation2 + $0x66] sm:$0xff] }
 0x376   :  { %3873 = vst.msk [vmem:[#allocation2 + $0x98] sm:$0xff] %vm3795_vm2, %v3783_v25  ;;  %v3598_v16 = vadd.f32 %v3560_v27, %v3448_v13  ;;  %v11309_v27 = vld [vmem:[#allocation2 + $0x68] sm:$0xff]  ;;  %v4488_v25 = vld [vmem:[#allocation3 + $0x118] sm:$0xff]  ;;  %v3300_v13 = vadd.f32 %v3266_v28, %v10968_v14  ;;  %v3272_v7 = vpop.f32.mrf.mxu1 }
 0x377   :  { %v3713_v19 = vpop.f32.mrf.mxu0  ;;  %4553 = vmatpush.msrb.mxu1 %v4488_v25 }
 0x378   :  { %v3748_v55 = vadd.f32 %v3710_v31, %v3598_v16  ;;  %v4318_v31 = vld [vmem:[#allocation2 + $0x69] sm:$0xff] }
 0x37a   :  { %v3768_v56 = vadd.f32 %v11238_v15, %v3748_v55  ;;  %8535 = vmatmul.msk.f32.gmra.mxu1 %vm3795_vm2, %v11305_v53 }
 0x37b   :  { %v3413_v62 = vpop.f32.mrf.mxu2  ;;  %8551 = vmatmul.msk.f32.gmra.mxu2 %vm3795_vm2, %v11307_v32 }
 0x37c   :  { %v3563_v47 = vpop.f32.mrf.mxu3  ;;  %v3784_v45 = vmax.f32 %v3768_v56, 0.0  ;;  %v3449_v42 = vadd.f32 %v3413_v62, %v3299_v43  ;;  %8567 = vmatmul.msk.f32.gmra.mxu3 %vm3795_vm2, %v11309_v27 }
 0x37d   :  { %8583 = vmatmul.msk.f32.gmra.mxu0 %vm3795_vm2, %v4318_v31 }
 0x37e   :  { %3874 = vst.msk [vmem:[#allocation2 + $0xb0] sm:$0xff] %vm3795_vm2, %v3784_v45  ;;  %v3599_v20 = vadd.f32 %v3563_v47, %v3449_v42  ;;  %v11321_v47 = vld [vmem:[#allocation2 + $0x7f] sm:$0xff] }
 0x37f   :  { %v3716_v49 = vpop.f32.mrf.mxu0  ;;  %v11325_v45 = vld [vmem:[#allocation2 + $0x80] sm:$0xff] }
 0x380   :  { %v3749_v2 = vadd.f32 %v3713_v19, %v3599_v20  ;;  %v11323_v19 = vld [vmem:[#allocation2 + $0x7e] sm:$0xff]  ;;  %12795 = vst [vmem:[#allocation22_spill] sm:$0xff] %v11325_v45  ;;  %v3301_v20 = vadd.f32 %v3269_v5, %v10980_v58  ;;  %v3302_v5 = vadd.f32 %v3272_v7, %v10995_v41 }
 0x381   :  { %v4319_v42 = vld [vmem:[#allocation2 + $0x81] sm:$0xff] }
 0x382   :  { %v3769_v16 = vadd.f32 %v11238_v15, %v3749_v2  ;;  %8536 = vmatmul.msk.f32.gmra.mxu1 %vm3795_vm2, %v11321_v47 }
 0x383   :  { %v3416_v55 = vpop.f32.mrf.mxu2  ;;  %8552 = vmatmul.msk.f32.gmra.mxu2 %vm3795_vm2, %v11323_v19 }
 0x384   :  { %v3566_v43 = vpop.f32.mrf.mxu3  ;;  %v3785_v56 = vmax.f32 %v3769_v16, 0.0  ;;  %v3450_v62 = vadd.f32 %v3416_v55, %v3300_v13  ;;  %8568 = vmatmul.msk.f32.gmra.mxu3 %vm3795_vm2, %v11325_v45  ;;  %v2702_v16 = vadd.f32 %v10922_v9, %v10791_v23  ;;  %v3275_v55 = vpop.f32.mrf.mxu1  ;;  %v11344_v45 = vld [vmem:[#allocation2 + $0x98] sm:$0xff] }
 0x385   :  { %8584 = vmatmul.msk.f32.gmra.mxu0 %vm3795_vm2, %v4319_v42  ;;  %v4320_v42 = vld [vmem:[#allocation2 + $0x99] sm:$0xff] }
 0x386   :  { %3875 = vst.msk [vmem:[#allocation2 + $0xc8] sm:$0xff] %vm3795_vm2, %v3785_v56  ;;  %v3600_v31 = vadd.f32 %v3566_v43, %v3450_v62  ;;  %v11339_v62 = vld [vmem:[#allocation2 + $0x97] sm:$0xff] }
 0x387   :  { %v3719_v28 = vpop.f32.mrf.mxu0 }
 0x388   :  { %v3750_v14 = vadd.f32 %v3716_v49, %v3600_v31  ;;  %v11341_v49 = vld [vmem:[#allocation2 + $0x96] sm:$0xff]  ;;  %v2852_v31 = vadd.f32 %v11000_v46, %v2702_v16 }
 0x389   :  { %v4487_v46 = vld [vmem:[#allocation3 + $0x110] sm:$0xff] }
 0x38a   :  { %v3770_v2 = vadd.f32 %v11238_v15, %v3750_v14  ;;  %8537 = vmatmul.msk.f32.gmra.mxu1 %vm3795_vm2, %v11339_v62  ;;  %v3002_v14 = vadd.f32 %v11002_v29, %v2852_v31  ;;  %v11365_v29 = vld [vmem:[#allocation2 + $0xb0] sm:$0xff] }
 0x38b   :  { %v3419_v25 = vpop.f32.mrf.mxu2  ;;  %8553 = vmatmul.msk.f32.gmra.mxu2 %vm3795_vm2, %v11341_v49  ;;  %4554 = vmatpush.msrb.mxu1 %v4487_v46  ;;  %v4321_v31 = vld [vmem:[#allocation2 + $0xb1] sm:$0xff] }
 0x38c   :  { %v3569_v13 = vpop.f32.mrf.mxu3  ;;  %v3786_v43 = vmax.f32 %v3770_v2, 0.0  ;;  %v3451_v56 = vadd.f32 %v3419_v25, %v3301_v20  ;;  %8569 = vmatmul.msk.f32.gmra.mxu3 %vm3795_vm2, %v11344_v45  ;;  %v3278_v7 = vpop.f32.mrf.mxu1 }
 0x38d   :  { %8585 = vmatmul.msk.f32.gmra.mxu0 %vm3795_vm2, %v4320_v42  ;;  %v3153_v42 = vadd.f32 %v10998_v36, %v3002_v14  ;;  %v2704_v14 = vadd.f32 %v10955_v21, %v10827_v0  ;;  %v4486_v21 = vld [vmem:[#allocation3 + $0x108] sm:$0xff] }
 0x38e   :  { %3876 = vst.msk [vmem:[#allocation2 + $0xe0] sm:$0xff] %vm3795_vm2, %v3786_v43  ;;  %v3601_v58 = vadd.f32 %v3569_v13, %v3451_v56  ;;  %v2703_v13 = vadd.f32 %v10938_v6, %v10804_v4  ;;  %v11359_v43 = vld [vmem:[#allocation2 + $0xaf] sm:$0xff]  ;;  %4555 = vmatpush.msrb.mxu1 %v4486_v21 }
 0x38f   :  { %v3722_v9 = vpop.f32.mrf.mxu0  ;;  %v11361_v56 = vld [vmem:[#allocation2 + $0xae] sm:$0xff]  ;;  %v3303_v36 = vadd.f32 %v3275_v55, %v3153_v42 }
 0x390   :  { %v3751_v23 = vadd.f32 %v3719_v28, %v3601_v58  ;;  %v2853_v41 = vadd.f32 %v11022_v1, %v2703_v13 }
 0x392   :  { %v3771_v20 = vadd.f32 %v11238_v15, %v3751_v23  ;;  %8538 = vmatmul.msk.f32.gmra.mxu1 %vm3795_vm2, %v11359_v43  ;;  %v3003_v1 = vadd.f32 %v11024_v48, %v2853_v41 }
 0x393   :  { %v3422_v2 = vpop.f32.mrf.mxu2  ;;  %8554 = vmatmul.msk.f32.gmra.mxu2 %vm3795_vm2, %v11361_v56 }
 0x394   :  { %v3572_v25 = vpop.f32.mrf.mxu3  ;;  %v3787_v28 = vmax.f32 %v3771_v20, 0.0  ;;  %v3452_v16 = vadd.f32 %v3422_v2, %v3302_v5  ;;  %8570 = vmatmul.msk.f32.gmra.mxu3 %vm3795_vm2, %v11365_v29  ;;  %v3154_v13 = vadd.f32 %v11014_v30, %v3003_v1  ;;  %v3281_v55 = vpop.f32.mrf.mxu1 }
 0x395   :  { %8586 = vmatmul.msk.f32.gmra.mxu0 %vm3795_vm2, %v4321_v31  ;;  %v4322_v31 = vld [vmem:[#allocation2 + $0x129] sm:$0xff] }
 0x396   :  { %3877 = vst.msk [vmem:[#allocation2 + $0x158] sm:$0xff] %vm3795_vm2, %v3787_v28  ;;  %v3602_v58 = vadd.f32 %v3572_v25, %v3452_v16  ;;  %v3917_v25 = vld [vmem:[#allocation2 + $0x127] sm:$0xff]  ;;  %v2854_v28 = vadd.f32 %v11052_v37, %v2704_v14  ;;  %v3304_v30 = vadd.f32 %v3278_v7, %v3154_v13 }
 0x397   :  { %v3725_v6 = vpop.f32.mrf.mxu0  ;;  %v4168_v16 = vld [vmem:[#allocation2 + $0x128] sm:$0xff]  ;;  %v11396_v14 = vld [vmem:[#allocation2 + $0x140] sm:$0xff] }
 0x398   :  { %v3752_v4 = vadd.f32 %v3722_v9, %v3602_v58  ;;  %v3893_v9 = vld [vmem:[#allocation2 + $0x126] sm:$0xff]  ;;  %v3004_v37 = vadd.f32 %v11054_v3, %v2854_v28  ;;  %v2706_v28 = vadd.f32 %v10988_v59, %v10861_v12 }
 0x399   :  { %v4323_v3 = vld [vmem:[#allocation2 + $0x141] sm:$0xff] }
 0x39a   :  { %v3772_v23 = vadd.f32 %v11238_v15, %v3752_v4  ;;  %8539 = vmatmul.msk.f32.gmra.mxu1 %vm3795_vm2, %v3917_v25  ;;  %v4485_v59 = vld [vmem:[#allocation3 + $0x100] sm:$0xff] }
 0x39b   :  { %v3425_v46 = vpop.f32.mrf.mxu2  ;;  %8555 = vmatmul.msk.f32.gmra.mxu2 %vm3795_vm2, %v3893_v9  ;;  %4556 = vmatpush.msrb.mxu1 %v4485_v59 }
 0x39c   :  { %v3575_v5 = vpop.f32.mrf.mxu3  ;;  %v3788_v20 = vmax.f32 %v3772_v23, 0.0  ;;  %v3453_v2 = vadd.f32 %v3425_v46, %v3303_v36  ;;  %8571 = vmatmul.msk.f32.gmra.mxu3 %vm3795_vm2, %v4168_v16  ;;  %v2705_v36 = vadd.f32 %v10974_v63, %v10840_v8  ;;  %v11392_v46 = vld [vmem:[#allocation2 + $0x13e] sm:$0xff] }
 0x39d   :  { %8587 = vmatmul.msk.f32.gmra.mxu0 %vm3795_vm2, %v4322_v31  ;;  %v11416_v21 = vld [vmem:[#allocation2 + $0x158] sm:$0xff] }
 0x39e   :  { %3878 = vst.msk [vmem:[#allocation2 + $0x170] sm:$0xff] %vm3795_vm2, %v3788_v20  ;;  %v3603_v48 = vadd.f32 %v3575_v5, %v3453_v2  ;;  %v3155_v5 = vadd.f32 %v11044_v39, %v3004_v37  ;;  %v2855_v7 = vadd.f32 %v11086_v52, %v2705_v36  ;;  %v3284_v2 = vpop.f32.mrf.mxu1  ;;  %v4955_v36 = vld [vmem:[#allocation3 + $0x1f8] sm:$0xff] }
 0x39f   :  { %v3728_v0 = vpop.f32.mrf.mxu0  ;;  %5012 = vmatpush.msra.mxu0 %v4955_v36 }
 0x3a0   :  { %v3753_v42 = vadd.f32 %v3725_v6, %v3603_v48  ;;  %v11390_v6 = vld [vmem:[#allocation2 + $0x13f] sm:$0xff]  ;;  %v3305_v39 = vadd.f32 %v3281_v55, %v3155_v5  ;;  %v3005_v52 = vadd.f32 %v11088_v22, %v2855_v7  ;;  %v11410_v48 = vld [vmem:[#allocation2 + $0x157] sm:$0xff]  ;;  %v2856_v55 = vadd.f32 %v11114_v60, %v2706_v28 }
 0x3a1   :  { %v4324_v22 = vld [vmem:[#allocation2 + $0x159] sm:$0xff] }
 0x3a2   :  { %v3773_v41 = vadd.f32 %v11238_v15, %v3753_v42  ;;  %8540 = vmatmul.msk.f32.gmra.mxu1 %vm3795_vm2, %v11390_v6  ;;  %v11412_v42 = vld [vmem:[#allocation2 + $0x156] sm:$0xff] }
 0x3a3   :  { %v3428_v58 = vpop.f32.mrf.mxu2  ;;  %8556 = vmatmul.msk.f32.gmra.mxu2 %vm3795_vm2, %v11392_v46  ;;  %v4801_v60 = vld [vmem:[#allocation3 + $0x1b8] sm:$0xff] }
 0x3a4   :  { %v3578_v4 = vpop.f32.mrf.mxu3  ;;  %v3789_v1 = vmax.f32 %v3773_v41, 0.0  ;;  %v3454_v23 = vadd.f32 %v3428_v58, %v3304_v30  ;;  %8572 = vmatmul.msk.f32.gmra.mxu3 %vm3795_vm2, %v11396_v14  ;;  %v3006_v41 = vadd.f32 %v11116_v35, %v2856_v55  ;;  %v4799_v35 = vld [vmem:[#allocation3 + $0x1a8] sm:$0xff]  ;;  %v4952_v55 = vld [vmem:[#allocation3 + $0x1e0] sm:$0xff] }
 0x3a5   :  { %8588 = vmatmul.msk.f32.gmra.mxu0 %vm3795_vm2, %v4323_v3  ;;  %4858 = vmatpush.msra.mxu3 %v4801_v60  ;;  %v4954_v3 = vld [vmem:[#allocation3 + $0x1f0] sm:$0xff] }
 0x3a6   :  { %3879 = vst.msk [vmem:[#allocation2 + $0x188] sm:$0xff] %vm3795_vm2, %v3789_v1  ;;  %v3604_v20 = vadd.f32 %v3578_v4, %v3454_v23  ;;  %v4646_v1 = vld [vmem:[#allocation3 + $0x170] sm:$0xff]  ;;  %5013 = vmatpush.msra.mxu0 %v4954_v3 }
 0x3a7   :  { %v3731_v63 = vpop.f32.mrf.mxu0  ;;  %v4800_v23 = vld [vmem:[#allocation3 + $0x1b0] sm:$0xff] }
 0x3a8   :  { %v3754_v8 = vadd.f32 %v3728_v0, %v3604_v20  ;;  %v3156_v0 = vadd.f32 %v11076_v54, %v3005_v52  ;;  %v4647_v54 = vld [vmem:[#allocation3 + $0x178] sm:$0xff]  ;;  %v4645_v20 = vld [vmem:[#allocation3 + $0x168] sm:$0xff]  ;;  %4859 = vmatpush.msra.mxu3 %v4800_v23 }
 0x3a9   :  { %4704 = vmatpush.msra.mxu2 %v4647_v54  ;;  %v4953_v52 = vld [vmem:[#allocation3 + $0x1e8] sm:$0xff]  ;;  %v4951_v54 = vld [vmem:[#allocation3 + $0x1d8] sm:$0xff] }
 0x3aa   :  { %v3774_v25 = vadd.f32 %v11238_v15, %v3754_v8  ;;  %8541 = vmatmul.msk.f32.gmra.mxu1 %vm3795_vm2, %v11410_v48  ;;  %v3306_v37 = vadd.f32 %v3284_v2, %v3156_v0  ;;  %v2707_v8 = vadd.f32 %v11009_v26, %v10876_v18  ;;  %v3287_v2 = vpop.f32.mrf.mxu1  ;;  %4860 = vmatpush.msra.mxu3 %v4799_v35  ;;  %v4644_v26 = vld [vmem:[#allocation3 + $0x160] sm:$0xff]  ;;  %v4795_v35 = vld [vmem:[#allocation3 + $0x188] sm:$0xff] }
 0x3ab   :  { %v3431_v9 = vpop.f32.mrf.mxu2  ;;  %8557 = vmatmul.msk.f32.gmra.mxu2 %vm3795_vm2, %v11412_v42  ;;  %5014 = vmatpush.msra.mxu0 %v4953_v52  ;;  %v4798_v0 = vld [vmem:[#allocation3 + $0x1a0] sm:$0xff] }
 0x3ac   :  { %v3581_v13 = vpop.f32.mrf.mxu3  ;;  %v3790_v16 = vmax.f32 %v3774_v25, 0.0  ;;  %v3455_v31 = vadd.f32 %v3431_v9, %v3305_v39  ;;  %8573 = vmatmul.msk.f32.gmra.mxu3 %vm3795_vm2, %v11416_v21  ;;  %4705 = vmatpush.msra.mxu2 %v4646_v1  ;;  %v11430_v25 = vld [vmem:[#allocation2 + $0x16f] sm:$0xff]  ;;  %v2857_v28 = vadd.f32 %v11152_v61, %v2707_v8  ;;  %v4643_v61 = vld [vmem:[#allocation3 + $0x158] sm:$0xff] }
 0x3ad   :  { %8589 = vmatmul.msk.f32.gmra.mxu0 %vm3795_vm2, %v4324_v22  ;;  %v11432_v9 = vld [vmem:[#allocation2 + $0x16e] sm:$0xff]  ;;  %v4797_v22 = vld [vmem:[#allocation3 + $0x198] sm:$0xff]  ;;  %4861 = vmatpush.msra.mxu3 %v4798_v0 }
 0x3ae   :  { %3880 = vst.msk [vmem:[#allocation2 + $0x1a0] sm:$0xff] %vm3795_vm2, %v3790_v16  ;;  %v3605_v30 = vadd.f32 %v3581_v13, %v3455_v31  ;;  %v3157_v13 = vadd.f32 %v11106_v33, %v3006_v41  ;;  %v11436_v16 = vld [vmem:[#allocation2 + $0x170] sm:$0xff]  ;;  %4706 = vmatpush.msra.mxu2 %v4645_v20  ;;  %5015 = vmatpush.msra.mxu0 %v4952_v55  ;;  %v11448_v23 = vld [vmem:[#allocation2 + $0x187] sm:$0xff] }
 0x3af   :  { %v3734_v4 = vpop.f32.mrf.mxu0  ;;  %v4325_v31 = vld [vmem:[#allocation2 + $0x171] sm:$0xff]  ;;  %4862 = vmatpush.msra.mxu3 %v4797_v22  ;;  %v11453_v3 = vld [vmem:[#allocation2 + $0x188] sm:$0xff] }
 0x3b0   :  { %v3755_v12 = vadd.f32 %v3731_v63, %v3605_v30  ;;  %v3307_v30 = vadd.f32 %v3287_v2, %v3157_v13  ;;  %4707 = vmatpush.msra.mxu2 %v4644_v26  ;;  %v4642_v41 = vld [vmem:[#allocation3 + $0x150] sm:$0xff]  ;;  %5016 = vmatpush.msra.mxu0 %v4951_v54  ;;  %v4640_v2 = vld [vmem:[#allocation3 + $0x140] sm:$0xff] }
 0x3b1   :  { %v4950_v1 = vld [vmem:[#allocation3 + $0x1d0] sm:$0xff]  ;;  %v4794_v13 = vld [vmem:[#allocation3 + $0x180] sm:$0xff] }
 0x3b2   :  { %v3775_v58 = vadd.f32 %v11238_v15, %v3755_v12  ;;  %8542 = vmatmul.msk.f32.gmra.mxu1 %vm3795_vm2, %v11430_v25  ;;  %v3007_v12 = vadd.f32 %v11154_v34, %v2857_v28  ;;  %4708 = vmatpush.msra.mxu2 %v4643_v61  ;;  %v4326_v20 = vld [vmem:[#allocation2 + $0x189] sm:$0xff]  ;;  %v5109_v28 = vld [vmem:[#allocation3 + $0x238] sm:$0xff]  ;;  %v4948_v26 = vld [vmem:[#allocation3 + $0x1c0] sm:$0xff] }
 0x3b3   :  { %v3434_v5 = vpop.f32.mrf.mxu2  ;;  %8558 = vmatmul.msk.f32.gmra.mxu2 %vm3795_vm2, %v11432_v9  ;;  %5017 = vmatpush.msra.mxu0 %v4950_v1 }
 0x3b4   :  { %v3584_v7 = vpop.f32.mrf.mxu3  ;;  %v3791_v63 = vmax.f32 %v3775_v58, 0.0  ;;  %v3456_v39 = vadd.f32 %v3434_v5, %v3306_v37  ;;  %8574 = vmatmul.msk.f32.gmra.mxu3 %vm3795_vm2, %v11436_v16  ;;  %v4796_v58 = vld [vmem:[#allocation3 + $0x190] sm:$0xff]  ;;  %v11450_v5 = vld [vmem:[#allocation2 + $0x186] sm:$0xff]  ;;  %4709 = vmatpush.msra.mxu2 %v4642_v41 }
 0x3b5   :  { %8590 = vmatmul.msk.f32.gmra.mxu0 %vm3795_vm2, %v4325_v31  ;;  %4863 = vmatpush.msra.mxu3 %v4796_v58  ;;  %v11464_v22 = vld [vmem:[#allocation2 + $0x19f] sm:$0xff] }
 0x3b6   :  { %3881 = vst.msk [vmem:[#allocation2 + $0x1b8] sm:$0xff] %vm3795_vm2, %v3791_v63  ;;  %v3606_v18 = vadd.f32 %v3584_v7, %v3456_v39  ;;  %v3158_v7 = vadd.f32 %v11140_v50, %v3007_v12  ;;  %v3290_v63 = vpop.f32.mrf.mxu1  ;;  %v4641_v39 = vld [vmem:[#allocation3 + $0x148] sm:$0xff]  ;;  %5166 = vmatpush.msra.mxu1 %v5109_v28  ;;  %v11468_v12 = vld [vmem:[#allocation2 + $0x1a0] sm:$0xff] }
 0x3b7   :  { %v3737_v34 = vpop.f32.mrf.mxu0  ;;  %v4949_v50 = vld [vmem:[#allocation3 + $0x1c8] sm:$0xff]  ;;  %4710 = vmatpush.msra.mxu2 %v4641_v39  ;;  %4864 = vmatpush.msra.mxu3 %v4795_v35 }
 0x3b8   :  { %v3756_v33 = vadd.f32 %v3734_v4, %v3606_v18  ;;  %v3308_v31 = vadd.f32 %v3290_v63, %v3158_v7  ;;  %5018 = vmatpush.msra.mxu0 %v4949_v50 }
 0x3b9   :  { %4711 = vmatpush.msra.mxu2 %v4640_v2  ;;  %4865 = vmatpush.msra.mxu3 %v4794_v13  ;;  %v5107_v2 = vld [vmem:[#allocation3 + $0x228] sm:$0xff] }
 0x3ba   :  { %v3776_v59 = vadd.f32 %v11238_v15, %v3756_v33  ;;  %8543 = vmatmul.msk.f32.gmra.mxu1 %vm3795_vm2, %v11448_v23  ;;  %5019 = vmatpush.msra.mxu0 %v4948_v26 }
 0x3bb   :  { %v3437_v60 = vpop.f32.mrf.mxu2  ;;  %8559 = vmatmul.msk.f32.gmra.mxu2 %vm3795_vm2, %v11450_v5 }
 0x3bc   :  { %v3587_v37 = vpop.f32.mrf.mxu3  ;;  %v3792_v4 = vmax.f32 %v3776_v59, 0.0  ;;  %v3457_v36 = vadd.f32 %v3437_v60, %v3307_v30  ;;  %8575 = vmatmul.msk.f32.gmra.mxu3 %vm3795_vm2, %v11453_v3  ;;  %v11466_v30 = vld [vmem:[#allocation2 + $0x19e] sm:$0xff] }
 0x3bd   :  { %8591 = vmatmul.msk.f32.gmra.mxu0 %vm3795_vm2, %v4326_v20  ;;  %v4327_v59 = vld [vmem:[#allocation2 + $0x1a1] sm:$0xff]  ;;  %v11483_v1 = vld [vmem:[#allocation2 + $0x1b8] sm:$0xff] }
 0x3be   :  { %3882 = vst.msk [vmem:[#allocation2 + $0x1d0] sm:$0xff] %vm3795_vm2, %v3792_v4  ;;  %v3607_v8 = vadd.f32 %v3587_v37, %v3457_v36  ;;  %v11479_v4 = vld [vmem:[#allocation2 + $0x1b7] sm:$0xff]  ;;  %v11506_v39 = vpop.f32.mrf.mxu1 }
 0x3bf   :  { %v3740_v60 = vpop.f32.mrf.mxu0  ;;  %v11481_v36 = vld [vmem:[#allocation2 + $0x1b6] sm:$0xff] }
 0x3c0   :  { %v3757_v52 = vadd.f32 %v3737_v34, %v3607_v8  ;;  %v4328_v34 = vld [vmem:[#allocation2 + $0x1b9] sm:$0xff] }
 0x3c2   :  { %v3777_v18 = vadd.f32 %v11238_v15, %v3757_v52  ;;  %8544 = vmatmul.msk.f32.gmra.mxu1 %vm3795_vm2, %v11464_v22  ;;  %v4468_v52 = vld [vmem:[#allocation2 + $0xa] sm:$0xff] }
 0x3c3   :  { %v3440_v0 = vpop.f32.mrf.mxu2  ;;  %8560 = vmatmul.msk.f32.gmra.mxu2 %vm3795_vm2, %v11466_v30 }
 0x3c4   :  { %v3590_v33 = vpop.f32.mrf.mxu3  ;;  %v3793_v55 = vmax.f32 %v3777_v18, 0.0  ;;  %v3458_v61 = vadd.f32 %v3440_v0, %v3308_v31  ;;  %8576 = vmatmul.msk.f32.gmra.mxu3 %vm3795_vm2, %v11468_v12  ;;  %v11525_v18 = vld [vmem:[#allocation2 + $0x22] sm:$0xff]  ;;  %v11539_v0 = vld [vmem:[#allocation2 + $0x3a] sm:$0xff] }
 0x3c5   :  { %8592 = vmatmul.msk.f32.gmra.mxu0 %vm3795_vm2, %v4327_v59  ;;  %v11493_v7 = vld [vmem:[#allocation2 + $0x1cf] sm:$0xff] }
 0x3c6   :  { %3883 = vst.msk [vmem:[#allocation2 + $0x1e8] sm:$0xff] %vm3795_vm2, %v3793_v55  ;;  %v3608_v54 = vadd.f32 %v3590_v33, %v3458_v61  ;;  %v11495_v20 = vld [vmem:[#allocation2 + $0x1ce] sm:$0xff]  ;;  %v11521_v28 = vpop.f32.mrf.mxu1 }
 0x3c7   :  { %v11497_v8 = vld [vmem:[#allocation2 + $0x1d0] sm:$0xff]  ;;  %v11508_v35 = vpop.f32.mrf.mxu0 }
 0x3c8   :  { %v3758_v37 = vadd.f32 %v3740_v60, %v3608_v54  ;;  %v4329_v63 = vld [vmem:[#allocation2 + $0x1d1] sm:$0xff] }
 0x3c9   :  { %v11549_v54 = vld [vmem:[#allocation2 + $0x52] sm:$0xff] }
 0x3ca   :  { %v3778_v41 = vadd.f32 %v11238_v15, %v3758_v37  ;;  %8545 = vmatmul.msk.f32.gmra.mxu1 %vm3795_vm2, %v11479_v4  ;;  %v5108_v15 = vld [vmem:[#allocation3 + $0x230] sm:$0xff] }
 0x3cb   :  { %8561 = vmatmul.msk.f32.gmra.mxu2 %vm3795_vm2, %v11481_v36  ;;  %5167 = vmatpush.msra.mxu1 %v5108_v15  ;;  %v11513_v50 = vpop.f32.mrf.mxu2 }
 0x3cc   :  { %v3794_v58 = vmax.f32 %v3778_v41, 0.0  ;;  %8577 = vmatmul.msk.f32.gmra.mxu3 %vm3795_vm2, %v11483_v1  ;;  %v11519_v13 = vpop.f32.mrf.mxu3 }
 0x3cd   :  { %8593 = vmatmul.msk.f32.gmra.mxu0 %vm3795_vm2, %v4328_v34  ;;  %5168 = vmatpush.msra.mxu1 %v5107_v2  ;;  %v11561_v34 = vld [vmem:[#allocation2 + $0x6a] sm:$0xff] }
 0x3ce   :  { %3884 = vst.msk [vmem:[#allocation2 + $0x200] sm:$0xff] %vm3795_vm2, %v3794_v58 }
 0x3cf   :  { %v11523_v31 = vpop.f32.mrf.mxu0 }
 0x3d2   :  { %8546 = vmatmul.msk.f32.gmra.mxu1 %vm3795_vm2, %v11493_v7 }
 0x3d3   :  { %8562 = vmatmul.msk.f32.gmra.mxu2 %vm3795_vm2, %v11495_v20 }
 0x3d4   :  { %8578 = vmatmul.msk.f32.gmra.mxu3 %vm3795_vm2, %v11497_v8 }
 0x3d5   :  { %8594 = vmatmul.msk.f32.gmra.mxu0 %vm3795_vm2, %v4329_v63 }
 0x3da   :  { %8595 = vmatmul.msk.f32.vlgmr.msrb.gmra.mxu1 %vm3795_vm2, %v4468_v52 }
 0x3db   :  { %8611 = vmatmul.msk.f32.vlgmr.msra.gmra.mxu2 %vm3795_vm2, %v11188_v51  ;;  %v11537_v51 = vpop.f32.mrf.mxu3 }
 0x3dc   :  { %8627 = vmatmul.msk.f32.vlgmr.msra.gmra.mxu3 %vm3795_vm2, %v11169_v10  ;;  %v11535_v10 = vpop.f32.mrf.mxu2 }
 0x3dd   :  { %8643 = vmatmul.msk.f32.vlgmr.msra.gmra.mxu0 %vm3795_vm2, %v11190_v44 }
 0x3e2   :  { %8596 = vmatmul.msk.f32.gmra.mxu1 %vm3795_vm2, %v11525_v18 }
 0x3e3   :  { %8612 = vmatmul.msk.f32.gmra.mxu2 %vm3795_vm2, %v11276_v17 }
 0x3e4   :  { %8628 = vmatmul.msk.f32.gmra.mxu3 %vm3795_vm2, %v11274_v24  ;;  %v5106_v24 = vld [vmem:[#allocation3 + $0x220] sm:$0xff] }
 0x3e5   :  { %8644 = vmatmul.msk.f32.gmra.mxu0 %vm3795_vm2, %v11278_v40  ;;  %5169 = vmatpush.msra.mxu1 %v5106_v24  ;;  %v11573_v24 = vld [vmem:[#allocation2 + $0x82] sm:$0xff] }
 0x3e7   :  { %v4005_v44 = vpop.f32.mrf.mxu1 }
 0x3ea   :  { %v4410_v26 = vpop.f32.mrf.mxu0  ;;  %8597 = vmatmul.msk.f32.gmra.mxu1 %vm3795_vm2, %v11539_v0 }
 0x3eb   :  { %8613 = vmatmul.msk.f32.gmra.mxu2 %vm3795_vm2, %v11291_v57 }
 0x3ec   :  { %8629 = vmatmul.msk.f32.gmra.mxu3 %vm3795_vm2, %v11289_v38 }
 0x3ed   :  { %8645 = vmatmul.msk.f32.gmra.mxu0 %vm3795_vm2, %v11293_v11 }
 0x3ee   :  { %v4118_v17 = vpop.f32.mrf.mxu2 }
 0x3ef   :  { %v4119_v40 = vadd.f32 %v4118_v17, %v4005_v44  ;;  %v4256_v33 = vpop.f32.mrf.mxu3  ;;  %v4008_v55 = vpop.f32.mrf.mxu1 }
 0x3f1   :  { %v4300_v61 = vadd.f32 %v4256_v33, %v4119_v40 }
 0x3f2   :  { %v4413_v59 = vpop.f32.mrf.mxu0  ;;  %8598 = vmatmul.msk.f32.gmra.mxu1 %vm3795_vm2, %v11549_v54 }
 0x3f3   :  { %8614 = vmatmul.msk.f32.gmra.mxu2 %vm3795_vm2, %v11307_v32  ;;  %v11555_v38 = vadd.f32 %v4410_v26, %v4300_v61 }
 0x3f4   :  { %8630 = vmatmul.msk.f32.gmra.mxu3 %vm3795_vm2, %v11305_v53  ;;  %v12796_v53 = vld [vmem:[#allocation22_spill] sm:$0xff] }
 0x3f5   :  { %8646 = vmatmul.msk.f32.gmra.mxu0 %vm3795_vm2, %v11309_v27  ;;  %v5105_v27 = vld [vmem:[#allocation3 + $0x218] sm:$0xff] }
 0x3f6   :  { %v4121_v57 = vpop.f32.mrf.mxu2  ;;  %5170 = vmatpush.msra.mxu1 %v5105_v27 }
 0x3f7   :  { %v4122_v11 = vadd.f32 %v4121_v57, %v4008_v55  ;;  %v4259_v60 = vpop.f32.mrf.mxu3  ;;  %v4011_v37 = vpop.f32.mrf.mxu1 }
 0x3f9   :  { %v4301_v41 = vadd.f32 %v4259_v60, %v4122_v11 }
 0x3fa   :  { %v4416_v58 = vpop.f32.mrf.mxu0  ;;  %8599 = vmatmul.msk.f32.gmra.mxu1 %vm3795_vm2, %v11561_v34 }
 0x3fb   :  { %8615 = vmatmul.msk.f32.gmra.mxu2 %vm3795_vm2, %v11323_v19  ;;  %v11567_v32 = vadd.f32 %v4413_v59, %v4301_v41  ;;  %v11585_v59 = vld [vmem:[#allocation2 + $0x9a] sm:$0xff] }
 0x3fc   :  { %8631 = vmatmul.msk.f32.gmra.mxu3 %vm3795_vm2, %v11321_v47 }
 0x3fd   :  { %8647 = vmatmul.msk.f32.gmra.mxu0 %vm3795_vm2, %v12796_v53  ;;  %v11599_v53 = vld [vmem:[#allocation2 + $0xc6] sm:$0xff] }
 0x3fe   :  { %v4124_v15 = vpop.f32.mrf.mxu2 }
 0x3ff   :  { %v4125_v63 = vadd.f32 %v4124_v15, %v4011_v37  ;;  %v4262_v52 = vpop.f32.mrf.mxu3  ;;  %v4014_v2 = vpop.f32.mrf.mxu1 }
 0x401   :  { %v4302_v44 = vadd.f32 %v4262_v52, %v4125_v63 }
 0x402   :  { %v4419_v26 = vpop.f32.mrf.mxu0  ;;  %8600 = vmatmul.msk.f32.gmra.mxu1 %vm3795_vm2, %v11573_v24 }
 0x403   :  { %8616 = vmatmul.msk.f32.gmra.mxu2 %vm3795_vm2, %v11341_v49  ;;  %v11579_v47 = vadd.f32 %v4416_v58, %v4302_v44  ;;  %v11597_v58 = vld [vmem:[#allocation2 + $0xb2] sm:$0xff] }
 0x404   :  { %8632 = vmatmul.msk.f32.gmra.mxu3 %vm3795_vm2, %v11339_v62 }
 0x405   :  { %8648 = vmatmul.msk.f32.gmra.mxu0 %vm3795_vm2, %v11344_v45  ;;  %v5104_v45 = vld [vmem:[#allocation3 + $0x210] sm:$0xff] }
 0x406   :  { %v4127_v19 = vpop.f32.mrf.mxu2  ;;  %5171 = vmatpush.msra.mxu1 %v5104_v45  ;;  %v11621_v45 = vld [vmem:[#allocation2 + $0x142] sm:$0xff] }
 0x407   :  { %v4128_v17 = vadd.f32 %v4127_v19, %v4014_v2  ;;  %v4265_v40 = vpop.f32.mrf.mxu3  ;;  %v4017_v33 = vpop.f32.mrf.mxu1  ;;  %v4476_v2 = vld [vmem:[#allocation2 + $0x12a] sm:$0xff] }
 0x409   :  { %v4303_v55 = vadd.f32 %v4265_v40, %v4128_v17  ;;  %v5103_v17 = vld [vmem:[#allocation3 + $0x208] sm:$0xff] }
 0x40a   :  { %v4422_v61 = vpop.f32.mrf.mxu0  ;;  %8601 = vmatmul.msk.f32.gmra.mxu1 %vm3795_vm2, %v11585_v59 }
 0x40b   :  { %8617 = vmatmul.msk.f32.gmra.mxu2 %vm3795_vm2, %v11361_v56  ;;  %v11591_v49 = vadd.f32 %v4419_v26, %v4303_v55  ;;  %v4938_v56 = vld [vmem:[#allocation2 + $0xc8] sm:$0xff]  ;;  %5172 = vmatpush.msra.mxu1 %v5103_v17  ;;  %v5262_v17 = vld [vmem:[#allocation3 + $0x270] sm:$0xff] }
 0x40c   :  { %8633 = vmatmul.msk.f32.gmra.mxu3 %vm3795_vm2, %v11359_v43  ;;  %v11605_v43 = vld [vmem:[#allocation2 + $0xc7] sm:$0xff] }
 0x40d   :  { %8649 = vmatmul.msk.f32.gmra.mxu0 %vm3795_vm2, %v11365_v29 }
 0x40e   :  { %v4130_v62 = vpop.f32.mrf.mxu2 }
 0x40f   :  { %v4131_v57 = vadd.f32 %v4130_v62, %v4017_v33  ;;  %v4268_v11 = vpop.f32.mrf.mxu3  ;;  %v4020_v60 = vpop.f32.mrf.mxu1 }
 0x411   :  { %v4304_v37 = vadd.f32 %v4268_v11, %v4131_v57 }
 0x412   :  { %v4425_v41 = vpop.f32.mrf.mxu0  ;;  %8602 = vmatmul.msk.f32.gmra.mxu1 %vm3795_vm2, %v11597_v58 }
 0x413   :  { %8618 = vmatmul.msk.f32.gmra.mxu2 %vm3795_vm2, %v11599_v53  ;;  %v11607_v29 = vadd.f32 %v4422_v61, %v4304_v37 }
 0x414   :  { %8634 = vmatmul.msk.f32.gmra.mxu3 %vm3795_vm2, %v11605_v43 }
 0x415   :  { %8650 = vmatmul.msk.f32.gmra.mxu0 %vm3795_vm2, %v4938_v56  ;;  %v11633_v56 = vld [vmem:[#allocation2 + $0x15a] sm:$0xff] }
 0x416   :  { %v4133_v27 = vpop.f32.mrf.mxu2 }
 0x417   :  { %v4134_v15 = vadd.f32 %v4133_v27, %v4020_v60  ;;  %v4271_v63 = vpop.f32.mrf.mxu3  ;;  %v4023_v52 = vpop.f32.mrf.mxu1  ;;  %v5417_v27 = vld [vmem:[#allocation3 + $0x2b8] sm:$0xff] }
 0x418   :  { %5474 = vmatpush.msrb.mxu3 %v5417_v27  ;;  %v5567_v27 = vld [vmem:[#allocation3 + $0x2d8] sm:$0xff] }
 0x419   :  { %v4305_v44 = vadd.f32 %v4271_v63, %v4134_v15  ;;  %v5571_v15 = vld [vmem:[#allocation3 + $0x2f8] sm:$0xff] }
 0x41a   :  { %v4428_v26 = vpop.f32.mrf.mxu0  ;;  %8603 = vmatmul.msk.f32.gmra.mxu1 %vm3795_vm2, %v4476_v2  ;;  %5628 = vmatpush.msrb.mxu0 %v5571_v15  ;;  %v5258_v15 = vld [vmem:[#allocation3 + $0x250] sm:$0xff] }
 0x41b   :  { %8619 = vmatmul.msk.f32.gmra.mxu2 %vm3795_vm2, %v11392_v46  ;;  %v11615_v19 = vadd.f32 %v4425_v41, %v4305_v44 }
 0x41c   :  { %8635 = vmatmul.msk.f32.gmra.mxu3 %vm3795_vm2, %v11390_v6 }
 0x41d   :  { %8651 = vmatmul.msk.f32.gmra.mxu0 %vm3795_vm2, %v11396_v14 }
 0x41e   :  { %v4136_v40 = vpop.f32.mrf.mxu2 }
 0x41f   :  { %v4137_v33 = vadd.f32 %v4136_v40, %v4023_v52  ;;  %v4274_v55 = vpop.f32.mrf.mxu3  ;;  %v4026_v61 = vpop.f32.mrf.mxu1  ;;  %v5416_v40 = vld [vmem:[#allocation3 + $0x2b0] sm:$0xff] }
 0x420   :  { %5475 = vmatpush.msrb.mxu3 %v5416_v40 }
 0x421   :  { %v4306_v62 = vadd.f32 %v4274_v55, %v4137_v33  ;;  %v5261_v33 = vld [vmem:[#allocation3 + $0x268] sm:$0xff] }
 0x422   :  { %v4431_v57 = vpop.f32.mrf.mxu0  ;;  %8604 = vmatmul.msk.f32.gmra.mxu1 %vm3795_vm2, %v11621_v45  ;;  %v5415_v55 = vld [vmem:[#allocation3 + $0x2a8] sm:$0xff] }
 0x423   :  { %8620 = vmatmul.msk.f32.gmra.mxu2 %vm3795_vm2, %v11412_v42  ;;  %v11627_v6 = vadd.f32 %v4428_v26, %v4306_v62  ;;  %v5569_v62 = vld [vmem:[#allocation3 + $0x2e8] sm:$0xff]  ;;  %5476 = vmatpush.msrb.mxu3 %v5415_v55  ;;  %v5410_v55 = vld [vmem:[#allocation3 + $0x280] sm:$0xff] }
 0x424   :  { %8636 = vmatmul.msk.f32.gmra.mxu3 %vm3795_vm2, %v11410_v48  ;;  %v5102_v48 = vld [vmem:[#allocation3 + $0x200] sm:$0xff] }
 0x425   :  { %8652 = vmatmul.msk.f32.gmra.mxu0 %vm3795_vm2, %v11416_v21  ;;  %v5263_v21 = vld [vmem:[#allocation3 + $0x278] sm:$0xff]  ;;  %5173 = vmatpush.msra.mxu1 %v5102_v48 }
 0x426   :  { %v4139_v46 = vpop.f32.mrf.mxu2  ;;  %5320 = vmatpush.msrb.mxu2 %v5263_v21 }
 0x427   :  { %v4140_v14 = vadd.f32 %v4139_v46, %v4026_v61  ;;  %v4277_v11 = vpop.f32.mrf.mxu3  ;;  %v4029_v60 = vpop.f32.mrf.mxu1  ;;  %v5414_v46 = vld [vmem:[#allocation3 + $0x2a0] sm:$0xff] }
 0x428   :  { %5321 = vmatpush.msrb.mxu2 %v5262_v17  ;;  %5477 = vmatpush.msrb.mxu3 %v5414_v46  ;;  %v5411_v17 = vld [vmem:[#allocation3 + $0x288] sm:$0xff]  ;;  %v5564_v46 = vld [vmem:[#allocation3 + $0x2c0] sm:$0xff] }
 0x429   :  { %v4307_v37 = vadd.f32 %v4277_v11, %v4140_v14  ;;  %v5568_v11 = vld [vmem:[#allocation3 + $0x2e0] sm:$0xff] }
 0x42a   :  { %v4434_v41 = vpop.f32.mrf.mxu0  ;;  %8605 = vmatmul.msk.f32.gmra.mxu1 %vm3795_vm2, %v11633_v56  ;;  %5322 = vmatpush.msrb.mxu2 %v5261_v33  ;;  %v5256_v33 = vld [vmem:[#allocation3 + $0x240] sm:$0xff] }
 0x42b   :  { %8621 = vmatmul.msk.f32.gmra.mxu2 %vm3795_vm2, %v11432_v9  ;;  %v11639_v42 = vadd.f32 %v4431_v57, %v4307_v37  ;;  %v5260_v57 = vld [vmem:[#allocation3 + $0x260] sm:$0xff] }
 0x42c   :  { %8637 = vmatmul.msk.f32.gmra.mxu3 %vm3795_vm2, %v11430_v25  ;;  %v11645_v25 = vld [vmem:[#allocation2 + $0x172] sm:$0xff]  ;;  %5323 = vmatpush.msrb.mxu2 %v5260_v57  ;;  %v11669_v57 = vld [vmem:[#allocation2 + $0x1a2] sm:$0xff] }
 0x42d   :  { %8653 = vmatmul.msk.f32.gmra.mxu0 %vm3795_vm2, %v11436_v16  ;;  %v5570_v16 = vld [vmem:[#allocation3 + $0x2f0] sm:$0xff] }
 0x42e   :  { %v4142_v63 = vpop.f32.mrf.mxu2  ;;  %5629 = vmatpush.msrb.mxu0 %v5570_v16  ;;  %v5565_v16 = vld [vmem:[#allocation3 + $0x2c8] sm:$0xff] }
 0x42f   :  { %v4143_v52 = vadd.f32 %v4142_v63, %v4029_v60  ;;  %v4280_v2 = vpop.f32.mrf.mxu3  ;;  %v4032_v9 = vpop.f32.mrf.mxu1  ;;  %v5259_v60 = vld [vmem:[#allocation3 + $0x258] sm:$0xff]  ;;  %v5412_v63 = vld [vmem:[#allocation3 + $0x290] sm:$0xff] }
 0x430   :  { %5630 = vmatpush.msrb.mxu0 %v5569_v62  ;;  %5324 = vmatpush.msrb.mxu2 %v5259_v60 }
 0x431   :  { %v4308_v44 = vadd.f32 %v4280_v2, %v4143_v52  ;;  %v5566_v2 = vld [vmem:[#allocation3 + $0x2d0] sm:$0xff] }
 0x432   :  { %v4437_v26 = vpop.f32.mrf.mxu0  ;;  %8606 = vmatmul.msk.f32.gmra.mxu1 %vm3795_vm2, %v11645_v25  ;;  %5631 = vmatpush.msrb.mxu0 %v5568_v11 }
 0x433   :  { %8622 = vmatmul.msk.f32.gmra.mxu2 %vm3795_vm2, %v11450_v5  ;;  %v11651_v61 = vadd.f32 %v4434_v41, %v4308_v44  ;;  %v5413_v41 = vld [vmem:[#allocation3 + $0x298] sm:$0xff] }
 0x434   :  { %8638 = vmatmul.msk.f32.gmra.mxu3 %vm3795_vm2, %v11448_v23  ;;  %v5725_v44 = vld [vmem:[#allocation3 + $0x338] sm:$0xff]  ;;  %5632 = vmatpush.msrb.mxu0 %v5567_v27 }
 0x435   :  { %8654 = vmatmul.msk.f32.gmra.mxu0 %vm3795_vm2, %v11453_v3  ;;  %v11657_v3 = vld [vmem:[#allocation2 + $0x18a] sm:$0xff]  ;;  %5478 = vmatpush.msrb.mxu3 %v5413_v41 }
 0x436   :  { %v4145_v14 = vpop.f32.mrf.mxu2  ;;  %5325 = vmatpush.msrb.mxu2 %v5258_v15  ;;  %5782 = vmatpush.msrb.mxu1 %v5725_v44  ;;  %v11695_v44 = vld [vmem:[#allocation2 + $0x1e6] sm:$0xff] }
 0x437   :  { %v4146_v37 = vadd.f32 %v4145_v14, %v4032_v9  ;;  %v4283_v5 = vpop.f32.mrf.mxu3  ;;  %v4035_v48 = vpop.f32.mrf.mxu1  ;;  %v5257_v9 = vld [vmem:[#allocation3 + $0x248] sm:$0xff]  ;;  %5479 = vmatpush.msrb.mxu3 %v5412_v63  ;;  %5633 = vmatpush.msrb.mxu0 %v5566_v2 }
 0x438   :  { %5326 = vmatpush.msrb.mxu2 %v5257_v9  ;;  %v11693_v9 = vld [vmem:[#allocation2 + $0x1d2] sm:$0xff] }
 0x439   :  { %v4309_v23 = vadd.f32 %v4283_v5, %v4146_v37  ;;  %5480 = vmatpush.msrb.mxu3 %v5411_v17  ;;  %5634 = vmatpush.msrb.mxu0 %v5565_v16 }
 0x43a   :  { %v4440_v21 = vpop.f32.mrf.mxu0  ;;  %8607 = vmatmul.msk.f32.gmra.mxu1 %vm3795_vm2, %v11657_v3  ;;  %5327 = vmatpush.msrb.mxu2 %v5256_v33 }
 0x43b   :  { %8623 = vmatmul.msk.f32.gmra.mxu2 %vm3795_vm2, %v11466_v30  ;;  %v11663_v52 = vadd.f32 %v4437_v26, %v4309_v23  ;;  %5481 = vmatpush.msrb.mxu3 %v5410_v55  ;;  %v11681_v23 = vld [vmem:[#allocation2 + $0x1ba] sm:$0xff] }
 0x43c   :  { %8639 = vmatmul.msk.f32.gmra.mxu3 %vm3795_vm2, %v11464_v22  ;;  %5635 = vmatpush.msrb.mxu0 %v5564_v46  ;;  %v5547_v46 = vld [vmem:[#allocation2 + $0x37] sm:$0xff] }
 0x43d   :  { %8655 = vmatmul.msk.f32.gmra.mxu0 %vm3795_vm2, %v11468_v12 }
 0x43e   :  { %v4148_v40 = vpop.f32.mrf.mxu2 }
 0x43f   :  { %v4149_v30 = vadd.f32 %v4148_v40, %v4035_v48  ;;  %v4286_v26 = vpop.f32.mrf.mxu3  ;;  %v4038_v22 = vpop.f32.mrf.mxu1 }
 0x441   :  { %v4310_v62 = vadd.f32 %v4286_v26, %v4149_v30  ;;  %v5085_v30 = vld [vmem:[#allocation2 + $0x21] sm:$0xff] }
 0x442   :  { %v4443_v12 = vpop.f32.mrf.mxu0  ;;  %8608 = vmatmul.msk.f32.gmra.mxu1 %vm3795_vm2, %v11669_v57 }
 0x443   :  { %8624 = vmatmul.msk.f32.gmra.mxu2 %vm3795_vm2, %v11481_v36  ;;  %v11675_v14 = vadd.f32 %v4440_v21, %v4310_v62 }
 0x444   :  { %8640 = vmatmul.msk.f32.gmra.mxu3 %vm3795_vm2, %v11479_v4  ;;  %v5724_v4 = vld [vmem:[#allocation3 + $0x330] sm:$0xff] }
 0x445   :  { %8656 = vmatmul.msk.f32.gmra.mxu0 %vm3795_vm2, %v11483_v1  ;;  %5783 = vmatpush.msrb.mxu1 %v5724_v4 }
 0x446   :  { %v4151_v11 = vpop.f32.mrf.mxu2 }
 0x447   :  { %v4152_v60 = vadd.f32 %v4151_v11, %v4038_v22  ;;  %v4289_v37 = vpop.f32.mrf.mxu3  ;;  %v4041_v5 = vpop.f32.mrf.mxu1  ;;  %v4116_v22 = vadd.f32 %v11535_v10, %v11521_v28 }
 0x449   :  { %v4311_v41 = vadd.f32 %v4289_v37, %v4152_v60  ;;  %v4299_v28 = vadd.f32 %v11537_v51, %v4116_v22 }
 0x44a   :  { %v4446_v48 = vpop.f32.mrf.mxu0  ;;  %8609 = vmatmul.msk.f32.gmra.mxu1 %vm3795_vm2, %v11681_v23 }
 0x44b   :  { %8625 = vmatmul.msk.f32.gmra.mxu2 %vm3795_vm2, %v11495_v20  ;;  %v11687_v36 = vadd.f32 %v4443_v12, %v4311_v41  ;;  %v4113_v20 = vadd.f32 %v11513_v50, %v11506_v39  ;;  %v5393_v12 = vld [vmem:[#allocation2 + $0x36] sm:$0xff]  ;;  %v4453_v4 = vadd.f32 %v11523_v31, %v4299_v28 }
 0x44c   :  { %8641 = vmatmul.msk.f32.gmra.mxu3 %vm3795_vm2, %v11493_v7  ;;  %v11703_v7 = vld [vmem:[#allocation2 + $0x1e7] sm:$0xff] }
 0x44d   :  { %8657 = vmatmul.msk.f32.gmra.mxu0 %vm3795_vm2, %v11497_v8  ;;  %v4946_v8 = vld [vmem:[#allocation2 + $0x1e8] sm:$0xff]  ;;  %v4298_v16 = vadd.f32 %v11519_v13, %v4113_v20 }
 0x44e   :  { %v4154_v1 = vpop.f32.mrf.mxu2  ;;  %v5723_v13 = vld [vmem:[#allocation3 + $0x328] sm:$0xff] }
 0x44f   :  { %v4155_v21 = vadd.f32 %v4154_v1, %v4041_v5  ;;  %v4292_v27 = vpop.f32.mrf.mxu3  ;;  %v4044_v15 = vpop.f32.mrf.mxu1  ;;  %v4452_v62 = vadd.f32 %v11508_v35, %v4298_v16  ;;  %5784 = vmatpush.msrb.mxu1 %v5723_v13  ;;  %v11729_v1 = vld [vmem:[#allocation2 + $0x4e] sm:$0xff]  ;;  %v5550_v13 = vld [vmem:[#allocation2 + $0x7f] sm:$0xff] }
 0x450   :  { %v5549_v16 = vld [vmem:[#allocation2 + $0x67] sm:$0xff] }
 0x451   :  { %v4312_v63 = vadd.f32 %v4292_v27, %v4155_v21  ;;  %v5548_v21 = vld [vmem:[#allocation2 + $0x4f] sm:$0xff] }
 0x452   :  { %v4449_v2 = vpop.f32.mrf.mxu0  ;;  %8610 = vmatmul.msk.f32.gmra.mxu1 %vm3795_vm2, %v11693_v9 }
 0x453   :  { %8626 = vmatmul.msk.f32.gmra.mxu2 %vm3795_vm2, %v11695_v44  ;;  %v11705_v17 = vadd.f32 %v4446_v48, %v4312_v63 }
 0x454   :  { %8642 = vmatmul.msk.f32.gmra.mxu3 %vm3795_vm2, %v11703_v7 }
 0x455   :  { %8658 = vmatmul.msk.f32.gmra.mxu0 %vm3795_vm2, %v4946_v8 }
 0x456   :  { %v4157_v40 = vpop.f32.mrf.mxu2 }
 0x457   :  { %v4158_v39 = vadd.f32 %v4157_v40, %v4044_v15  ;;  %v4295_v50 = vpop.f32.mrf.mxu3  ;;  %v4558_v33 = vpop.f32.mrf.mxu1  ;;  %v11736_v40 = vld [vmem:[#allocation2 + $0x51] sm:$0xff] }
 0x458   :  { %v4606_v60 = vadd.f32 %v4558_v33, %v4452_v62 }
 0x459   :  { %v4313_v26 = vadd.f32 %v4295_v50, %v4158_v39  ;;  %v5722_v50 = vld [vmem:[#allocation3 + $0x320] sm:$0xff] }
 0x45a   :  { %v5021_v55 = vpop.f32.mrf.mxu0  ;;  %8659 = vmatmul.msk.f32.vlgmr.msra.gmra.mxu1 %vm3795_vm2, %v5085_v30 }
 0x45b   :  { %8675 = vmatmul.msk.f32.vlgmr.msrb.gmra.mxu2 %vm3795_vm2, %v11525_v18  ;;  %v11717_v11 = vadd.f32 %v4449_v2, %v4313_v26  ;;  %v11722_v18 = vld [vmem:[#allocation2 + $0x39] sm:$0xff]  ;;  %5785 = vmatpush.msrb.mxu1 %v5722_v50  ;;  %v5552_v50 = vld [vmem:[#allocation2 + $0xaf] sm:$0xff] }
 0x45c   :  { %8691 = vmatmul.msk.f32.vlgmr.msrb.gmra.mxu3 %vm3795_vm2, %v5393_v12  ;;  %v11750_v12 = vld [vmem:[#allocation2 + $0x69] sm:$0xff] }
 0x45d   :  { %8707 = vmatmul.msk.f32.vlgmr.msrb.gmra.mxu0 %vm3795_vm2, %v5547_v46  ;;  %v11756_v46 = vld [vmem:[#allocation2 + $0x7e] sm:$0xff] }
 0x45e   :  { %v4713_v37 = vpop.f32.mrf.mxu2 }
 0x45f   :  { %v4761_v35 = vadd.f32 %v4713_v37, %v4606_v60  ;;  %v4867_v10 = vpop.f32.mrf.mxu3  ;;  %v4561_v5 = vpop.f32.mrf.mxu1 }
 0x460   :  { %v4607_v51 = vadd.f32 %v4561_v5, %v4453_v4  ;;  %v5551_v4 = vld [vmem:[#allocation2 + $0x97] sm:$0xff] }
 0x461   :  { %v4915_v41 = vadd.f32 %v4867_v10, %v4761_v35 }
 0x462   :  { %v5024_v48 = vpop.f32.mrf.mxu0  ;;  %8660 = vmatmul.msk.f32.gmra.mxu1 %vm3795_vm2, %v11722_v18 }
 0x463   :  { %8676 = vmatmul.msk.f32.gmra.mxu2 %vm3795_vm2, %v11539_v0  ;;  %v11731_v27 = vadd.f32 %v5021_v55, %v4915_v41  ;;  %v11742_v0 = vld [vmem:[#allocation2 + $0x66] sm:$0xff] }
 0x464   :  { %8692 = vmatmul.msk.f32.gmra.mxu3 %vm3795_vm2, %v11729_v1 }
 0x465   :  { %8708 = vmatmul.msk.f32.gmra.mxu0 %vm3795_vm2, %v5548_v21 }
 0x466   :  { %v4716_v15 = vpop.f32.mrf.mxu2 }
 0x467   :  { %v4762_v63 = vadd.f32 %v4716_v15, %v4607_v51  ;;  %v4870_v31 = vpop.f32.mrf.mxu3  ;;  %v4564_v2 = vpop.f32.mrf.mxu1 }
 0x468   :  { %v4608_v33 = vadd.f32 %v4564_v2, %v11555_v38 }
 0x469   :  { %v4916_v20 = vadd.f32 %v4870_v31, %v4762_v63 }
 0x46a   :  { %v5027_v8 = vpop.f32.mrf.mxu0  ;;  %8661 = vmatmul.msk.f32.gmra.mxu1 %vm3795_vm2, %v11736_v40 }
 0x46b   :  { %8677 = vmatmul.msk.f32.gmra.mxu2 %vm3795_vm2, %v11549_v54  ;;  %v11744_v39 = vadd.f32 %v5024_v48, %v4916_v20  ;;  %v11764_v48 = vld [vmem:[#allocation2 + $0x81] sm:$0xff] }
 0x46c   :  { %8693 = vmatmul.msk.f32.gmra.mxu3 %vm3795_vm2, %v11742_v0 }
 0x46d   :  { %8709 = vmatmul.msk.f32.gmra.mxu0 %vm3795_vm2, %v5549_v16  ;;  %v11784_v16 = vld [vmem:[#allocation2 + $0xae] sm:$0xff] }
 0x46e   :  { %v4719_v30 = vpop.f32.mrf.mxu2 }
 0x46f   :  { %v4763_v26 = vadd.f32 %v4719_v30, %v4608_v33  ;;  %v4873_v55 = vpop.f32.mrf.mxu3  ;;  %v4567_v22 = vpop.f32.mrf.mxu1 }
 0x470   :  { %v4609_v38 = vadd.f32 %v4567_v22, %v11567_v32  ;;  %v5721_v32 = vld [vmem:[#allocation3 + $0x318] sm:$0xff] }
 0x471   :  { %v4917_v62 = vadd.f32 %v4873_v55, %v4763_v26  ;;  %5786 = vmatpush.msrb.mxu1 %v5721_v32 }
 0x472   :  { %v5030_v54 = vpop.f32.mrf.mxu0  ;;  %8662 = vmatmul.msk.f32.gmra.mxu1 %vm3795_vm2, %v11750_v12 }
 0x473   :  { %8678 = vmatmul.msk.f32.gmra.mxu2 %vm3795_vm2, %v11561_v34  ;;  %v11758_v60 = vadd.f32 %v5027_v8, %v4917_v62  ;;  %v11770_v34 = vld [vmem:[#allocation2 + $0x96] sm:$0xff] }
 0x474   :  { %8694 = vmatmul.msk.f32.gmra.mxu3 %vm3795_vm2, %v11756_v46  ;;  %v11778_v8 = vld [vmem:[#allocation2 + $0x99] sm:$0xff] }
 0x475   :  { %8710 = vmatmul.msk.f32.gmra.mxu0 %vm3795_vm2, %v5550_v13  ;;  %v11792_v13 = vld [vmem:[#allocation2 + $0xb1] sm:$0xff] }
 0x476   :  { %v4722_v37 = vpop.f32.mrf.mxu2 }
 0x477   :  { %v4764_v28 = vadd.f32 %v4722_v37, %v4609_v38  ;;  %v4876_v35 = vpop.f32.mrf.mxu3  ;;  %v4570_v10 = vpop.f32.mrf.mxu1 }
 0x478   :  { %v4610_v51 = vadd.f32 %v4570_v10, %v11579_v47 }
 0x479   :  { %v4918_v5 = vadd.f32 %v4876_v35, %v4764_v28 }
 0x47a   :  { %v5033_v41 = vpop.f32.mrf.mxu0  ;;  %8663 = vmatmul.msk.f32.gmra.mxu1 %vm3795_vm2, %v11764_v48 }
 0x47b   :  { %8679 = vmatmul.msk.f32.gmra.mxu2 %vm3795_vm2, %v11573_v24  ;;  %v11772_v21 = vadd.f32 %v5030_v54, %v4918_v5 }
 0x47c   :  { %8695 = vmatmul.msk.f32.gmra.mxu3 %vm3795_vm2, %v11770_v34 }
 0x47d   :  { %8711 = vmatmul.msk.f32.gmra.mxu0 %vm3795_vm2, %v5551_v4  ;;  %v11805_v4 = vld [vmem:[#allocation2 + $0xc9] sm:$0xff] }
 0x47e   :  { %v4725_v15 = vpop.f32.mrf.mxu2 }
 0x47f   :  { %v4765_v63 = vadd.f32 %v4725_v15, %v4610_v51  ;;  %v4879_v31 = vpop.f32.mrf.mxu3  ;;  %v4573_v2 = vpop.f32.mrf.mxu1 }
 0x480   :  { %v4611_v47 = vadd.f32 %v4573_v2, %v11591_v49  ;;  %v5720_v49 = vld [vmem:[#allocation3 + $0x310] sm:$0xff]  ;;  %v5093_v2 = vld [vmem:[#allocation2 + $0x141] sm:$0xff] }
 0x481   :  { %v4919_v20 = vadd.f32 %v4879_v31, %v4765_v63  ;;  %5787 = vmatpush.msrb.mxu1 %v5720_v49 }
 0x482   :  { %v5036_v24 = vpop.f32.mrf.mxu0  ;;  %8664 = vmatmul.msk.f32.gmra.mxu1 %vm3795_vm2, %v11778_v8 }
 0x483   :  { %8680 = vmatmul.msk.f32.gmra.mxu2 %vm3795_vm2, %v11585_v59  ;;  %v11786_v33 = vadd.f32 %v5033_v41, %v4919_v20 }
 0x484   :  { %8696 = vmatmul.msk.f32.gmra.mxu3 %vm3795_vm2, %v11784_v16 }
 0x485   :  { %8712 = vmatmul.msk.f32.gmra.mxu0 %vm3795_vm2, %v5552_v50  ;;  %v5401_v50 = vld [vmem:[#allocation2 + $0x156] sm:$0xff] }
 0x486   :  { %v4728_v30 = vpop.f32.mrf.mxu2 }
 0x487   :  { %v4766_v26 = vadd.f32 %v4728_v30, %v4611_v47  ;;  %v4882_v55 = vpop.f32.mrf.mxu3  ;;  %v4576_v22 = vpop.f32.mrf.mxu1  ;;  %v5555_v47 = vld [vmem:[#allocation2 + $0x157] sm:$0xff] }
 0x488   :  { %v4612_v38 = vadd.f32 %v4576_v22, %v11607_v29 }
 0x489   :  { %v4920_v62 = vadd.f32 %v4882_v55, %v4766_v26 }
 0x48a   :  { %v5039_v54 = vpop.f32.mrf.mxu0  ;;  %8665 = vmatmul.msk.f32.gmra.mxu1 %vm3795_vm2, %v11792_v13 }
 0x48b   :  { %8681 = vmatmul.msk.f32.gmra.mxu2 %vm3795_vm2, %v11597_v58  ;;  %v11798_v59 = vadd.f32 %v5036_v24, %v4920_v62  ;;  %v11807_v58 = vld [vmem:[#allocation2 + $0xca] sm:$0xff] }
 0x48c   :  { %8697 = vmatmul.msk.f32.gmra.mxu3 %vm3795_vm2, %v11599_v53  ;;  %v11813_v53 = vld [vmem:[#allocation2 + $0xde] sm:$0xff] }
 0x48d   :  { %8713 = vmatmul.msk.f32.gmra.mxu0 %vm3795_vm2, %v11605_v43  ;;  %v5554_v43 = vld [vmem:[#allocation2 + $0xdf] sm:$0xff] }
 0x48e   :  { %v4731_v37 = vpop.f32.mrf.mxu2 }
 0x48f   :  { %v4767_v28 = vadd.f32 %v4731_v37, %v4612_v38  ;;  %v4885_v35 = vpop.f32.mrf.mxu3  ;;  %v4579_v10 = vpop.f32.mrf.mxu1  ;;  %v11829_v37 = vld [vmem:[#allocation2 + $0x159] sm:$0xff] }
 0x490   :  { %v4613_v32 = vadd.f32 %v4579_v10, %v11615_v19  ;;  %v5719_v19 = vld [vmem:[#allocation3 + $0x308] sm:$0xff] }
 0x491   :  { %v4921_v5 = vadd.f32 %v4885_v35, %v4767_v28  ;;  %5788 = vmatpush.msrb.mxu1 %v5719_v19  ;;  %v5556_v28 = vld [vmem:[#allocation2 + $0x16f] sm:$0xff] }
 0x492   :  { %v5042_v41 = vpop.f32.mrf.mxu0  ;;  %8666 = vmatmul.msk.f32.gmra.mxu1 %vm3795_vm2, %v11805_v4 }
 0x493   :  { %8682 = vmatmul.msk.f32.gmra.mxu2 %vm3795_vm2, %v11807_v58  ;;  %v11815_v29 = vadd.f32 %v5039_v54, %v4921_v5 }
 0x494   :  { %8698 = vmatmul.msk.f32.gmra.mxu3 %vm3795_vm2, %v11813_v53 }
 0x495   :  { %8714 = vmatmul.msk.f32.gmra.mxu0 %vm3795_vm2, %v5554_v43 }
 0x496   :  { %v4734_v51 = vpop.f32.mrf.mxu2 }
 0x497   :  { %v4768_v15 = vadd.f32 %v4734_v51, %v4613_v32  ;;  %v4888_v63 = vpop.f32.mrf.mxu3  ;;  %v4582_v31 = vpop.f32.mrf.mxu1 }
 0x498   :  { %v4614_v26 = vadd.f32 %v4582_v31, %v11627_v6 }
 0x499   :  { %v4922_v20 = vadd.f32 %v4888_v63, %v4768_v15  ;;  %v11843_v15 = vld [vmem:[#allocation2 + $0x171] sm:$0xff]  ;;  %v5557_v63 = vld [vmem:[#allocation2 + $0x187] sm:$0xff] }
 0x49a   :  { %v5045_v24 = vpop.f32.mrf.mxu0  ;;  %8667 = vmatmul.msk.f32.gmra.mxu1 %vm3795_vm2, %v5093_v2  ;;  %v5879_v2 = vld [vmem:[#allocation3 + $0x378] sm:$0xff] }
 0x49b   :  { %8683 = vmatmul.msk.f32.gmra.mxu2 %vm3795_vm2, %v11621_v45  ;;  %v11824_v30 = vadd.f32 %v5042_v41, %v4922_v20  ;;  %v11835_v45 = vld [vmem:[#allocation2 + $0x16e] sm:$0xff]  ;;  %v6033_v20 = vld [vmem:[#allocation3 + $0x3b8] sm:$0xff] }
 0x49c   :  { %8699 = vmatmul.msk.f32.gmra.mxu3 %vm3795_vm2, %v5401_v50  ;;  %5936 = vmatpush.msra.mxu2 %v5879_v2  ;;  %v6188_v50 = vld [vmem:[#allocation3 + $0x3f8] sm:$0xff] }
 0x49d   :  { %8715 = vmatmul.msk.f32.gmra.mxu0 %vm3795_vm2, %v5555_v47  ;;  %6090 = vmatpush.msra.mxu3 %v6033_v20  ;;  %v5875_v2 = vld [vmem:[#allocation3 + $0x358] sm:$0xff] }
 0x49e   :  { %v4737_v55 = vpop.f32.mrf.mxu2  ;;  %6245 = vmatpush.msra.mxu0 %v6188_v50 }
 0x49f   :  { %v4769_v22 = vadd.f32 %v4737_v55, %v4614_v26  ;;  %v4891_v62 = vpop.f32.mrf.mxu3  ;;  %v4585_v54 = vpop.f32.mrf.mxu1 }
 0x4a0   :  { %v4615_v6 = vadd.f32 %v4585_v54, %v11639_v42  ;;  %v5718_v42 = vld [vmem:[#allocation3 + $0x300] sm:$0xff]  ;;  %v6032_v54 = vld [vmem:[#allocation3 + $0x3b0] sm:$0xff] }
 0x4a1   :  { %v4923_v49 = vadd.f32 %v4891_v62, %v4769_v22  ;;  %5789 = vmatpush.msrb.mxu1 %v5718_v42  ;;  %v5878_v62 = vld [vmem:[#allocation3 + $0x370] sm:$0xff]  ;;  %6091 = vmatpush.msra.mxu3 %v6032_v54 }
 0x4a2   :  { %v5048_v38 = vpop.f32.mrf.mxu0  ;;  %8668 = vmatmul.msk.f32.gmra.mxu1 %vm3795_vm2, %v11829_v37  ;;  %5937 = vmatpush.msra.mxu2 %v5878_v62  ;;  %v5559_v62 = vld [vmem:[#allocation2 + $0x1b7] sm:$0xff] }
 0x4a3   :  { %8684 = vmatmul.msk.f32.gmra.mxu2 %vm3795_vm2, %v11633_v56  ;;  %v11837_v35 = vadd.f32 %v5045_v24, %v4923_v49  ;;  %v11849_v56 = vld [vmem:[#allocation2 + $0x186] sm:$0xff]  ;;  %v6028_v54 = vld [vmem:[#allocation3 + $0x390] sm:$0xff] }
 0x4a4   :  { %8700 = vmatmul.msk.f32.gmra.mxu3 %vm3795_vm2, %v11835_v45  ;;  %v11857_v49 = vld [vmem:[#allocation2 + $0x189] sm:$0xff] }
 0x4a5   :  { %8716 = vmatmul.msk.f32.gmra.mxu0 %vm3795_vm2, %v5556_v28  ;;  %v5877_v28 = vld [vmem:[#allocation3 + $0x368] sm:$0xff] }
 0x4a6   :  { %v4740_v10 = vpop.f32.mrf.mxu2  ;;  %5938 = vmatpush.msra.mxu2 %v5877_v28  ;;  %v6183_v28 = vld [vmem:[#allocation3 + $0x3d0] sm:$0xff] }
 0x4a7   :  { %v4770_v5 = vadd.f32 %v4740_v10, %v4615_v6  ;;  %v4894_v41 = vpop.f32.mrf.mxu3  ;;  %v4588_v43 = vpop.f32.mrf.mxu1  ;;  %v5558_v6 = vld [vmem:[#allocation2 + $0x19f] sm:$0xff]  ;;  %v6031_v10 = vld [vmem:[#allocation3 + $0x3a8] sm:$0xff] }
 0x4a8   :  { %v4616_v24 = vadd.f32 %v4588_v43, %v11651_v61  ;;  %v11863_v61 = vld [vmem:[#allocation2 + $0x19e] sm:$0xff]  ;;  %6092 = vmatpush.msra.mxu3 %v6031_v10 }
 0x4a9   :  { %v4924_v32 = vadd.f32 %v4894_v41, %v4770_v5  ;;  %v6186_v41 = vld [vmem:[#allocation3 + $0x3e8] sm:$0xff]  ;;  %v5876_v43 = vld [vmem:[#allocation3 + $0x360] sm:$0xff]  ;;  %v6342_v10 = vld [vmem:[#allocation3 + $0x438] sm:$0xff] }
 0x4aa   :  { %v5051_v51 = vpop.f32.mrf.mxu0  ;;  %8669 = vmatmul.msk.f32.gmra.mxu1 %vm3795_vm2, %v11843_v15  ;;  %5939 = vmatpush.msra.mxu2 %v5876_v43  ;;  %v6027_v43 = vld [vmem:[#allocation3 + $0x388] sm:$0xff] }
 0x4ab   :  { %8685 = vmatmul.msk.f32.gmra.mxu2 %vm3795_vm2, %v11645_v25  ;;  %v11851_v31 = vadd.f32 %v5048_v38, %v4924_v32  ;;  %v6187_v38 = vld [vmem:[#allocation3 + $0x3f0] sm:$0xff]  ;;  %6399 = vmatpush.msra.mxu1 %v6342_v10 }
 0x4ac   :  { %8701 = vmatmul.msk.f32.gmra.mxu3 %vm3795_vm2, %v11849_v56  ;;  %6246 = vmatpush.msra.mxu0 %v6187_v38 }
 0x4ad   :  { %8717 = vmatmul.msk.f32.gmra.mxu0 %vm3795_vm2, %v5557_v63  ;;  %v6030_v63 = vld [vmem:[#allocation3 + $0x3a0] sm:$0xff]  ;;  %5940 = vmatpush.msra.mxu2 %v5875_v2 }
 0x4ae   :  { %v4743_v47 = vpop.f32.mrf.mxu2  ;;  %6247 = vmatpush.msra.mxu0 %v6186_v41  ;;  %6093 = vmatpush.msra.mxu3 %v6030_v63  ;;  %v5872_v63 = vld [vmem:[#allocation3 + $0x340] sm:$0xff] }
 0x4af   :  { %v4771_v25 = vadd.f32 %v4743_v47, %v4616_v24  ;;  %v4897_v19 = vpop.f32.mrf.mxu3  ;;  %v4591_v26 = vpop.f32.mrf.mxu1 }
 0x4b0   :  { %v4617_v32 = vadd.f32 %v4591_v26, %v11663_v52  ;;  %v6184_v52 = vld [vmem:[#allocation3 + $0x3d8] sm:$0xff]  ;;  %v5874_v26 = vld [vmem:[#allocation3 + $0x350] sm:$0xff] }
 0x4b1   :  { %v4925_v55 = vadd.f32 %v4897_v19, %v4771_v25  ;;  %v11871_v19 = vld [vmem:[#allocation2 + $0x1a1] sm:$0xff]  ;;  %5941 = vmatpush.msra.mxu2 %v5874_v26 }
 0x4b2   :  { %v5054_v22 = vpop.f32.mrf.mxu0  ;;  %8670 = vmatmul.msk.f32.gmra.mxu1 %vm3795_vm2, %v11857_v49 }
 0x4b3   :  { %8686 = vmatmul.msk.f32.gmra.mxu2 %vm3795_vm2, %v11657_v3  ;;  %v11865_v5 = vadd.f32 %v5051_v51, %v4925_v55  ;;  %v6185_v3 = vld [vmem:[#allocation3 + $0x3e0] sm:$0xff]  ;;  %v6029_v51 = vld [vmem:[#allocation3 + $0x398] sm:$0xff] }
 0x4b4   :  { %8702 = vmatmul.msk.f32.gmra.mxu3 %vm3795_vm2, %v11863_v61  ;;  %6248 = vmatpush.msra.mxu0 %v6185_v3  ;;  %v11877_v55 = vld [vmem:[#allocation2 + $0x1b6] sm:$0xff]  ;;  %v6026_v3 = vld [vmem:[#allocation3 + $0x380] sm:$0xff] }
 0x4b5   :  { %8718 = vmatmul.msk.f32.gmra.mxu0 %vm3795_vm2, %v5558_v6  ;;  %6094 = vmatpush.msra.mxu3 %v6029_v51  ;;  %v5873_v6 = vld [vmem:[#allocation3 + $0x348] sm:$0xff]  ;;  %v6181_v51 = vld [vmem:[#allocation3 + $0x3c0] sm:$0xff] }
 0x4b6   :  { %v4746_v42 = vpop.f32.mrf.mxu2  ;;  %6249 = vmatpush.msra.mxu0 %v6184_v52  ;;  %5942 = vmatpush.msra.mxu2 %v5873_v6 }
 0x4b7   :  { %v4772_v20 = vadd.f32 %v4746_v42, %v4617_v32  ;;  %v4900_v24 = vpop.f32.mrf.mxu3  ;;  %v4594_v50 = vpop.f32.mrf.mxu1  ;;  %6095 = vmatpush.msra.mxu3 %v6028_v54  ;;  %v6182_v32 = vld [vmem:[#allocation3 + $0x3c8] sm:$0xff] }
 0x4b8   :  { %v4618_v41 = vadd.f32 %v4594_v50, %v11675_v14  ;;  %6250 = vmatpush.msra.mxu0 %v6183_v28  ;;  %5943 = vmatpush.msra.mxu2 %v5872_v63  ;;  %v11885_v14 = vld [vmem:[#allocation2 + $0x1b9] sm:$0xff]  ;;  %v11891_v50 = vld [vmem:[#allocation2 + $0x1ce] sm:$0xff] }
 0x4b9   :  { %v4926_v47 = vadd.f32 %v4900_v24, %v4772_v20  ;;  %6096 = vmatpush.msra.mxu3 %v6027_v43 }
 0x4ba   :  { %v5057_v25 = vpop.f32.mrf.mxu0  ;;  %8671 = vmatmul.msk.f32.gmra.mxu1 %vm3795_vm2, %v11871_v19  ;;  %6251 = vmatpush.msra.mxu0 %v6182_v32 }
 0x4bb   :  { %8687 = vmatmul.msk.f32.gmra.mxu2 %vm3795_vm2, %v11669_v57  ;;  %v11879_v38 = vadd.f32 %v5054_v22, %v4926_v47  ;;  %6097 = vmatpush.msra.mxu3 %v6026_v3  ;;  %v5560_v47 = vld [vmem:[#allocation2 + $0x1cf] sm:$0xff] }
 0x4bc   :  { %8703 = vmatmul.msk.f32.gmra.mxu3 %vm3795_vm2, %v11877_v55  ;;  %6252 = vmatpush.msra.mxu0 %v6181_v51 }
 0x4bd   :  { %8719 = vmatmul.msk.f32.gmra.mxu0 %vm3795_vm2, %v5559_v62 }
 0x4be   :  { %v4749_v57 = vpop.f32.mrf.mxu2 }
 0x4bf   :  { %v4773_v22 = vadd.f32 %v4749_v57, %v4618_v41  ;;  %v4903_v42 = vpop.f32.mrf.mxu3  ;;  %v4597_v2 = vpop.f32.mrf.mxu1 }
 0x4c0   :  { %v4619_v26 = vadd.f32 %v4597_v2, %v11687_v36  ;;  %v6341_v36 = vld [vmem:[#allocation3 + $0x430] sm:$0xff] }
 0x4c1   :  { %v4927_v20 = vadd.f32 %v4903_v42, %v4773_v22  ;;  %6400 = vmatpush.msra.mxu1 %v6341_v36  ;;  %v11912_v2 = vld [vmem:[#allocation2 + $0x1e9] sm:$0xff] }
 0x4c2   :  { %v5060_v24 = vpop.f32.mrf.mxu0  ;;  %8672 = vmatmul.msk.f32.gmra.mxu1 %vm3795_vm2, %v11885_v14 }
 0x4c3   :  { %8688 = vmatmul.msk.f32.gmra.mxu2 %vm3795_vm2, %v11681_v23  ;;  %v11893_v52 = vadd.f32 %v5057_v25, %v4927_v20  ;;  %v11899_v23 = vld [vmem:[#allocation2 + $0x1d1] sm:$0xff] }
 0x4c4   :  { %8704 = vmatmul.msk.f32.gmra.mxu3 %vm3795_vm2, %v11891_v50 }
 0x4c5   :  { %8720 = vmatmul.msk.f32.gmra.mxu0 %vm3795_vm2, %v5560_v47 }
 0x4c6   :  { %v4752_v62 = vpop.f32.mrf.mxu2 }
 0x4c7   :  { %v4774_v54 = vadd.f32 %v4752_v62, %v4619_v26  ;;  %v4906_v28 = vpop.f32.mrf.mxu3  ;;  %v4600_v6 = vpop.f32.mrf.mxu1 }
 0x4c8   :  { %v4620_v43 = vadd.f32 %v4600_v6, %v11705_v17  ;;  %v6009_v6 = vld [vmem:[#allocation2 + $0x3a] sm:$0xff] }
 0x4c9   :  { %v4928_v10 = vadd.f32 %v4906_v28, %v4774_v54  ;;  %v5701_v28 = vld [vmem:[#allocation2 + $0x38] sm:$0xff] }
 0x4ca   :  { %v5063_v41 = vpop.f32.mrf.mxu0  ;;  %8673 = vmatmul.msk.f32.gmra.mxu1 %vm3795_vm2, %v11899_v23 }
 0x4cb   :  { %8689 = vmatmul.msk.f32.gmra.mxu2 %vm3795_vm2, %v11693_v9  ;;  %v11905_v25 = vadd.f32 %v5060_v24, %v4928_v10  ;;  %v11914_v9 = vld [vmem:[#allocation2 + $0x1ea] sm:$0xff] }
 0x4cc   :  { %8705 = vmatmul.msk.f32.gmra.mxu3 %vm3795_vm2, %v11695_v44  ;;  %v11920_v44 = vld [vmem:[#allocation2 + $0x1fe] sm:$0xff] }
 0x4cd   :  { %8721 = vmatmul.msk.f32.gmra.mxu0 %vm3795_vm2, %v11703_v7  ;;  %v5562_v7 = vld [vmem:[#allocation2 + $0x1ff] sm:$0xff] }
 0x4ce   :  { %v4755_v57 = vpop.f32.mrf.mxu2 }
 0x4cf   :  { %v4775_v32 = vadd.f32 %v4755_v57, %v4620_v43  ;;  %v4909_v63 = vpop.f32.mrf.mxu3  ;;  %v4603_v22 = vpop.f32.mrf.mxu1 }
 0x4d0   :  { %v4621_v20 = vadd.f32 %v4603_v22, %v11717_v11  ;;  %v6340_v11 = vld [vmem:[#allocation3 + $0x428] sm:$0xff] }
 0x4d1   :  { %v4929_v42 = vadd.f32 %v4909_v63, %v4775_v32  ;;  %6401 = vmatpush.msra.mxu1 %v6340_v11 }
 0x4d2   :  { %v5066_v3 = vpop.f32.mrf.mxu0  ;;  %8674 = vmatmul.msk.f32.gmra.mxu1 %vm3795_vm2, %v11912_v2 }
 0x4d3   :  { %8690 = vmatmul.msk.f32.gmra.mxu2 %vm3795_vm2, %v11914_v9  ;;  %v11922_v17 = vadd.f32 %v5063_v41, %v4929_v42  ;;  %v11937_v42 = vld [vmem:[#allocation2 + $0x50] sm:$0xff] }
 0x4d4   :  { %8706 = vmatmul.msk.f32.gmra.mxu3 %vm3795_vm2, %v11920_v44 }
 0x4d5   :  { %8722 = vmatmul.msk.f32.gmra.mxu0 %vm3795_vm2, %v5562_v7 }
 0x4d6   :  { %v4758_v24 = vpop.f32.mrf.mxu2 }
 0x4d7   :  { %v4776_v51 = vadd.f32 %v4758_v24, %v4621_v20  ;;  %v4912_v47 = vpop.f32.mrf.mxu3  ;;  %v5175_v26 = vpop.f32.mrf.mxu1 }
 0x4d8   :  { %v5223_v41 = vadd.f32 %v5175_v26, %v11731_v27  ;;  %v11952_v26 = vld [vmem:[#allocation2 + $0x68] sm:$0xff] }
 0x4d9   :  { %v4930_v62 = vadd.f32 %v4912_v47, %v4776_v51 }
 0x4da   :  { %v5637_v54 = vpop.f32.mrf.mxu0  ;;  %8723 = vmatmul.msk.f32.vlgmr.msrb.gmra.mxu1 %vm3795_vm2, %v5701_v28 }
 0x4db   :  { %8739 = vmatmul.msk.f32.vlgmr.msra.gmra.mxu2 %vm3795_vm2, %v11722_v18  ;;  %v11931_v10 = vadd.f32 %v5066_v3, %v4930_v62  ;;  %v11943_v18 = vld [vmem:[#allocation2 + $0x52] sm:$0xff] }
 0x4dc   :  { %8755 = vmatmul.msk.f32.vlgmr.msra.gmra.mxu3 %vm3795_vm2, %v6009_v6 }
 0x4dd   :  { %8771 = vmatmul.msk.f32.vlgmr.msra.gmra.mxu0 %vm3795_vm2, %v11729_v1 }
 0x4de   :  { %v5329_v36 = vpop.f32.mrf.mxu2 }
 0x4df   :  { %v5377_v43 = vadd.f32 %v5329_v36, %v5223_v41  ;;  %v5483_v57 = vpop.f32.mrf.mxu3  ;;  %v5178_v32 = vpop.f32.mrf.mxu1  ;;  %v11967_v36 = vld [vmem:[#allocation2 + $0x80] sm:$0xff] }
 0x4e0   :  { %v5224_v27 = vadd.f32 %v5178_v32, %v11744_v39 }
 0x4e1   :  { %v5531_v63 = vadd.f32 %v5483_v57, %v5377_v43  ;;  %v11973_v43 = vld [vmem:[#allocation2 + $0x82] sm:$0xff] }
 0x4e2   :  { %v5640_v22 = vpop.f32.mrf.mxu0  ;;  %8724 = vmatmul.msk.f32.gmra.mxu1 %vm3795_vm2, %v11937_v42 }
 0x4e3   :  { %8740 = vmatmul.msk.f32.gmra.mxu2 %vm3795_vm2, %v11736_v40  ;;  %v11945_v1 = vadd.f32 %v5637_v54, %v5531_v63  ;;  %v11958_v40 = vld [vmem:[#allocation2 + $0x6a] sm:$0xff] }
 0x4e4   :  { %8756 = vmatmul.msk.f32.gmra.mxu3 %vm3795_vm2, %v11943_v18 }
 0x4e5   :  { %8772 = vmatmul.msk.f32.gmra.mxu0 %vm3795_vm2, %v11742_v0  ;;  %v6339_v0 = vld [vmem:[#allocation3 + $0x420] sm:$0xff] }
 0x4e6   :  { %v5332_v3 = vpop.f32.mrf.mxu2  ;;  %6402 = vmatpush.msra.mxu1 %v6339_v0 }
 0x4e7   :  { %v5378_v7 = vadd.f32 %v5332_v3, %v5224_v27  ;;  %v5486_v20 = vpop.f32.mrf.mxu3  ;;  %v5181_v24 = vpop.f32.mrf.mxu1 }
 0x4e8   :  { %v5225_v39 = vadd.f32 %v5181_v24, %v11758_v60 }
 0x4e9   :  { %v5532_v51 = vadd.f32 %v5486_v20, %v5378_v7  ;;  %v11982_v7 = vld [vmem:[#allocation2 + $0x98] sm:$0xff] }
 0x4ea   :  { %v5643_v47 = vpop.f32.mrf.mxu0  ;;  %8725 = vmatmul.msk.f32.gmra.mxu1 %vm3795_vm2, %v11952_v26 }
 0x4eb   :  { %8741 = vmatmul.msk.f32.gmra.mxu2 %vm3795_vm2, %v11750_v12  ;;  %v11960_v62 = vadd.f32 %v5640_v22, %v5532_v51 }
 0x4ec   :  { %8757 = vmatmul.msk.f32.gmra.mxu3 %vm3795_vm2, %v11958_v40 }
 0x4ed   :  { %8773 = vmatmul.msk.f32.gmra.mxu0 %vm3795_vm2, %v11756_v46 }
 0x4ee   :  { %v5335_v54 = vpop.f32.mrf.mxu2 }
 0x4ef   :  { %v5379_v28 = vadd.f32 %v5335_v54, %v5225_v39  ;;  %v5489_v6 = vpop.f32.mrf.mxu3  ;;  %v5184_v11 = vpop.f32.mrf.mxu1  ;;  %v11997_v54 = vld [vmem:[#allocation2 + $0xb0] sm:$0xff] }
 0x4f0   :  { %v5226_v60 = vadd.f32 %v5184_v11, %v11772_v21 }
 0x4f1   :  { %v5533_v41 = vadd.f32 %v5489_v6, %v5379_v28  ;;  %v12003_v28 = vld [vmem:[#allocation2 + $0xb2] sm:$0xff] }
 0x4f2   :  { %v5646_v12 = vpop.f32.mrf.mxu0  ;;  %8726 = vmatmul.msk.f32.gmra.mxu1 %vm3795_vm2, %v11967_v36 }
 0x4f3   :  { %8742 = vmatmul.msk.f32.gmra.mxu2 %vm3795_vm2, %v11764_v48  ;;  %v11975_v46 = vadd.f32 %v5643_v47, %v5533_v41  ;;  %v11988_v48 = vld [vmem:[#allocation2 + $0x9a] sm:$0xff] }
 0x4f4   :  { %8758 = vmatmul.msk.f32.gmra.mxu3 %vm3795_vm2, %v11973_v43 }
 0x4f5   :  { %8774 = vmatmul.msk.f32.gmra.mxu0 %vm3795_vm2, %v11770_v34  ;;  %v6338_v34 = vld [vmem:[#allocation3 + $0x418] sm:$0xff] }
 0x4f6   :  { %v5338_v57 = vpop.f32.mrf.mxu2  ;;  %6403 = vmatpush.msra.mxu1 %v6338_v34 }
 0x4f7   :  { %v5380_v32 = vadd.f32 %v5338_v57, %v5226_v60  ;;  %v5492_v63 = vpop.f32.mrf.mxu3  ;;  %v5187_v22 = vpop.f32.mrf.mxu1 }
 0x4f8   :  { %v5227_v21 = vadd.f32 %v5187_v22, %v11786_v33 }
 0x4f9   :  { %v5534_v27 = vadd.f32 %v5492_v63, %v5380_v32  ;;  %v12011_v63 = vld [vmem:[#allocation2 + $0xc8] sm:$0xff] }
 0x4fa   :  { %v5649_v3 = vpop.f32.mrf.mxu0  ;;  %8727 = vmatmul.msk.f32.gmra.mxu1 %vm3795_vm2, %v11982_v7 }
 0x4fb   :  { %8743 = vmatmul.msk.f32.gmra.mxu2 %vm3795_vm2, %v11778_v8  ;;  %v11990_v20 = vadd.f32 %v5646_v12, %v5534_v27 }
 0x4fc   :  { %8759 = vmatmul.msk.f32.gmra.mxu3 %vm3795_vm2, %v11988_v48 }
 0x4fd   :  { %8775 = vmatmul.msk.f32.gmra.mxu0 %vm3795_vm2, %v11784_v16  ;;  %v6169_v16 = vld [vmem:[#allocation2 + $0xc6] sm:$0xff] }
 0x4fe   :  { %v5341_v24 = vpop.f32.mrf.mxu2 }
 0x4ff   :  { %v5381_v51 = vadd.f32 %v5341_v24, %v5227_v21  ;;  %v5495_v47 = vpop.f32.mrf.mxu3  ;;  %v5190_v0 = vpop.f32.mrf.mxu1 }
 0x500   :  { %v5228_v33 = vadd.f32 %v5190_v0, %v11798_v59  ;;  %v6337_v59 = vld [vmem:[#allocation3 + $0x410] sm:$0xff]  ;;  %v12026_v0 = vld [vmem:[#allocation2 + $0xe1] sm:$0xff] }
 0x501   :  { %v5535_v39 = vadd.f32 %v5495_v47, %v5381_v51  ;;  %6404 = vmatpush.msra.mxu1 %v6337_v59  ;;  %v6171_v47 = vld [vmem:[#allocation2 + $0xf6] sm:$0xff] }
 0x502   :  { %v5652_v8 = vpop.f32.mrf.mxu0  ;;  %8728 = vmatmul.msk.f32.gmra.mxu1 %vm3795_vm2, %v11997_v54 }
 0x503   :  { %8744 = vmatmul.msk.f32.gmra.mxu2 %vm3795_vm2, %v11792_v13  ;;  %v12005_v6 = vadd.f32 %v5649_v3, %v5535_v39 }
 0x504   :  { %8760 = vmatmul.msk.f32.gmra.mxu3 %vm3795_vm2, %v12003_v28 }
 0x505   :  { %8776 = vmatmul.msk.f32.gmra.mxu0 %vm3795_vm2, %v6169_v16 }
 0x506   :  { %v5344_v11 = vpop.f32.mrf.mxu2 }
 0x507   :  { %v5382_v41 = vadd.f32 %v5344_v11, %v5228_v33  ;;  %v5498_v12 = vpop.f32.mrf.mxu3  ;;  %v5193_v60 = vpop.f32.mrf.mxu1 }
 0x508   :  { %v5229_v22 = vadd.f32 %v5193_v60, %v11815_v29  ;;  %v6017_v60 = vld [vmem:[#allocation2 + $0x15a] sm:$0xff] }
 0x509   :  { %v5536_v57 = vadd.f32 %v5498_v12, %v5382_v41  ;;  %v5709_v12 = vld [vmem:[#allocation2 + $0x158] sm:$0xff] }
 0x50a   :  { %v5655_v32 = vpop.f32.mrf.mxu0  ;;  %8729 = vmatmul.msk.f32.gmra.mxu1 %vm3795_vm2, %v12011_v63 }
 0x50b   :  { %8745 = vmatmul.msk.f32.gmra.mxu2 %vm3795_vm2, %v11805_v4  ;;  %v12017_v13 = vadd.f32 %v5652_v8, %v5536_v57  ;;  %v12024_v4 = vld [vmem:[#allocation2 + $0xe0] sm:$0xff] }
 0x50c   :  { %8761 = vmatmul.msk.f32.gmra.mxu3 %vm3795_vm2, %v11807_v58  ;;  %v12032_v58 = vld [vmem:[#allocation2 + $0xe2] sm:$0xff] }
 0x50d   :  { %8777 = vmatmul.msk.f32.gmra.mxu0 %vm3795_vm2, %v11813_v53 }
 0x50e   :  { %v5347_v27 = vpop.f32.mrf.mxu2 }
 0x50f   :  { %v5383_v3 = vadd.f32 %v5347_v27, %v5229_v22  ;;  %v5501_v34 = vpop.f32.mrf.mxu3  ;;  %v5196_v21 = vpop.f32.mrf.mxu1 }
 0x510   :  { %v5230_v29 = vadd.f32 %v5196_v21, %v11824_v30  ;;  %v6336_v30 = vld [vmem:[#allocation3 + $0x408] sm:$0xff] }
 0x511   :  { %v5537_v24 = vadd.f32 %v5501_v34, %v5383_v3  ;;  %6405 = vmatpush.msra.mxu1 %v6336_v30 }
 0x512   :  { %v5658_v51 = vpop.f32.mrf.mxu0  ;;  %8730 = vmatmul.msk.f32.gmra.mxu1 %vm3795_vm2, %v12024_v4 }
 0x513   :  { %8746 = vmatmul.msk.f32.gmra.mxu2 %vm3795_vm2, %v12026_v0  ;;  %v12034_v53 = vadd.f32 %v5655_v32, %v5537_v24  ;;  %v12049_v24 = vld [vmem:[#allocation2 + $0x170] sm:$0xff] }
 0x514   :  { %8762 = vmatmul.msk.f32.gmra.mxu3 %vm3795_vm2, %v12032_v58 }
 0x515   :  { %8778 = vmatmul.msk.f32.gmra.mxu0 %vm3795_vm2, %v6171_v47 }
 0x516   :  { %v5350_v39 = vpop.f32.mrf.mxu2 }
 0x517   :  { %v5384_v8 = vadd.f32 %v5350_v39, %v5230_v29  ;;  %v5504_v16 = vpop.f32.mrf.mxu3  ;;  %v5199_v33 = vpop.f32.mrf.mxu1 }
 0x518   :  { %v5231_v32 = vadd.f32 %v5199_v33, %v11837_v35  ;;  %v12064_v33 = vld [vmem:[#allocation2 + $0x188] sm:$0xff] }
 0x519   :  { %v5538_v11 = vadd.f32 %v5504_v16, %v5384_v8 }
 0x51a   :  { %v5661_v41 = vpop.f32.mrf.mxu0  ;;  %8731 = vmatmul.msk.f32.gmra.mxu1 %vm3795_vm2, %v5709_v12 }
 0x51b   :  { %8747 = vmatmul.msk.f32.gmra.mxu2 %vm3795_vm2, %v11829_v37  ;;  %v12043_v57 = vadd.f32 %v5658_v51, %v5538_v11  ;;  %v12055_v37 = vld [vmem:[#allocation2 + $0x172] sm:$0xff] }
 0x51c   :  { %8763 = vmatmul.msk.f32.gmra.mxu3 %vm3795_vm2, %v6017_v60  ;;  %v6804_v60 = vld [vmem:[#allocation3 + $0x4f8] sm:$0xff] }
 0x51d   :  { %8779 = vmatmul.msk.f32.gmra.mxu0 %vm3795_vm2, %v11835_v45 }
 0x51e   :  { %v5353_v59 = vpop.f32.mrf.mxu2  ;;  %6861 = vmatpush.msrb.mxu0 %v6804_v60  ;;  %v6646_v60 = vld [vmem:[#allocation3 + $0x498] sm:$0xff] }
 0x51f   :  { %v5385_v22 = vadd.f32 %v5353_v59, %v5231_v32  ;;  %v5507_v27 = vpop.f32.mrf.mxu3  ;;  %v5202_v3 = vpop.f32.mrf.mxu1 }
 0x520   :  { %v5232_v35 = vadd.f32 %v5202_v3, %v11851_v31  ;;  %v6496_v31 = vld [vmem:[#allocation3 + $0x478] sm:$0xff]  ;;  %v6495_v3 = vld [vmem:[#allocation3 + $0x470] sm:$0xff] }
 0x521   :  { %v5539_v34 = vadd.f32 %v5507_v27, %v5385_v22  ;;  %6553 = vmatpush.msrb.mxu2 %v6496_v31 }
 0x522   :  { %v5664_v21 = vpop.f32.mrf.mxu0  ;;  %8732 = vmatmul.msk.f32.gmra.mxu1 %vm3795_vm2, %v12049_v24 }
 0x523   :  { %8748 = vmatmul.msk.f32.gmra.mxu2 %vm3795_vm2, %v11843_v15  ;;  %v12057_v45 = vadd.f32 %v5661_v41, %v5539_v34  ;;  %v12070_v15 = vld [vmem:[#allocation2 + $0x18a] sm:$0xff]  ;;  %v6650_v41 = vld [vmem:[#allocation3 + $0x4b8] sm:$0xff] }
 0x524   :  { %8764 = vmatmul.msk.f32.gmra.mxu3 %vm3795_vm2, %v12055_v37  ;;  %v6649_v34 = vld [vmem:[#allocation3 + $0x4b0] sm:$0xff]  ;;  %6554 = vmatpush.msrb.mxu2 %v6495_v3 }
 0x525   :  { %8780 = vmatmul.msk.f32.gmra.mxu0 %vm3795_vm2, %v11849_v56  ;;  %v6335_v56 = vld [vmem:[#allocation3 + $0x400] sm:$0xff]  ;;  %6707 = vmatpush.msrb.mxu3 %v6650_v41  ;;  %v6492_v41 = vld [vmem:[#allocation3 + $0x458] sm:$0xff]  ;;  %v6645_v3 = vld [vmem:[#allocation3 + $0x490] sm:$0xff] }
 0x526   :  { %v5356_v51 = vpop.f32.mrf.mxu2  ;;  %6406 = vmatpush.msra.mxu1 %v6335_v56  ;;  %v6647_v56 = vld [vmem:[#allocation3 + $0x4a0] sm:$0xff] }
 0x527   :  { %v5386_v47 = vadd.f32 %v5356_v51, %v5232_v35  ;;  %v5510_v29 = vpop.f32.mrf.mxu3  ;;  %v5205_v39 = vpop.f32.mrf.mxu1  ;;  %6708 = vmatpush.msrb.mxu3 %v6649_v34  ;;  %v6494_v35 = vld [vmem:[#allocation3 + $0x468] sm:$0xff] }
 0x528   :  { %v5233_v12 = vadd.f32 %v5205_v39, %v11865_v5  ;;  %v12085_v5 = vld [vmem:[#allocation2 + $0x1a2] sm:$0xff]  ;;  %6555 = vmatpush.msrb.mxu2 %v6494_v35 }
 0x529   :  { %v5540_v8 = vadd.f32 %v5510_v29, %v5386_v47  ;;  %v6648_v51 = vld [vmem:[#allocation3 + $0x4a8] sm:$0xff]  ;;  %v6493_v39 = vld [vmem:[#allocation3 + $0x460] sm:$0xff] }
 0x52a   :  { %v5667_v16 = vpop.f32.mrf.mxu0  ;;  %8733 = vmatmul.msk.f32.gmra.mxu1 %vm3795_vm2, %v12064_v33  ;;  %v6802_v29 = vld [vmem:[#allocation3 + $0x4e8] sm:$0xff]  ;;  %6709 = vmatpush.msrb.mxu3 %v6648_v51  ;;  %v6959_v51 = vld [vmem:[#allocation3 + $0x538] sm:$0xff] }
 0x52b   :  { %8749 = vmatmul.msk.f32.gmra.mxu2 %vm3795_vm2, %v11857_v49  ;;  %v12072_v11 = vadd.f32 %v5664_v21, %v5540_v8  ;;  %v12079_v21 = vld [vmem:[#allocation2 + $0x1a0] sm:$0xff]  ;;  %v6490_v35 = vld [vmem:[#allocation3 + $0x448] sm:$0xff]  ;;  %7016 = vmatpush.msrb.mxu1 %v6959_v51 }
 0x52c   :  { %8765 = vmatmul.msk.f32.gmra.mxu3 %vm3795_vm2, %v12070_v15  ;;  %6556 = vmatpush.msrb.mxu2 %v6493_v39  ;;  %v6644_v39 = vld [vmem:[#allocation3 + $0x488] sm:$0xff] }
 0x52d   :  { %8781 = vmatmul.msk.f32.gmra.mxu0 %vm3795_vm2, %v11863_v61  ;;  %v6803_v61 = vld [vmem:[#allocation3 + $0x4f0] sm:$0xff]  ;;  %6710 = vmatpush.msrb.mxu3 %v6647_v56  ;;  %v6489_v56 = vld [vmem:[#allocation3 + $0x440] sm:$0xff] }
 0x52e   :  { %v5359_v30 = vpop.f32.mrf.mxu2  ;;  %6862 = vmatpush.msrb.mxu0 %v6803_v61  ;;  %6557 = vmatpush.msrb.mxu2 %v6492_v41  ;;  %v6799_v61 = vld [vmem:[#allocation3 + $0x4d0] sm:$0xff] }
 0x52f   :  { %v5387_v49 = vadd.f32 %v5359_v30, %v5233_v12  ;;  %v5513_v32 = vpop.f32.mrf.mxu3  ;;  %v5208_v59 = vpop.f32.mrf.mxu1  ;;  %6711 = vmatpush.msrb.mxu3 %v6646_v60  ;;  %v12115_v60 = vld [vmem:[#allocation2 + $0x1d2] sm:$0xff] }
 0x530   :  { %v5234_v8 = vadd.f32 %v5208_v59, %v11879_v38  ;;  %6863 = vmatpush.msrb.mxu0 %v6802_v29  ;;  %v6800_v38 = vld [vmem:[#allocation3 + $0x4d8] sm:$0xff]  ;;  %v6491_v59 = vld [vmem:[#allocation3 + $0x450] sm:$0xff] }
 0x531   :  { %v5541_v22 = vadd.f32 %v5513_v32, %v5387_v49  ;;  %v12094_v32 = vld [vmem:[#allocation2 + $0x1b8] sm:$0xff]  ;;  %6558 = vmatpush.msrb.mxu2 %v6491_v59  ;;  %6712 = vmatpush.msrb.mxu3 %v6645_v3 }
 0x532   :  { %v5670_v27 = vpop.f32.mrf.mxu0  ;;  %8734 = vmatmul.msk.f32.gmra.mxu1 %vm3795_vm2, %v12079_v21 }
 0x533   :  { %8750 = vmatmul.msk.f32.gmra.mxu2 %vm3795_vm2, %v11871_v19  ;;  %v12087_v47 = vadd.f32 %v5667_v16, %v5541_v22  ;;  %v6801_v19 = vld [vmem:[#allocation3 + $0x4e0] sm:$0xff]  ;;  %6713 = vmatpush.msrb.mxu3 %v6644_v39 }
 0x534   :  { %8766 = vmatmul.msk.f32.gmra.mxu3 %vm3795_vm2, %v12085_v5  ;;  %6864 = vmatpush.msrb.mxu0 %v6801_v19  ;;  %v12100_v22 = vld [vmem:[#allocation2 + $0x1ba] sm:$0xff] }
 0x535   :  { %8782 = vmatmul.msk.f32.gmra.mxu0 %vm3795_vm2, %v11877_v55  ;;  %6559 = vmatpush.msrb.mxu2 %v6490_v35  ;;  %v6643_v19 = vld [vmem:[#allocation3 + $0x480] sm:$0xff] }
 0x536   :  { %v5362_v31 = vpop.f32.mrf.mxu2  ;;  %6865 = vmatpush.msrb.mxu0 %v6800_v38  ;;  %6714 = vmatpush.msrb.mxu3 %v6643_v19 }
 0x537   :  { %v5388_v12 = vadd.f32 %v5362_v31, %v5234_v8  ;;  %v5516_v16 = vpop.f32.mrf.mxu3  ;;  %v5211_v30 = vpop.f32.mrf.mxu1  ;;  %v6798_v8 = vld [vmem:[#allocation3 + $0x4c8] sm:$0xff]  ;;  %6560 = vmatpush.msrb.mxu2 %v6489_v56 }
 0x538   :  { %v5235_v29 = vadd.f32 %v5211_v30, %v11893_v52  ;;  %6866 = vmatpush.msrb.mxu0 %v6799_v61  ;;  %v12109_v52 = vld [vmem:[#allocation2 + $0x1d0] sm:$0xff]  ;;  %v6177_v30 = vld [vmem:[#allocation2 + $0x1e6] sm:$0xff] }
 0x539   :  { %v5542_v49 = vadd.f32 %v5516_v16, %v5388_v12  ;;  %v6797_v16 = vld [vmem:[#allocation3 + $0x4c0] sm:$0xff] }
 0x53a   :  { %v5673_v55 = vpop.f32.mrf.mxu0  ;;  %8735 = vmatmul.msk.f32.gmra.mxu1 %vm3795_vm2, %v12094_v32  ;;  %6867 = vmatpush.msrb.mxu0 %v6798_v8 }
 0x53b   :  { %8751 = vmatmul.msk.f32.gmra.mxu2 %vm3795_vm2, %v11885_v14  ;;  %v12102_v34 = vadd.f32 %v5670_v27, %v5542_v49 }
 0x53c   :  { %8767 = vmatmul.msk.f32.gmra.mxu3 %vm3795_vm2, %v12100_v22  ;;  %6868 = vmatpush.msrb.mxu0 %v6797_v16 }
 0x53d   :  { %8783 = vmatmul.msk.f32.gmra.mxu0 %vm3795_vm2, %v11891_v50 }
 0x53e   :  { %v5365_v14 = vpop.f32.mrf.mxu2 }
 0x53f   :  { %v5389_v27 = vadd.f32 %v5365_v14, %v5235_v29  ;;  %v5519_v31 = vpop.f32.mrf.mxu3  ;;  %v5214_v41 = vpop.f32.mrf.mxu1 }
 0x540   :  { %v5236_v38 = vadd.f32 %v5214_v41, %v11905_v25  ;;  %v6958_v25 = vld [vmem:[#allocation3 + $0x530] sm:$0xff] }
 0x541   :  { %v5543_v50 = vadd.f32 %v5519_v31, %v5389_v27  ;;  %7017 = vmatpush.msrb.mxu1 %v6958_v25  ;;  %v6179_v41 = vld [vmem:[#allocation2 + $0x216] sm:$0xff] }
 0x542   :  { %v5676_v12 = vpop.f32.mrf.mxu0  ;;  %8736 = vmatmul.msk.f32.gmra.mxu1 %vm3795_vm2, %v12109_v52 }
 0x543   :  { %8752 = vmatmul.msk.f32.gmra.mxu2 %vm3795_vm2, %v11899_v23  ;;  %v12117_v49 = vadd.f32 %v5673_v55, %v5543_v50  ;;  %v12123_v23 = vld [vmem:[#allocation2 + $0x1e8] sm:$0xff] }
 0x544   :  { %8768 = vmatmul.msk.f32.gmra.mxu3 %vm3795_vm2, %v12115_v60  ;;  %v12138_v50 = vld [vmem:[#allocation2 + $0x201] sm:$0xff] }
 0x545   :  { %8784 = vmatmul.msk.f32.gmra.mxu0 %vm3795_vm2, %v6177_v30 }
 0x546   :  { %v5368_v59 = vpop.f32.mrf.mxu2 }
 0x547   :  { %v5390_v3 = vadd.f32 %v5368_v59, %v5236_v38  ;;  %v5522_v61 = vpop.f32.mrf.mxu3  ;;  %v5217_v35 = vpop.f32.mrf.mxu1 }
 0x548   :  { %v5237_v39 = vadd.f32 %v5217_v35, %v11922_v17  ;;  %v6626_v35 = vld [vmem:[#allocation2 + $0x51] sm:$0xff] }
 0x549   :  { %v5544_v51 = vadd.f32 %v5522_v61, %v5390_v3  ;;  %v6318_v61 = vld [vmem:[#allocation2 + $0x4f] sm:$0xff] }
 0x54a   :  { %v5679_v29 = vpop.f32.mrf.mxu0  ;;  %8737 = vmatmul.msk.f32.gmra.mxu1 %vm3795_vm2, %v12123_v23 }
 0x54b   :  { %8753 = vmatmul.msk.f32.gmra.mxu2 %vm3795_vm2, %v11912_v2  ;;  %v12129_v55 = vadd.f32 %v5676_v12, %v5544_v51  ;;  %v12136_v2 = vld [vmem:[#allocation2 + $0x200] sm:$0xff] }
 0x54c   :  { %8769 = vmatmul.msk.f32.gmra.mxu3 %vm3795_vm2, %v11914_v9  ;;  %v12144_v9 = vld [vmem:[#allocation2 + $0x202] sm:$0xff] }
 0x54d   :  { %8785 = vmatmul.msk.f32.gmra.mxu0 %vm3795_vm2, %v11920_v44 }
 0x54e   :  { %v5371_v14 = vpop.f32.mrf.mxu2 }
 0x54f   :  { %v5391_v8 = vadd.f32 %v5371_v14, %v5237_v39  ;;  %v5525_v56 = vpop.f32.mrf.mxu3  ;;  %v5220_v27 = vpop.f32.mrf.mxu1 }
 0x550   :  { %v5238_v17 = vadd.f32 %v5220_v27, %v11931_v10  ;;  %v6957_v10 = vld [vmem:[#allocation3 + $0x528] sm:$0xff] }
 0x551   :  { %v5545_v31 = vadd.f32 %v5525_v56, %v5391_v8  ;;  %7018 = vmatpush.msrb.mxu1 %v6957_v10 }
 0x552   :  { %v5682_v19 = vpop.f32.mrf.mxu0  ;;  %8738 = vmatmul.msk.f32.gmra.mxu1 %vm3795_vm2, %v12136_v2 }
 0x553   :  { %8754 = vmatmul.msk.f32.gmra.mxu2 %vm3795_vm2, %v12138_v50  ;;  %v12146_v44 = vadd.f32 %v5679_v29, %v5545_v31  ;;  %v12161_v31 = vld [vmem:[#allocation2 + $0x67] sm:$0xff] }
 0x554   :  { %8770 = vmatmul.msk.f32.gmra.mxu3 %vm3795_vm2, %v12144_v9 }
 0x555   :  { %8786 = vmatmul.msk.f32.gmra.mxu0 %vm3795_vm2, %v6179_v41 }
 0x556   :  { %v5374_v12 = vpop.f32.mrf.mxu2 }
 0x557   :  { %v5392_v16 = vadd.f32 %v5374_v12, %v5238_v17  ;;  %v5528_v30 = vpop.f32.mrf.mxu3  ;;  %v5791_v38 = vpop.f32.mrf.mxu1 }
 0x558   :  { %v5839_v29 = vadd.f32 %v5791_v38, %v11945_v1  ;;  %v12176_v38 = vld [vmem:[#allocation2 + $0x7f] sm:$0xff] }
 0x559   :  { %v5546_v59 = vadd.f32 %v5528_v30, %v5392_v16 }
 0x55a   :  { %v6254_v3 = vpop.f32.mrf.mxu0  ;;  %8787 = vmatmul.msk.f32.vlgmr.msra.gmra.mxu1 %vm3795_vm2, %v6318_v61 }
 0x55b   :  { %8803 = vmatmul.msk.f32.vlgmr.msrb.gmra.mxu2 %vm3795_vm2, %v11937_v42  ;;  %v12155_v51 = vadd.f32 %v5682_v19, %v5546_v59  ;;  %v12167_v42 = vld [vmem:[#allocation2 + $0x69] sm:$0xff] }
 0x55c   :  { %8819 = vmatmul.msk.f32.vlgmr.msrb.gmra.mxu3 %vm3795_vm2, %v6626_v35 }
 0x55d   :  { %8835 = vmatmul.msk.f32.vlgmr.msrb.gmra.mxu0 %vm3795_vm2, %v11943_v18 }
 0x55e   :  { %v5945_v25 = vpop.f32.mrf.mxu2 }
 0x55f   :  { %v5993_v39 = vadd.f32 %v5945_v25, %v5839_v29  ;;  %v6099_v14 = vpop.f32.mrf.mxu3  ;;  %v5794_v8 = vpop.f32.mrf.mxu1  ;;  %v12191_v25 = vld [vmem:[#allocation2 + $0x97] sm:$0xff] }
 0x560   :  { %v5840_v1 = vadd.f32 %v5794_v8, %v11960_v62 }
 0x561   :  { %v6147_v56 = vadd.f32 %v6099_v14, %v5993_v39  ;;  %v12197_v39 = vld [vmem:[#allocation2 + $0x99] sm:$0xff] }
 0x562   :  { %v6257_v27 = vpop.f32.mrf.mxu0  ;;  %8788 = vmatmul.msk.f32.gmra.mxu1 %vm3795_vm2, %v12161_v31 }
 0x563   :  { %8804 = vmatmul.msk.f32.gmra.mxu2 %vm3795_vm2, %v11952_v26  ;;  %v12169_v18 = vadd.f32 %v6254_v3, %v6147_v56  ;;  %v12182_v26 = vld [vmem:[#allocation2 + $0x81] sm:$0xff] }
 0x564   :  { %8820 = vmatmul.msk.f32.gmra.mxu3 %vm3795_vm2, %v12167_v42 }
 0x565   :  { %8836 = vmatmul.msk.f32.gmra.mxu0 %vm3795_vm2, %v11958_v40  ;;  %v6956_v40 = vld [vmem:[#allocation3 + $0x520] sm:$0xff] }
 0x566   :  { %v5948_v19 = vpop.f32.mrf.mxu2  ;;  %7019 = vmatpush.msrb.mxu1 %v6956_v40 }
 0x567   :  { %v5994_v41 = vadd.f32 %v5948_v19, %v5840_v1  ;;  %v6102_v17 = vpop.f32.mrf.mxu3  ;;  %v5797_v12 = vpop.f32.mrf.mxu1 }
 0x568   :  { %v5841_v62 = vadd.f32 %v5797_v12, %v11975_v46 }
 0x569   :  { %v6148_v16 = vadd.f32 %v6102_v17, %v5994_v41  ;;  %v12206_v41 = vld [vmem:[#allocation2 + $0xaf] sm:$0xff] }
 0x56a   :  { %v6260_v30 = vpop.f32.mrf.mxu0  ;;  %8789 = vmatmul.msk.f32.gmra.mxu1 %vm3795_vm2, %v12176_v38 }
 0x56b   :  { %8805 = vmatmul.msk.f32.gmra.mxu2 %vm3795_vm2, %v11967_v36  ;;  %v12184_v59 = vadd.f32 %v6257_v27, %v6148_v16 }
 0x56c   :  { %8821 = vmatmul.msk.f32.gmra.mxu3 %vm3795_vm2, %v12182_v26 }
 0x56d   :  { %8837 = vmatmul.msk.f32.gmra.mxu0 %vm3795_vm2, %v11973_v43 }
 0x56e   :  { %v5951_v3 = vpop.f32.mrf.mxu2 }
 0x56f   :  { %v5995_v61 = vadd.f32 %v5951_v3, %v5841_v62  ;;  %v6105_v35 = vpop.f32.mrf.mxu3  ;;  %v5800_v10 = vpop.f32.mrf.mxu1  ;;  %v12221_v3 = vld [vmem:[#allocation2 + $0xc7] sm:$0xff] }
 0x570   :  { %v5842_v46 = vadd.f32 %v5800_v10, %v11990_v20 }
 0x571   :  { %v6149_v29 = vadd.f32 %v6105_v35, %v5995_v61  ;;  %v12227_v61 = vld [vmem:[#allocation2 + $0xc9] sm:$0xff] }
 0x572   :  { %v6263_v36 = vpop.f32.mrf.mxu0  ;;  %8790 = vmatmul.msk.f32.gmra.mxu1 %vm3795_vm2, %v12191_v25 }
 0x573   :  { %8806 = vmatmul.msk.f32.gmra.mxu2 %vm3795_vm2, %v11982_v7  ;;  %v12199_v43 = vadd.f32 %v6260_v30, %v6149_v29  ;;  %v12212_v7 = vld [vmem:[#allocation2 + $0xb1] sm:$0xff] }
 0x574   :  { %8822 = vmatmul.msk.f32.gmra.mxu3 %vm3795_vm2, %v12197_v39 }
 0x575   :  { %8838 = vmatmul.msk.f32.gmra.mxu0 %vm3795_vm2, %v11988_v48  ;;  %v6955_v48 = vld [vmem:[#allocation3 + $0x518] sm:$0xff] }
 0x576   :  { %v5954_v14 = vpop.f32.mrf.mxu2  ;;  %7020 = vmatpush.msrb.mxu1 %v6955_v48 }
 0x577   :  { %v5996_v8 = vadd.f32 %v5954_v14, %v5842_v46  ;;  %v6108_v56 = vpop.f32.mrf.mxu3  ;;  %v5803_v27 = vpop.f32.mrf.mxu1 }
 0x578   :  { %v5843_v20 = vadd.f32 %v5803_v27, %v12005_v6 }
 0x579   :  { %v6150_v1 = vadd.f32 %v6108_v56, %v5996_v8  ;;  %v12235_v56 = vld [vmem:[#allocation2 + $0xdf] sm:$0xff] }
 0x57a   :  { %v6266_v19 = vpop.f32.mrf.mxu0  ;;  %8791 = vmatmul.msk.f32.gmra.mxu1 %vm3795_vm2, %v12206_v41 }
 0x57b   :  { %8807 = vmatmul.msk.f32.gmra.mxu2 %vm3795_vm2, %v11997_v54  ;;  %v12214_v17 = vadd.f32 %v6263_v36, %v6150_v1 }
 0x57c   :  { %8823 = vmatmul.msk.f32.gmra.mxu3 %vm3795_vm2, %v12212_v7 }
 0x57d   :  { %8839 = vmatmul.msk.f32.gmra.mxu0 %vm3795_vm2, %v12003_v28  ;;  %v6785_v28 = vld [vmem:[#allocation2 + $0xca] sm:$0xff] }
 0x57e   :  { %v5957_v12 = vpop.f32.mrf.mxu2 }
 0x57f   :  { %v5997_v16 = vadd.f32 %v5957_v12, %v5843_v20  ;;  %v6111_v30 = vpop.f32.mrf.mxu3  ;;  %v5806_v40 = vpop.f32.mrf.mxu1  ;;  %v12248_v12 = vld [vmem:[#allocation2 + $0xf7] sm:$0xff] }
 0x580   :  { %v5844_v6 = vadd.f32 %v5806_v40, %v12017_v13  ;;  %v6954_v13 = vld [vmem:[#allocation3 + $0x510] sm:$0xff]  ;;  %v12252_v40 = vld [vmem:[#allocation2 + $0xf9] sm:$0xff] }
 0x581   :  { %v6151_v62 = vadd.f32 %v6111_v30, %v5997_v16  ;;  %7021 = vmatpush.msrb.mxu1 %v6954_v13  ;;  %v12250_v16 = vld [vmem:[#allocation2 + $0xf8] sm:$0xff] }
 0x582   :  { %v6269_v54 = vpop.f32.mrf.mxu0  ;;  %8792 = vmatmul.msk.f32.gmra.mxu1 %vm3795_vm2, %v12221_v3 }
 0x583   :  { %8808 = vmatmul.msk.f32.gmra.mxu2 %vm3795_vm2, %v12011_v63  ;;  %v12229_v35 = vadd.f32 %v6266_v19, %v6151_v62 }
 0x584   :  { %8824 = vmatmul.msk.f32.gmra.mxu3 %vm3795_vm2, %v12227_v61 }
 0x585   :  { %8840 = vmatmul.msk.f32.gmra.mxu0 %vm3795_vm2, %v6785_v28 }
 0x586   :  { %v5960_v10 = vpop.f32.mrf.mxu2 }
 0x587   :  { %v5998_v29 = vadd.f32 %v5960_v10, %v5844_v6  ;;  %v6114_v36 = vpop.f32.mrf.mxu3  ;;  %v5809_v46 = vpop.f32.mrf.mxu1 }
 0x588   :  { %v5845_v27 = vadd.f32 %v5809_v46, %v12034_v53  ;;  %v6634_v46 = vld [vmem:[#allocation2 + $0x171] sm:$0xff] }
 0x589   :  { %v6152_v14 = vadd.f32 %v6114_v36, %v5998_v29  ;;  %v6326_v36 = vld [vmem:[#allocation2 + $0x16f] sm:$0xff] }
 0x58a   :  { %v6272_v8 = vpop.f32.mrf.mxu0  ;;  %8793 = vmatmul.msk.f32.gmra.mxu1 %vm3795_vm2, %v12235_v56 }
 0x58b   :  { %8809 = vmatmul.msk.f32.gmra.mxu2 %vm3795_vm2, %v12024_v4  ;;  %v12241_v63 = vadd.f32 %v6269_v54, %v6152_v14 }
 0x58c   :  { %8825 = vmatmul.msk.f32.gmra.mxu3 %vm3795_vm2, %v12026_v0  ;;  %v6787_v0 = vld [vmem:[#allocation2 + $0xfa] sm:$0xff] }
 0x58d   :  { %8841 = vmatmul.msk.f32.gmra.mxu0 %vm3795_vm2, %v12032_v58 }
 0x58e   :  { %v5963_v1 = vpop.f32.mrf.mxu2 }
 0x58f   :  { %v5999_v19 = vadd.f32 %v5963_v1, %v5845_v27  ;;  %v6117_v48 = vpop.f32.mrf.mxu3  ;;  %v5812_v20 = vpop.f32.mrf.mxu1 }
 0x590   :  { %v5846_v53 = vadd.f32 %v5812_v20, %v12043_v57  ;;  %v6953_v57 = vld [vmem:[#allocation3 + $0x508] sm:$0xff] }
 0x591   :  { %v6153_v4 = vadd.f32 %v6117_v48, %v5999_v19  ;;  %7022 = vmatpush.msrb.mxu1 %v6953_v57 }
 0x592   :  { %v6275_v30 = vpop.f32.mrf.mxu0  ;;  %8794 = vmatmul.msk.f32.gmra.mxu1 %vm3795_vm2, %v12248_v12 }
 0x593   :  { %8810 = vmatmul.msk.f32.gmra.mxu2 %vm3795_vm2, %v12250_v16  ;;  %v12258_v58 = vadd.f32 %v6272_v8, %v6153_v4  ;;  %v12273_v4 = vld [vmem:[#allocation2 + $0x187] sm:$0xff] }
 0x594   :  { %8826 = vmatmul.msk.f32.gmra.mxu3 %vm3795_vm2, %v12252_v40 }
 0x595   :  { %8842 = vmatmul.msk.f32.gmra.mxu0 %vm3795_vm2, %v6787_v0 }
 0x596   :  { %v5966_v62 = vpop.f32.mrf.mxu2 }
 0x597   :  { %v6000_v54 = vadd.f32 %v5966_v62, %v5846_v53  ;;  %v6120_v28 = vpop.f32.mrf.mxu3  ;;  %v5815_v6 = vpop.f32.mrf.mxu1 }
 0x598   :  { %v5847_v8 = vadd.f32 %v5815_v6, %v12057_v45  ;;  %v12288_v6 = vld [vmem:[#allocation2 + $0x19f] sm:$0xff] }
 0x599   :  { %v6154_v10 = vadd.f32 %v6120_v28, %v6000_v54 }
 0x59a   :  { %v6278_v29 = vpop.f32.mrf.mxu0  ;;  %8795 = vmatmul.msk.f32.gmra.mxu1 %vm3795_vm2, %v6326_v36 }
 0x59b   :  { %8811 = vmatmul.msk.f32.gmra.mxu2 %vm3795_vm2, %v12049_v24  ;;  %v12267_v14 = vadd.f32 %v6275_v30, %v6154_v10  ;;  %v12279_v24 = vld [vmem:[#allocation2 + $0x189] sm:$0xff] }
 0x59c   :  { %8827 = vmatmul.msk.f32.gmra.mxu3 %vm3795_vm2, %v6634_v46  ;;  %v7421_v46 = vld [vmem:[#allocation3 + $0x5f8] sm:$0xff] }
 0x59d   :  { %8843 = vmatmul.msk.f32.gmra.mxu0 %vm3795_vm2, %v12055_v37 }
 0x59e   :  { %v5969_v13 = vpop.f32.mrf.mxu2  ;;  %7478 = vmatpush.msra.mxu0 %v7421_v46  ;;  %v7263_v46 = vld [vmem:[#allocation3 + $0x598] sm:$0xff] }
 0x59f   :  { %v6001_v27 = vadd.f32 %v5969_v13, %v5847_v8  ;;  %v6123_v1 = vpop.f32.mrf.mxu3  ;;  %v5818_v19 = vpop.f32.mrf.mxu1 }
 0x5a0   :  { %v5848_v45 = vadd.f32 %v5818_v19, %v12072_v11  ;;  %v7113_v11 = vld [vmem:[#allocation3 + $0x578] sm:$0xff]  ;;  %v7112_v19 = vld [vmem:[#allocation3 + $0x570] sm:$0xff] }
 0x5a1   :  { %v6155_v48 = vadd.f32 %v6123_v1, %v6001_v27  ;;  %7170 = vmatpush.msra.mxu2 %v7113_v11 }
 0x5a2   :  { %v6281_v20 = vpop.f32.mrf.mxu0  ;;  %8796 = vmatmul.msk.f32.gmra.mxu1 %vm3795_vm2, %v12273_v4 }
 0x5a3   :  { %8812 = vmatmul.msk.f32.gmra.mxu2 %vm3795_vm2, %v12064_v33  ;;  %v12281_v37 = vadd.f32 %v6278_v29, %v6155_v48  ;;  %v12294_v33 = vld [vmem:[#allocation2 + $0x1a1] sm:$0xff]  ;;  %v7267_v29 = vld [vmem:[#allocation3 + $0x5b8] sm:$0xff]  ;;  %v7266_v48 = vld [vmem:[#allocation3 + $0x5b0] sm:$0xff] }
 0x5a4   :  { %8828 = vmatmul.msk.f32.gmra.mxu3 %vm3795_vm2, %v12279_v24  ;;  %7171 = vmatpush.msra.mxu2 %v7112_v19  ;;  %v7262_v19 = vld [vmem:[#allocation3 + $0x590] sm:$0xff] }
 0x5a5   :  { %8844 = vmatmul.msk.f32.gmra.mxu0 %vm3795_vm2, %v12070_v15  ;;  %v6952_v15 = vld [vmem:[#allocation3 + $0x500] sm:$0xff]  ;;  %7324 = vmatpush.msra.mxu3 %v7267_v29  ;;  %v7109_v29 = vld [vmem:[#allocation3 + $0x558] sm:$0xff] }
 0x5a6   :  { %v5972_v30 = vpop.f32.mrf.mxu2  ;;  %7023 = vmatpush.msrb.mxu1 %v6952_v15  ;;  %v7264_v15 = vld [vmem:[#allocation3 + $0x5a0] sm:$0xff] }
 0x5a7   :  { %v6002_v0 = vadd.f32 %v5972_v30, %v5848_v45  ;;  %v6126_v53 = vpop.f32.mrf.mxu3  ;;  %v5821_v62 = vpop.f32.mrf.mxu1  ;;  %7325 = vmatpush.msra.mxu3 %v7266_v48  ;;  %v7111_v45 = vld [vmem:[#allocation3 + $0x568] sm:$0xff] }
 0x5a8   :  { %v5849_v36 = vadd.f32 %v5821_v62, %v12087_v47  ;;  %v12309_v47 = vld [vmem:[#allocation2 + $0x1b9] sm:$0xff]  ;;  %v7265_v30 = vld [vmem:[#allocation3 + $0x5a8] sm:$0xff]  ;;  %7172 = vmatpush.msra.mxu2 %v7111_v45 }
 0x5a9   :  { %v6156_v54 = vadd.f32 %v6126_v53, %v6002_v0  ;;  %v7419_v53 = vld [vmem:[#allocation3 + $0x5e8] sm:$0xff]  ;;  %v7110_v62 = vld [vmem:[#allocation3 + $0x560] sm:$0xff]  ;;  %7326 = vmatpush.msra.mxu3 %v7265_v30  ;;  %v7575_v30 = vld [vmem:[#allocation3 + $0x638] sm:$0xff] }
 0x5aa   :  { %v6284_v28 = vpop.f32.mrf.mxu0  ;;  %8797 = vmatmul.msk.f32.gmra.mxu1 %vm3795_vm2, %v12288_v6  ;;  %7173 = vmatpush.msra.mxu2 %v7110_v62  ;;  %v7107_v45 = vld [vmem:[#allocation3 + $0x548] sm:$0xff] }
 0x5ab   :  { %8813 = vmatmul.msk.f32.gmra.mxu2 %vm3795_vm2, %v12079_v21  ;;  %v12296_v10 = vadd.f32 %v6281_v20, %v6156_v54  ;;  %v12303_v20 = vld [vmem:[#allocation2 + $0x1b7] sm:$0xff]  ;;  %7327 = vmatpush.msra.mxu3 %v7264_v15  ;;  %v7261_v62 = vld [vmem:[#allocation3 + $0x588] sm:$0xff]  ;;  %v7106_v15 = vld [vmem:[#allocation3 + $0x540] sm:$0xff] }
 0x5ac   :  { %8829 = vmatmul.msk.f32.gmra.mxu3 %vm3795_vm2, %v12294_v33  ;;  %7174 = vmatpush.msra.mxu2 %v7109_v29 }
 0x5ad   :  { %8845 = vmatmul.msk.f32.gmra.mxu0 %vm3795_vm2, %v12085_v5  ;;  %v7420_v5 = vld [vmem:[#allocation3 + $0x5f0] sm:$0xff]  ;;  %7328 = vmatpush.msra.mxu3 %v7263_v46 }
 0x5ae   :  { %v5975_v57 = vpop.f32.mrf.mxu2  ;;  %7479 = vmatpush.msra.mxu0 %v7420_v5  ;;  %v7416_v5 = vld [vmem:[#allocation3 + $0x5d0] sm:$0xff]  ;;  %7632 = vmatpush.msra.mxu1 %v7575_v30 }
 0x5af   :  { %v6003_v21 = vadd.f32 %v5975_v57, %v5849_v36  ;;  %v6129_v8 = vpop.f32.mrf.mxu3  ;;  %v5824_v13 = vpop.f32.mrf.mxu1  ;;  %7329 = vmatpush.msra.mxu3 %v7262_v19  ;;  %v12339_v46 = vld [vmem:[#allocation2 + $0x1e9] sm:$0xff] }
 0x5b0   :  { %v5850_v54 = vadd.f32 %v5824_v13, %v12102_v34  ;;  %7480 = vmatpush.msra.mxu0 %v7419_v53  ;;  %v7417_v34 = vld [vmem:[#allocation3 + $0x5d8] sm:$0xff]  ;;  %v7108_v13 = vld [vmem:[#allocation3 + $0x550] sm:$0xff] }
 0x5b1   :  { %v6157_v27 = vadd.f32 %v6129_v8, %v6003_v21  ;;  %v12318_v8 = vld [vmem:[#allocation2 + $0x1cf] sm:$0xff]  ;;  %7175 = vmatpush.msra.mxu2 %v7108_v13  ;;  %7330 = vmatpush.msra.mxu3 %v7261_v62 }
 0x5b2   :  { %v6287_v1 = vpop.f32.mrf.mxu0  ;;  %8798 = vmatmul.msk.f32.gmra.mxu1 %vm3795_vm2, %v12303_v20 }
 0x5b3   :  { %8814 = vmatmul.msk.f32.gmra.mxu2 %vm3795_vm2, %v12094_v32  ;;  %v12311_v0 = vadd.f32 %v6284_v28, %v6157_v27  ;;  %v7418_v32 = vld [vmem:[#allocation3 + $0x5e0] sm:$0xff]  ;;  %v12324_v27 = vld [vmem:[#allocation2 + $0x1d1] sm:$0xff] }
 0x5b4   :  { %8830 = vmatmul.msk.f32.gmra.mxu3 %vm3795_vm2, %v12309_v47  ;;  %7481 = vmatpush.msra.mxu0 %v7418_v32  ;;  %v7260_v32 = vld [vmem:[#allocation3 + $0x580] sm:$0xff] }
 0x5b5   :  { %8846 = vmatmul.msk.f32.gmra.mxu0 %vm3795_vm2, %v12100_v22  ;;  %7176 = vmatpush.msra.mxu2 %v7107_v45 }
 0x5b6   :  { %v5978_v11 = vpop.f32.mrf.mxu2  ;;  %7482 = vmatpush.msra.mxu0 %v7417_v34  ;;  %7331 = vmatpush.msra.mxu3 %v7260_v32  ;;  %v12365_v32 = vld [vmem:[#allocation2 + $0x218] sm:$0xff] }
 0x5b7   :  { %v6004_v36 = vadd.f32 %v5978_v11, %v5850_v54  ;;  %v6132_v28 = vpop.f32.mrf.mxu3  ;;  %v5827_v57 = vpop.f32.mrf.mxu1  ;;  %v7415_v54 = vld [vmem:[#allocation3 + $0x5c8] sm:$0xff]  ;;  %7177 = vmatpush.msra.mxu2 %v7106_v15 }
 0x5b8   :  { %v5851_v53 = vadd.f32 %v5827_v57, %v12117_v49  ;;  %7483 = vmatpush.msra.mxu0 %v7416_v5  ;;  %v12333_v49 = vld [vmem:[#allocation2 + $0x1e7] sm:$0xff] }
 0x5b9   :  { %v6158_v21 = vadd.f32 %v6132_v28, %v6004_v36  ;;  %v7414_v28 = vld [vmem:[#allocation3 + $0x5c0] sm:$0xff]  ;;  %v12341_v57 = vld [vmem:[#allocation2 + $0x1ea] sm:$0xff] }
 0x5ba   :  { %v6290_v22 = vpop.f32.mrf.mxu0  ;;  %8799 = vmatmul.msk.f32.gmra.mxu1 %vm3795_vm2, %v12318_v8  ;;  %7484 = vmatpush.msra.mxu0 %v7415_v54 }
 0x5bb   :  { %8815 = vmatmul.msk.f32.gmra.mxu2 %vm3795_vm2, %v12109_v52  ;;  %v12326_v48 = vadd.f32 %v6287_v1, %v6158_v21 }
 0x5bc   :  { %8831 = vmatmul.msk.f32.gmra.mxu3 %vm3795_vm2, %v12324_v27  ;;  %7485 = vmatpush.msra.mxu0 %v7414_v28 }
 0x5bd   :  { %8847 = vmatmul.msk.f32.gmra.mxu0 %vm3795_vm2, %v12115_v60 }
 0x5be   :  { %v5981_v52 = vpop.f32.mrf.mxu2 }
 0x5bf   :  { %v6005_v1 = vadd.f32 %v5981_v52, %v5851_v53  ;;  %v6135_v11 = vpop.f32.mrf.mxu3  ;;  %v5830_v29 = vpop.f32.mrf.mxu1  ;;  %v12350_v53 = vld [vmem:[#allocation2 + $0x1ff] sm:$0xff] }
 0x5c0   :  { %v5852_v34 = vadd.f32 %v5830_v29, %v12129_v55  ;;  %v7574_v55 = vld [vmem:[#allocation3 + $0x630] sm:$0xff] }
 0x5c1   :  { %v6159_v60 = vadd.f32 %v6135_v11, %v6005_v1  ;;  %7633 = vmatpush.msra.mxu1 %v7574_v55  ;;  %v12363_v11 = vld [vmem:[#allocation2 + $0x217] sm:$0xff] }
 0x5c2   :  { %v6293_v36 = vpop.f32.mrf.mxu0  ;;  %8800 = vmatmul.msk.f32.gmra.mxu1 %vm3795_vm2, %v12333_v49 }
 0x5c3   :  { %8816 = vmatmul.msk.f32.gmra.mxu2 %vm3795_vm2, %v12123_v23  ;;  %v12343_v21 = vadd.f32 %v6290_v22, %v6159_v60  ;;  %v12367_v60 = vld [vmem:[#allocation2 + $0x219] sm:$0xff] }
 0x5c4   :  { %8832 = vmatmul.msk.f32.gmra.mxu3 %vm3795_vm2, %v12339_v46 }
 0x5c5   :  { %8848 = vmatmul.msk.f32.gmra.mxu0 %vm3795_vm2, %v12341_v57 }
 0x5c6   :  { %v5984_v13 = vpop.f32.mrf.mxu2 }
 0x5c7   :  { %v6006_v19 = vadd.f32 %v5984_v13, %v5852_v34  ;;  %v6138_v5 = vpop.f32.mrf.mxu3  ;;  %v5833_v45 = vpop.f32.mrf.mxu1 }
 0x5c8   :  { %v5853_v62 = vadd.f32 %v5833_v45, %v12146_v44  ;;  %v6935_v45 = vld [vmem:[#allocation2 + $0x66] sm:$0xff] }
 0x5c9   :  { %v6160_v23 = vadd.f32 %v6138_v5, %v6006_v19 }
 0x5ca   :  { %v6296_v30 = vpop.f32.mrf.mxu0  ;;  %8801 = vmatmul.msk.f32.gmra.mxu1 %vm3795_vm2, %v12350_v53 }
 0x5cb   :  { %8817 = vmatmul.msk.f32.gmra.mxu2 %vm3795_vm2, %v12136_v2  ;;  %v12356_v22 = vadd.f32 %v6293_v36, %v6160_v23  ;;  %v7243_v23 = vld [vmem:[#allocation2 + $0x68] sm:$0xff] }
 0x5cc   :  { %8833 = vmatmul.msk.f32.gmra.mxu3 %vm3795_vm2, %v12138_v50  ;;  %v12369_v50 = vld [vmem:[#allocation2 + $0x21a] sm:$0xff] }
 0x5cd   :  { %8849 = vmatmul.msk.f32.gmra.mxu0 %vm3795_vm2, %v12144_v9 }
 0x5ce   :  { %v5987_v52 = vpop.f32.mrf.mxu2 }
 0x5cf   :  { %v6007_v54 = vadd.f32 %v5987_v52, %v5853_v62  ;;  %v6141_v15 = vpop.f32.mrf.mxu3  ;;  %v5836_v1 = vpop.f32.mrf.mxu1 }
 0x5d0   :  { %v5854_v44 = vadd.f32 %v5836_v1, %v12155_v51  ;;  %v7573_v51 = vld [vmem:[#allocation3 + $0x628] sm:$0xff] }
 0x5d1   :  { %v6161_v2 = vadd.f32 %v6141_v15, %v6007_v54  ;;  %7634 = vmatpush.msra.mxu1 %v7573_v51 }
 0x5d2   :  { %v6299_v29 = vpop.f32.mrf.mxu0  ;;  %8802 = vmatmul.msk.f32.gmra.mxu1 %vm3795_vm2, %v12363_v11 }
 0x5d3   :  { %8818 = vmatmul.msk.f32.gmra.mxu2 %vm3795_vm2, %v12365_v32  ;;  %v12375_v9 = vadd.f32 %v6296_v30, %v6161_v2 }
 0x5d4   :  { %8834 = vmatmul.msk.f32.gmra.mxu3 %vm3795_vm2, %v12367_v60 }
 0x5d5   :  { %8850 = vmatmul.msk.f32.gmra.mxu0 %vm3795_vm2, %v12369_v50 }
 0x5d6   :  { %v5990_v36 = vpop.f32.mrf.mxu2 }
 0x5d7   :  { %v6008_v28 = vadd.f32 %v5990_v36, %v5854_v44  ;;  %v6144_v34 = vpop.f32.mrf.mxu3  ;;  %v6408_v13 = vpop.f32.mrf.mxu1  ;;  %v6936_v44 = vld [vmem:[#allocation2 + $0x7e] sm:$0xff] }
 0x5d8   :  { %v6456_v55 = vadd.f32 %v6408_v13, %v12169_v18 }
 0x5d9   :  { %v6162_v19 = vadd.f32 %v6144_v34, %v6008_v28 }
 0x5da   :  { %v6870_v5 = vpop.f32.mrf.mxu0  ;;  %8851 = vmatmul.msk.f32.vlgmr.msrb.gmra.mxu1 %vm3795_vm2, %v6935_v45  ;;  %v6937_v45 = vld [vmem:[#allocation2 + $0x96] sm:$0xff] }
 0x5db   :  { %8867 = vmatmul.msk.f32.vlgmr.msra.gmra.mxu2 %vm3795_vm2, %v12161_v31  ;;  %v12385_v30 = vadd.f32 %v6299_v29, %v6162_v19  ;;  %v7244_v31 = vld [vmem:[#allocation2 + $0x80] sm:$0xff] }
 0x5dc   :  { %8883 = vmatmul.msk.f32.vlgmr.msra.gmra.mxu3 %vm3795_vm2, %v7243_v23 }
 0x5dd   :  { %8899 = vmatmul.msk.f32.vlgmr.msra.gmra.mxu0 %vm3795_vm2, %v12167_v42 }
 0x5de   :  { %v6562_v62 = vpop.f32.mrf.mxu2 }
 0x5df   :  { %v6610_v52 = vadd.f32 %v6562_v62, %v6456_v55  ;;  %v6716_v54 = vpop.f32.mrf.mxu3  ;;  %v6411_v15 = vpop.f32.mrf.mxu1 }
 0x5e0   :  { %v6457_v42 = vadd.f32 %v6411_v15, %v12184_v59  ;;  %v6938_v15 = vld [vmem:[#allocation2 + $0xae] sm:$0xff] }
 0x5e1   :  { %v6764_v1 = vadd.f32 %v6716_v54, %v6610_v52 }
 0x5e2   :  { %v6873_v2 = vpop.f32.mrf.mxu0  ;;  %8852 = vmatmul.msk.f32.gmra.mxu1 %vm3795_vm2, %v6936_v44 }
 0x5e3   :  { %8868 = vmatmul.msk.f32.gmra.mxu2 %vm3795_vm2, %v12176_v38  ;;  %v12394_v29 = vadd.f32 %v6870_v5, %v6764_v1  ;;  %v7245_v38 = vld [vmem:[#allocation2 + $0x98] sm:$0xff] }
 0x5e4   :  { %8884 = vmatmul.msk.f32.gmra.mxu3 %vm3795_vm2, %v7244_v31 }
 0x5e5   :  { %8900 = vmatmul.msk.f32.gmra.mxu0 %vm3795_vm2, %v12182_v26  ;;  %v7572_v26 = vld [vmem:[#allocation3 + $0x620] sm:$0xff] }
 0x5e6   :  { %v6565_v18 = vpop.f32.mrf.mxu2  ;;  %7635 = vmatpush.msra.mxu1 %v7572_v26 }
 0x5e7   :  { %v6611_v36 = vadd.f32 %v6565_v18, %v6457_v42  ;;  %v6719_v28 = vpop.f32.mrf.mxu3  ;;  %v6414_v34 = vpop.f32.mrf.mxu1 }
 0x5e8   :  { %v6458_v59 = vadd.f32 %v6414_v34, %v12199_v43 }
 0x5e9   :  { %v6765_v13 = vadd.f32 %v6719_v28, %v6611_v36  ;;  %v6939_v36 = vld [vmem:[#allocation2 + $0xc6] sm:$0xff] }
 0x5ea   :  { %v6876_v19 = vpop.f32.mrf.mxu0  ;;  %8853 = vmatmul.msk.f32.gmra.mxu1 %vm3795_vm2, %v6937_v45 }
 0x5eb   :  { %8869 = vmatmul.msk.f32.gmra.mxu2 %vm3795_vm2, %v12191_v25  ;;  %v12403_v5 = vadd.f32 %v6873_v2, %v6765_v13  ;;  %v7246_v25 = vld [vmem:[#allocation2 + $0xb0] sm:$0xff] }
 0x5ec   :  { %8885 = vmatmul.msk.f32.gmra.mxu3 %vm3795_vm2, %v7245_v38 }
 0x5ed   :  { %8901 = vmatmul.msk.f32.gmra.mxu0 %vm3795_vm2, %v12197_v39 }
 0x5ee   :  { %v6568_v23 = vpop.f32.mrf.mxu2 }
 0x5ef   :  { %v6612_v51 = vadd.f32 %v6568_v23, %v6458_v59  ;;  %v6722_v55 = vpop.f32.mrf.mxu3  ;;  %v6417_v62 = vpop.f32.mrf.mxu1  ;;  %v6940_v59 = vld [vmem:[#allocation2 + $0xde] sm:$0xff] }
 0x5f0   :  { %v6459_v39 = vadd.f32 %v6417_v62, %v12214_v17  ;;  %v7402_v23 = vld [vmem:[#allocation2 + $0xe1] sm:$0xff] }
 0x5f1   :  { %v6766_v52 = vadd.f32 %v6722_v55, %v6612_v51 }
 0x5f2   :  { %v6879_v54 = vpop.f32.mrf.mxu0  ;;  %8854 = vmatmul.msk.f32.gmra.mxu1 %vm3795_vm2, %v6938_v15 }
 0x5f3   :  { %8870 = vmatmul.msk.f32.gmra.mxu2 %vm3795_vm2, %v12206_v41  ;;  %v12412_v1 = vadd.f32 %v6876_v19, %v6766_v52  ;;  %v7247_v41 = vld [vmem:[#allocation2 + $0xc8] sm:$0xff] }
 0x5f4   :  { %8886 = vmatmul.msk.f32.gmra.mxu3 %vm3795_vm2, %v7246_v25 }
 0x5f5   :  { %8902 = vmatmul.msk.f32.gmra.mxu0 %vm3795_vm2, %v12212_v7  ;;  %v7571_v7 = vld [vmem:[#allocation3 + $0x618] sm:$0xff] }
 0x5f6   :  { %v6571_v43 = vpop.f32.mrf.mxu2  ;;  %7636 = vmatpush.msra.mxu1 %v7571_v7  ;;  %v7404_v7 = vld [vmem:[#allocation2 + $0x111] sm:$0xff] }
 0x5f7   :  { %v6613_v2 = vadd.f32 %v6571_v43, %v6459_v39  ;;  %v6725_v44 = vpop.f32.mrf.mxu3  ;;  %v6420_v31 = vpop.f32.mrf.mxu1 }
 0x5f8   :  { %v6460_v17 = vadd.f32 %v6420_v31, %v12229_v35 }
 0x5f9   :  { %v6767_v42 = vadd.f32 %v6725_v44, %v6613_v2 }
 0x5fa   :  { %v6882_v18 = vpop.f32.mrf.mxu0  ;;  %8855 = vmatmul.msk.f32.gmra.mxu1 %vm3795_vm2, %v6939_v36 }
 0x5fb   :  { %8871 = vmatmul.msk.f32.gmra.mxu2 %vm3795_vm2, %v12221_v3  ;;  %v12421_v28 = vadd.f32 %v6879_v54, %v6767_v42  ;;  %v7248_v3 = vld [vmem:[#allocation2 + $0xe0] sm:$0xff]  ;;  %v6941_v54 = vld [vmem:[#allocation2 + $0xf6] sm:$0xff]  ;;  %v6942_v42 = vld [vmem:[#allocation2 + $0x10e] sm:$0xff] }
 0x5fc   :  { %8887 = vmatmul.msk.f32.gmra.mxu3 %vm3795_vm2, %v7247_v41  ;;  %v7250_v41 = vld [vmem:[#allocation2 + $0x110] sm:$0xff] }
 0x5fd   :  { %8903 = vmatmul.msk.f32.gmra.mxu0 %vm3795_vm2, %v12227_v61 }
 0x5fe   :  { %v6574_v34 = vpop.f32.mrf.mxu2 }
 0x5ff   :  { %v6614_v13 = vadd.f32 %v6574_v34, %v6460_v17  ;;  %v6728_v19 = vpop.f32.mrf.mxu3  ;;  %v6423_v45 = vpop.f32.mrf.mxu1 }
 0x600   :  { %v6461_v61 = vadd.f32 %v6423_v45, %v12241_v63  ;;  %v7570_v63 = vld [vmem:[#allocation3 + $0x610] sm:$0xff] }
 0x601   :  { %v6768_v38 = vadd.f32 %v6728_v19, %v6614_v13  ;;  %7637 = vmatpush.msra.mxu1 %v7570_v63 }
 0x602   :  { %v6885_v26 = vpop.f32.mrf.mxu0  ;;  %8856 = vmatmul.msk.f32.gmra.mxu1 %vm3795_vm2, %v6940_v59 }
 0x603   :  { %8872 = vmatmul.msk.f32.gmra.mxu2 %vm3795_vm2, %v12235_v56  ;;  %v12430_v51 = vadd.f32 %v6882_v18, %v6768_v38  ;;  %v7096_v18 = vld [vmem:[#allocation2 + $0x10f] sm:$0xff]  ;;  %v6943_v38 = vld [vmem:[#allocation2 + $0x186] sm:$0xff] }
 0x604   :  { %8888 = vmatmul.msk.f32.gmra.mxu3 %vm3795_vm2, %v7248_v3 }
 0x605   :  { %8904 = vmatmul.msk.f32.gmra.mxu0 %vm3795_vm2, %v7402_v23 }
 0x606   :  { %v6577_v35 = vpop.f32.mrf.mxu2 }
 0x607   :  { %v6615_v55 = vadd.f32 %v6577_v35, %v6461_v61  ;;  %v6731_v62 = vpop.f32.mrf.mxu3  ;;  %v6426_v52 = vpop.f32.mrf.mxu1 }
 0x608   :  { %v6462_v39 = vadd.f32 %v6426_v52, %v12258_v58 }
 0x609   :  { %v6769_v15 = vadd.f32 %v6731_v62, %v6615_v55 }
 0x60a   :  { %v6888_v25 = vpop.f32.mrf.mxu0  ;;  %8857 = vmatmul.msk.f32.gmra.mxu1 %vm3795_vm2, %v6941_v54  ;;  %v6944_v54 = vld [vmem:[#allocation2 + $0x19e] sm:$0xff] }
 0x60b   :  { %8873 = vmatmul.msk.f32.gmra.mxu2 %vm3795_vm2, %v12248_v12  ;;  %v12438_v56 = vadd.f32 %v6885_v26, %v6769_v15  ;;  %v7251_v26 = vld [vmem:[#allocation2 + $0x188] sm:$0xff] }
 0x60c   :  { %8889 = vmatmul.msk.f32.gmra.mxu3 %vm3795_vm2, %v12250_v16 }
 0x60d   :  { %8905 = vmatmul.msk.f32.gmra.mxu0 %vm3795_vm2, %v12252_v40 }
 0x60e   :  { %v6580_v43 = vpop.f32.mrf.mxu2 }
 0x60f   :  { %v6616_v2 = vadd.f32 %v6580_v43, %v6462_v39  ;;  %v6734_v44 = vpop.f32.mrf.mxu3  ;;  %v6429_v31 = vpop.f32.mrf.mxu1 }
 0x610   :  { %v6463_v40 = vadd.f32 %v6429_v31, %v12267_v14  ;;  %v7569_v14 = vld [vmem:[#allocation3 + $0x608] sm:$0xff]  ;;  %v7568_v31 = vld [vmem:[#allocation3 + $0x600] sm:$0xff] }
 0x611   :  { %v6770_v36 = vadd.f32 %v6734_v44, %v6616_v2  ;;  %7638 = vmatpush.msra.mxu1 %v7569_v14  ;;  %v6945_v44 = vld [vmem:[#allocation2 + $0x1b6] sm:$0xff] }
 0x612   :  { %v6891_v12 = vpop.f32.mrf.mxu0  ;;  %8858 = vmatmul.msk.f32.gmra.mxu1 %vm3795_vm2, %v6942_v42 }
 0x613   :  { %8874 = vmatmul.msk.f32.gmra.mxu2 %vm3795_vm2, %v7096_v18  ;;  %v12447_v16 = vadd.f32 %v6888_v25, %v6770_v36  ;;  %7639 = vmatpush.msra.mxu1 %v7568_v31  ;;  %v7104_v31 = vld [vmem:[#allocation2 + $0x22f] sm:$0xff] }
 0x614   :  { %8890 = vmatmul.msk.f32.gmra.mxu3 %vm3795_vm2, %v7250_v41 }
 0x615   :  { %8906 = vmatmul.msk.f32.gmra.mxu0 %vm3795_vm2, %v7404_v7 }
 0x616   :  { %v6583_v58 = vpop.f32.mrf.mxu2 }
 0x617   :  { %v6617_v17 = vadd.f32 %v6583_v58, %v6463_v40  ;;  %v6737_v34 = vpop.f32.mrf.mxu3  ;;  %v6432_v13 = vpop.f32.mrf.mxu1  ;;  %v6946_v40 = vld [vmem:[#allocation2 + $0x1ce] sm:$0xff] }
 0x618   :  { %v6464_v3 = vadd.f32 %v6432_v13, %v12281_v37 }
 0x619   :  { %v6771_v19 = vadd.f32 %v6737_v34, %v6617_v17 }
 0x61a   :  { %v6894_v45 = vpop.f32.mrf.mxu0  ;;  %8859 = vmatmul.msk.f32.gmra.mxu1 %vm3795_vm2, %v6943_v38 }
 0x61b   :  { %8875 = vmatmul.msk.f32.gmra.mxu2 %vm3795_vm2, %v12273_v4  ;;  %v12455_v59 = vadd.f32 %v6891_v12, %v6771_v19  ;;  %v7252_v4 = vld [vmem:[#allocation2 + $0x1a0] sm:$0xff] }
 0x61c   :  { %8891 = vmatmul.msk.f32.gmra.mxu3 %vm3795_vm2, %v7251_v26 }
 0x61d   :  { %8907 = vmatmul.msk.f32.gmra.mxu0 %vm3795_vm2, %v12279_v24 }
 0x61e   :  { %v6586_v23 = vpop.f32.mrf.mxu2 }
 0x61f   :  { %v6618_v61 = vadd.f32 %v6586_v23, %v6464_v3  ;;  %v6740_v35 = vpop.f32.mrf.mxu3  ;;  %v6435_v55 = vpop.f32.mrf.mxu1 }
 0x620   :  { %v6465_v24 = vadd.f32 %v6435_v55, %v12296_v10  ;;  %v7410_v55 = vld [vmem:[#allocation2 + $0x201] sm:$0xff] }
 0x621   :  { %v6772_v62 = vadd.f32 %v6740_v35, %v6618_v61  ;;  %v6948_v35 = vld [vmem:[#allocation2 + $0x1fe] sm:$0xff] }
 0x622   :  { %v6897_v52 = vpop.f32.mrf.mxu0  ;;  %8860 = vmatmul.msk.f32.gmra.mxu1 %vm3795_vm2, %v6944_v54 }
 0x623   :  { %8876 = vmatmul.msk.f32.gmra.mxu2 %vm3795_vm2, %v12288_v6  ;;  %v12464_v15 = vadd.f32 %v6894_v45, %v6772_v62  ;;  %v7253_v6 = vld [vmem:[#allocation2 + $0x1b8] sm:$0xff]  ;;  %v6947_v45 = vld [vmem:[#allocation2 + $0x1e6] sm:$0xff] }
 0x624   :  { %8892 = vmatmul.msk.f32.gmra.mxu3 %vm3795_vm2, %v7252_v4 }
 0x625   :  { %8908 = vmatmul.msk.f32.gmra.mxu0 %vm3795_vm2, %v12294_v33 }
 0x626   :  { %v6589_v37 = vpop.f32.mrf.mxu2 }
 0x627   :  { %v6619_v25 = vadd.f32 %v6589_v37, %v6465_v24  ;;  %v6743_v63 = vpop.f32.mrf.mxu3  ;;  %v6438_v39 = vpop.f32.mrf.mxu1  ;;  %v6949_v37 = vld [vmem:[#allocation2 + $0x216] sm:$0xff] }
 0x628   :  { %v6466_v33 = vadd.f32 %v6438_v39, %v12311_v0 }
 0x629   :  { %v6773_v43 = vadd.f32 %v6743_v63, %v6619_v25 }
 0x62a   :  { %v6900_v2 = vpop.f32.mrf.mxu0  ;;  %8861 = vmatmul.msk.f32.gmra.mxu1 %vm3795_vm2, %v6945_v44 }
 0x62b   :  { %8877 = vmatmul.msk.f32.gmra.mxu2 %vm3795_vm2, %v12303_v20  ;;  %v12473_v42 = vadd.f32 %v6897_v52, %v6773_v43  ;;  %v7254_v20 = vld [vmem:[#allocation2 + $0x1d0] sm:$0xff] }
 0x62c   :  { %8893 = vmatmul.msk.f32.gmra.mxu3 %vm3795_vm2, %v7253_v6  ;;  %v6950_v6 = vld [vmem:[#allocation2 + $0x22e] sm:$0xff] }
 0x62d   :  { %8909 = vmatmul.msk.f32.gmra.mxu0 %vm3795_vm2, %v12309_v47 }
 0x62e   :  { %v6592_v10 = vpop.f32.mrf.mxu2 }
 0x62f   :  { %v6620_v18 = vadd.f32 %v6592_v10, %v6466_v33  ;;  %v6746_v36 = vpop.f32.mrf.mxu3  ;;  %v6441_v12 = vpop.f32.mrf.mxu1  ;;  %v7258_v10 = vld [vmem:[#allocation2 + $0x230] sm:$0xff] }
 0x630   :  { %v6467_v47 = vadd.f32 %v6441_v12, %v12326_v48 }
 0x631   :  { %v6774_v41 = vadd.f32 %v6746_v36, %v6620_v18 }
 0x632   :  { %v6903_v7 = vpop.f32.mrf.mxu0  ;;  %8862 = vmatmul.msk.f32.gmra.mxu1 %vm3795_vm2, %v6946_v40  ;;  %v7551_v40 = vld [vmem:[#allocation2 + $0x6a] sm:$0xff] }
 0x633   :  { %8878 = vmatmul.msk.f32.gmra.mxu2 %vm3795_vm2, %v12318_v8  ;;  %v12482_v58 = vadd.f32 %v6900_v2, %v6774_v41  ;;  %v7255_v8 = vld [vmem:[#allocation2 + $0x1e8] sm:$0xff] }
 0x634   :  { %8894 = vmatmul.msk.f32.gmra.mxu3 %vm3795_vm2, %v7254_v20 }
 0x635   :  { %8910 = vmatmul.msk.f32.gmra.mxu0 %vm3795_vm2, %v12324_v27 }
 0x636   :  { %v6595_v0 = vpop.f32.mrf.mxu2 }
 0x637   :  { %v6621_v17 = vadd.f32 %v6595_v0, %v6467_v47  ;;  %v6749_v34 = vpop.f32.mrf.mxu3  ;;  %v6444_v13 = vpop.f32.mrf.mxu1  ;;  %v7552_v0 = vld [vmem:[#allocation2 + $0x82] sm:$0xff] }
 0x638   :  { %v6468_v27 = vadd.f32 %v6444_v13, %v12343_v21  ;;  %v7554_v13 = vld [vmem:[#allocation2 + $0xb2] sm:$0xff] }
 0x639   :  { %v6775_v19 = vadd.f32 %v6749_v34, %v6621_v17  ;;  %v7553_v34 = vld [vmem:[#allocation2 + $0x9a] sm:$0xff] }
 0x63a   :  { %8863 = vmatmul.msk.f32.gmra.mxu1 %vm3795_vm2, %v6947_v45  ;;  %v6906_v26 = vpop.f32.mrf.mxu0  ;;  %v7555_v45 = vld [vmem:[#allocation2 + $0xca] sm:$0xff] }
 0x63b   :  { %8879 = vmatmul.msk.f32.gmra.mxu2 %vm3795_vm2, %v12333_v49  ;;  %v12491_v38 = vadd.f32 %v6903_v7, %v6775_v19  ;;  %v7256_v49 = vld [vmem:[#allocation2 + $0x200] sm:$0xff] }
 0x63c   :  { %8895 = vmatmul.msk.f32.gmra.mxu3 %vm3795_vm2, %v7255_v8 }
 0x63d   :  { %8911 = vmatmul.msk.f32.gmra.mxu0 %vm3795_vm2, %v12339_v46 }
 0x63e   :  { %v6598_v48 = vpop.f32.mrf.mxu2 }
 0x63f   :  { %v6622_v14 = vadd.f32 %v6598_v48, %v6468_v27  ;;  %v6752_v3 = vpop.f32.mrf.mxu3  ;;  %v6447_v23 = vpop.f32.mrf.mxu1  ;;  %v7557_v48 = vld [vmem:[#allocation2 + $0xfa] sm:$0xff] }
 0x640   :  { %v6469_v46 = vadd.f32 %v6447_v23, %v12356_v22 }
 0x641   :  { %v6776_v61 = vadd.f32 %v6752_v3, %v6622_v14  ;;  %v7558_v3 = vld [vmem:[#allocation2 + $0x112] sm:$0xff] }
 0x642   :  { %8864 = vmatmul.msk.f32.gmra.mxu1 %vm3795_vm2, %v6948_v35  ;;  %v6909_v21 = vpop.f32.mrf.mxu0  ;;  %v7559_v35 = vld [vmem:[#allocation2 + $0x18a] sm:$0xff] }
 0x643   :  { %8880 = vmatmul.msk.f32.gmra.mxu2 %vm3795_vm2, %v12350_v53  ;;  %v12500_v62 = vadd.f32 %v6906_v26, %v6776_v61  ;;  %v7556_v26 = vld [vmem:[#allocation2 + $0xe2] sm:$0xff] }
 0x644   :  { %8896 = vmatmul.msk.f32.gmra.mxu3 %vm3795_vm2, %v7256_v49 }
 0x645   :  { %8912 = vmatmul.msk.f32.gmra.mxu0 %vm3795_vm2, %v7410_v55 }
 0x646   :  { %v6601_v52 = vpop.f32.mrf.mxu2 }
 0x647   :  { %v6623_v54 = vadd.f32 %v6601_v52, %v6469_v46  ;;  %v6755_v4 = vpop.f32.mrf.mxu3  ;;  %v6450_v24 = vpop.f32.mrf.mxu1  ;;  %v7560_v46 = vld [vmem:[#allocation2 + $0x1a2] sm:$0xff] }
 0x648   :  { %v6470_v22 = vadd.f32 %v6450_v24, %v12375_v9 }
 0x649   :  { %v6777_v25 = vadd.f32 %v6755_v4, %v6623_v54  ;;  %v7561_v54 = vld [vmem:[#allocation2 + $0x1ba] sm:$0xff] }
 0x64a   :  { %8865 = vmatmul.msk.f32.gmra.mxu1 %vm3795_vm2, %v6949_v37  ;;  %v6912_v2 = vpop.f32.mrf.mxu0  ;;  %v7562_v37 = vld [vmem:[#allocation2 + $0x1d2] sm:$0xff] }
 0x64b   :  { %8881 = vmatmul.msk.f32.gmra.mxu2 %vm3795_vm2, %v12363_v11  ;;  %v12508_v53 = vadd.f32 %v6909_v21, %v6777_v25  ;;  %v7412_v11 = vld [vmem:[#allocation2 + $0x231] sm:$0xff] }
 0x64c   :  { %8897 = vmatmul.msk.f32.gmra.mxu3 %vm3795_vm2, %v12365_v32 }
 0x64d   :  { %8913 = vmatmul.msk.f32.gmra.mxu0 %vm3795_vm2, %v12367_v60 }
 0x64e   :  { %v6604_v63 = vpop.f32.mrf.mxu2 }
 0x64f   :  { %v6624_v39 = vadd.f32 %v6604_v63, %v6470_v22  ;;  %v6758_v43 = vpop.f32.mrf.mxu3  ;;  %v6453_v44 = vpop.f32.mrf.mxu1 }
 0x650   :  { %v6471_v60 = vadd.f32 %v6453_v44, %v12385_v30 }
 0x651   :  { %v6778_v33 = vadd.f32 %v6758_v43, %v6624_v39 }
 0x652   :  { %8866 = vmatmul.msk.f32.gmra.mxu1 %vm3795_vm2, %v6950_v6  ;;  %v6915_v7 = vpop.f32.mrf.mxu0  ;;  %v7564_v6 = vld [vmem:[#allocation2 + $0x202] sm:$0xff] }
 0x653   :  { %8882 = vmatmul.msk.f32.gmra.mxu2 %vm3795_vm2, %v7104_v31  ;;  %v12517_v32 = vadd.f32 %v6912_v2, %v6778_v33 }
 0x654   :  { %8898 = vmatmul.msk.f32.gmra.mxu3 %vm3795_vm2, %v7258_v10 }
 0x655   :  { %8914 = vmatmul.msk.f32.gmra.mxu0 %vm3795_vm2, %v7412_v11 }
 0x656   :  { %v6607_v9 = vpop.f32.mrf.mxu2 }
 0x657   :  { %v6625_v18 = vadd.f32 %v6607_v9, %v6471_v60  ;;  %v6761_v36 = vpop.f32.mrf.mxu3  ;;  %v12522_v12 = vpop.f32.mrf.mxu1  ;;  %v7566_v9 = vld [vmem:[#allocation2 + $0x232] sm:$0xff] }
 0x658   :  { %v7073_v11 = vadd.f32 %v12522_v12, %v12394_v29  ;;  %v12586_v29 = vld [vmem:[%s12676_s4] ss:$0 sm:$0xff] }
 0x659   :  { %v6779_v41 = vadd.f32 %v6761_v36, %v6625_v18 }
 0x65a   :  { %8915 = vmatmul.msk.f32.vlgmr.msra.gmra.mxu1 %vm3795_vm2, %v7551_v40  ;;  %v7487_v25 = vpop.f32.mrf.mxu0 }
 0x65b   :  { %v6933_v20 = vadd.f32 %v6915_v7, %v6779_v41 }
 0x65e   :  { %v7179_v4 = vpop.f32.mrf.mxu2 }
 0x65f   :  { %v12525_v47 = vpop.f32.mrf.mxu1  ;;  %v7227_v60 = vadd.f32 %v7179_v4, %v7073_v11 }
 0x662   :  { %8916 = vmatmul.msk.f32.gmra.mxu1 %vm3795_vm2, %v7552_v0  ;;  %v7490_v2 = vpop.f32.mrf.mxu0 }
 0x666   :  { %v7182_v22 = vpop.f32.mrf.mxu2 }
 0x667   :  { %v12528_v17 = vpop.f32.mrf.mxu1 }
 0x66a   :  { %8917 = vmatmul.msk.f32.gmra.mxu1 %vm3795_vm2, %v7553_v34 }
 0x66f   :  { %v12531_v30 = vpop.f32.mrf.mxu1 }
 0x672   :  { %8918 = vmatmul.msk.f32.gmra.mxu1 %vm3795_vm2, %v7554_v13 }
 0x677   :  { %v12534_v19 = vpop.f32.mrf.mxu1 }
 0x67a   :  { %8919 = vmatmul.msk.f32.gmra.mxu1 %vm3795_vm2, %v7555_v45 }
 0x67f   :  { %v12537_v8 = vpop.f32.mrf.mxu1 }
 0x682   :  { %8920 = vmatmul.msk.f32.gmra.mxu1 %vm3795_vm2, %v7556_v26  ;;  %v7075_v26 = vadd.f32 %v12528_v17, %v12412_v1 }
 0x687   :  { %v12540_v27 = vpop.f32.mrf.mxu1 }
 0x68a   :  { %8921 = vmatmul.msk.f32.gmra.mxu1 %vm3795_vm2, %v7557_v48 }
 0x68f   :  { %v12543_v14 = vpop.f32.mrf.mxu1 }
 0x692   :  { %8922 = vmatmul.msk.f32.gmra.mxu1 %vm3795_vm2, %v7558_v3 }
 0x697   :  { %v7049_v23 = vpop.f32.mrf.mxu1 }
 0x698   :  { %v12547_v61 = vadd.f32 %v7049_v23, %v12464_v15 }
 0x69a   :  { %8923 = vmatmul.msk.f32.gmra.mxu1 %vm3795_vm2, %v7559_v35 }
 0x69f   :  { %v7052_v49 = vpop.f32.mrf.mxu1 }
 0x6a0   :  { %v12551_v55 = vadd.f32 %v7052_v49, %v12473_v42  ;;  %v7333_v42 = vpop.f32.mrf.mxu3 }
 0x6a1   :  { %v7381_v41 = vadd.f32 %v7333_v42, %v7227_v60  ;;  %v7078_v60 = vadd.f32 %v12537_v8, %v12438_v56 }
 0x6a2   :  { %8924 = vmatmul.msk.f32.gmra.mxu1 %vm3795_vm2, %v7560_v46 }
 0x6a7   :  { %v7055_v21 = vpop.f32.mrf.mxu1 }
 0x6a8   :  { %v12555_v52 = vadd.f32 %v7055_v21, %v12482_v58  ;;  %v7336_v58 = vpop.f32.mrf.mxu3 }
 0x6aa   :  { %8925 = vmatmul.msk.f32.gmra.mxu1 %vm3795_vm2, %v7561_v54  ;;  %v7076_v54 = vadd.f32 %v12531_v30, %v12421_v28 }
 0x6af   :  { %v7058_v15 = vpop.f32.mrf.mxu1 }
 0x6b0   :  { %v12559_v24 = vadd.f32 %v7058_v15, %v12491_v38  ;;  %v7185_v38 = vpop.f32.mrf.mxu2  ;;  %v7339_v31 = vpop.f32.mrf.mxu3 }
 0x6b2   :  { %8926 = vmatmul.msk.f32.gmra.mxu1 %vm3795_vm2, %v7562_v37 }
 0x6b7   :  { %v7061_v63 = vpop.f32.mrf.mxu1 }
 0x6b8   :  { %v12563_v39 = vadd.f32 %v7061_v63, %v12500_v62  ;;  %v7493_v62 = vpop.f32.mrf.mxu0  ;;  %v7342_v36 = vpop.f32.mrf.mxu3 }
 0x6ba   :  { %8927 = vmatmul.msk.f32.gmra.mxu1 %vm3795_vm2, %v12341_v57  ;;  %v7188_v57 = vpop.f32.mrf.mxu2 }
 0x6bb   :  { %v7230_v1 = vadd.f32 %v7188_v57, %v7076_v54 }
 0x6bd   :  { %v7384_v63 = vadd.f32 %v7342_v36, %v7230_v1 }
 0x6bf   :  { %v7064_v43 = vpop.f32.mrf.mxu1 }
 0x6c0   :  { %v12568_v44 = vadd.f32 %v7064_v43, %v12508_v53  ;;  %v7496_v7 = vpop.f32.mrf.mxu0  ;;  %v7345_v45 = vpop.f32.mrf.mxu3  ;;  %v7077_v43 = vadd.f32 %v12534_v19, %v12430_v51 }
 0x6c1   :  { %v7538_v30 = vadd.f32 %v7496_v7, %v7384_v63 }
 0x6c2   :  { %8928 = vmatmul.msk.f32.gmra.mxu1 %vm3795_vm2, %v7564_v6  ;;  %v7191_v40 = vpop.f32.mrf.mxu2 }
 0x6c3   :  { %v7231_v28 = vadd.f32 %v7191_v40, %v7077_v43  ;;  %v7079_v40 = vadd.f32 %v12540_v27, %v12447_v16 }
 0x6c7   :  { %v7067_v33 = vpop.f32.mrf.mxu1 }
 0x6c8   :  { %v12572_v10 = vadd.f32 %v7067_v33, %v12517_v32  ;;  %v7074_v32 = vadd.f32 %v12525_v47, %v12403_v5  ;;  %v7229_v5 = vadd.f32 %v7185_v38, %v7075_v26  ;;  %v7499_v47 = vpop.f32.mrf.mxu0  ;;  %v7348_v15 = vpop.f32.mrf.mxu3  ;;  %v7385_v33 = vadd.f32 %v7345_v45, %v7231_v28 }
 0x6ca   :  { %8929 = vmatmul.msk.f32.gmra.mxu1 %vm3795_vm2, %v12369_v50  ;;  %v7228_v0 = vadd.f32 %v7182_v22, %v7074_v32  ;;  %v7535_v50 = vadd.f32 %v7487_v25, %v7381_v41  ;;  %v7194_v23 = vpop.f32.mrf.mxu2  ;;  %v7383_v46 = vadd.f32 %v7339_v31, %v7229_v5  ;;  %v7539_v19 = vadd.f32 %v7499_v47, %v7385_v33 }
 0x6cb   :  { %v7232_v51 = vadd.f32 %v7194_v23, %v7078_v60 }
 0x6cc   :  { %v7537_v17 = vadd.f32 %v7493_v62, %v7383_v46 }
 0x6cd   :  { %v7386_v32 = vadd.f32 %v7348_v15, %v7232_v51 }
 0x6cf   :  { %v7070_v53 = vpop.f32.mrf.mxu1 }
 0x6d0   :  { %v12578_v18 = vadd.f32 %v7070_v53, %v6933_v20  ;;  %v7382_v20 = vadd.f32 %v7336_v58, %v7228_v0  ;;  %v7502_v42 = vpop.f32.mrf.mxu0  ;;  %v7351_v38 = vpop.f32.mrf.mxu3 }
 0x6d1   :  { %v7540_v8 = vadd.f32 %v7502_v42, %v7386_v32 }
 0x6d2   :  { %8930 = vmatmul.msk.f32.gmra.mxu1 %vm3795_vm2, %v7566_v9  ;;  %v7536_v3 = vadd.f32 %v7490_v2, %v7382_v20  ;;  %v7197_v22 = vpop.f32.mrf.mxu2 }
 0x6d3   :  { %v7233_v56 = vadd.f32 %v7197_v22, %v7079_v40 }
 0x6d7   :  { %v7641_v12 = vpop.f32.mrf.mxu1 }
 0x6d8   :  { %v7689_v34 = vadd.f32 %v7641_v12, %v7535_v50  ;;  %v7505_v62 = vpop.f32.mrf.mxu0  ;;  %v7354_v41 = vpop.f32.mrf.mxu3 }
 0x6da   :  { %v7709_v13 = vadd.f32 %v12586_v29, %v7689_v34  ;;  %v7200_v11 = vpop.f32.mrf.mxu2 }
 0x6dc   :  { %v7725_v48 = vmax.f32 %v7709_v13, 0.0  ;;  %v7387_v13 = vadd.f32 %v7351_v38, %v7233_v56 }
 0x6de   :  { %7741 = vst [vmem:[%s12677_s5] sm:$0xff] %v7725_v48  ;;  %v7080_v48 = vadd.f32 %v12543_v14, %v12455_v59  ;;  %v7541_v47 = vadd.f32 %v7505_v62, %v7387_v13 }
 0x6df   :  { %v7644_v35 = vpop.f32.mrf.mxu1 }
 0x6e0   :  { %v7690_v49 = vadd.f32 %v7644_v35, %v7536_v3  ;;  %v7508_v0 = vpop.f32.mrf.mxu0  ;;  %v7357_v26 = vpop.f32.mrf.mxu3  ;;  %v7234_v16 = vadd.f32 %v7200_v11, %v7080_v48 }
 0x6e2   :  { %v7710_v21 = vadd.f32 %v12586_v29, %v7690_v49  ;;  %v7203_v12 = vpop.f32.mrf.mxu2  ;;  %v7388_v49 = vadd.f32 %v7354_v41, %v7234_v16 }
 0x6e4   :  { %v7726_v4 = vmax.f32 %v7710_v21, 0.0  ;;  %v7542_v59 = vadd.f32 %v7508_v0, %v7388_v49 }
 0x6e6   :  { %7742 = vst [vmem:[%s12677_s5 + $0x8] sm:$0xff] %v7726_v4  ;;  %v7235_v4 = vadd.f32 %v7203_v12, %v12547_v61 }
 0x6e7   :  { %v7647_v37 = vpop.f32.mrf.mxu1 }
 0x6e8   :  { %v7691_v25 = vadd.f32 %v7647_v37, %v7537_v17  ;;  %v7511_v27 = vpop.f32.mrf.mxu0  ;;  %v7360_v54 = vpop.f32.mrf.mxu3  ;;  %v7389_v37 = vadd.f32 %v7357_v26, %v7235_v4 }
 0x6ea   :  { %v7711_v58 = vadd.f32 %v12586_v29, %v7691_v25  ;;  %v7206_v3 = vpop.f32.mrf.mxu2  ;;  %v7543_v61 = vadd.f32 %v7511_v27, %v7389_v37 }
 0x6eb   :  { %v7236_v22 = vadd.f32 %v7206_v3, %v12551_v55 }
 0x6ec   :  { %v7727_v2 = vmax.f32 %v7711_v58, 0.0 }
 0x6ee   :  { %7743 = vst [vmem:[%s12677_s5 + $0x10] sm:$0xff] %v7727_v2  ;;  %v7390_v2 = vadd.f32 %v7360_v54, %v7236_v22 }
 0x6ef   :  { %v7650_v6 = vpop.f32.mrf.mxu1 }
 0x6f0   :  { %v7692_v31 = vadd.f32 %v7650_v6, %v7538_v30  ;;  %v7514_v15 = vpop.f32.mrf.mxu0  ;;  %v7363_v63 = vpop.f32.mrf.mxu3 }
 0x6f1   :  { %v7544_v55 = vadd.f32 %v7514_v15, %v7390_v2 }
 0x6f2   :  { %v7712_v57 = vadd.f32 %v12586_v29, %v7692_v31  ;;  %v7209_v17 = vpop.f32.mrf.mxu2 }
 0x6f3   :  { %v7237_v31 = vadd.f32 %v7209_v17, %v12555_v52 }
 0x6f4   :  { %v7728_v53 = vmax.f32 %v7712_v57, 0.0 }
 0x6f5   :  { %v7391_v11 = vadd.f32 %v7363_v63, %v7237_v31 }
 0x6f6   :  { %7744 = vst [vmem:[%s12677_s5 + $0x18] sm:$0xff] %v7728_v53 }
 0x6f7   :  { %v7653_v9 = vpop.f32.mrf.mxu1 }
 0x6f8   :  { %v7693_v36 = vadd.f32 %v7653_v9, %v7539_v19  ;;  %v7517_v28 = vpop.f32.mrf.mxu0  ;;  %v7366_v57 = vpop.f32.mrf.mxu3 }
 0x6f9   :  { %v7545_v52 = vadd.f32 %v7517_v28, %v7391_v11 }
 0x6fa   :  { %v7713_v7 = vadd.f32 %v12586_v29, %v7693_v36  ;;  %v7212_v38 = vpop.f32.mrf.mxu2 }
 0x6fb   :  { %v7238_v9 = vadd.f32 %v7212_v38, %v12559_v24 }
 0x6fc   :  { %v7729_v50 = vmax.f32 %v7713_v7, 0.0 }
 0x6fd   :  { %v7392_v32 = vadd.f32 %v7366_v57, %v7238_v9 }
 0x6fe   :  { %7745 = vst [vmem:[%s12677_s5 + $0x20] sm:$0xff] %v7729_v50 }
 0x6ff   :  { %v7656_v34 = vpop.f32.mrf.mxu1 }
 0x700   :  { %v7694_v20 = vadd.f32 %v7656_v34, %v7540_v8  ;;  %v7520_v53 = vpop.f32.mrf.mxu0  ;;  %v7369_v40 = vpop.f32.mrf.mxu3 }
 0x701   :  { %v7546_v24 = vadd.f32 %v7520_v53, %v7392_v32 }
 0x702   :  { %v7714_v45 = vadd.f32 %v12586_v29, %v7694_v20  ;;  %v7215_v19 = vpop.f32.mrf.mxu2 }
 0x703   :  { %v7239_v12 = vadd.f32 %v7215_v19, %v12563_v39 }
 0x704   :  { %v7730_v5 = vmax.f32 %v7714_v45, 0.0 }
 0x705   :  { %v7393_v20 = vadd.f32 %v7369_v40, %v7239_v12 }
 0x706   :  { %7746 = vst [vmem:[%s12677_s5 + $0x28] sm:$0xff] %v7730_v5 }
 0x707   :  { %v7659_v23 = vpop.f32.mrf.mxu1 }
 0x708   :  { %v7695_v35 = vadd.f32 %v7659_v23, %v7541_v47  ;;  %v7523_v50 = vpop.f32.mrf.mxu0  ;;  %v7372_v26 = vpop.f32.mrf.mxu3 }
 0x709   :  { %v7547_v39 = vadd.f32 %v7523_v50, %v7393_v20 }
 0x70a   :  { %v7715_v46 = vadd.f32 %v12586_v29, %v7695_v35  ;;  %v7218_v56 = vpop.f32.mrf.mxu2 }
 0x70b   :  { %v7240_v48 = vadd.f32 %v7218_v56, %v12568_v44 }
 0x70c   :  { %v7731_v21 = vmax.f32 %v7715_v46, 0.0 }
 0x70d   :  { %v7394_v3 = vadd.f32 %v7372_v26, %v7240_v48 }
 0x70e   :  { %7747 = vst [vmem:[%s12677_s5 + $0x30] sm:$0xff] %v7731_v21 }
 0x70f   :  { %v7662_v14 = vpop.f32.mrf.mxu1 }
 0x710   :  { %v7696_v1 = vadd.f32 %v7662_v14, %v7542_v59  ;;  %v7526_v27 = vpop.f32.mrf.mxu0  ;;  %v7375_v49 = vpop.f32.mrf.mxu3 }
 0x711   :  { %v7548_v44 = vadd.f32 %v7526_v27, %v7394_v3 }
 0x712   :  { %v7716_v42 = vadd.f32 %v12586_v29, %v7696_v1  ;;  %v7221_v47 = vpop.f32.mrf.mxu2 }
 0x713   :  { %v7241_v46 = vadd.f32 %v7221_v47, %v12572_v10 }
 0x714   :  { %v7732_v25 = vmax.f32 %v7716_v42, 0.0 }
 0x715   :  { %v7395_v59 = vadd.f32 %v7375_v49, %v7241_v46 }
 0x716   :  { %7748 = vst [vmem:[%s12677_s5 + $0x38] sm:$0xff] %v7732_v25 }
 0x717   :  { %v7665_v58 = vpop.f32.mrf.mxu1 }
 0x718   :  { %v7697_v43 = vadd.f32 %v7665_v58, %v7543_v61  ;;  %v7529_v4 = vpop.f32.mrf.mxu0  ;;  %v7378_v10 = vpop.f32.mrf.mxu3 }
 0x719   :  { %v7549_v17 = vadd.f32 %v7529_v4, %v7395_v59 }
 0x71a   :  { %v7717_v30 = vadd.f32 %v12586_v29, %v7697_v43  ;;  %v7224_v15 = vpop.f32.mrf.mxu2 }
 0x71b   :  { %v7242_v37 = vadd.f32 %v7224_v15, %v12578_v18 }
 0x71c   :  { %v7733_v6 = vmax.f32 %v7717_v30, 0.0 }
 0x71d   :  { %v7396_v22 = vadd.f32 %v7378_v10, %v7242_v37 }
 0x71e   :  { %7749 = vst [vmem:[%s12677_s5 + $0x40] sm:$0xff] %v7733_v6 }
 0x71f   :  { %v7668_v33 = vpop.f32.mrf.mxu1 }
 0x720   :  { %v7698_v62 = vadd.f32 %v7668_v33, %v7544_v55  ;;  %v7532_v63 = vpop.f32.mrf.mxu0 }
 0x721   :  { %v7550_v43 = vadd.f32 %v7532_v63, %v7396_v22 }
 0x722   :  { %v7718_v60 = vadd.f32 %v12586_v29, %v7698_v62 }
 0x724   :  { %v7734_v51 = vmax.f32 %v7718_v60, 0.0 }
 0x726   :  { %7750 = vst [vmem:[%s12677_s5 + $0x48] sm:$0xff] %v7734_v51 }
 0x727   :  { %v7671_v36 = vpop.f32.mrf.mxu1 }
 0x728   :  { %v7699_v41 = vadd.f32 %v7671_v36, %v7545_v52 }
 0x72a   :  { %v7719_v7 = vadd.f32 %v12586_v29, %v7699_v41 }
 0x72c   :  { %v7735_v0 = vmax.f32 %v7719_v7, 0.0 }
 0x72e   :  { %7751 = vst [vmem:[%s12677_s5 + $0x50] sm:$0xff] %v7735_v0 }
 0x72f   :  { %v7674_v8 = vpop.f32.mrf.mxu1 }
 0x730   :  { %v7700_v34 = vadd.f32 %v7674_v8, %v7546_v24 }
 0x732   :  { %v7720_v13 = vadd.f32 %v12586_v29, %v7700_v34 }
 0x734   :  { %v7736_v45 = vmax.f32 %v7720_v13, 0.0 }
 0x736   :  { %7752 = vst [vmem:[%s12677_s5 + $0x58] sm:$0xff] %v7736_v45 }
 0x737   :  { %v7677_v5 = vpop.f32.mrf.mxu1 }
 0x738   :  { %v7701_v16 = vadd.f32 %v7677_v5, %v7547_v39 }
 0x73a   :  { %v7721_v23 = vadd.f32 %v12586_v29, %v7701_v16 }
 0x73c   :  { %v7737_v35 = vmax.f32 %v7721_v23, 0.0 }
 0x73e   :  { %7753 = vst [vmem:[%s12677_s5 + $0x60] sm:$0xff] %v7737_v35 }
 0x73f   :  { %v7680_v21 = vpop.f32.mrf.mxu1 }
 0x740   :  { %v7702_v54 = vadd.f32 %v7680_v21, %v7548_v44 }
 0x742   :  { %v7722_v14 = vadd.f32 %v12586_v29, %v7702_v54 }
 0x744   :  { %v7738_v1 = vmax.f32 %v7722_v14, 0.0 }
 0x746   :  { %7754 = vst [vmem:[%s12677_s5 + $0x68] sm:$0xff] %v7738_v1 }
 0x747   :  { %v7683_v42 = vpop.f32.mrf.mxu1 }
 0x748   :  { %v7703_v25 = vadd.f32 %v7683_v42, %v7549_v17 }
 0x74a   :  { %v7723_v61 = vadd.f32 %v12586_v29, %v7703_v25 }
 0x74c   :  { %v7739_v58 = vmax.f32 %v7723_v61, 0.0 }
 0x74e   :  { %7755 = vst [vmem:[%s12677_s5 + $0x70] sm:$0xff] %v7739_v58 }
 0x74f   :  { %v7686_v2 = vpop.f32.mrf.mxu1 }
 0x750   :  { %v7704_v28 = vadd.f32 %v7686_v2, %v7550_v43 }
 0x752   :  { %v7724_v18 = vadd.f32 %v12586_v29, %v7704_v28 }
 0x754   :  { %v7740_v30 = vmax.f32 %v7724_v18, 0.0 }
 0x756   :  { %7756 = vst [vmem:[%s12677_s5 + $0x78] sm:$0xff] %v7740_v30 }
 0x757   :  { %7761 = vsyncpa [#allocation4], 1 }

</bundles_post_ra>
